<compile_context>
chip_gen: v7x
topology: tpu7x:2x2x1
jax: 0.10.0
libtpu: 0.0.40
codegen_flags: <defaults>
</compile_context>

<pallas_src>
import math
import functools

import jax
import jax.numpy as jnp
from jax.experimental import pallas as pl
from jax.experimental.pallas import tpu as pltpu

D_MODEL = 64
NHEAD = 4
HEAD_DIM = D_MODEL // NHEAD
DFF = 128
INPUT_SIZE = 9
MAX_LEN = 500
LN_EPS = 1e-5

# Row layout of the packed (35, 64) "vec64" slab.
B_IN_ROW = 0      # input_fc bias
BO_BASE = 1       # attn out-proj biases, attn idx 0..5 -> rows 1..6
B2_BASE = 7       # ffn second-linear biases, ffn idx 0..3 -> rows 7..10
LNG_BASE = 11     # layernorm gammas, ln idx 0..11 -> rows 11..22
LNB_BASE = 23     # layernorm betas,  ln idx 0..11 -> rows 23..34
N_VEC64 = 35


# ----------------------------- fused forward kernel -----------------------------

def _forward_kernel(x_ref, pe_ref, w_in_ref, wqkv_ref, bqkv_ref, wo_ref,
                    w1_ref, b1_ref, w2_ref, vec64_ref, w_out_ref,
                    out_ref, *, B, Ls, Lt):
    D, H, dh = D_MODEL, NHEAD, HEAD_DIM
    scale = 1.0 / math.sqrt(dh)

    def row64(r):
        return vec64_ref[r:r + 1, :]                       # (1, 64)

    def layer_norm(y, ln_idx):
        mean = jnp.mean(y, axis=-1, keepdims=True)
        var = jnp.mean((y - mean) ** 2, axis=-1, keepdims=True)
        return ((y - mean) * jax.lax.rsqrt(var + LN_EPS)
                * row64(LNG_BASE + ln_idx) + row64(LNB_BASE + ln_idx))

    def mha(xq, xkv, same_kv, a_idx, Lq, Lk):
        # Fused QKV projection: one (.,64)@(64,192) matmul per input stream.
        wqkv = wqkv_ref[a_idx]                              # (64, 192)
        bqkv = bqkv_ref[a_idx:a_idx + 1, :]                 # (1, 192)
        qkv_q = jnp.dot(xq, wqkv, preferred_element_type=jnp.float32) + bqkv
        qkv_kv = qkv_q if same_kv else (
            jnp.dot(xkv, wqkv, preferred_element_type=jnp.float32) + bqkv)

        heads = []
        for h in range(H):                                  # H=4, unrolled
            q_h = qkv_q[:, h * dh:(h + 1) * dh].reshape(B, Lq, dh)
            k_h = qkv_kv[:, D + h * dh:D + (h + 1) * dh].reshape(B, Lk, dh)
            v_h = qkv_kv[:, 2 * D + h * dh:2 * D + (h + 1) * dh].reshape(B, Lk, dh)
            s = jnp.einsum('bqd,bkd->bqk', q_h, k_h,
                           preferred_element_type=jnp.float32) * scale
            s = s - jnp.max(s, axis=-1, keepdims=True)
            e = jnp.exp(s)
            p = e / jnp.sum(e, axis=-1, keepdims=True)      # exact softmax
            heads.append(jnp.einsum('bqk,bkd->bqd', p, v_h,
                                    preferred_element_type=jnp.float32))
        ctx = jnp.concatenate(heads, axis=-1).reshape(B * Lq, D)   # in registers
        return (jnp.dot(ctx, wo_ref[a_idx], preferred_element_type=jnp.float32)
                + row64(BO_BASE + a_idx))

    def ffn(x, f_idx):
        h1 = (jnp.dot(x, w1_ref[f_idx], preferred_element_type=jnp.float32)
              + b1_ref[f_idx:f_idx + 1, :])
        h1 = jnp.maximum(h1, 0.0)                           # ReLU
        return (jnp.dot(h1, w2_ref[f_idx], preferred_element_type=jnp.float32)
                + row64(B2_BASE + f_idx))

    # ---- embeddings: one fused matmul for src+tgt rows, PE added in registers
    e = (jnp.dot(x_ref[...], w_in_ref[...], preferred_element_type=jnp.float32)
         + row64(B_IN_ROW) + pe_ref[...])                   # (B*(Ls+Lt), 64)
    src_e = e[0:B * Ls, :]
    tgt_e = e[B * Ls:B * Ls + B * Lt, :]

    # ---- encoder (attn idx 0,1 ; ffn idx 0,1 ; ln idx 0..3, final norm 4)
    mem = src_e
    for li in range(2):
        a = mha(mem, mem, True, li, Ls, Ls)
        mem = layer_norm(mem + a, 2 * li + 0)
        mem = layer_norm(mem + ffn(mem, li), 2 * li + 1)
    mem = layer_norm(mem, 4)

    # ---- decoder (self attn idx 2,4 ; cross attn idx 3,5 ; ffn idx 2,3 ;
    #               ln idx 5..10, final norm 11)
    x = tgt_e
    for li in range(2):
        a = mha(x, x, True, 2 + 2 * li, Lt, Lt)
        x = layer_norm(x + a, 5 + 3 * li + 0)
        c = mha(x, mem, False, 3 + 2 * li, Lt, Ls)
        x = layer_norm(x + c, 5 + 3 * li + 1)
        x = layer_norm(x + ffn(x, 2 + li), 5 + 3 * li + 2)
    x = layer_norm(x, 11)

    # ---- output projection; w_out_ref holds [W(64,1); b(1,1)] stacked -> (65,1)
    out_ref[...] = (jnp.dot(x, w_out_ref[0:D, :], preferred_element_type=jnp.float32)
                    + w_out_ref[D:D + 1, :])


def transformer_forward(packed, src, tgt):
    B, Ls, _ = src.shape
    Lt = tgt.shape[1]

    x2d = jnp.concatenate(
        [src.reshape(B * Ls, INPUT_SIZE), tgt.reshape(B * Lt, INPUT_SIZE)],
        axis=0).astype(jnp.float32)                         # (B*(Ls+Lt), 9)
    pe = packed["pe"]
    pe2d = jnp.concatenate(
        [jnp.tile(pe[:Ls], (B, 1)), jnp.tile(pe[:Lt], (B, 1))],
        axis=0).astype(jnp.float32)                         # (B*(Ls+Lt), 64), ~8 KB

    kern = functools.partial(_forward_kernel, B=B, Ls=Ls, Lt=Lt)
    out = pl.pallas_call(
        kern,
        out_shape=jax.ShapeDtypeStruct((B * Lt, 1), jnp.float32),
    )(x2d, pe2d, packed["w_in"], packed["wqkv"], packed["bqkv"], packed["wo"],
      packed["w1"], packed["b1"], packed["w2"], packed["vec64"], packed["w_out"])
    return out.reshape(B, Lt)                               # squeeze(-1)


# ----------------------------- parameter init & packing -----------------------------

def positional_encoding(max_len, d_model):
    position = jnp.arange(max_len, dtype=jnp.float32)[:, None]
    div_term = jnp.exp(jnp.arange(0, d_model, 2, dtype=jnp.float32)
                       * (-math.log(10000.0) / d_model))
    ang = position * div_term
    pe = jnp.zeros((max_len, d_model), jnp.float32)
    pe = pe.at[:, 0::2].set(jnp.sin(ang))
    pe = pe.at[:, 1::2].set(jnp.cos(ang))
    return pe


def init_params(key):
    keys = iter(jax.random.split(key, 256))

    def lin(fan_in, fan_out):
        bound = 1.0 / math.sqrt(fan_in)
        w = jax.random.uniform(next(keys), (fan_in, fan_out), jnp.float32, -bound, bound)
        b = jax.random.uniform(next(keys), (1, fan_out), jnp.float32, -bound, bound)
        return w, b

    def attn_params():
        wq, bq = lin(D_MODEL, D_MODEL)
        wk, bk = lin(D_MODEL, D_MODEL)
        wv, bv = lin(D_MODEL, D_MODEL)
        wo, bo = lin(D_MODEL, D_MODEL)
        return dict(wqkv=jnp.concatenate([wq, wk, wv], axis=1),   # (64, 192)
                    bqkv=jnp.concatenate([bq, bk, bv], axis=1),   # (1, 192)
                    wo=wo, bo=bo)

    def ln():
        return (jnp.ones((1, D_MODEL), jnp.float32),
                jnp.zeros((1, D_MODEL), jnp.float32))

    params = {}
    params["w_in"], params["b_in"] = lin(INPUT_SIZE, D_MODEL)
    params["pe"] = positional_encoding(MAX_LEN, D_MODEL)

    enc_layers = []
    for _ in range(2):
        w1, b1 = lin(D_MODEL, DFF)
        w2, b2 = lin(DFF, D_MODEL)
        g1, be1 = ln()
        g2, be2 = ln()
        enc_layers.append(dict(self_attn=attn_params(),
                               w1=w1, b1=b1, w2=w2, b2=b2,
                               ln1_g=g1, ln1_b=be1, ln2_g=g2, ln2_b=be2))
    params["enc_layers"] = enc_layers
    params["enc_norm_g"], params["enc_norm_b"] = ln()

    dec_layers = []
    for _ in range(2):
        w1, b1 = lin(D_MODEL, DFF)
        w2, b2 = lin(DFF, D_MODEL)
        g1, be1 = ln()
        g2, be2 = ln()
        g3, be3 = ln()
        dec_layers.append(dict(self_attn=attn_params(),
                               cross_attn=attn_params(),
                               w1=w1, b1=b1, w2=w2, b2=b2,
                               ln1_g=g1, ln1_b=be1,
                               ln2_g=g2, ln2_b=be2,
                               ln3_g=g3, ln3_b=be3))
    params["dec_layers"] = dec_layers
    params["dec_norm_g"], params["dec_norm_b"] = ln()

    params["w_out"], params["b_out"] = lin(D_MODEL, 1)
    return params


def pack_params(p):
    """Pack the nested parameter tree into a handful of dense slabs (few DMAs)."""
    e0, e1 = p["enc_layers"]
    d0, d1 = p["dec_layers"]
    # Attention index order: enc0.self, enc1.self, dec0.self, dec0.cross, dec1.self, dec1.cross
    attn = [e0["self_attn"], e1["self_attn"],
            d0["self_attn"], d0["cross_attn"],
            d1["self_attn"], d1["cross_attn"]]
    ffns = [e0, e1, d0, d1]
    ln_g = [e0["ln1_g"], e0["ln2_g"], e1["ln1_g"], e1["ln2_g"], p["enc_norm_g"],
            d0["ln1_g"], d0["ln2_g"], d0["ln3_g"],
            d1["ln1_g"], d1["ln2_g"], d1["ln3_g"], p["dec_norm_g"]]
    ln_b = [e0["ln1_b"], e0["ln2_b"], e1["ln1_b"], e1["ln2_b"], p["enc_norm_b"],
            d0["ln1_b"], d0["ln2_b"], d0["ln3_b"],
            d1["ln1_b"], d1["ln2_b"], d1["ln3_b"], p["dec_norm_b"]]

    vec64 = jnp.concatenate(
        [p["b_in"]] + [a["bo"] for a in attn] + [f["b2"] for f in ffns] + ln_g + ln_b,
        axis=0)                                              # (35, 64)
    assert vec64.shape == (N_VEC64, D_MODEL)

    return dict(
        pe=p["pe"],
        w_in=p["w_in"],                                      # (9, 64)
        wqkv=jnp.stack([a["wqkv"] for a in attn]),           # (6, 64, 192)
        bqkv=jnp.concatenate([a["bqkv"] for a in attn], 0),  # (6, 192)
        wo=jnp.stack([a["wo"] for a in attn]),               # (6, 64, 64)
        w1=jnp.stack([f["w1"] for f in ffns]),               # (4, 64, 128)
        b1=jnp.concatenate([f["b1"] for f in ffns], 0),      # (4, 128)
        w2=jnp.stack([f["w2"] for f in ffns]),               # (4, 128, 64)
        vec64=vec64,                                         # (35, 64)
        w_out=jnp.concatenate([p["w_out"], p["b_out"]], 0),  # (65, 1)
    )


# ----------------------------- main -----------------------------

if __name__ == "__main__":
    key = jax.random.PRNGKey(0)
    k_src, k_tgt, k_param = jax.random.split(key, 3)

    B, LS, LT = 2, 8, 8
    src = jax.random.normal(k_src, (B, LS, INPUT_SIZE), jnp.float32)
    tgt = jax.random.normal(k_tgt, (B, LT, INPUT_SIZE), jnp.float32)

    params = init_params(k_param)
    packed = pack_params(params)

    fwd = jax.jit(lambda s, t: transformer_forward(packed, s, t))
    out = fwd(src, tgt)
    out = jax.block_until_ready(out)

    assert out.shape == (B, LT), out.shape
    assert bool(jnp.all(jnp.isfinite(out)))
    print("KERNEL_OK")
</pallas_src>

<mosaic_0001>
module attributes {stable_mosaic.version = 11 : i64} {
  func.func @_forward_kernel(%arg0: memref<32x9xf32, #tpu.memory_space<vmem>>, %arg1: memref<32x64xf32, #tpu.memory_space<vmem>>, %arg2: memref<9x64xf32, #tpu.memory_space<vmem>>, %arg3: memref<6x64x192xf32, #tpu.memory_space<vmem>>, %arg4: memref<6x192xf32, #tpu.memory_space<vmem>>, %arg5: memref<6x64x64xf32, #tpu.memory_space<vmem>>, %arg6: memref<4x64x128xf32, #tpu.memory_space<vmem>>, %arg7: memref<4x128xf32, #tpu.memory_space<vmem>>, %arg8: memref<4x128x64xf32, #tpu.memory_space<vmem>>, %arg9: memref<35x64xf32, #tpu.memory_space<vmem>>, %arg10: memref<65x1xf32, #tpu.memory_space<vmem>>, %arg11: memref<16x1xf32, #tpu.memory_space<vmem>>) attributes {dimension_semantics = [], scalar_prefetch = 0 : i64, scratch_operands = 0 : i64, tpu.core_type = #tpu.core_type<tc>} {
    %c0 = arith.constant 0 : index
    %c0_0 = arith.constant 0 : index
    %0 = vector.load %arg0[%c0, %c0_0] : memref<32x9xf32, #tpu.memory_space<vmem>>, vector<32x9xf32>
    %c0_1 = arith.constant 0 : index
    %c0_2 = arith.constant 0 : index
    %1 = vector.load %arg2[%c0_1, %c0_2] : memref<9x64xf32, #tpu.memory_space<vmem>>, vector<9x64xf32>
    %cst = arith.constant dense<0.000000e+00> : vector<32x64xf32>
    %2 = tpu.matmul %0, %1, %cst {dimension_numbers = #tpu.dot_dimension_numbers<[1], [0], [0], [1], [0, 0, 1, 1], [], []>} : vector<32x9xf32>, vector<9x64xf32>, vector<32x64xf32> -> vector<32x64xf32>
    %c0_3 = arith.constant 0 : index
    %c0_4 = arith.constant 0 : index
    %3 = vector.load %arg9[%c0_3, %c0_4] : memref<35x64xf32, #tpu.memory_space<vmem>>, vector<1x64xf32>
    %4 = vector.broadcast %3 : vector<1x64xf32> to vector<32x64xf32>
    %5 = arith.addf %2, %4 : vector<32x64xf32>
    %c0_5 = arith.constant 0 : index
    %c0_6 = arith.constant 0 : index
    %6 = vector.load %arg1[%c0_5, %c0_6] : memref<32x64xf32, #tpu.memory_space<vmem>>, vector<32x64xf32>
    %7 = arith.addf %5, %6 : vector<32x64xf32>
    %8 = vector.extract_strided_slice %7 {offsets = [0, 0], sizes = [16, 64], strides = [1, 1]} : vector<32x64xf32> to vector<16x64xf32>
    %9 = vector.extract_strided_slice %7 {offsets = [16, 0], sizes = [16, 64], strides = [1, 1]} : vector<32x64xf32> to vector<16x64xf32>
    %c0_7 = arith.constant 0 : index
    %c0_8 = arith.constant 0 : index
    %c0_9 = arith.constant 0 : index
    %10 = vector.load %arg3[%c0_7, %c0_8, %c0_9] : memref<6x64x192xf32, #tpu.memory_space<vmem>>, vector<1x64x192xf32>
    %11 = vector.shape_cast %10 : vector<1x64x192xf32> to vector<64x192xf32>
    %c0_10 = arith.constant 0 : index
    %c0_11 = arith.constant 0 : index
    %12 = vector.load %arg4[%c0_10, %c0_11] : memref<6x192xf32, #tpu.memory_space<vmem>>, vector<1x192xf32>
    %cst_12 = arith.constant dense<0.000000e+00> : vector<16x192xf32>
    %13 = tpu.matmul %8, %11, %cst_12 {dimension_numbers = #tpu.dot_dimension_numbers<[1], [0], [0], [1], [0, 0, 1, 1], [], []>} : vector<16x64xf32>, vector<64x192xf32>, vector<16x192xf32> -> vector<16x192xf32>
    %14 = vector.broadcast %12 : vector<1x192xf32> to vector<16x192xf32>
    %15 = arith.addf %13, %14 : vector<16x192xf32>
    %16 = vector.extract_strided_slice %15 {offsets = [0, 0], sizes = [16, 16], strides = [1, 1]} : vector<16x192xf32> to vector<16x16xf32>
    %17 = vector.shape_cast %16 : vector<16x16xf32> to vector<2x8x16xf32>
    %18 = vector.extract_strided_slice %15 {offsets = [0, 64], sizes = [16, 16], strides = [1, 1]} : vector<16x192xf32> to vector<16x16xf32>
    %19 = vector.shape_cast %18 : vector<16x16xf32> to vector<2x8x16xf32>
    %20 = vector.extract_strided_slice %15 {offsets = [0, 128], sizes = [16, 16], strides = [1, 1]} : vector<16x192xf32> to vector<16x16xf32>
    %21 = vector.shape_cast %20 : vector<16x16xf32> to vector<2x8x16xf32>
    "tpu.trace_start"() <{level = 10 : i32, message = "bqd,bkd->bqk"}> : () -> ()
    %cst_13 = arith.constant dense<0.000000e+00> : vector<2x8x8xf32>
    %22 = tpu.matmul %17, %19, %cst_13 {dimension_numbers = #tpu.dot_dimension_numbers<[2], [2], [1], [1], [0, 0, 0, 1, 1, 1], [0], [0]>} : vector<2x8x16xf32>, vector<2x8x16xf32>, vector<2x8x8xf32> -> vector<2x8x8xf32>
    "tpu.trace_stop"() : () -> ()
    %cst_14 = arith.constant 2.500000e-01 : f32
    %23 = vector.broadcast %cst_14 : f32 to vector<2x8x8xf32>
    %24 = arith.mulf %22, %23 : vector<2x8x8xf32>
    %cst_15 = arith.constant dense<0xFF800000> : vector<2x8xf32>
    %25 = vector.multi_reduction <maximumf>, %24, %cst_15 [2] : vector<2x8x8xf32> to vector<2x8xf32>
    %26 = vector.shape_cast %25 : vector<2x8xf32> to vector<2x8x1xf32>
    %27 = vector.broadcast %26 : vector<2x8x1xf32> to vector<2x8x8xf32>
    %28 = arith.subf %24, %27 : vector<2x8x8xf32>
    %29 = math.exp %28 : vector<2x8x8xf32>
    %cst_16 = arith.constant dense<0.000000e+00> : vector<2x8xf32>
    %30 = vector.multi_reduction <add>, %29, %cst_16 [2] : vector<2x8x8xf32> to vector<2x8xf32>
    %31 = vector.shape_cast %30 : vector<2x8xf32> to vector<2x8x1xf32>
    %32 = vector.broadcast %31 : vector<2x8x1xf32> to vector<2x8x8xf32>
    %33 = arith.divf %29, %32 : vector<2x8x8xf32>
    "tpu.trace_start"() <{level = 10 : i32, message = "bqk,bkd->bqd"}> : () -> ()
    %cst_17 = arith.constant dense<0.000000e+00> : vector<2x8x16xf32>
    %34 = tpu.matmul %33, %21, %cst_17 {dimension_numbers = #tpu.dot_dimension_numbers<[2], [1], [1], [2], [0, 0, 0, 1, 1, 2], [0], [0]>} : vector<2x8x8xf32>, vector<2x8x16xf32>, vector<2x8x16xf32> -> vector<2x8x16xf32>
    "tpu.trace_stop"() : () -> ()
    %35 = vector.extract_strided_slice %15 {offsets = [0, 16], sizes = [16, 16], strides = [1, 1]} : vector<16x192xf32> to vector<16x16xf32>
    %36 = vector.shape_cast %35 : vector<16x16xf32> to vector<2x8x16xf32>
    %37 = vector.extract_strided_slice %15 {offsets = [0, 80], sizes = [16, 16], strides = [1, 1]} : vector<16x192xf32> to vector<16x16xf32>
    %38 = vector.shape_cast %37 : vector<16x16xf32> to vector<2x8x16xf32>
    %39 = vector.extract_strided_slice %15 {offsets = [0, 144], sizes = [16, 16], strides = [1, 1]} : vector<16x192xf32> to vector<16x16xf32>
    %40 = vector.shape_cast %39 : vector<16x16xf32> to vector<2x8x16xf32>
    "tpu.trace_start"() <{level = 10 : i32, message = "bqd,bkd->bqk"}> : () -> ()
    %cst_18 = arith.constant dense<0.000000e+00> : vector<2x8x8xf32>
    %41 = tpu.matmul %36, %38, %cst_18 {dimension_numbers = #tpu.dot_dimension_numbers<[2], [2], [1], [1], [0, 0, 0, 1, 1, 1], [0], [0]>} : vector<2x8x16xf32>, vector<2x8x16xf32>, vector<2x8x8xf32> -> vector<2x8x8xf32>
    "tpu.trace_stop"() : () -> ()
    %cst_19 = arith.constant 2.500000e-01 : f32
    %42 = vector.broadcast %cst_19 : f32 to vector<2x8x8xf32>
    %43 = arith.mulf %41, %42 : vector<2x8x8xf32>
    %cst_20 = arith.constant dense<0xFF800000> : vector<2x8xf32>
    %44 = vector.multi_reduction <maximumf>, %43, %cst_20 [2] : vector<2x8x8xf32> to vector<2x8xf32>
    %45 = vector.shape_cast %44 : vector<2x8xf32> to vector<2x8x1xf32>
    %46 = vector.broadcast %45 : vector<2x8x1xf32> to vector<2x8x8xf32>
    %47 = arith.subf %43, %46 : vector<2x8x8xf32>
    %48 = math.exp %47 : vector<2x8x8xf32>
    %cst_21 = arith.constant dense<0.000000e+00> : vector<2x8xf32>
    %49 = vector.multi_reduction <add>, %48, %cst_21 [2] : vector<2x8x8xf32> to vector<2x8xf32>
    %50 = vector.shape_cast %49 : vector<2x8xf32> to vector<2x8x1xf32>
    %51 = vector.broadcast %50 : vector<2x8x1xf32> to vector<2x8x8xf32>
    %52 = arith.divf %48, %51 : vector<2x8x8xf32>
    "tpu.trace_start"() <{level = 10 : i32, message = "bqk,bkd->bqd"}> : () -> ()
    %cst_22 = arith.constant dense<0.000000e+00> : vector<2x8x16xf32>
    %53 = tpu.matmul %52, %40, %cst_22 {dimension_numbers = #tpu.dot_dimension_numbers<[2], [1], [1], [2], [0, 0, 0, 1, 1, 2], [0], [0]>} : vector<2x8x8xf32>, vector<2x8x16xf32>, vector<2x8x16xf32> -> vector<2x8x16xf32>
    "tpu.trace_stop"() : () -> ()
    %54 = vector.extract_strided_slice %15 {offsets = [0, 32], sizes = [16, 16], strides = [1, 1]} : vector<16x192xf32> to vector<16x16xf32>
    %55 = vector.shape_cast %54 : vector<16x16xf32> to vector<2x8x16xf32>
    %56 = vector.extract_strided_slice %15 {offsets = [0, 96], sizes = [16, 16], strides = [1, 1]} : vector<16x192xf32> to vector<16x16xf32>
    %57 = vector.shape_cast %56 : vector<16x16xf32> to vector<2x8x16xf32>
    %58 = vector.extract_strided_slice %15 {offsets = [0, 160], sizes = [16, 16], strides = [1, 1]} : vector<16x192xf32> to vector<16x16xf32>
    %59 = vector.shape_cast %58 : vector<16x16xf32> to vector<2x8x16xf32>
    "tpu.trace_start"() <{level = 10 : i32, message = "bqd,bkd->bqk"}> : () -> ()
    %cst_23 = arith.constant dense<0.000000e+00> : vector<2x8x8xf32>
    %60 = tpu.matmul %55, %57, %cst_23 {dimension_numbers = #tpu.dot_dimension_numbers<[2], [2], [1], [1], [0, 0, 0, 1, 1, 1], [0], [0]>} : vector<2x8x16xf32>, vector<2x8x16xf32>, vector<2x8x8xf32> -> vector<2x8x8xf32>
    "tpu.trace_stop"() : () -> ()
    %cst_24 = arith.constant 2.500000e-01 : f32
    %61 = vector.broadcast %cst_24 : f32 to vector<2x8x8xf32>
    %62 = arith.mulf %60, %61 : vector<2x8x8xf32>
    %cst_25 = arith.constant dense<0xFF800000> : vector<2x8xf32>
    %63 = vector.multi_reduction <maximumf>, %62, %cst_25 [2] : vector<2x8x8xf32> to vector<2x8xf32>
    %64 = vector.shape_cast %63 : vector<2x8xf32> to vector<2x8x1xf32>
    %65 = vector.broadcast %64 : vector<2x8x1xf32> to vector<2x8x8xf32>
    %66 = arith.subf %62, %65 : vector<2x8x8xf32>
    %67 = math.exp %66 : vector<2x8x8xf32>
    %cst_26 = arith.constant dense<0.000000e+00> : vector<2x8xf32>
    %68 = vector.multi_reduction <add>, %67, %cst_26 [2] : vector<2x8x8xf32> to vector<2x8xf32>
    %69 = vector.shape_cast %68 : vector<2x8xf32> to vector<2x8x1xf32>
    %70 = vector.broadcast %69 : vector<2x8x1xf32> to vector<2x8x8xf32>
    %71 = arith.divf %67, %70 : vector<2x8x8xf32>
    "tpu.trace_start"() <{level = 10 : i32, message = "bqk,bkd->bqd"}> : () -> ()
    %cst_27 = arith.constant dense<0.000000e+00> : vector<2x8x16xf32>
    %72 = tpu.matmul %71, %59, %cst_27 {dimension_numbers = #tpu.dot_dimension_numbers<[2], [1], [1], [2], [0, 0, 0, 1, 1, 2], [0], [0]>} : vector<2x8x8xf32>, vector<2x8x16xf32>, vector<2x8x16xf32> -> vector<2x8x16xf32>
    "tpu.trace_stop"() : () -> ()
    %73 = vector.extract_strided_slice %15 {offsets = [0, 48], sizes = [16, 16], strides = [1, 1]} : vector<16x192xf32> to vector<16x16xf32>
    %74 = vector.shape_cast %73 : vector<16x16xf32> to vector<2x8x16xf32>
    %75 = vector.extract_strided_slice %15 {offsets = [0, 112], sizes = [16, 16], strides = [1, 1]} : vector<16x192xf32> to vector<16x16xf32>
    %76 = vector.shape_cast %75 : vector<16x16xf32> to vector<2x8x16xf32>
    %77 = vector.extract_strided_slice %15 {offsets = [0, 176], sizes = [16, 16], strides = [1, 1]} : vector<16x192xf32> to vector<16x16xf32>
    %78 = vector.shape_cast %77 : vector<16x16xf32> to vector<2x8x16xf32>
    "tpu.trace_start"() <{level = 10 : i32, message = "bqd,bkd->bqk"}> : () -> ()
    %cst_28 = arith.constant dense<0.000000e+00> : vector<2x8x8xf32>
    %79 = tpu.matmul %74, %76, %cst_28 {dimension_numbers = #tpu.dot_dimension_numbers<[2], [2], [1], [1], [0, 0, 0, 1, 1, 1], [0], [0]>} : vector<2x8x16xf32>, vector<2x8x16xf32>, vector<2x8x8xf32> -> vector<2x8x8xf32>
    "tpu.trace_stop"() : () -> ()
    %cst_29 = arith.constant 2.500000e-01 : f32
    %80 = vector.broadcast %cst_29 : f32 to vector<2x8x8xf32>
    %81 = arith.mulf %79, %80 : vector<2x8x8xf32>
    %cst_30 = arith.constant dense<0xFF800000> : vector<2x8xf32>
    %82 = vector.multi_reduction <maximumf>, %81, %cst_30 [2] : vector<2x8x8xf32> to vector<2x8xf32>
    %83 = vector.shape_cast %82 : vector<2x8xf32> to vector<2x8x1xf32>
    %84 = vector.broadcast %83 : vector<2x8x1xf32> to vector<2x8x8xf32>
    %85 = arith.subf %81, %84 : vector<2x8x8xf32>
    %86 = math.exp %85 : vector<2x8x8xf32>
    %cst_31 = arith.constant dense<0.000000e+00> : vector<2x8xf32>
    %87 = vector.multi_reduction <add>, %86, %cst_31 [2] : vector<2x8x8xf32> to vector<2x8xf32>
    %88 = vector.shape_cast %87 : vector<2x8xf32> to vector<2x8x1xf32>
    %89 = vector.broadcast %88 : vector<2x8x1xf32> to vector<2x8x8xf32>
    %90 = arith.divf %86, %89 : vector<2x8x8xf32>
    "tpu.trace_start"() <{level = 10 : i32, message = "bqk,bkd->bqd"}> : () -> ()
    %cst_32 = arith.constant dense<0.000000e+00> : vector<2x8x16xf32>
    %91 = tpu.matmul %90, %78, %cst_32 {dimension_numbers = #tpu.dot_dimension_numbers<[2], [1], [1], [2], [0, 0, 0, 1, 1, 2], [0], [0]>} : vector<2x8x8xf32>, vector<2x8x16xf32>, vector<2x8x16xf32> -> vector<2x8x16xf32>
    "tpu.trace_stop"() : () -> ()
    %92 = tpu.concatenate %34, %53, %72, %91 in 2 : vector<2x8x16xf32>, vector<2x8x16xf32>, vector<2x8x16xf32>, vector<2x8x16xf32> -> vector<2x8x64xf32>
    %93 = vector.shape_cast %92 : vector<2x8x64xf32> to vector<16x64xf32>
    %c0_33 = arith.constant 0 : index
    %c0_34 = arith.constant 0 : index
    %c0_35 = arith.constant 0 : index
    %94 = vector.load %arg5[%c0_33, %c0_34, %c0_35] : memref<6x64x64xf32, #tpu.memory_space<vmem>>, vector<1x64x64xf32>
    %95 = vector.shape_cast %94 : vector<1x64x64xf32> to vector<64x64xf32>
    %cst_36 = arith.constant dense<0.000000e+00> : vector<16x64xf32>
    %96 = tpu.matmul %93, %95, %cst_36 {dimension_numbers = #tpu.dot_dimension_numbers<[1], [0], [0], [1], [0, 0, 1, 1], [], []>} : vector<16x64xf32>, vector<64x64xf32>, vector<16x64xf32> -> vector<16x64xf32>
    %c1 = arith.constant 1 : index
    %c0_37 = arith.constant 0 : index
    %97 = vector.load %arg9[%c1, %c0_37] : memref<35x64xf32, #tpu.memory_space<vmem>>, vector<1x64xf32>
    %98 = vector.broadcast %97 : vector<1x64xf32> to vector<16x64xf32>
    %99 = arith.addf %96, %98 : vector<16x64xf32>
    %100 = arith.addf %8, %99 : vector<16x64xf32>
    %cst_38 = arith.constant dense<0.000000e+00> : vector<16xf32>
    %101 = vector.multi_reduction <add>, %100, %cst_38 [1] : vector<16x64xf32> to vector<16xf32>
    %102 = vector.shape_cast %101 : vector<16xf32> to vector<16x1xf32>
    %cst_39 = arith.constant 6.400000e+01 : f32
    %103 = vector.broadcast %cst_39 : f32 to vector<16x1xf32>
    %104 = arith.divf %102, %103 : vector<16x1xf32>
    %105 = vector.broadcast %104 : vector<16x1xf32> to vector<16x64xf32>
    %106 = arith.subf %100, %105 : vector<16x64xf32>
    %107 = arith.mulf %106, %106 : vector<16x64xf32>
    %cst_40 = arith.constant dense<0.000000e+00> : vector<16xf32>
    %108 = vector.multi_reduction <add>, %107, %cst_40 [1] : vector<16x64xf32> to vector<16xf32>
    %109 = vector.shape_cast %108 : vector<16xf32> to vector<16x1xf32>
    %cst_41 = arith.constant 6.400000e+01 : f32
    %110 = vector.broadcast %cst_41 : f32 to vector<16x1xf32>
    %111 = arith.divf %109, %110 : vector<16x1xf32>
    %112 = vector.broadcast %104 : vector<16x1xf32> to vector<16x64xf32>
    %113 = arith.subf %100, %112 : vector<16x64xf32>
    %cst_42 = arith.constant 9.99999974E-6 : f32
    %114 = vector.broadcast %cst_42 : f32 to vector<16x1xf32>
    %115 = arith.addf %111, %114 : vector<16x1xf32>
    %116 = math.rsqrt %115 : vector<16x1xf32>
    %117 = vector.broadcast %116 : vector<16x1xf32> to vector<16x64xf32>
    %118 = arith.mulf %113, %117 : vector<16x64xf32>
    %c11 = arith.constant 11 : index
    %c0_43 = arith.constant 0 : index
    %119 = vector.load %arg9[%c11, %c0_43] : memref<35x64xf32, #tpu.memory_space<vmem>>, vector<1x64xf32>
    %120 = vector.broadcast %119 : vector<1x64xf32> to vector<16x64xf32>
    %121 = arith.mulf %118, %120 : vector<16x64xf32>
    %c23 = arith.constant 23 : index
    %c0_44 = arith.constant 0 : index
    %122 = vector.load %arg9[%c23, %c0_44] : memref<35x64xf32, #tpu.memory_space<vmem>>, vector<1x64xf32>
    %123 = vector.broadcast %122 : vector<1x64xf32> to vector<16x64xf32>
    %124 = arith.addf %121, %123 : vector<16x64xf32>
    %c0_45 = arith.constant 0 : index
    %c0_46 = arith.constant 0 : index
    %c0_47 = arith.constant 0 : index
    %125 = vector.load %arg6[%c0_45, %c0_46, %c0_47] : memref<4x64x128xf32, #tpu.memory_space<vmem>>, vector<1x64x128xf32>
    %126 = vector.shape_cast %125 : vector<1x64x128xf32> to vector<64x128xf32>
    %cst_48 = arith.constant dense<0.000000e+00> : vector<16x128xf32>
    %127 = tpu.matmul %124, %126, %cst_48 {dimension_numbers = #tpu.dot_dimension_numbers<[1], [0], [0], [1], [0, 0, 1, 1], [], []>} : vector<16x64xf32>, vector<64x128xf32>, vector<16x128xf32> -> vector<16x128xf32>
    %c0_49 = arith.constant 0 : index
    %c0_50 = arith.constant 0 : index
    %128 = vector.load %arg7[%c0_49, %c0_50] : memref<4x128xf32, #tpu.memory_space<vmem>>, vector<1x128xf32>
    %129 = vector.broadcast %128 : vector<1x128xf32> to vector<16x128xf32>
    %130 = arith.addf %127, %129 : vector<16x128xf32>
    %cst_51 = arith.constant 0.000000e+00 : f32
    %131 = vector.broadcast %cst_51 : f32 to vector<16x128xf32>
    %132 = arith.maximumf %130, %131 : vector<16x128xf32>
    %c0_52 = arith.constant 0 : index
    %c0_53 = arith.constant 0 : index
    %c0_54 = arith.constant 0 : index
    %133 = vector.load %arg8[%c0_52, %c0_53, %c0_54] : memref<4x128x64xf32, #tpu.memory_space<vmem>>, vector<1x128x64xf32>
    %134 = vector.shape_cast %133 : vector<1x128x64xf32> to vector<128x64xf32>
    %cst_55 = arith.constant dense<0.000000e+00> : vector<16x64xf32>
    %135 = tpu.matmul %132, %134, %cst_55 {dimension_numbers = #tpu.dot_dimension_numbers<[1], [0], [0], [1], [0, 0, 1, 1], [], []>} : vector<16x128xf32>, vector<128x64xf32>, vector<16x64xf32> -> vector<16x64xf32>
    %c7 = arith.constant 7 : index
    %c0_56 = arith.constant 0 : index
    %136 = vector.load %arg9[%c7, %c0_56] : memref<35x64xf32, #tpu.memory_space<vmem>>, vector<1x64xf32>
    %137 = vector.broadcast %136 : vector<1x64xf32> to vector<16x64xf32>
    %138 = arith.addf %135, %137 : vector<16x64xf32>
    %139 = arith.addf %124, %138 : vector<16x64xf32>
    %cst_57 = arith.constant dense<0.000000e+00> : vector<16xf32>
    %140 = vector.multi_reduction <add>, %139, %cst_57 [1] : vector<16x64xf32> to vector<16xf32>
    %141 = vector.shape_cast %140 : vector<16xf32> to vector<16x1xf32>
    %cst_58 = arith.constant 6.400000e+01 : f32
    %142 = vector.broadcast %cst_58 : f32 to vector<16x1xf32>
    %143 = arith.divf %141, %142 : vector<16x1xf32>
    %144 = vector.broadcast %143 : vector<16x1xf32> to vector<16x64xf32>
    %145 = arith.subf %139, %144 : vector<16x64xf32>
    %146 = arith.mulf %145, %145 : vector<16x64xf32>
    %cst_59 = arith.constant dense<0.000000e+00> : vector<16xf32>
    %147 = vector.multi_reduction <add>, %146, %cst_59 [1] : vector<16x64xf32> to vector<16xf32>
    %148 = vector.shape_cast %147 : vector<16xf32> to vector<16x1xf32>
    %cst_60 = arith.constant 6.400000e+01 : f32
    %149 = vector.broadcast %cst_60 : f32 to vector<16x1xf32>
    %150 = arith.divf %148, %149 : vector<16x1xf32>
    %151 = vector.broadcast %143 : vector<16x1xf32> to vector<16x64xf32>
    %152 = arith.subf %139, %151 : vector<16x64xf32>
    %cst_61 = arith.constant 9.99999974E-6 : f32
    %153 = vector.broadcast %cst_61 : f32 to vector<16x1xf32>
    %154 = arith.addf %150, %153 : vector<16x1xf32>
    %155 = math.rsqrt %154 : vector<16x1xf32>
    %156 = vector.broadcast %155 : vector<16x1xf32> to vector<16x64xf32>
    %157 = arith.mulf %152, %156 : vector<16x64xf32>
    %c12 = arith.constant 12 : index
    %c0_62 = arith.constant 0 : index
    %158 = vector.load %arg9[%c12, %c0_62] : memref<35x64xf32, #tpu.memory_space<vmem>>, vector<1x64xf32>
    %159 = vector.broadcast %158 : vector<1x64xf32> to vector<16x64xf32>
    %160 = arith.mulf %157, %159 : vector<16x64xf32>
    %c24 = arith.constant 24 : index
    %c0_63 = arith.constant 0 : index
    %161 = vector.load %arg9[%c24, %c0_63] : memref<35x64xf32, #tpu.memory_space<vmem>>, vector<1x64xf32>
    %162 = vector.broadcast %161 : vector<1x64xf32> to vector<16x64xf32>
    %163 = arith.addf %160, %162 : vector<16x64xf32>
    %c1_64 = arith.constant 1 : index
    %c0_65 = arith.constant 0 : index
    %c0_66 = arith.constant 0 : index
    %164 = vector.load %arg3[%c1_64, %c0_65, %c0_66] : memref<6x64x192xf32, #tpu.memory_space<vmem>>, vector<1x64x192xf32>
    %165 = vector.shape_cast %164 : vector<1x64x192xf32> to vector<64x192xf32>
    %c1_67 = arith.constant 1 : index
    %c0_68 = arith.constant 0 : index
    %166 = vector.load %arg4[%c1_67, %c0_68] : memref<6x192xf32, #tpu.memory_space<vmem>>, vector<1x192xf32>
    %cst_69 = arith.constant dense<0.000000e+00> : vector<16x192xf32>
    %167 = tpu.matmul %163, %165, %cst_69 {dimension_numbers = #tpu.dot_dimension_numbers<[1], [0], [0], [1], [0, 0, 1, 1], [], []>} : vector<16x64xf32>, vector<64x192xf32>, vector<16x192xf32> -> vector<16x192xf32>
    %168 = vector.broadcast %166 : vector<1x192xf32> to vector<16x192xf32>
    %169 = arith.addf %167, %168 : vector<16x192xf32>
    %170 = vector.extract_strided_slice %169 {offsets = [0, 0], sizes = [16, 16], strides = [1, 1]} : vector<16x192xf32> to vector<16x16xf32>
    %171 = vector.shape_cast %170 : vector<16x16xf32> to vector<2x8x16xf32>
    %172 = vector.extract_strided_slice %169 {offsets = [0, 64], sizes = [16, 16], strides = [1, 1]} : vector<16x192xf32> to vector<16x16xf32>
    %173 = vector.shape_cast %172 : vector<16x16xf32> to vector<2x8x16xf32>
    %174 = vector.extract_strided_slice %169 {offsets = [0, 128], sizes = [16, 16], strides = [1, 1]} : vector<16x192xf32> to vector<16x16xf32>
    %175 = vector.shape_cast %174 : vector<16x16xf32> to vector<2x8x16xf32>
    "tpu.trace_start"() <{level = 10 : i32, message = "bqd,bkd->bqk"}> : () -> ()
    %cst_70 = arith.constant dense<0.000000e+00> : vector<2x8x8xf32>
    %176 = tpu.matmul %171, %173, %cst_70 {dimension_numbers = #tpu.dot_dimension_numbers<[2], [2], [1], [1], [0, 0, 0, 1, 1, 1], [0], [0]>} : vector<2x8x16xf32>, vector<2x8x16xf32>, vector<2x8x8xf32> -> vector<2x8x8xf32>
    "tpu.trace_stop"() : () -> ()
    %cst_71 = arith.constant 2.500000e-01 : f32
    %177 = vector.broadcast %cst_71 : f32 to vector<2x8x8xf32>
    %178 = arith.mulf %176, %177 : vector<2x8x8xf32>
    %cst_72 = arith.constant dense<0xFF800000> : vector<2x8xf32>
    %179 = vector.multi_reduction <maximumf>, %178, %cst_72 [2] : vector<2x8x8xf32> to vector<2x8xf32>
    %180 = vector.shape_cast %179 : vector<2x8xf32> to vector<2x8x1xf32>
    %181 = vector.broadcast %180 : vector<2x8x1xf32> to vector<2x8x8xf32>
    %182 = arith.subf %178, %181 : vector<2x8x8xf32>
    %183 = math.exp %182 : vector<2x8x8xf32>
    %cst_73 = arith.constant dense<0.000000e+00> : vector<2x8xf32>
    %184 = vector.multi_reduction <add>, %183, %cst_73 [2] : vector<2x8x8xf32> to vector<2x8xf32>
    %185 = vector.shape_cast %184 : vector<2x8xf32> to vector<2x8x1xf32>
    %186 = vector.broadcast %185 : vector<2x8x1xf32> to vector<2x8x8xf32>
    %187 = arith.divf %183, %186 : vector<2x8x8xf32>
    "tpu.trace_start"() <{level = 10 : i32, message = "bqk,bkd->bqd"}> : () -> ()
    %cst_74 = arith.constant dense<0.000000e+00> : vector<2x8x16xf32>
    %188 = tpu.matmul %187, %175, %cst_74 {dimension_numbers = #tpu.dot_dimension_numbers<[2], [1], [1], [2], [0, 0, 0, 1, 1, 2], [0], [0]>} : vector<2x8x8xf32>, vector<2x8x16xf32>, vector<2x8x16xf32> -> vector<2x8x16xf32>
    "tpu.trace_stop"() : () -> ()
    %189 = vector.extract_strided_slice %169 {offsets = [0, 16], sizes = [16, 16], strides = [1, 1]} : vector<16x192xf32> to vector<16x16xf32>
    %190 = vector.shape_cast %189 : vector<16x16xf32> to vector<2x8x16xf32>
    %191 = vector.extract_strided_slice %169 {offsets = [0, 80], sizes = [16, 16], strides = [1, 1]} : vector<16x192xf32> to vector<16x16xf32>
    %192 = vector.shape_cast %191 : vector<16x16xf32> to vector<2x8x16xf32>
    %193 = vector.extract_strided_slice %169 {offsets = [0, 144], sizes = [16, 16], strides = [1, 1]} : vector<16x192xf32> to vector<16x16xf32>
    %194 = vector.shape_cast %193 : vector<16x16xf32> to vector<2x8x16xf32>
    "tpu.trace_start"() <{level = 10 : i32, message = "bqd,bkd->bqk"}> : () -> ()
    %cst_75 = arith.constant dense<0.000000e+00> : vector<2x8x8xf32>
    %195 = tpu.matmul %190, %192, %cst_75 {dimension_numbers = #tpu.dot_dimension_numbers<[2], [2], [1], [1], [0, 0, 0, 1, 1, 1], [0], [0]>} : vector<2x8x16xf32>, vector<2x8x16xf32>, vector<2x8x8xf32> -> vector<2x8x8xf32>
    "tpu.trace_stop"() : () -> ()
    %cst_76 = arith.constant 2.500000e-01 : f32
    %196 = vector.broadcast %cst_76 : f32 to vector<2x8x8xf32>
    %197 = arith.mulf %195, %196 : vector<2x8x8xf32>
    %cst_77 = arith.constant dense<0xFF800000> : vector<2x8xf32>
    %198 = vector.multi_reduction <maximumf>, %197, %cst_77 [2] : vector<2x8x8xf32> to vector<2x8xf32>
    %199 = vector.shape_cast %198 : vector<2x8xf32> to vector<2x8x1xf32>
    %200 = vector.broadcast %199 : vector<2x8x1xf32> to vector<2x8x8xf32>
    %201 = arith.subf %197, %200 : vector<2x8x8xf32>
    %202 = math.exp %201 : vector<2x8x8xf32>
    %cst_78 = arith.constant dense<0.000000e+00> : vector<2x8xf32>
    %203 = vector.multi_reduction <add>, %202, %cst_78 [2] : vector<2x8x8xf32> to vector<2x8xf32>
    %204 = vector.shape_cast %203 : vector<2x8xf32> to vector<2x8x1xf32>
    %205 = vector.broadcast %204 : vector<2x8x1xf32> to vector<2x8x8xf32>
    %206 = arith.divf %202, %205 : vector<2x8x8xf32>
    "tpu.trace_start"() <{level = 10 : i32, message = "bqk,bkd->bqd"}> : () -> ()
    %cst_79 = arith.constant dense<0.000000e+00> : vector<2x8x16xf32>
    %207 = tpu.matmul %206, %194, %cst_79 {dimension_numbers = #tpu.dot_dimension_numbers<[2], [1], [1], [2], [0, 0, 0, 1, 1, 2], [0], [0]>} : vector<2x8x8xf32>, vector<2x8x16xf32>, vector<2x8x16xf32> -> vector<2x8x16xf32>
    "tpu.trace_stop"() : () -> ()
    %208 = vector.extract_strided_slice %169 {offsets = [0, 32], sizes = [16, 16], strides = [1, 1]} : vector<16x192xf32> to vector<16x16xf32>
    %209 = vector.shape_cast %208 : vector<16x16xf32> to vector<2x8x16xf32>
    %210 = vector.extract_strided_slice %169 {offsets = [0, 96], sizes = [16, 16], strides = [1, 1]} : vector<16x192xf32> to vector<16x16xf32>
    %211 = vector.shape_cast %210 : vector<16x16xf32> to vector<2x8x16xf32>
    %212 = vector.extract_strided_slice %169 {offsets = [0, 160], sizes = [16, 16], strides = [1, 1]} : vector<16x192xf32> to vector<16x16xf32>
    %213 = vector.shape_cast %212 : vector<16x16xf32> to vector<2x8x16xf32>
    "tpu.trace_start"() <{level = 10 : i32, message = "bqd,bkd->bqk"}> : () -> ()
    %cst_80 = arith.constant dense<0.000000e+00> : vector<2x8x8xf32>
    %214 = tpu.matmul %209, %211, %cst_80 {dimension_numbers = #tpu.dot_dimension_numbers<[2], [2], [1], [1], [0, 0, 0, 1, 1, 1], [0], [0]>} : vector<2x8x16xf32>, vector<2x8x16xf32>, vector<2x8x8xf32> -> vector<2x8x8xf32>
    "tpu.trace_stop"() : () -> ()
    %cst_81 = arith.constant 2.500000e-01 : f32
    %215 = vector.broadcast %cst_81 : f32 to vector<2x8x8xf32>
    %216 = arith.mulf %214, %215 : vector<2x8x8xf32>
    %cst_82 = arith.constant dense<0xFF800000> : vector<2x8xf32>
    %217 = vector.multi_reduction <maximumf>, %216, %cst_82 [2] : vector<2x8x8xf32> to vector<2x8xf32>
    %218 = vector.shape_cast %217 : vector<2x8xf32> to vector<2x8x1xf32>
    %219 = vector.broadcast %218 : vector<2x8x1xf32> to vector<2x8x8xf32>
    %220 = arith.subf %216, %219 : vector<2x8x8xf32>
    %221 = math.exp %220 : vector<2x8x8xf32>
    %cst_83 = arith.constant dense<0.000000e+00> : vector<2x8xf32>
    %222 = vector.multi_reduction <add>, %221, %cst_83 [2] : vector<2x8x8xf32> to vector<2x8xf32>
    %223 = vector.shape_cast %222 : vector<2x8xf32> to vector<2x8x1xf32>
    %224 = vector.broadcast %223 : vector<2x8x1xf32> to vector<2x8x8xf32>
    %225 = arith.divf %221, %224 : vector<2x8x8xf32>
    "tpu.trace_start"() <{level = 10 : i32, message = "bqk,bkd->bqd"}> : () -> ()
    %cst_84 = arith.constant dense<0.000000e+00> : vector<2x8x16xf32>
    %226 = tpu.matmul %225, %213, %cst_84 {dimension_numbers = #tpu.dot_dimension_numbers<[2], [1], [1], [2], [0, 0, 0, 1, 1, 2], [0], [0]>} : vector<2x8x8xf32>, vector<2x8x16xf32>, vector<2x8x16xf32> -> vector<2x8x16xf32>
    "tpu.trace_stop"() : () -> ()
    %227 = vector.extract_strided_slice %169 {offsets = [0, 48], sizes = [16, 16], strides = [1, 1]} : vector<16x192xf32> to vector<16x16xf32>
    %228 = vector.shape_cast %227 : vector<16x16xf32> to vector<2x8x16xf32>
    %229 = vector.extract_strided_slice %169 {offsets = [0, 112], sizes = [16, 16], strides = [1, 1]} : vector<16x192xf32> to vector<16x16xf32>
    %230 = vector.shape_cast %229 : vector<16x16xf32> to vector<2x8x16xf32>
    %231 = vector.extract_strided_slice %169 {offsets = [0, 176], sizes = [16, 16], strides = [1, 1]} : vector<16x192xf32> to vector<16x16xf32>
    %232 = vector.shape_cast %231 : vector<16x16xf32> to vector<2x8x16xf32>
    "tpu.trace_start"() <{level = 10 : i32, message = "bqd,bkd->bqk"}> : () -> ()
    %cst_85 = arith.constant dense<0.000000e+00> : vector<2x8x8xf32>
    %233 = tpu.matmul %228, %230, %cst_85 {dimension_numbers = #tpu.dot_dimension_numbers<[2], [2], [1], [1], [0, 0, 0, 1, 1, 1], [0], [0]>} : vector<2x8x16xf32>, vector<2x8x16xf32>, vector<2x8x8xf32> -> vector<2x8x8xf32>
    "tpu.trace_stop"() : () -> ()
    %cst_86 = arith.constant 2.500000e-01 : f32
    %234 = vector.broadcast %cst_86 : f32 to vector<2x8x8xf32>
    %235 = arith.mulf %233, %234 : vector<2x8x8xf32>
    %cst_87 = arith.constant dense<0xFF800000> : vector<2x8xf32>
    %236 = vector.multi_reduction <maximumf>, %235, %cst_87 [2] : vector<2x8x8xf32> to vector<2x8xf32>
    %237 = vector.shape_cast %236 : vector<2x8xf32> to vector<2x8x1xf32>
    %238 = vector.broadcast %237 : vector<2x8x1xf32> to vector<2x8x8xf32>
    %239 = arith.subf %235, %238 : vector<2x8x8xf32>
    %240 = math.exp %239 : vector<2x8x8xf32>
    %cst_88 = arith.constant dense<0.000000e+00> : vector<2x8xf32>
    %241 = vector.multi_reduction <add>, %240, %cst_88 [2] : vector<2x8x8xf32> to vector<2x8xf32>
    %242 = vector.shape_cast %241 : vector<2x8xf32> to vector<2x8x1xf32>
    %243 = vector.broadcast %242 : vector<2x8x1xf32> to vector<2x8x8xf32>
    %244 = arith.divf %240, %243 : vector<2x8x8xf32>
    "tpu.trace_start"() <{level = 10 : i32, message = "bqk,bkd->bqd"}> : () -> ()
    %cst_89 = arith.constant dense<0.000000e+00> : vector<2x8x16xf32>
    %245 = tpu.matmul %244, %232, %cst_89 {dimension_numbers = #tpu.dot_dimension_numbers<[2], [1], [1], [2], [0, 0, 0, 1, 1, 2], [0], [0]>} : vector<2x8x8xf32>, vector<2x8x16xf32>, vector<2x8x16xf32> -> vector<2x8x16xf32>
    "tpu.trace_stop"() : () -> ()
    %246 = tpu.concatenate %188, %207, %226, %245 in 2 : vector<2x8x16xf32>, vector<2x8x16xf32>, vector<2x8x16xf32>, vector<2x8x16xf32> -> vector<2x8x64xf32>
    %247 = vector.shape_cast %246 : vector<2x8x64xf32> to vector<16x64xf32>
    %c1_90 = arith.constant 1 : index
    %c0_91 = arith.constant 0 : index
    %c0_92 = arith.constant 0 : index
    %248 = vector.load %arg5[%c1_90, %c0_91, %c0_92] : memref<6x64x64xf32, #tpu.memory_space<vmem>>, vector<1x64x64xf32>
    %249 = vector.shape_cast %248 : vector<1x64x64xf32> to vector<64x64xf32>
    %cst_93 = arith.constant dense<0.000000e+00> : vector<16x64xf32>
    %250 = tpu.matmul %247, %249, %cst_93 {dimension_numbers = #tpu.dot_dimension_numbers<[1], [0], [0], [1], [0, 0, 1, 1], [], []>} : vector<16x64xf32>, vector<64x64xf32>, vector<16x64xf32> -> vector<16x64xf32>
    %c2 = arith.constant 2 : index
    %c0_94 = arith.constant 0 : index
    %251 = vector.load %arg9[%c2, %c0_94] : memref<35x64xf32, #tpu.memory_space<vmem>>, vector<1x64xf32>
    %252 = vector.broadcast %251 : vector<1x64xf32> to vector<16x64xf32>
    %253 = arith.addf %250, %252 : vector<16x64xf32>
    %254 = arith.addf %163, %253 : vector<16x64xf32>
    %cst_95 = arith.constant dense<0.000000e+00> : vector<16xf32>
    %255 = vector.multi_reduction <add>, %254, %cst_95 [1] : vector<16x64xf32> to vector<16xf32>
    %256 = vector.shape_cast %255 : vector<16xf32> to vector<16x1xf32>
    %cst_96 = arith.constant 6.400000e+01 : f32
    %257 = vector.broadcast %cst_96 : f32 to vector<16x1xf32>
    %258 = arith.divf %256, %257 : vector<16x1xf32>
    %259 = vector.broadcast %258 : vector<16x1xf32> to vector<16x64xf32>
    %260 = arith.subf %254, %259 : vector<16x64xf32>
    %261 = arith.mulf %260, %260 : vector<16x64xf32>
    %cst_97 = arith.constant dense<0.000000e+00> : vector<16xf32>
    %262 = vector.multi_reduction <add>, %261, %cst_97 [1] : vector<16x64xf32> to vector<16xf32>
    %263 = vector.shape_cast %262 : vector<16xf32> to vector<16x1xf32>
    %cst_98 = arith.constant 6.400000e+01 : f32
    %264 = vector.broadcast %cst_98 : f32 to vector<16x1xf32>
    %265 = arith.divf %263, %264 : vector<16x1xf32>
    %266 = vector.broadcast %258 : vector<16x1xf32> to vector<16x64xf32>
    %267 = arith.subf %254, %266 : vector<16x64xf32>
    %cst_99 = arith.constant 9.99999974E-6 : f32
    %268 = vector.broadcast %cst_99 : f32 to vector<16x1xf32>
    %269 = arith.addf %265, %268 : vector<16x1xf32>
    %270 = math.rsqrt %269 : vector<16x1xf32>
    %271 = vector.broadcast %270 : vector<16x1xf32> to vector<16x64xf32>
    %272 = arith.mulf %267, %271 : vector<16x64xf32>
    %c13 = arith.constant 13 : index
    %c0_100 = arith.constant 0 : index
    %273 = vector.load %arg9[%c13, %c0_100] : memref<35x64xf32, #tpu.memory_space<vmem>>, vector<1x64xf32>
    %274 = vector.broadcast %273 : vector<1x64xf32> to vector<16x64xf32>
    %275 = arith.mulf %272, %274 : vector<16x64xf32>
    %c25 = arith.constant 25 : index
    %c0_101 = arith.constant 0 : index
    %276 = vector.load %arg9[%c25, %c0_101] : memref<35x64xf32, #tpu.memory_space<vmem>>, vector<1x64xf32>
    %277 = vector.broadcast %276 : vector<1x64xf32> to vector<16x64xf32>
    %278 = arith.addf %275, %277 : vector<16x64xf32>
    %c1_102 = arith.constant 1 : index
    %c0_103 = arith.constant 0 : index
    %c0_104 = arith.constant 0 : index
    %279 = vector.load %arg6[%c1_102, %c0_103, %c0_104] : memref<4x64x128xf32, #tpu.memory_space<vmem>>, vector<1x64x128xf32>
    %280 = vector.shape_cast %279 : vector<1x64x128xf32> to vector<64x128xf32>
    %cst_105 = arith.constant dense<0.000000e+00> : vector<16x128xf32>
    %281 = tpu.matmul %278, %280, %cst_105 {dimension_numbers = #tpu.dot_dimension_numbers<[1], [0], [0], [1], [0, 0, 1, 1], [], []>} : vector<16x64xf32>, vector<64x128xf32>, vector<16x128xf32> -> vector<16x128xf32>
    %c1_106 = arith.constant 1 : index
    %c0_107 = arith.constant 0 : index
    %282 = vector.load %arg7[%c1_106, %c0_107] : memref<4x128xf32, #tpu.memory_space<vmem>>, vector<1x128xf32>
    %283 = vector.broadcast %282 : vector<1x128xf32> to vector<16x128xf32>
    %284 = arith.addf %281, %283 : vector<16x128xf32>
    %cst_108 = arith.constant 0.000000e+00 : f32
    %285 = vector.broadcast %cst_108 : f32 to vector<16x128xf32>
    %286 = arith.maximumf %284, %285 : vector<16x128xf32>
    %c1_109 = arith.constant 1 : index
    %c0_110 = arith.constant 0 : index
    %c0_111 = arith.constant 0 : index
    %287 = vector.load %arg8[%c1_109, %c0_110, %c0_111] : memref<4x128x64xf32, #tpu.memory_space<vmem>>, vector<1x128x64xf32>
    %288 = vector.shape_cast %287 : vector<1x128x64xf32> to vector<128x64xf32>
    %cst_112 = arith.constant dense<0.000000e+00> : vector<16x64xf32>
    %289 = tpu.matmul %286, %288, %cst_112 {dimension_numbers = #tpu.dot_dimension_numbers<[1], [0], [0], [1], [0, 0, 1, 1], [], []>} : vector<16x128xf32>, vector<128x64xf32>, vector<16x64xf32> -> vector<16x64xf32>
    %c8 = arith.constant 8 : index
    %c0_113 = arith.constant 0 : index
    %290 = vector.load %arg9[%c8, %c0_113] : memref<35x64xf32, #tpu.memory_space<vmem>>, vector<1x64xf32>
    %291 = vector.broadcast %290 : vector<1x64xf32> to vector<16x64xf32>
    %292 = arith.addf %289, %291 : vector<16x64xf32>
    %293 = arith.addf %278, %292 : vector<16x64xf32>
    %cst_114 = arith.constant dense<0.000000e+00> : vector<16xf32>
    %294 = vector.multi_reduction <add>, %293, %cst_114 [1] : vector<16x64xf32> to vector<16xf32>
    %295 = vector.shape_cast %294 : vector<16xf32> to vector<16x1xf32>
    %cst_115 = arith.constant 6.400000e+01 : f32
    %296 = vector.broadcast %cst_115 : f32 to vector<16x1xf32>
    %297 = arith.divf %295, %296 : vector<16x1xf32>
    %298 = vector.broadcast %297 : vector<16x1xf32> to vector<16x64xf32>
    %299 = arith.subf %293, %298 : vector<16x64xf32>
    %300 = arith.mulf %299, %299 : vector<16x64xf32>
    %cst_116 = arith.constant dense<0.000000e+00> : vector<16xf32>
    %301 = vector.multi_reduction <add>, %300, %cst_116 [1] : vector<16x64xf32> to vector<16xf32>
    %302 = vector.shape_cast %301 : vector<16xf32> to vector<16x1xf32>
    %cst_117 = arith.constant 6.400000e+01 : f32
    %303 = vector.broadcast %cst_117 : f32 to vector<16x1xf32>
    %304 = arith.divf %302, %303 : vector<16x1xf32>
    %305 = vector.broadcast %297 : vector<16x1xf32> to vector<16x64xf32>
    %306 = arith.subf %293, %305 : vector<16x64xf32>
    %cst_118 = arith.constant 9.99999974E-6 : f32
    %307 = vector.broadcast %cst_118 : f32 to vector<16x1xf32>
    %308 = arith.addf %304, %307 : vector<16x1xf32>
    %309 = math.rsqrt %308 : vector<16x1xf32>
    %310 = vector.broadcast %309 : vector<16x1xf32> to vector<16x64xf32>
    %311 = arith.mulf %306, %310 : vector<16x64xf32>
    %c14 = arith.constant 14 : index
    %c0_119 = arith.constant 0 : index
    %312 = vector.load %arg9[%c14, %c0_119] : memref<35x64xf32, #tpu.memory_space<vmem>>, vector<1x64xf32>
    %313 = vector.broadcast %312 : vector<1x64xf32> to vector<16x64xf32>
    %314 = arith.mulf %311, %313 : vector<16x64xf32>
    %c26 = arith.constant 26 : index
    %c0_120 = arith.constant 0 : index
    %315 = vector.load %arg9[%c26, %c0_120] : memref<35x64xf32, #tpu.memory_space<vmem>>, vector<1x64xf32>
    %316 = vector.broadcast %315 : vector<1x64xf32> to vector<16x64xf32>
    %317 = arith.addf %314, %316 : vector<16x64xf32>
    %cst_121 = arith.constant dense<0.000000e+00> : vector<16xf32>
    %318 = vector.multi_reduction <add>, %317, %cst_121 [1] : vector<16x64xf32> to vector<16xf32>
    %319 = vector.shape_cast %318 : vector<16xf32> to vector<16x1xf32>
    %cst_122 = arith.constant 6.400000e+01 : f32
    %320 = vector.broadcast %cst_122 : f32 to vector<16x1xf32>
    %321 = arith.divf %319, %320 : vector<16x1xf32>
    %322 = vector.broadcast %321 : vector<16x1xf32> to vector<16x64xf32>
    %323 = arith.subf %317, %322 : vector<16x64xf32>
    %324 = arith.mulf %323, %323 : vector<16x64xf32>
    %cst_123 = arith.constant dense<0.000000e+00> : vector<16xf32>
    %325 = vector.multi_reduction <add>, %324, %cst_123 [1] : vector<16x64xf32> to vector<16xf32>
    %326 = vector.shape_cast %325 : vector<16xf32> to vector<16x1xf32>
    %cst_124 = arith.constant 6.400000e+01 : f32
    %327 = vector.broadcast %cst_124 : f32 to vector<16x1xf32>
    %328 = arith.divf %326, %327 : vector<16x1xf32>
    %329 = vector.broadcast %321 : vector<16x1xf32> to vector<16x64xf32>
    %330 = arith.subf %317, %329 : vector<16x64xf32>
    %cst_125 = arith.constant 9.99999974E-6 : f32
    %331 = vector.broadcast %cst_125 : f32 to vector<16x1xf32>
    %332 = arith.addf %328, %331 : vector<16x1xf32>
    %333 = math.rsqrt %332 : vector<16x1xf32>
    %334 = vector.broadcast %333 : vector<16x1xf32> to vector<16x64xf32>
    %335 = arith.mulf %330, %334 : vector<16x64xf32>
    %c15 = arith.constant 15 : index
    %c0_126 = arith.constant 0 : index
    %336 = vector.load %arg9[%c15, %c0_126] : memref<35x64xf32, #tpu.memory_space<vmem>>, vector<1x64xf32>
    %337 = vector.broadcast %336 : vector<1x64xf32> to vector<16x64xf32>
    %338 = arith.mulf %335, %337 : vector<16x64xf32>
    %c27 = arith.constant 27 : index
    %c0_127 = arith.constant 0 : index
    %339 = vector.load %arg9[%c27, %c0_127] : memref<35x64xf32, #tpu.memory_space<vmem>>, vector<1x64xf32>
    %340 = vector.broadcast %339 : vector<1x64xf32> to vector<16x64xf32>
    %341 = arith.addf %338, %340 : vector<16x64xf32>
    %c2_128 = arith.constant 2 : index
    %c0_129 = arith.constant 0 : index
    %c0_130 = arith.constant 0 : index
    %342 = vector.load %arg3[%c2_128, %c0_129, %c0_130] : memref<6x64x192xf32, #tpu.memory_space<vmem>>, vector<1x64x192xf32>
    %343 = vector.shape_cast %342 : vector<1x64x192xf32> to vector<64x192xf32>
    %c2_131 = arith.constant 2 : index
    %c0_132 = arith.constant 0 : index
    %344 = vector.load %arg4[%c2_131, %c0_132] : memref<6x192xf32, #tpu.memory_space<vmem>>, vector<1x192xf32>
    %cst_133 = arith.constant dense<0.000000e+00> : vector<16x192xf32>
    %345 = tpu.matmul %9, %343, %cst_133 {dimension_numbers = #tpu.dot_dimension_numbers<[1], [0], [0], [1], [0, 0, 1, 1], [], []>} : vector<16x64xf32>, vector<64x192xf32>, vector<16x192xf32> -> vector<16x192xf32>
    %346 = vector.broadcast %344 : vector<1x192xf32> to vector<16x192xf32>
    %347 = arith.addf %345, %346 : vector<16x192xf32>
    %348 = vector.extract_strided_slice %347 {offsets = [0, 0], sizes = [16, 16], strides = [1, 1]} : vector<16x192xf32> to vector<16x16xf32>
    %349 = vector.shape_cast %348 : vector<16x16xf32> to vector<2x8x16xf32>
    %350 = vector.extract_strided_slice %347 {offsets = [0, 64], sizes = [16, 16], strides = [1, 1]} : vector<16x192xf32> to vector<16x16xf32>
    %351 = vector.shape_cast %350 : vector<16x16xf32> to vector<2x8x16xf32>
    %352 = vector.extract_strided_slice %347 {offsets = [0, 128], sizes = [16, 16], strides = [1, 1]} : vector<16x192xf32> to vector<16x16xf32>
    %353 = vector.shape_cast %352 : vector<16x16xf32> to vector<2x8x16xf32>
    "tpu.trace_start"() <{level = 10 : i32, message = "bqd,bkd->bqk"}> : () -> ()
    %cst_134 = arith.constant dense<0.000000e+00> : vector<2x8x8xf32>
    %354 = tpu.matmul %349, %351, %cst_134 {dimension_numbers = #tpu.dot_dimension_numbers<[2], [2], [1], [1], [0, 0, 0, 1, 1, 1], [0], [0]>} : vector<2x8x16xf32>, vector<2x8x16xf32>, vector<2x8x8xf32> -> vector<2x8x8xf32>
    "tpu.trace_stop"() : () -> ()
    %cst_135 = arith.constant 2.500000e-01 : f32
    %355 = vector.broadcast %cst_135 : f32 to vector<2x8x8xf32>
    %356 = arith.mulf %354, %355 : vector<2x8x8xf32>
    %cst_136 = arith.constant dense<0xFF800000> : vector<2x8xf32>
    %357 = vector.multi_reduction <maximumf>, %356, %cst_136 [2] : vector<2x8x8xf32> to vector<2x8xf32>
    %358 = vector.shape_cast %357 : vector<2x8xf32> to vector<2x8x1xf32>
    %359 = vector.broadcast %358 : vector<2x8x1xf32> to vector<2x8x8xf32>
    %360 = arith.subf %356, %359 : vector<2x8x8xf32>
    %361 = math.exp %360 : vector<2x8x8xf32>
    %cst_137 = arith.constant dense<0.000000e+00> : vector<2x8xf32>
    %362 = vector.multi_reduction <add>, %361, %cst_137 [2] : vector<2x8x8xf32> to vector<2x8xf32>
    %363 = vector.shape_cast %362 : vector<2x8xf32> to vector<2x8x1xf32>
    %364 = vector.broadcast %363 : vector<2x8x1xf32> to vector<2x8x8xf32>
    %365 = arith.divf %361, %364 : vector<2x8x8xf32>
    "tpu.trace_start"() <{level = 10 : i32, message = "bqk,bkd->bqd"}> : () -> ()
    %cst_138 = arith.constant dense<0.000000e+00> : vector<2x8x16xf32>
    %366 = tpu.matmul %365, %353, %cst_138 {dimension_numbers = #tpu.dot_dimension_numbers<[2], [1], [1], [2], [0, 0, 0, 1, 1, 2], [0], [0]>} : vector<2x8x8xf32>, vector<2x8x16xf32>, vector<2x8x16xf32> -> vector<2x8x16xf32>
    "tpu.trace_stop"() : () -> ()
    %367 = vector.extract_strided_slice %347 {offsets = [0, 16], sizes = [16, 16], strides = [1, 1]} : vector<16x192xf32> to vector<16x16xf32>
    %368 = vector.shape_cast %367 : vector<16x16xf32> to vector<2x8x16xf32>
    %369 = vector.extract_strided_slice %347 {offsets = [0, 80], sizes = [16, 16], strides = [1, 1]} : vector<16x192xf32> to vector<16x16xf32>
    %370 = vector.shape_cast %369 : vector<16x16xf32> to vector<2x8x16xf32>
    %371 = vector.extract_strided_slice %347 {offsets = [0, 144], sizes = [16, 16], strides = [1, 1]} : vector<16x192xf32> to vector<16x16xf32>
    %372 = vector.shape_cast %371 : vector<16x16xf32> to vector<2x8x16xf32>
    "tpu.trace_start"() <{level = 10 : i32, message = "bqd,bkd->bqk"}> : () -> ()
    %cst_139 = arith.constant dense<0.000000e+00> : vector<2x8x8xf32>
    %373 = tpu.matmul %368, %370, %cst_139 {dimension_numbers = #tpu.dot_dimension_numbers<[2], [2], [1], [1], [0, 0, 0, 1, 1, 1], [0], [0]>} : vector<2x8x16xf32>, vector<2x8x16xf32>, vector<2x8x8xf32> -> vector<2x8x8xf32>
    "tpu.trace_stop"() : () -> ()
    %cst_140 = arith.constant 2.500000e-01 : f32
    %374 = vector.broadcast %cst_140 : f32 to vector<2x8x8xf32>
    %375 = arith.mulf %373, %374 : vector<2x8x8xf32>
    %cst_141 = arith.constant dense<0xFF800000> : vector<2x8xf32>
    %376 = vector.multi_reduction <maximumf>, %375, %cst_141 [2] : vector<2x8x8xf32> to vector<2x8xf32>
    %377 = vector.shape_cast %376 : vector<2x8xf32> to vector<2x8x1xf32>
    %378 = vector.broadcast %377 : vector<2x8x1xf32> to vector<2x8x8xf32>
    %379 = arith.subf %375, %378 : vector<2x8x8xf32>
    %380 = math.exp %379 : vector<2x8x8xf32>
    %cst_142 = arith.constant dense<0.000000e+00> : vector<2x8xf32>
    %381 = vector.multi_reduction <add>, %380, %cst_142 [2] : vector<2x8x8xf32> to vector<2x8xf32>
    %382 = vector.shape_cast %381 : vector<2x8xf32> to vector<2x8x1xf32>
    %383 = vector.broadcast %382 : vector<2x8x1xf32> to vector<2x8x8xf32>
    %384 = arith.divf %380, %383 : vector<2x8x8xf32>
    "tpu.trace_start"() <{level = 10 : i32, message = "bqk,bkd->bqd"}> : () -> ()
    %cst_143 = arith.constant dense<0.000000e+00> : vector<2x8x16xf32>
    %385 = tpu.matmul %384, %372, %cst_143 {dimension_numbers = #tpu.dot_dimension_numbers<[2], [1], [1], [2], [0, 0, 0, 1, 1, 2], [0], [0]>} : vector<2x8x8xf32>, vector<2x8x16xf32>, vector<2x8x16xf32> -> vector<2x8x16xf32>
    "tpu.trace_stop"() : () -> ()
    %386 = vector.extract_strided_slice %347 {offsets = [0, 32], sizes = [16, 16], strides = [1, 1]} : vector<16x192xf32> to vector<16x16xf32>
    %387 = vector.shape_cast %386 : vector<16x16xf32> to vector<2x8x16xf32>
    %388 = vector.extract_strided_slice %347 {offsets = [0, 96], sizes = [16, 16], strides = [1, 1]} : vector<16x192xf32> to vector<16x16xf32>
    %389 = vector.shape_cast %388 : vector<16x16xf32> to vector<2x8x16xf32>
    %390 = vector.extract_strided_slice %347 {offsets = [0, 160], sizes = [16, 16], strides = [1, 1]} : vector<16x192xf32> to vector<16x16xf32>
    %391 = vector.shape_cast %390 : vector<16x16xf32> to vector<2x8x16xf32>
    "tpu.trace_start"() <{level = 10 : i32, message = "bqd,bkd->bqk"}> : () -> ()
    %cst_144 = arith.constant dense<0.000000e+00> : vector<2x8x8xf32>
    %392 = tpu.matmul %387, %389, %cst_144 {dimension_numbers = #tpu.dot_dimension_numbers<[2], [2], [1], [1], [0, 0, 0, 1, 1, 1], [0], [0]>} : vector<2x8x16xf32>, vector<2x8x16xf32>, vector<2x8x8xf32> -> vector<2x8x8xf32>
    "tpu.trace_stop"() : () -> ()
    %cst_145 = arith.constant 2.500000e-01 : f32
    %393 = vector.broadcast %cst_145 : f32 to vector<2x8x8xf32>
    %394 = arith.mulf %392, %393 : vector<2x8x8xf32>
    %cst_146 = arith.constant dense<0xFF800000> : vector<2x8xf32>
    %395 = vector.multi_reduction <maximumf>, %394, %cst_146 [2] : vector<2x8x8xf32> to vector<2x8xf32>
    %396 = vector.shape_cast %395 : vector<2x8xf32> to vector<2x8x1xf32>
    %397 = vector.broadcast %396 : vector<2x8x1xf32> to vector<2x8x8xf32>
    %398 = arith.subf %394, %397 : vector<2x8x8xf32>
    %399 = math.exp %398 : vector<2x8x8xf32>
    %cst_147 = arith.constant dense<0.000000e+00> : vector<2x8xf32>
    %400 = vector.multi_reduction <add>, %399, %cst_147 [2] : vector<2x8x8xf32> to vector<2x8xf32>
    %401 = vector.shape_cast %400 : vector<2x8xf32> to vector<2x8x1xf32>
    %402 = vector.broadcast %401 : vector<2x8x1xf32> to vector<2x8x8xf32>
    %403 = arith.divf %399, %402 : vector<2x8x8xf32>
    "tpu.trace_start"() <{level = 10 : i32, message = "bqk,bkd->bqd"}> : () -> ()
    %cst_148 = arith.constant dense<0.000000e+00> : vector<2x8x16xf32>
    %404 = tpu.matmul %403, %391, %cst_148 {dimension_numbers = #tpu.dot_dimension_numbers<[2], [1], [1], [2], [0, 0, 0, 1, 1, 2], [0], [0]>} : vector<2x8x8xf32>, vector<2x8x16xf32>, vector<2x8x16xf32> -> vector<2x8x16xf32>
    "tpu.trace_stop"() : () -> ()
    %405 = vector.extract_strided_slice %347 {offsets = [0, 48], sizes = [16, 16], strides = [1, 1]} : vector<16x192xf32> to vector<16x16xf32>
    %406 = vector.shape_cast %405 : vector<16x16xf32> to vector<2x8x16xf32>
    %407 = vector.extract_strided_slice %347 {offsets = [0, 112], sizes = [16, 16], strides = [1, 1]} : vector<16x192xf32> to vector<16x16xf32>
    %408 = vector.shape_cast %407 : vector<16x16xf32> to vector<2x8x16xf32>
    %409 = vector.extract_strided_slice %347 {offsets = [0, 176], sizes = [16, 16], strides = [1, 1]} : vector<16x192xf32> to vector<16x16xf32>
    %410 = vector.shape_cast %409 : vector<16x16xf32> to vector<2x8x16xf32>
    "tpu.trace_start"() <{level = 10 : i32, message = "bqd,bkd->bqk"}> : () -> ()
    %cst_149 = arith.constant dense<0.000000e+00> : vector<2x8x8xf32>
    %411 = tpu.matmul %406, %408, %cst_149 {dimension_numbers = #tpu.dot_dimension_numbers<[2], [2], [1], [1], [0, 0, 0, 1, 1, 1], [0], [0]>} : vector<2x8x16xf32>, vector<2x8x16xf32>, vector<2x8x8xf32> -> vector<2x8x8xf32>
    "tpu.trace_stop"() : () -> ()
    %cst_150 = arith.constant 2.500000e-01 : f32
    %412 = vector.broadcast %cst_150 : f32 to vector<2x8x8xf32>
    %413 = arith.mulf %411, %412 : vector<2x8x8xf32>
    %cst_151 = arith.constant dense<0xFF800000> : vector<2x8xf32>
    %414 = vector.multi_reduction <maximumf>, %413, %cst_151 [2] : vector<2x8x8xf32> to vector<2x8xf32>
    %415 = vector.shape_cast %414 : vector<2x8xf32> to vector<2x8x1xf32>
    %416 = vector.broadcast %415 : vector<2x8x1xf32> to vector<2x8x8xf32>
    %417 = arith.subf %413, %416 : vector<2x8x8xf32>
    %418 = math.exp %417 : vector<2x8x8xf32>
    %cst_152 = arith.constant dense<0.000000e+00> : vector<2x8xf32>
    %419 = vector.multi_reduction <add>, %418, %cst_152 [2] : vector<2x8x8xf32> to vector<2x8xf32>
    %420 = vector.shape_cast %419 : vector<2x8xf32> to vector<2x8x1xf32>
    %421 = vector.broadcast %420 : vector<2x8x1xf32> to vector<2x8x8xf32>
    %422 = arith.divf %418, %421 : vector<2x8x8xf32>
    "tpu.trace_start"() <{level = 10 : i32, message = "bqk,bkd->bqd"}> : () -> ()
    %cst_153 = arith.constant dense<0.000000e+00> : vector<2x8x16xf32>
    %423 = tpu.matmul %422, %410, %cst_153 {dimension_numbers = #tpu.dot_dimension_numbers<[2], [1], [1], [2], [0, 0, 0, 1, 1, 2], [0], [0]>} : vector<2x8x8xf32>, vector<2x8x16xf32>, vector<2x8x16xf32> -> vector<2x8x16xf32>
    "tpu.trace_stop"() : () -> ()
    %424 = tpu.concatenate %366, %385, %404, %423 in 2 : vector<2x8x16xf32>, vector<2x8x16xf32>, vector<2x8x16xf32>, vector<2x8x16xf32> -> vector<2x8x64xf32>
    %425 = vector.shape_cast %424 : vector<2x8x64xf32> to vector<16x64xf32>
    %c2_154 = arith.constant 2 : index
    %c0_155 = arith.constant 0 : index
    %c0_156 = arith.constant 0 : index
    %426 = vector.load %arg5[%c2_154, %c0_155, %c0_156] : memref<6x64x64xf32, #tpu.memory_space<vmem>>, vector<1x64x64xf32>
    %427 = vector.shape_cast %426 : vector<1x64x64xf32> to vector<64x64xf32>
    %cst_157 = arith.constant dense<0.000000e+00> : vector<16x64xf32>
    %428 = tpu.matmul %425, %427, %cst_157 {dimension_numbers = #tpu.dot_dimension_numbers<[1], [0], [0], [1], [0, 0, 1, 1], [], []>} : vector<16x64xf32>, vector<64x64xf32>, vector<16x64xf32> -> vector<16x64xf32>
    %c3 = arith.constant 3 : index
    %c0_158 = arith.constant 0 : index
    %429 = vector.load %arg9[%c3, %c0_158] : memref<35x64xf32, #tpu.memory_space<vmem>>, vector<1x64xf32>
    %430 = vector.broadcast %429 : vector<1x64xf32> to vector<16x64xf32>
    %431 = arith.addf %428, %430 : vector<16x64xf32>
    %432 = arith.addf %9, %431 : vector<16x64xf32>
    %cst_159 = arith.constant dense<0.000000e+00> : vector<16xf32>
    %433 = vector.multi_reduction <add>, %432, %cst_159 [1] : vector<16x64xf32> to vector<16xf32>
    %434 = vector.shape_cast %433 : vector<16xf32> to vector<16x1xf32>
    %cst_160 = arith.constant 6.400000e+01 : f32
    %435 = vector.broadcast %cst_160 : f32 to vector<16x1xf32>
    %436 = arith.divf %434, %435 : vector<16x1xf32>
    %437 = vector.broadcast %436 : vector<16x1xf32> to vector<16x64xf32>
    %438 = arith.subf %432, %437 : vector<16x64xf32>
    %439 = arith.mulf %438, %438 : vector<16x64xf32>
    %cst_161 = arith.constant dense<0.000000e+00> : vector<16xf32>
    %440 = vector.multi_reduction <add>, %439, %cst_161 [1] : vector<16x64xf32> to vector<16xf32>
    %441 = vector.shape_cast %440 : vector<16xf32> to vector<16x1xf32>
    %cst_162 = arith.constant 6.400000e+01 : f32
    %442 = vector.broadcast %cst_162 : f32 to vector<16x1xf32>
    %443 = arith.divf %441, %442 : vector<16x1xf32>
    %444 = vector.broadcast %436 : vector<16x1xf32> to vector<16x64xf32>
    %445 = arith.subf %432, %444 : vector<16x64xf32>
    %cst_163 = arith.constant 9.99999974E-6 : f32
    %446 = vector.broadcast %cst_163 : f32 to vector<16x1xf32>
    %447 = arith.addf %443, %446 : vector<16x1xf32>
    %448 = math.rsqrt %447 : vector<16x1xf32>
    %449 = vector.broadcast %448 : vector<16x1xf32> to vector<16x64xf32>
    %450 = arith.mulf %445, %449 : vector<16x64xf32>
    %c16 = arith.constant 16 : index
    %c0_164 = arith.constant 0 : index
    %451 = vector.load %arg9[%c16, %c0_164] : memref<35x64xf32, #tpu.memory_space<vmem>>, vector<1x64xf32>
    %452 = vector.broadcast %451 : vector<1x64xf32> to vector<16x64xf32>
    %453 = arith.mulf %450, %452 : vector<16x64xf32>
    %c28 = arith.constant 28 : index
    %c0_165 = arith.constant 0 : index
    %454 = vector.load %arg9[%c28, %c0_165] : memref<35x64xf32, #tpu.memory_space<vmem>>, vector<1x64xf32>
    %455 = vector.broadcast %454 : vector<1x64xf32> to vector<16x64xf32>
    %456 = arith.addf %453, %455 : vector<16x64xf32>
    %c3_166 = arith.constant 3 : index
    %c0_167 = arith.constant 0 : index
    %c0_168 = arith.constant 0 : index
    %457 = vector.load %arg3[%c3_166, %c0_167, %c0_168] : memref<6x64x192xf32, #tpu.memory_space<vmem>>, vector<1x64x192xf32>
    %458 = vector.shape_cast %457 : vector<1x64x192xf32> to vector<64x192xf32>
    %c3_169 = arith.constant 3 : index
    %c0_170 = arith.constant 0 : index
    %459 = vector.load %arg4[%c3_169, %c0_170] : memref<6x192xf32, #tpu.memory_space<vmem>>, vector<1x192xf32>
    %cst_171 = arith.constant dense<0.000000e+00> : vector<16x192xf32>
    %460 = tpu.matmul %456, %458, %cst_171 {dimension_numbers = #tpu.dot_dimension_numbers<[1], [0], [0], [1], [0, 0, 1, 1], [], []>} : vector<16x64xf32>, vector<64x192xf32>, vector<16x192xf32> -> vector<16x192xf32>
    %461 = vector.broadcast %459 : vector<1x192xf32> to vector<16x192xf32>
    %462 = arith.addf %460, %461 : vector<16x192xf32>
    %cst_172 = arith.constant dense<0.000000e+00> : vector<16x192xf32>
    %463 = tpu.matmul %341, %458, %cst_172 {dimension_numbers = #tpu.dot_dimension_numbers<[1], [0], [0], [1], [0, 0, 1, 1], [], []>} : vector<16x64xf32>, vector<64x192xf32>, vector<16x192xf32> -> vector<16x192xf32>
    %464 = vector.broadcast %459 : vector<1x192xf32> to vector<16x192xf32>
    %465 = arith.addf %463, %464 : vector<16x192xf32>
    %466 = vector.extract_strided_slice %462 {offsets = [0, 0], sizes = [16, 16], strides = [1, 1]} : vector<16x192xf32> to vector<16x16xf32>
    %467 = vector.shape_cast %466 : vector<16x16xf32> to vector<2x8x16xf32>
    %468 = vector.extract_strided_slice %465 {offsets = [0, 64], sizes = [16, 16], strides = [1, 1]} : vector<16x192xf32> to vector<16x16xf32>
    %469 = vector.shape_cast %468 : vector<16x16xf32> to vector<2x8x16xf32>
    %470 = vector.extract_strided_slice %465 {offsets = [0, 128], sizes = [16, 16], strides = [1, 1]} : vector<16x192xf32> to vector<16x16xf32>
    %471 = vector.shape_cast %470 : vector<16x16xf32> to vector<2x8x16xf32>
    "tpu.trace_start"() <{level = 10 : i32, message = "bqd,bkd->bqk"}> : () -> ()
    %cst_173 = arith.constant dense<0.000000e+00> : vector<2x8x8xf32>
    %472 = tpu.matmul %467, %469, %cst_173 {dimension_numbers = #tpu.dot_dimension_numbers<[2], [2], [1], [1], [0, 0, 0, 1, 1, 1], [0], [0]>} : vector<2x8x16xf32>, vector<2x8x16xf32>, vector<2x8x8xf32> -> vector<2x8x8xf32>
    "tpu.trace_stop"() : () -> ()
    %cst_174 = arith.constant 2.500000e-01 : f32
    %473 = vector.broadcast %cst_174 : f32 to vector<2x8x8xf32>
    %474 = arith.mulf %472, %473 : vector<2x8x8xf32>
    %cst_175 = arith.constant dense<0xFF800000> : vector<2x8xf32>
    %475 = vector.multi_reduction <maximumf>, %474, %cst_175 [2] : vector<2x8x8xf32> to vector<2x8xf32>
    %476 = vector.shape_cast %475 : vector<2x8xf32> to vector<2x8x1xf32>
    %477 = vector.broadcast %476 : vector<2x8x1xf32> to vector<2x8x8xf32>
    %478 = arith.subf %474, %477 : vector<2x8x8xf32>
    %479 = math.exp %478 : vector<2x8x8xf32>
    %cst_176 = arith.constant dense<0.000000e+00> : vector<2x8xf32>
    %480 = vector.multi_reduction <add>, %479, %cst_176 [2] : vector<2x8x8xf32> to vector<2x8xf32>
    %481 = vector.shape_cast %480 : vector<2x8xf32> to vector<2x8x1xf32>
    %482 = vector.broadcast %481 : vector<2x8x1xf32> to vector<2x8x8xf32>
    %483 = arith.divf %479, %482 : vector<2x8x8xf32>
    "tpu.trace_start"() <{level = 10 : i32, message = "bqk,bkd->bqd"}> : () -> ()
    %cst_177 = arith.constant dense<0.000000e+00> : vector<2x8x16xf32>
    %484 = tpu.matmul %483, %471, %cst_177 {dimension_numbers = #tpu.dot_dimension_numbers<[2], [1], [1], [2], [0, 0, 0, 1, 1, 2], [0], [0]>} : vector<2x8x8xf32>, vector<2x8x16xf32>, vector<2x8x16xf32> -> vector<2x8x16xf32>
    "tpu.trace_stop"() : () -> ()
    %485 = vector.extract_strided_slice %462 {offsets = [0, 16], sizes = [16, 16], strides = [1, 1]} : vector<16x192xf32> to vector<16x16xf32>
    %486 = vector.shape_cast %485 : vector<16x16xf32> to vector<2x8x16xf32>
    %487 = vector.extract_strided_slice %465 {offsets = [0, 80], sizes = [16, 16], strides = [1, 1]} : vector<16x192xf32> to vector<16x16xf32>
    %488 = vector.shape_cast %487 : vector<16x16xf32> to vector<2x8x16xf32>
    %489 = vector.extract_strided_slice %465 {offsets = [0, 144], sizes = [16, 16], strides = [1, 1]} : vector<16x192xf32> to vector<16x16xf32>
    %490 = vector.shape_cast %489 : vector<16x16xf32> to vector<2x8x16xf32>
    "tpu.trace_start"() <{level = 10 : i32, message = "bqd,bkd->bqk"}> : () -> ()
    %cst_178 = arith.constant dense<0.000000e+00> : vector<2x8x8xf32>
    %491 = tpu.matmul %486, %488, %cst_178 {dimension_numbers = #tpu.dot_dimension_numbers<[2], [2], [1], [1], [0, 0, 0, 1, 1, 1], [0], [0]>} : vector<2x8x16xf32>, vector<2x8x16xf32>, vector<2x8x8xf32> -> vector<2x8x8xf32>
    "tpu.trace_stop"() : () -> ()
    %cst_179 = arith.constant 2.500000e-01 : f32
    %492 = vector.broadcast %cst_179 : f32 to vector<2x8x8xf32>
    %493 = arith.mulf %491, %492 : vector<2x8x8xf32>
    %cst_180 = arith.constant dense<0xFF800000> : vector<2x8xf32>
    %494 = vector.multi_reduction <maximumf>, %493, %cst_180 [2] : vector<2x8x8xf32> to vector<2x8xf32>
    %495 = vector.shape_cast %494 : vector<2x8xf32> to vector<2x8x1xf32>
    %496 = vector.broadcast %495 : vector<2x8x1xf32> to vector<2x8x8xf32>
    %497 = arith.subf %493, %496 : vector<2x8x8xf32>
    %498 = math.exp %497 : vector<2x8x8xf32>
    %cst_181 = arith.constant dense<0.000000e+00> : vector<2x8xf32>
    %499 = vector.multi_reduction <add>, %498, %cst_181 [2] : vector<2x8x8xf32> to vector<2x8xf32>
    %500 = vector.shape_cast %499 : vector<2x8xf32> to vector<2x8x1xf32>
    %501 = vector.broadcast %500 : vector<2x8x1xf32> to vector<2x8x8xf32>
    %502 = arith.divf %498, %501 : vector<2x8x8xf32>
    "tpu.trace_start"() <{level = 10 : i32, message = "bqk,bkd->bqd"}> : () -> ()
    %cst_182 = arith.constant dense<0.000000e+00> : vector<2x8x16xf32>
    %503 = tpu.matmul %502, %490, %cst_182 {dimension_numbers = #tpu.dot_dimension_numbers<[2], [1], [1], [2], [0, 0, 0, 1, 1, 2], [0], [0]>} : vector<2x8x8xf32>, vector<2x8x16xf32>, vector<2x8x16xf32> -> vector<2x8x16xf32>
    "tpu.trace_stop"() : () -> ()
    %504 = vector.extract_strided_slice %462 {offsets = [0, 32], sizes = [16, 16], strides = [1, 1]} : vector<16x192xf32> to vector<16x16xf32>
    %505 = vector.shape_cast %504 : vector<16x16xf32> to vector<2x8x16xf32>
    %506 = vector.extract_strided_slice %465 {offsets = [0, 96], sizes = [16, 16], strides = [1, 1]} : vector<16x192xf32> to vector<16x16xf32>
    %507 = vector.shape_cast %506 : vector<16x16xf32> to vector<2x8x16xf32>
    %508 = vector.extract_strided_slice %465 {offsets = [0, 160], sizes = [16, 16], strides = [1, 1]} : vector<16x192xf32> to vector<16x16xf32>
    %509 = vector.shape_cast %508 : vector<16x16xf32> to vector<2x8x16xf32>
    "tpu.trace_start"() <{level = 10 : i32, message = "bqd,bkd->bqk"}> : () -> ()
    %cst_183 = arith.constant dense<0.000000e+00> : vector<2x8x8xf32>
    %510 = tpu.matmul %505, %507, %cst_183 {dimension_numbers = #tpu.dot_dimension_numbers<[2], [2], [1], [1], [0, 0, 0, 1, 1, 1], [0], [0]>} : vector<2x8x16xf32>, vector<2x8x16xf32>, vector<2x8x8xf32> -> vector<2x8x8xf32>
    "tpu.trace_stop"() : () -> ()
    %cst_184 = arith.constant 2.500000e-01 : f32
    %511 = vector.broadcast %cst_184 : f32 to vector<2x8x8xf32>
    %512 = arith.mulf %510, %511 : vector<2x8x8xf32>
    %cst_185 = arith.constant dense<0xFF800000> : vector<2x8xf32>
    %513 = vector.multi_reduction <maximumf>, %512, %cst_185 [2] : vector<2x8x8xf32> to vector<2x8xf32>
    %514 = vector.shape_cast %513 : vector<2x8xf32> to vector<2x8x1xf32>
    %515 = vector.broadcast %514 : vector<2x8x1xf32> to vector<2x8x8xf32>
    %516 = arith.subf %512, %515 : vector<2x8x8xf32>
    %517 = math.exp %516 : vector<2x8x8xf32>
    %cst_186 = arith.constant dense<0.000000e+00> : vector<2x8xf32>
    %518 = vector.multi_reduction <add>, %517, %cst_186 [2] : vector<2x8x8xf32> to vector<2x8xf32>
    %519 = vector.shape_cast %518 : vector<2x8xf32> to vector<2x8x1xf32>
    %520 = vector.broadcast %519 : vector<2x8x1xf32> to vector<2x8x8xf32>
    %521 = arith.divf %517, %520 : vector<2x8x8xf32>
    "tpu.trace_start"() <{level = 10 : i32, message = "bqk,bkd->bqd"}> : () -> ()
    %cst_187 = arith.constant dense<0.000000e+00> : vector<2x8x16xf32>
    %522 = tpu.matmul %521, %509, %cst_187 {dimension_numbers = #tpu.dot_dimension_numbers<[2], [1], [1], [2], [0, 0, 0, 1, 1, 2], [0], [0]>} : vector<2x8x8xf32>, vector<2x8x16xf32>, vector<2x8x16xf32> -> vector<2x8x16xf32>
    "tpu.trace_stop"() : () -> ()
    %523 = vector.extract_strided_slice %462 {offsets = [0, 48], sizes = [16, 16], strides = [1, 1]} : vector<16x192xf32> to vector<16x16xf32>
    %524 = vector.shape_cast %523 : vector<16x16xf32> to vector<2x8x16xf32>
    %525 = vector.extract_strided_slice %465 {offsets = [0, 112], sizes = [16, 16], strides = [1, 1]} : vector<16x192xf32> to vector<16x16xf32>
    %526 = vector.shape_cast %525 : vector<16x16xf32> to vector<2x8x16xf32>
    %527 = vector.extract_strided_slice %465 {offsets = [0, 176], sizes = [16, 16], strides = [1, 1]} : vector<16x192xf32> to vector<16x16xf32>
    %528 = vector.shape_cast %527 : vector<16x16xf32> to vector<2x8x16xf32>
    "tpu.trace_start"() <{level = 10 : i32, message = "bqd,bkd->bqk"}> : () -> ()
    %cst_188 = arith.constant dense<0.000000e+00> : vector<2x8x8xf32>
    %529 = tpu.matmul %524, %526, %cst_188 {dimension_numbers = #tpu.dot_dimension_numbers<[2], [2], [1], [1], [0, 0, 0, 1, 1, 1], [0], [0]>} : vector<2x8x16xf32>, vector<2x8x16xf32>, vector<2x8x8xf32> -> vector<2x8x8xf32>
    "tpu.trace_stop"() : () -> ()
    %cst_189 = arith.constant 2.500000e-01 : f32
    %530 = vector.broadcast %cst_189 : f32 to vector<2x8x8xf32>
    %531 = arith.mulf %529, %530 : vector<2x8x8xf32>
    %cst_190 = arith.constant dense<0xFF800000> : vector<2x8xf32>
    %532 = vector.multi_reduction <maximumf>, %531, %cst_190 [2] : vector<2x8x8xf32> to vector<2x8xf32>
    %533 = vector.shape_cast %532 : vector<2x8xf32> to vector<2x8x1xf32>
    %534 = vector.broadcast %533 : vector<2x8x1xf32> to vector<2x8x8xf32>
    %535 = arith.subf %531, %534 : vector<2x8x8xf32>
    %536 = math.exp %535 : vector<2x8x8xf32>
    %cst_191 = arith.constant dense<0.000000e+00> : vector<2x8xf32>
    %537 = vector.multi_reduction <add>, %536, %cst_191 [2] : vector<2x8x8xf32> to vector<2x8xf32>
    %538 = vector.shape_cast %537 : vector<2x8xf32> to vector<2x8x1xf32>
    %539 = vector.broadcast %538 : vector<2x8x1xf32> to vector<2x8x8xf32>
    %540 = arith.divf %536, %539 : vector<2x8x8xf32>
    "tpu.trace_start"() <{level = 10 : i32, message = "bqk,bkd->bqd"}> : () -> ()
    %cst_192 = arith.constant dense<0.000000e+00> : vector<2x8x16xf32>
    %541 = tpu.matmul %540, %528, %cst_192 {dimension_numbers = #tpu.dot_dimension_numbers<[2], [1], [1], [2], [0, 0, 0, 1, 1, 2], [0], [0]>} : vector<2x8x8xf32>, vector<2x8x16xf32>, vector<2x8x16xf32> -> vector<2x8x16xf32>
    "tpu.trace_stop"() : () -> ()
    %542 = tpu.concatenate %484, %503, %522, %541 in 2 : vector<2x8x16xf32>, vector<2x8x16xf32>, vector<2x8x16xf32>, vector<2x8x16xf32> -> vector<2x8x64xf32>
    %543 = vector.shape_cast %542 : vector<2x8x64xf32> to vector<16x64xf32>
    %c3_193 = arith.constant 3 : index
    %c0_194 = arith.constant 0 : index
    %c0_195 = arith.constant 0 : index
    %544 = vector.load %arg5[%c3_193, %c0_194, %c0_195] : memref<6x64x64xf32, #tpu.memory_space<vmem>>, vector<1x64x64xf32>
    %545 = vector.shape_cast %544 : vector<1x64x64xf32> to vector<64x64xf32>
    %cst_196 = arith.constant dense<0.000000e+00> : vector<16x64xf32>
    %546 = tpu.matmul %543, %545, %cst_196 {dimension_numbers = #tpu.dot_dimension_numbers<[1], [0], [0], [1], [0, 0, 1, 1], [], []>} : vector<16x64xf32>, vector<64x64xf32>, vector<16x64xf32> -> vector<16x64xf32>
    %c4 = arith.constant 4 : index
    %c0_197 = arith.constant 0 : index
    %547 = vector.load %arg9[%c4, %c0_197] : memref<35x64xf32, #tpu.memory_space<vmem>>, vector<1x64xf32>
    %548 = vector.broadcast %547 : vector<1x64xf32> to vector<16x64xf32>
    %549 = arith.addf %546, %548 : vector<16x64xf32>
    %550 = arith.addf %456, %549 : vector<16x64xf32>
    %cst_198 = arith.constant dense<0.000000e+00> : vector<16xf32>
    %551 = vector.multi_reduction <add>, %550, %cst_198 [1] : vector<16x64xf32> to vector<16xf32>
    %552 = vector.shape_cast %551 : vector<16xf32> to vector<16x1xf32>
    %cst_199 = arith.constant 6.400000e+01 : f32
    %553 = vector.broadcast %cst_199 : f32 to vector<16x1xf32>
    %554 = arith.divf %552, %553 : vector<16x1xf32>
    %555 = vector.broadcast %554 : vector<16x1xf32> to vector<16x64xf32>
    %556 = arith.subf %550, %555 : vector<16x64xf32>
    %557 = arith.mulf %556, %556 : vector<16x64xf32>
    %cst_200 = arith.constant dense<0.000000e+00> : vector<16xf32>
    %558 = vector.multi_reduction <add>, %557, %cst_200 [1] : vector<16x64xf32> to vector<16xf32>
    %559 = vector.shape_cast %558 : vector<16xf32> to vector<16x1xf32>
    %cst_201 = arith.constant 6.400000e+01 : f32
    %560 = vector.broadcast %cst_201 : f32 to vector<16x1xf32>
    %561 = arith.divf %559, %560 : vector<16x1xf32>
    %562 = vector.broadcast %554 : vector<16x1xf32> to vector<16x64xf32>
    %563 = arith.subf %550, %562 : vector<16x64xf32>
    %cst_202 = arith.constant 9.99999974E-6 : f32
    %564 = vector.broadcast %cst_202 : f32 to vector<16x1xf32>
    %565 = arith.addf %561, %564 : vector<16x1xf32>
    %566 = math.rsqrt %565 : vector<16x1xf32>
    %567 = vector.broadcast %566 : vector<16x1xf32> to vector<16x64xf32>
    %568 = arith.mulf %563, %567 : vector<16x64xf32>
    %c17 = arith.constant 17 : index
    %c0_203 = arith.constant 0 : index
    %569 = vector.load %arg9[%c17, %c0_203] : memref<35x64xf32, #tpu.memory_space<vmem>>, vector<1x64xf32>
    %570 = vector.broadcast %569 : vector<1x64xf32> to vector<16x64xf32>
    %571 = arith.mulf %568, %570 : vector<16x64xf32>
    %c29 = arith.constant 29 : index
    %c0_204 = arith.constant 0 : index
    %572 = vector.load %arg9[%c29, %c0_204] : memref<35x64xf32, #tpu.memory_space<vmem>>, vector<1x64xf32>
    %573 = vector.broadcast %572 : vector<1x64xf32> to vector<16x64xf32>
    %574 = arith.addf %571, %573 : vector<16x64xf32>
    %c2_205 = arith.constant 2 : index
    %c0_206 = arith.constant 0 : index
    %c0_207 = arith.constant 0 : index
    %575 = vector.load %arg6[%c2_205, %c0_206, %c0_207] : memref<4x64x128xf32, #tpu.memory_space<vmem>>, vector<1x64x128xf32>
    %576 = vector.shape_cast %575 : vector<1x64x128xf32> to vector<64x128xf32>
    %cst_208 = arith.constant dense<0.000000e+00> : vector<16x128xf32>
    %577 = tpu.matmul %574, %576, %cst_208 {dimension_numbers = #tpu.dot_dimension_numbers<[1], [0], [0], [1], [0, 0, 1, 1], [], []>} : vector<16x64xf32>, vector<64x128xf32>, vector<16x128xf32> -> vector<16x128xf32>
    %c2_209 = arith.constant 2 : index
    %c0_210 = arith.constant 0 : index
    %578 = vector.load %arg7[%c2_209, %c0_210] : memref<4x128xf32, #tpu.memory_space<vmem>>, vector<1x128xf32>
    %579 = vector.broadcast %578 : vector<1x128xf32> to vector<16x128xf32>
    %580 = arith.addf %577, %579 : vector<16x128xf32>
    %cst_211 = arith.constant 0.000000e+00 : f32
    %581 = vector.broadcast %cst_211 : f32 to vector<16x128xf32>
    %582 = arith.maximumf %580, %581 : vector<16x128xf32>
    %c2_212 = arith.constant 2 : index
    %c0_213 = arith.constant 0 : index
    %c0_214 = arith.constant 0 : index
    %583 = vector.load %arg8[%c2_212, %c0_213, %c0_214] : memref<4x128x64xf32, #tpu.memory_space<vmem>>, vector<1x128x64xf32>
    %584 = vector.shape_cast %583 : vector<1x128x64xf32> to vector<128x64xf32>
    %cst_215 = arith.constant dense<0.000000e+00> : vector<16x64xf32>
    %585 = tpu.matmul %582, %584, %cst_215 {dimension_numbers = #tpu.dot_dimension_numbers<[1], [0], [0], [1], [0, 0, 1, 1], [], []>} : vector<16x128xf32>, vector<128x64xf32>, vector<16x64xf32> -> vector<16x64xf32>
    %c9 = arith.constant 9 : index
    %c0_216 = arith.constant 0 : index
    %586 = vector.load %arg9[%c9, %c0_216] : memref<35x64xf32, #tpu.memory_space<vmem>>, vector<1x64xf32>
    %587 = vector.broadcast %586 : vector<1x64xf32> to vector<16x64xf32>
    %588 = arith.addf %585, %587 : vector<16x64xf32>
    %589 = arith.addf %574, %588 : vector<16x64xf32>
    %cst_217 = arith.constant dense<0.000000e+00> : vector<16xf32>
    %590 = vector.multi_reduction <add>, %589, %cst_217 [1] : vector<16x64xf32> to vector<16xf32>
    %591 = vector.shape_cast %590 : vector<16xf32> to vector<16x1xf32>
    %cst_218 = arith.constant 6.400000e+01 : f32
    %592 = vector.broadcast %cst_218 : f32 to vector<16x1xf32>
    %593 = arith.divf %591, %592 : vector<16x1xf32>
    %594 = vector.broadcast %593 : vector<16x1xf32> to vector<16x64xf32>
    %595 = arith.subf %589, %594 : vector<16x64xf32>
    %596 = arith.mulf %595, %595 : vector<16x64xf32>
    %cst_219 = arith.constant dense<0.000000e+00> : vector<16xf32>
    %597 = vector.multi_reduction <add>, %596, %cst_219 [1] : vector<16x64xf32> to vector<16xf32>
    %598 = vector.shape_cast %597 : vector<16xf32> to vector<16x1xf32>
    %cst_220 = arith.constant 6.400000e+01 : f32
    %599 = vector.broadcast %cst_220 : f32 to vector<16x1xf32>
    %600 = arith.divf %598, %599 : vector<16x1xf32>
    %601 = vector.broadcast %593 : vector<16x1xf32> to vector<16x64xf32>
    %602 = arith.subf %589, %601 : vector<16x64xf32>
    %cst_221 = arith.constant 9.99999974E-6 : f32
    %603 = vector.broadcast %cst_221 : f32 to vector<16x1xf32>
    %604 = arith.addf %600, %603 : vector<16x1xf32>
    %605 = math.rsqrt %604 : vector<16x1xf32>
    %606 = vector.broadcast %605 : vector<16x1xf32> to vector<16x64xf32>
    %607 = arith.mulf %602, %606 : vector<16x64xf32>
    %c18 = arith.constant 18 : index
    %c0_222 = arith.constant 0 : index
    %608 = vector.load %arg9[%c18, %c0_222] : memref<35x64xf32, #tpu.memory_space<vmem>>, vector<1x64xf32>
    %609 = vector.broadcast %608 : vector<1x64xf32> to vector<16x64xf32>
    %610 = arith.mulf %607, %609 : vector<16x64xf32>
    %c30 = arith.constant 30 : index
    %c0_223 = arith.constant 0 : index
    %611 = vector.load %arg9[%c30, %c0_223] : memref<35x64xf32, #tpu.memory_space<vmem>>, vector<1x64xf32>
    %612 = vector.broadcast %611 : vector<1x64xf32> to vector<16x64xf32>
    %613 = arith.addf %610, %612 : vector<16x64xf32>
    %c4_224 = arith.constant 4 : index
    %c0_225 = arith.constant 0 : index
    %c0_226 = arith.constant 0 : index
    %614 = vector.load %arg3[%c4_224, %c0_225, %c0_226] : memref<6x64x192xf32, #tpu.memory_space<vmem>>, vector<1x64x192xf32>
    %615 = vector.shape_cast %614 : vector<1x64x192xf32> to vector<64x192xf32>
    %c4_227 = arith.constant 4 : index
    %c0_228 = arith.constant 0 : index
    %616 = vector.load %arg4[%c4_227, %c0_228] : memref<6x192xf32, #tpu.memory_space<vmem>>, vector<1x192xf32>
    %cst_229 = arith.constant dense<0.000000e+00> : vector<16x192xf32>
    %617 = tpu.matmul %613, %615, %cst_229 {dimension_numbers = #tpu.dot_dimension_numbers<[1], [0], [0], [1], [0, 0, 1, 1], [], []>} : vector<16x64xf32>, vector<64x192xf32>, vector<16x192xf32> -> vector<16x192xf32>
    %618 = vector.broadcast %616 : vector<1x192xf32> to vector<16x192xf32>
    %619 = arith.addf %617, %618 : vector<16x192xf32>
    %620 = vector.extract_strided_slice %619 {offsets = [0, 0], sizes = [16, 16], strides = [1, 1]} : vector<16x192xf32> to vector<16x16xf32>
    %621 = vector.shape_cast %620 : vector<16x16xf32> to vector<2x8x16xf32>
    %622 = vector.extract_strided_slice %619 {offsets = [0, 64], sizes = [16, 16], strides = [1, 1]} : vector<16x192xf32> to vector<16x16xf32>
    %623 = vector.shape_cast %622 : vector<16x16xf32> to vector<2x8x16xf32>
    %624 = vector.extract_strided_slice %619 {offsets = [0, 128], sizes = [16, 16], strides = [1, 1]} : vector<16x192xf32> to vector<16x16xf32>
    %625 = vector.shape_cast %624 : vector<16x16xf32> to vector<2x8x16xf32>
    "tpu.trace_start"() <{level = 10 : i32, message = "bqd,bkd->bqk"}> : () -> ()
    %cst_230 = arith.constant dense<0.000000e+00> : vector<2x8x8xf32>
    %626 = tpu.matmul %621, %623, %cst_230 {dimension_numbers = #tpu.dot_dimension_numbers<[2], [2], [1], [1], [0, 0, 0, 1, 1, 1], [0], [0]>} : vector<2x8x16xf32>, vector<2x8x16xf32>, vector<2x8x8xf32> -> vector<2x8x8xf32>
    "tpu.trace_stop"() : () -> ()
    %cst_231 = arith.constant 2.500000e-01 : f32
    %627 = vector.broadcast %cst_231 : f32 to vector<2x8x8xf32>
    %628 = arith.mulf %626, %627 : vector<2x8x8xf32>
    %cst_232 = arith.constant dense<0xFF800000> : vector<2x8xf32>
    %629 = vector.multi_reduction <maximumf>, %628, %cst_232 [2] : vector<2x8x8xf32> to vector<2x8xf32>
    %630 = vector.shape_cast %629 : vector<2x8xf32> to vector<2x8x1xf32>
    %631 = vector.broadcast %630 : vector<2x8x1xf32> to vector<2x8x8xf32>
    %632 = arith.subf %628, %631 : vector<2x8x8xf32>
    %633 = math.exp %632 : vector<2x8x8xf32>
    %cst_233 = arith.constant dense<0.000000e+00> : vector<2x8xf32>
    %634 = vector.multi_reduction <add>, %633, %cst_233 [2] : vector<2x8x8xf32> to vector<2x8xf32>
    %635 = vector.shape_cast %634 : vector<2x8xf32> to vector<2x8x1xf32>
    %636 = vector.broadcast %635 : vector<2x8x1xf32> to vector<2x8x8xf32>
    %637 = arith.divf %633, %636 : vector<2x8x8xf32>
    "tpu.trace_start"() <{level = 10 : i32, message = "bqk,bkd->bqd"}> : () -> ()
    %cst_234 = arith.constant dense<0.000000e+00> : vector<2x8x16xf32>
    %638 = tpu.matmul %637, %625, %cst_234 {dimension_numbers = #tpu.dot_dimension_numbers<[2], [1], [1], [2], [0, 0, 0, 1, 1, 2], [0], [0]>} : vector<2x8x8xf32>, vector<2x8x16xf32>, vector<2x8x16xf32> -> vector<2x8x16xf32>
    "tpu.trace_stop"() : () -> ()
    %639 = vector.extract_strided_slice %619 {offsets = [0, 16], sizes = [16, 16], strides = [1, 1]} : vector<16x192xf32> to vector<16x16xf32>
    %640 = vector.shape_cast %639 : vector<16x16xf32> to vector<2x8x16xf32>
    %641 = vector.extract_strided_slice %619 {offsets = [0, 80], sizes = [16, 16], strides = [1, 1]} : vector<16x192xf32> to vector<16x16xf32>
    %642 = vector.shape_cast %641 : vector<16x16xf32> to vector<2x8x16xf32>
    %643 = vector.extract_strided_slice %619 {offsets = [0, 144], sizes = [16, 16], strides = [1, 1]} : vector<16x192xf32> to vector<16x16xf32>
    %644 = vector.shape_cast %643 : vector<16x16xf32> to vector<2x8x16xf32>
    "tpu.trace_start"() <{level = 10 : i32, message = "bqd,bkd->bqk"}> : () -> ()
    %cst_235 = arith.constant dense<0.000000e+00> : vector<2x8x8xf32>
    %645 = tpu.matmul %640, %642, %cst_235 {dimension_numbers = #tpu.dot_dimension_numbers<[2], [2], [1], [1], [0, 0, 0, 1, 1, 1], [0], [0]>} : vector<2x8x16xf32>, vector<2x8x16xf32>, vector<2x8x8xf32> -> vector<2x8x8xf32>
    "tpu.trace_stop"() : () -> ()
    %cst_236 = arith.constant 2.500000e-01 : f32
    %646 = vector.broadcast %cst_236 : f32 to vector<2x8x8xf32>
    %647 = arith.mulf %645, %646 : vector<2x8x8xf32>
    %cst_237 = arith.constant dense<0xFF800000> : vector<2x8xf32>
    %648 = vector.multi_reduction <maximumf>, %647, %cst_237 [2] : vector<2x8x8xf32> to vector<2x8xf32>
    %649 = vector.shape_cast %648 : vector<2x8xf32> to vector<2x8x1xf32>
    %650 = vector.broadcast %649 : vector<2x8x1xf32> to vector<2x8x8xf32>
    %651 = arith.subf %647, %650 : vector<2x8x8xf32>
    %652 = math.exp %651 : vector<2x8x8xf32>
    %cst_238 = arith.constant dense<0.000000e+00> : vector<2x8xf32>
    %653 = vector.multi_reduction <add>, %652, %cst_238 [2] : vector<2x8x8xf32> to vector<2x8xf32>
    %654 = vector.shape_cast %653 : vector<2x8xf32> to vector<2x8x1xf32>
    %655 = vector.broadcast %654 : vector<2x8x1xf32> to vector<2x8x8xf32>
    %656 = arith.divf %652, %655 : vector<2x8x8xf32>
    "tpu.trace_start"() <{level = 10 : i32, message = "bqk,bkd->bqd"}> : () -> ()
    %cst_239 = arith.constant dense<0.000000e+00> : vector<2x8x16xf32>
    %657 = tpu.matmul %656, %644, %cst_239 {dimension_numbers = #tpu.dot_dimension_numbers<[2], [1], [1], [2], [0, 0, 0, 1, 1, 2], [0], [0]>} : vector<2x8x8xf32>, vector<2x8x16xf32>, vector<2x8x16xf32> -> vector<2x8x16xf32>
    "tpu.trace_stop"() : () -> ()
    %658 = vector.extract_strided_slice %619 {offsets = [0, 32], sizes = [16, 16], strides = [1, 1]} : vector<16x192xf32> to vector<16x16xf32>
    %659 = vector.shape_cast %658 : vector<16x16xf32> to vector<2x8x16xf32>
    %660 = vector.extract_strided_slice %619 {offsets = [0, 96], sizes = [16, 16], strides = [1, 1]} : vector<16x192xf32> to vector<16x16xf32>
    %661 = vector.shape_cast %660 : vector<16x16xf32> to vector<2x8x16xf32>
    %662 = vector.extract_strided_slice %619 {offsets = [0, 160], sizes = [16, 16], strides = [1, 1]} : vector<16x192xf32> to vector<16x16xf32>
    %663 = vector.shape_cast %662 : vector<16x16xf32> to vector<2x8x16xf32>
    "tpu.trace_start"() <{level = 10 : i32, message = "bqd,bkd->bqk"}> : () -> ()
    %cst_240 = arith.constant dense<0.000000e+00> : vector<2x8x8xf32>
    %664 = tpu.matmul %659, %661, %cst_240 {dimension_numbers = #tpu.dot_dimension_numbers<[2], [2], [1], [1], [0, 0, 0, 1, 1, 1], [0], [0]>} : vector<2x8x16xf32>, vector<2x8x16xf32>, vector<2x8x8xf32> -> vector<2x8x8xf32>
    "tpu.trace_stop"() : () -> ()
    %cst_241 = arith.constant 2.500000e-01 : f32
    %665 = vector.broadcast %cst_241 : f32 to vector<2x8x8xf32>
    %666 = arith.mulf %664, %665 : vector<2x8x8xf32>
    %cst_242 = arith.constant dense<0xFF800000> : vector<2x8xf32>
    %667 = vector.multi_reduction <maximumf>, %666, %cst_242 [2] : vector<2x8x8xf32> to vector<2x8xf32>
    %668 = vector.shape_cast %667 : vector<2x8xf32> to vector<2x8x1xf32>
    %669 = vector.broadcast %668 : vector<2x8x1xf32> to vector<2x8x8xf32>
    %670 = arith.subf %666, %669 : vector<2x8x8xf32>
    %671 = math.exp %670 : vector<2x8x8xf32>
    %cst_243 = arith.constant dense<0.000000e+00> : vector<2x8xf32>
    %672 = vector.multi_reduction <add>, %671, %cst_243 [2] : vector<2x8x8xf32> to vector<2x8xf32>
    %673 = vector.shape_cast %672 : vector<2x8xf32> to vector<2x8x1xf32>
    %674 = vector.broadcast %673 : vector<2x8x1xf32> to vector<2x8x8xf32>
    %675 = arith.divf %671, %674 : vector<2x8x8xf32>
    "tpu.trace_start"() <{level = 10 : i32, message = "bqk,bkd->bqd"}> : () -> ()
    %cst_244 = arith.constant dense<0.000000e+00> : vector<2x8x16xf32>
    %676 = tpu.matmul %675, %663, %cst_244 {dimension_numbers = #tpu.dot_dimension_numbers<[2], [1], [1], [2], [0, 0, 0, 1, 1, 2], [0], [0]>} : vector<2x8x8xf32>, vector<2x8x16xf32>, vector<2x8x16xf32> -> vector<2x8x16xf32>
    "tpu.trace_stop"() : () -> ()
    %677 = vector.extract_strided_slice %619 {offsets = [0, 48], sizes = [16, 16], strides = [1, 1]} : vector<16x192xf32> to vector<16x16xf32>
    %678 = vector.shape_cast %677 : vector<16x16xf32> to vector<2x8x16xf32>
    %679 = vector.extract_strided_slice %619 {offsets = [0, 112], sizes = [16, 16], strides = [1, 1]} : vector<16x192xf32> to vector<16x16xf32>
    %680 = vector.shape_cast %679 : vector<16x16xf32> to vector<2x8x16xf32>
    %681 = vector.extract_strided_slice %619 {offsets = [0, 176], sizes = [16, 16], strides = [1, 1]} : vector<16x192xf32> to vector<16x16xf32>
    %682 = vector.shape_cast %681 : vector<16x16xf32> to vector<2x8x16xf32>
    "tpu.trace_start"() <{level = 10 : i32, message = "bqd,bkd->bqk"}> : () -> ()
    %cst_245 = arith.constant dense<0.000000e+00> : vector<2x8x8xf32>
    %683 = tpu.matmul %678, %680, %cst_245 {dimension_numbers = #tpu.dot_dimension_numbers<[2], [2], [1], [1], [0, 0, 0, 1, 1, 1], [0], [0]>} : vector<2x8x16xf32>, vector<2x8x16xf32>, vector<2x8x8xf32> -> vector<2x8x8xf32>
    "tpu.trace_stop"() : () -> ()
    %cst_246 = arith.constant 2.500000e-01 : f32
    %684 = vector.broadcast %cst_246 : f32 to vector<2x8x8xf32>
    %685 = arith.mulf %683, %684 : vector<2x8x8xf32>
    %cst_247 = arith.constant dense<0xFF800000> : vector<2x8xf32>
    %686 = vector.multi_reduction <maximumf>, %685, %cst_247 [2] : vector<2x8x8xf32> to vector<2x8xf32>
    %687 = vector.shape_cast %686 : vector<2x8xf32> to vector<2x8x1xf32>
    %688 = vector.broadcast %687 : vector<2x8x1xf32> to vector<2x8x8xf32>
    %689 = arith.subf %685, %688 : vector<2x8x8xf32>
    %690 = math.exp %689 : vector<2x8x8xf32>
    %cst_248 = arith.constant dense<0.000000e+00> : vector<2x8xf32>
    %691 = vector.multi_reduction <add>, %690, %cst_248 [2] : vector<2x8x8xf32> to vector<2x8xf32>
    %692 = vector.shape_cast %691 : vector<2x8xf32> to vector<2x8x1xf32>
    %693 = vector.broadcast %692 : vector<2x8x1xf32> to vector<2x8x8xf32>
    %694 = arith.divf %690, %693 : vector<2x8x8xf32>
    "tpu.trace_start"() <{level = 10 : i32, message = "bqk,bkd->bqd"}> : () -> ()
    %cst_249 = arith.constant dense<0.000000e+00> : vector<2x8x16xf32>
    %695 = tpu.matmul %694, %682, %cst_249 {dimension_numbers = #tpu.dot_dimension_numbers<[2], [1], [1], [2], [0, 0, 0, 1, 1, 2], [0], [0]>} : vector<2x8x8xf32>, vector<2x8x16xf32>, vector<2x8x16xf32> -> vector<2x8x16xf32>
    "tpu.trace_stop"() : () -> ()
    %696 = tpu.concatenate %638, %657, %676, %695 in 2 : vector<2x8x16xf32>, vector<2x8x16xf32>, vector<2x8x16xf32>, vector<2x8x16xf32> -> vector<2x8x64xf32>
    %697 = vector.shape_cast %696 : vector<2x8x64xf32> to vector<16x64xf32>
    %c4_250 = arith.constant 4 : index
    %c0_251 = arith.constant 0 : index
    %c0_252 = arith.constant 0 : index
    %698 = vector.load %arg5[%c4_250, %c0_251, %c0_252] : memref<6x64x64xf32, #tpu.memory_space<vmem>>, vector<1x64x64xf32>
    %699 = vector.shape_cast %698 : vector<1x64x64xf32> to vector<64x64xf32>
    %cst_253 = arith.constant dense<0.000000e+00> : vector<16x64xf32>
    %700 = tpu.matmul %697, %699, %cst_253 {dimension_numbers = #tpu.dot_dimension_numbers<[1], [0], [0], [1], [0, 0, 1, 1], [], []>} : vector<16x64xf32>, vector<64x64xf32>, vector<16x64xf32> -> vector<16x64xf32>
    %c5 = arith.constant 5 : index
    %c0_254 = arith.constant 0 : index
    %701 = vector.load %arg9[%c5, %c0_254] : memref<35x64xf32, #tpu.memory_space<vmem>>, vector<1x64xf32>
    %702 = vector.broadcast %701 : vector<1x64xf32> to vector<16x64xf32>
    %703 = arith.addf %700, %702 : vector<16x64xf32>
    %704 = arith.addf %613, %703 : vector<16x64xf32>
    %cst_255 = arith.constant dense<0.000000e+00> : vector<16xf32>
    %705 = vector.multi_reduction <add>, %704, %cst_255 [1] : vector<16x64xf32> to vector<16xf32>
    %706 = vector.shape_cast %705 : vector<16xf32> to vector<16x1xf32>
    %cst_256 = arith.constant 6.400000e+01 : f32
    %707 = vector.broadcast %cst_256 : f32 to vector<16x1xf32>
    %708 = arith.divf %706, %707 : vector<16x1xf32>
    %709 = vector.broadcast %708 : vector<16x1xf32> to vector<16x64xf32>
    %710 = arith.subf %704, %709 : vector<16x64xf32>
    %711 = arith.mulf %710, %710 : vector<16x64xf32>
    %cst_257 = arith.constant dense<0.000000e+00> : vector<16xf32>
    %712 = vector.multi_reduction <add>, %711, %cst_257 [1] : vector<16x64xf32> to vector<16xf32>
    %713 = vector.shape_cast %712 : vector<16xf32> to vector<16x1xf32>
    %cst_258 = arith.constant 6.400000e+01 : f32
    %714 = vector.broadcast %cst_258 : f32 to vector<16x1xf32>
    %715 = arith.divf %713, %714 : vector<16x1xf32>
    %716 = vector.broadcast %708 : vector<16x1xf32> to vector<16x64xf32>
    %717 = arith.subf %704, %716 : vector<16x64xf32>
    %cst_259 = arith.constant 9.99999974E-6 : f32
    %718 = vector.broadcast %cst_259 : f32 to vector<16x1xf32>
    %719 = arith.addf %715, %718 : vector<16x1xf32>
    %720 = math.rsqrt %719 : vector<16x1xf32>
    %721 = vector.broadcast %720 : vector<16x1xf32> to vector<16x64xf32>
    %722 = arith.mulf %717, %721 : vector<16x64xf32>
    %c19 = arith.constant 19 : index
    %c0_260 = arith.constant 0 : index
    %723 = vector.load %arg9[%c19, %c0_260] : memref<35x64xf32, #tpu.memory_space<vmem>>, vector<1x64xf32>
    %724 = vector.broadcast %723 : vector<1x64xf32> to vector<16x64xf32>
    %725 = arith.mulf %722, %724 : vector<16x64xf32>
    %c31 = arith.constant 31 : index
    %c0_261 = arith.constant 0 : index
    %726 = vector.load %arg9[%c31, %c0_261] : memref<35x64xf32, #tpu.memory_space<vmem>>, vector<1x64xf32>
    %727 = vector.broadcast %726 : vector<1x64xf32> to vector<16x64xf32>
    %728 = arith.addf %725, %727 : vector<16x64xf32>
    %c5_262 = arith.constant 5 : index
    %c0_263 = arith.constant 0 : index
    %c0_264 = arith.constant 0 : index
    %729 = vector.load %arg3[%c5_262, %c0_263, %c0_264] : memref<6x64x192xf32, #tpu.memory_space<vmem>>, vector<1x64x192xf32>
    %730 = vector.shape_cast %729 : vector<1x64x192xf32> to vector<64x192xf32>
    %c5_265 = arith.constant 5 : index
    %c0_266 = arith.constant 0 : index
    %731 = vector.load %arg4[%c5_265, %c0_266] : memref<6x192xf32, #tpu.memory_space<vmem>>, vector<1x192xf32>
    %cst_267 = arith.constant dense<0.000000e+00> : vector<16x192xf32>
    %732 = tpu.matmul %728, %730, %cst_267 {dimension_numbers = #tpu.dot_dimension_numbers<[1], [0], [0], [1], [0, 0, 1, 1], [], []>} : vector<16x64xf32>, vector<64x192xf32>, vector<16x192xf32> -> vector<16x192xf32>
    %733 = vector.broadcast %731 : vector<1x192xf32> to vector<16x192xf32>
    %734 = arith.addf %732, %733 : vector<16x192xf32>
    %cst_268 = arith.constant dense<0.000000e+00> : vector<16x192xf32>
    %735 = tpu.matmul %341, %730, %cst_268 {dimension_numbers = #tpu.dot_dimension_numbers<[1], [0], [0], [1], [0, 0, 1, 1], [], []>} : vector<16x64xf32>, vector<64x192xf32>, vector<16x192xf32> -> vector<16x192xf32>
    %736 = vector.broadcast %731 : vector<1x192xf32> to vector<16x192xf32>
    %737 = arith.addf %735, %736 : vector<16x192xf32>
    %738 = vector.extract_strided_slice %734 {offsets = [0, 0], sizes = [16, 16], strides = [1, 1]} : vector<16x192xf32> to vector<16x16xf32>
    %739 = vector.shape_cast %738 : vector<16x16xf32> to vector<2x8x16xf32>
    %740 = vector.extract_strided_slice %737 {offsets = [0, 64], sizes = [16, 16], strides = [1, 1]} : vector<16x192xf32> to vector<16x16xf32>
    %741 = vector.shape_cast %740 : vector<16x16xf32> to vector<2x8x16xf32>
    %742 = vector.extract_strided_slice %737 {offsets = [0, 128], sizes = [16, 16], strides = [1, 1]} : vector<16x192xf32> to vector<16x16xf32>
    %743 = vector.shape_cast %742 : vector<16x16xf32> to vector<2x8x16xf32>
    "tpu.trace_start"() <{level = 10 : i32, message = "bqd,bkd->bqk"}> : () -> ()
    %cst_269 = arith.constant dense<0.000000e+00> : vector<2x8x8xf32>
    %744 = tpu.matmul %739, %741, %cst_269 {dimension_numbers = #tpu.dot_dimension_numbers<[2], [2], [1], [1], [0, 0, 0, 1, 1, 1], [0], [0]>} : vector<2x8x16xf32>, vector<2x8x16xf32>, vector<2x8x8xf32> -> vector<2x8x8xf32>
    "tpu.trace_stop"() : () -> ()
    %cst_270 = arith.constant 2.500000e-01 : f32
    %745 = vector.broadcast %cst_270 : f32 to vector<2x8x8xf32>
    %746 = arith.mulf %744, %745 : vector<2x8x8xf32>
    %cst_271 = arith.constant dense<0xFF800000> : vector<2x8xf32>
    %747 = vector.multi_reduction <maximumf>, %746, %cst_271 [2] : vector<2x8x8xf32> to vector<2x8xf32>
    %748 = vector.shape_cast %747 : vector<2x8xf32> to vector<2x8x1xf32>
    %749 = vector.broadcast %748 : vector<2x8x1xf32> to vector<2x8x8xf32>
    %750 = arith.subf %746, %749 : vector<2x8x8xf32>
    %751 = math.exp %750 : vector<2x8x8xf32>
    %cst_272 = arith.constant dense<0.000000e+00> : vector<2x8xf32>
    %752 = vector.multi_reduction <add>, %751, %cst_272 [2] : vector<2x8x8xf32> to vector<2x8xf32>
    %753 = vector.shape_cast %752 : vector<2x8xf32> to vector<2x8x1xf32>
    %754 = vector.broadcast %753 : vector<2x8x1xf32> to vector<2x8x8xf32>
    %755 = arith.divf %751, %754 : vector<2x8x8xf32>
    "tpu.trace_start"() <{level = 10 : i32, message = "bqk,bkd->bqd"}> : () -> ()
    %cst_273 = arith.constant dense<0.000000e+00> : vector<2x8x16xf32>
    %756 = tpu.matmul %755, %743, %cst_273 {dimension_numbers = #tpu.dot_dimension_numbers<[2], [1], [1], [2], [0, 0, 0, 1, 1, 2], [0], [0]>} : vector<2x8x8xf32>, vector<2x8x16xf32>, vector<2x8x16xf32> -> vector<2x8x16xf32>
    "tpu.trace_stop"() : () -> ()
    %757 = vector.extract_strided_slice %734 {offsets = [0, 16], sizes = [16, 16], strides = [1, 1]} : vector<16x192xf32> to vector<16x16xf32>
    %758 = vector.shape_cast %757 : vector<16x16xf32> to vector<2x8x16xf32>
    %759 = vector.extract_strided_slice %737 {offsets = [0, 80], sizes = [16, 16], strides = [1, 1]} : vector<16x192xf32> to vector<16x16xf32>
    %760 = vector.shape_cast %759 : vector<16x16xf32> to vector<2x8x16xf32>
    %761 = vector.extract_strided_slice %737 {offsets = [0, 144], sizes = [16, 16], strides = [1, 1]} : vector<16x192xf32> to vector<16x16xf32>
    %762 = vector.shape_cast %761 : vector<16x16xf32> to vector<2x8x16xf32>
    "tpu.trace_start"() <{level = 10 : i32, message = "bqd,bkd->bqk"}> : () -> ()
    %cst_274 = arith.constant dense<0.000000e+00> : vector<2x8x8xf32>
    %763 = tpu.matmul %758, %760, %cst_274 {dimension_numbers = #tpu.dot_dimension_numbers<[2], [2], [1], [1], [0, 0, 0, 1, 1, 1], [0], [0]>} : vector<2x8x16xf32>, vector<2x8x16xf32>, vector<2x8x8xf32> -> vector<2x8x8xf32>
    "tpu.trace_stop"() : () -> ()
    %cst_275 = arith.constant 2.500000e-01 : f32
    %764 = vector.broadcast %cst_275 : f32 to vector<2x8x8xf32>
    %765 = arith.mulf %763, %764 : vector<2x8x8xf32>
    %cst_276 = arith.constant dense<0xFF800000> : vector<2x8xf32>
    %766 = vector.multi_reduction <maximumf>, %765, %cst_276 [2] : vector<2x8x8xf32> to vector<2x8xf32>
    %767 = vector.shape_cast %766 : vector<2x8xf32> to vector<2x8x1xf32>
    %768 = vector.broadcast %767 : vector<2x8x1xf32> to vector<2x8x8xf32>
    %769 = arith.subf %765, %768 : vector<2x8x8xf32>
    %770 = math.exp %769 : vector<2x8x8xf32>
    %cst_277 = arith.constant dense<0.000000e+00> : vector<2x8xf32>
    %771 = vector.multi_reduction <add>, %770, %cst_277 [2] : vector<2x8x8xf32> to vector<2x8xf32>
    %772 = vector.shape_cast %771 : vector<2x8xf32> to vector<2x8x1xf32>
    %773 = vector.broadcast %772 : vector<2x8x1xf32> to vector<2x8x8xf32>
    %774 = arith.divf %770, %773 : vector<2x8x8xf32>
    "tpu.trace_start"() <{level = 10 : i32, message = "bqk,bkd->bqd"}> : () -> ()
    %cst_278 = arith.constant dense<0.000000e+00> : vector<2x8x16xf32>
    %775 = tpu.matmul %774, %762, %cst_278 {dimension_numbers = #tpu.dot_dimension_numbers<[2], [1], [1], [2], [0, 0, 0, 1, 1, 2], [0], [0]>} : vector<2x8x8xf32>, vector<2x8x16xf32>, vector<2x8x16xf32> -> vector<2x8x16xf32>
    "tpu.trace_stop"() : () -> ()
    %776 = vector.extract_strided_slice %734 {offsets = [0, 32], sizes = [16, 16], strides = [1, 1]} : vector<16x192xf32> to vector<16x16xf32>
    %777 = vector.shape_cast %776 : vector<16x16xf32> to vector<2x8x16xf32>
    %778 = vector.extract_strided_slice %737 {offsets = [0, 96], sizes = [16, 16], strides = [1, 1]} : vector<16x192xf32> to vector<16x16xf32>
    %779 = vector.shape_cast %778 : vector<16x16xf32> to vector<2x8x16xf32>
    %780 = vector.extract_strided_slice %737 {offsets = [0, 160], sizes = [16, 16], strides = [1, 1]} : vector<16x192xf32> to vector<16x16xf32>
    %781 = vector.shape_cast %780 : vector<16x16xf32> to vector<2x8x16xf32>
    "tpu.trace_start"() <{level = 10 : i32, message = "bqd,bkd->bqk"}> : () -> ()
    %cst_279 = arith.constant dense<0.000000e+00> : vector<2x8x8xf32>
    %782 = tpu.matmul %777, %779, %cst_279 {dimension_numbers = #tpu.dot_dimension_numbers<[2], [2], [1], [1], [0, 0, 0, 1, 1, 1], [0], [0]>} : vector<2x8x16xf32>, vector<2x8x16xf32>, vector<2x8x8xf32> -> vector<2x8x8xf32>
    "tpu.trace_stop"() : () -> ()
    %cst_280 = arith.constant 2.500000e-01 : f32
    %783 = vector.broadcast %cst_280 : f32 to vector<2x8x8xf32>
    %784 = arith.mulf %782, %783 : vector<2x8x8xf32>
    %cst_281 = arith.constant dense<0xFF800000> : vector<2x8xf32>
    %785 = vector.multi_reduction <maximumf>, %784, %cst_281 [2] : vector<2x8x8xf32> to vector<2x8xf32>
    %786 = vector.shape_cast %785 : vector<2x8xf32> to vector<2x8x1xf32>
    %787 = vector.broadcast %786 : vector<2x8x1xf32> to vector<2x8x8xf32>
    %788 = arith.subf %784, %787 : vector<2x8x8xf32>
    %789 = math.exp %788 : vector<2x8x8xf32>
    %cst_282 = arith.constant dense<0.000000e+00> : vector<2x8xf32>
    %790 = vector.multi_reduction <add>, %789, %cst_282 [2] : vector<2x8x8xf32> to vector<2x8xf32>
    %791 = vector.shape_cast %790 : vector<2x8xf32> to vector<2x8x1xf32>
    %792 = vector.broadcast %791 : vector<2x8x1xf32> to vector<2x8x8xf32>
    %793 = arith.divf %789, %792 : vector<2x8x8xf32>
    "tpu.trace_start"() <{level = 10 : i32, message = "bqk,bkd->bqd"}> : () -> ()
    %cst_283 = arith.constant dense<0.000000e+00> : vector<2x8x16xf32>
    %794 = tpu.matmul %793, %781, %cst_283 {dimension_numbers = #tpu.dot_dimension_numbers<[2], [1], [1], [2], [0, 0, 0, 1, 1, 2], [0], [0]>} : vector<2x8x8xf32>, vector<2x8x16xf32>, vector<2x8x16xf32> -> vector<2x8x16xf32>
    "tpu.trace_stop"() : () -> ()
    %795 = vector.extract_strided_slice %734 {offsets = [0, 48], sizes = [16, 16], strides = [1, 1]} : vector<16x192xf32> to vector<16x16xf32>
    %796 = vector.shape_cast %795 : vector<16x16xf32> to vector<2x8x16xf32>
    %797 = vector.extract_strided_slice %737 {offsets = [0, 112], sizes = [16, 16], strides = [1, 1]} : vector<16x192xf32> to vector<16x16xf32>
    %798 = vector.shape_cast %797 : vector<16x16xf32> to vector<2x8x16xf32>
    %799 = vector.extract_strided_slice %737 {offsets = [0, 176], sizes = [16, 16], strides = [1, 1]} : vector<16x192xf32> to vector<16x16xf32>
    %800 = vector.shape_cast %799 : vector<16x16xf32> to vector<2x8x16xf32>
    "tpu.trace_start"() <{level = 10 : i32, message = "bqd,bkd->bqk"}> : () -> ()
    %cst_284 = arith.constant dense<0.000000e+00> : vector<2x8x8xf32>
    %801 = tpu.matmul %796, %798, %cst_284 {dimension_numbers = #tpu.dot_dimension_numbers<[2], [2], [1], [1], [0, 0, 0, 1, 1, 1], [0], [0]>} : vector<2x8x16xf32>, vector<2x8x16xf32>, vector<2x8x8xf32> -> vector<2x8x8xf32>
    "tpu.trace_stop"() : () -> ()
    %cst_285 = arith.constant 2.500000e-01 : f32
    %802 = vector.broadcast %cst_285 : f32 to vector<2x8x8xf32>
    %803 = arith.mulf %801, %802 : vector<2x8x8xf32>
    %cst_286 = arith.constant dense<0xFF800000> : vector<2x8xf32>
    %804 = vector.multi_reduction <maximumf>, %803, %cst_286 [2] : vector<2x8x8xf32> to vector<2x8xf32>
    %805 = vector.shape_cast %804 : vector<2x8xf32> to vector<2x8x1xf32>
    %806 = vector.broadcast %805 : vector<2x8x1xf32> to vector<2x8x8xf32>
    %807 = arith.subf %803, %806 : vector<2x8x8xf32>
    %808 = math.exp %807 : vector<2x8x8xf32>
    %cst_287 = arith.constant dense<0.000000e+00> : vector<2x8xf32>
    %809 = vector.multi_reduction <add>, %808, %cst_287 [2] : vector<2x8x8xf32> to vector<2x8xf32>
    %810 = vector.shape_cast %809 : vector<2x8xf32> to vector<2x8x1xf32>
    %811 = vector.broadcast %810 : vector<2x8x1xf32> to vector<2x8x8xf32>
    %812 = arith.divf %808, %811 : vector<2x8x8xf32>
    "tpu.trace_start"() <{level = 10 : i32, message = "bqk,bkd->bqd"}> : () -> ()
    %cst_288 = arith.constant dense<0.000000e+00> : vector<2x8x16xf32>
    %813 = tpu.matmul %812, %800, %cst_288 {dimension_numbers = #tpu.dot_dimension_numbers<[2], [1], [1], [2], [0, 0, 0, 1, 1, 2], [0], [0]>} : vector<2x8x8xf32>, vector<2x8x16xf32>, vector<2x8x16xf32> -> vector<2x8x16xf32>
    "tpu.trace_stop"() : () -> ()
    %814 = tpu.concatenate %756, %775, %794, %813 in 2 : vector<2x8x16xf32>, vector<2x8x16xf32>, vector<2x8x16xf32>, vector<2x8x16xf32> -> vector<2x8x64xf32>
    %815 = vector.shape_cast %814 : vector<2x8x64xf32> to vector<16x64xf32>
    %c5_289 = arith.constant 5 : index
    %c0_290 = arith.constant 0 : index
    %c0_291 = arith.constant 0 : index
    %816 = vector.load %arg5[%c5_289, %c0_290, %c0_291] : memref<6x64x64xf32, #tpu.memory_space<vmem>>, vector<1x64x64xf32>
    %817 = vector.shape_cast %816 : vector<1x64x64xf32> to vector<64x64xf32>
    %cst_292 = arith.constant dense<0.000000e+00> : vector<16x64xf32>
    %818 = tpu.matmul %815, %817, %cst_292 {dimension_numbers = #tpu.dot_dimension_numbers<[1], [0], [0], [1], [0, 0, 1, 1], [], []>} : vector<16x64xf32>, vector<64x64xf32>, vector<16x64xf32> -> vector<16x64xf32>
    %c6 = arith.constant 6 : index
    %c0_293 = arith.constant 0 : index
    %819 = vector.load %arg9[%c6, %c0_293] : memref<35x64xf32, #tpu.memory_space<vmem>>, vector<1x64xf32>
    %820 = vector.broadcast %819 : vector<1x64xf32> to vector<16x64xf32>
    %821 = arith.addf %818, %820 : vector<16x64xf32>
    %822 = arith.addf %728, %821 : vector<16x64xf32>
    %cst_294 = arith.constant dense<0.000000e+00> : vector<16xf32>
    %823 = vector.multi_reduction <add>, %822, %cst_294 [1] : vector<16x64xf32> to vector<16xf32>
    %824 = vector.shape_cast %823 : vector<16xf32> to vector<16x1xf32>
    %cst_295 = arith.constant 6.400000e+01 : f32
    %825 = vector.broadcast %cst_295 : f32 to vector<16x1xf32>
    %826 = arith.divf %824, %825 : vector<16x1xf32>
    %827 = vector.broadcast %826 : vector<16x1xf32> to vector<16x64xf32>
    %828 = arith.subf %822, %827 : vector<16x64xf32>
    %829 = arith.mulf %828, %828 : vector<16x64xf32>
    %cst_296 = arith.constant dense<0.000000e+00> : vector<16xf32>
    %830 = vector.multi_reduction <add>, %829, %cst_296 [1] : vector<16x64xf32> to vector<16xf32>
    %831 = vector.shape_cast %830 : vector<16xf32> to vector<16x1xf32>
    %cst_297 = arith.constant 6.400000e+01 : f32
    %832 = vector.broadcast %cst_297 : f32 to vector<16x1xf32>
    %833 = arith.divf %831, %832 : vector<16x1xf32>
    %834 = vector.broadcast %826 : vector<16x1xf32> to vector<16x64xf32>
    %835 = arith.subf %822, %834 : vector<16x64xf32>
    %cst_298 = arith.constant 9.99999974E-6 : f32
    %836 = vector.broadcast %cst_298 : f32 to vector<16x1xf32>
    %837 = arith.addf %833, %836 : vector<16x1xf32>
    %838 = math.rsqrt %837 : vector<16x1xf32>
    %839 = vector.broadcast %838 : vector<16x1xf32> to vector<16x64xf32>
    %840 = arith.mulf %835, %839 : vector<16x64xf32>
    %c20 = arith.constant 20 : index
    %c0_299 = arith.constant 0 : index
    %841 = vector.load %arg9[%c20, %c0_299] : memref<35x64xf32, #tpu.memory_space<vmem>>, vector<1x64xf32>
    %842 = vector.broadcast %841 : vector<1x64xf32> to vector<16x64xf32>
    %843 = arith.mulf %840, %842 : vector<16x64xf32>
    %c32 = arith.constant 32 : index
    %c0_300 = arith.constant 0 : index
    %844 = vector.load %arg9[%c32, %c0_300] : memref<35x64xf32, #tpu.memory_space<vmem>>, vector<1x64xf32>
    %845 = vector.broadcast %844 : vector<1x64xf32> to vector<16x64xf32>
    %846 = arith.addf %843, %845 : vector<16x64xf32>
    %c3_301 = arith.constant 3 : index
    %c0_302 = arith.constant 0 : index
    %c0_303 = arith.constant 0 : index
    %847 = vector.load %arg6[%c3_301, %c0_302, %c0_303] : memref<4x64x128xf32, #tpu.memory_space<vmem>>, vector<1x64x128xf32>
    %848 = vector.shape_cast %847 : vector<1x64x128xf32> to vector<64x128xf32>
    %cst_304 = arith.constant dense<0.000000e+00> : vector<16x128xf32>
    %849 = tpu.matmul %846, %848, %cst_304 {dimension_numbers = #tpu.dot_dimension_numbers<[1], [0], [0], [1], [0, 0, 1, 1], [], []>} : vector<16x64xf32>, vector<64x128xf32>, vector<16x128xf32> -> vector<16x128xf32>
    %c3_305 = arith.constant 3 : index
    %c0_306 = arith.constant 0 : index
    %850 = vector.load %arg7[%c3_305, %c0_306] : memref<4x128xf32, #tpu.memory_space<vmem>>, vector<1x128xf32>
    %851 = vector.broadcast %850 : vector<1x128xf32> to vector<16x128xf32>
    %852 = arith.addf %849, %851 : vector<16x128xf32>
    %cst_307 = arith.constant 0.000000e+00 : f32
    %853 = vector.broadcast %cst_307 : f32 to vector<16x128xf32>
    %854 = arith.maximumf %852, %853 : vector<16x128xf32>
    %c3_308 = arith.constant 3 : index
    %c0_309 = arith.constant 0 : index
    %c0_310 = arith.constant 0 : index
    %855 = vector.load %arg8[%c3_308, %c0_309, %c0_310] : memref<4x128x64xf32, #tpu.memory_space<vmem>>, vector<1x128x64xf32>
    %856 = vector.shape_cast %855 : vector<1x128x64xf32> to vector<128x64xf32>
    %cst_311 = arith.constant dense<0.000000e+00> : vector<16x64xf32>
    %857 = tpu.matmul %854, %856, %cst_311 {dimension_numbers = #tpu.dot_dimension_numbers<[1], [0], [0], [1], [0, 0, 1, 1], [], []>} : vector<16x128xf32>, vector<128x64xf32>, vector<16x64xf32> -> vector<16x64xf32>
    %c10 = arith.constant 10 : index
    %c0_312 = arith.constant 0 : index
    %858 = vector.load %arg9[%c10, %c0_312] : memref<35x64xf32, #tpu.memory_space<vmem>>, vector<1x64xf32>
    %859 = vector.broadcast %858 : vector<1x64xf32> to vector<16x64xf32>
    %860 = arith.addf %857, %859 : vector<16x64xf32>
    %861 = arith.addf %846, %860 : vector<16x64xf32>
    %cst_313 = arith.constant dense<0.000000e+00> : vector<16xf32>
    %862 = vector.multi_reduction <add>, %861, %cst_313 [1] : vector<16x64xf32> to vector<16xf32>
    %863 = vector.shape_cast %862 : vector<16xf32> to vector<16x1xf32>
    %cst_314 = arith.constant 6.400000e+01 : f32
    %864 = vector.broadcast %cst_314 : f32 to vector<16x1xf32>
    %865 = arith.divf %863, %864 : vector<16x1xf32>
    %866 = vector.broadcast %865 : vector<16x1xf32> to vector<16x64xf32>
    %867 = arith.subf %861, %866 : vector<16x64xf32>
    %868 = arith.mulf %867, %867 : vector<16x64xf32>
    %cst_315 = arith.constant dense<0.000000e+00> : vector<16xf32>
    %869 = vector.multi_reduction <add>, %868, %cst_315 [1] : vector<16x64xf32> to vector<16xf32>
    %870 = vector.shape_cast %869 : vector<16xf32> to vector<16x1xf32>
    %cst_316 = arith.constant 6.400000e+01 : f32
    %871 = vector.broadcast %cst_316 : f32 to vector<16x1xf32>
    %872 = arith.divf %870, %871 : vector<16x1xf32>
    %873 = vector.broadcast %865 : vector<16x1xf32> to vector<16x64xf32>
    %874 = arith.subf %861, %873 : vector<16x64xf32>
    %cst_317 = arith.constant 9.99999974E-6 : f32
    %875 = vector.broadcast %cst_317 : f32 to vector<16x1xf32>
    %876 = arith.addf %872, %875 : vector<16x1xf32>
    %877 = math.rsqrt %876 : vector<16x1xf32>
    %878 = vector.broadcast %877 : vector<16x1xf32> to vector<16x64xf32>
    %879 = arith.mulf %874, %878 : vector<16x64xf32>
    %c21 = arith.constant 21 : index
    %c0_318 = arith.constant 0 : index
    %880 = vector.load %arg9[%c21, %c0_318] : memref<35x64xf32, #tpu.memory_space<vmem>>, vector<1x64xf32>
    %881 = vector.broadcast %880 : vector<1x64xf32> to vector<16x64xf32>
    %882 = arith.mulf %879, %881 : vector<16x64xf32>
    %c33 = arith.constant 33 : index
    %c0_319 = arith.constant 0 : index
    %883 = vector.load %arg9[%c33, %c0_319] : memref<35x64xf32, #tpu.memory_space<vmem>>, vector<1x64xf32>
    %884 = vector.broadcast %883 : vector<1x64xf32> to vector<16x64xf32>
    %885 = arith.addf %882, %884 : vector<16x64xf32>
    %cst_320 = arith.constant dense<0.000000e+00> : vector<16xf32>
    %886 = vector.multi_reduction <add>, %885, %cst_320 [1] : vector<16x64xf32> to vector<16xf32>
    %887 = vector.shape_cast %886 : vector<16xf32> to vector<16x1xf32>
    %cst_321 = arith.constant 6.400000e+01 : f32
    %888 = vector.broadcast %cst_321 : f32 to vector<16x1xf32>
    %889 = arith.divf %887, %888 : vector<16x1xf32>
    %890 = vector.broadcast %889 : vector<16x1xf32> to vector<16x64xf32>
    %891 = arith.subf %885, %890 : vector<16x64xf32>
    %892 = arith.mulf %891, %891 : vector<16x64xf32>
    %cst_322 = arith.constant dense<0.000000e+00> : vector<16xf32>
    %893 = vector.multi_reduction <add>, %892, %cst_322 [1] : vector<16x64xf32> to vector<16xf32>
    %894 = vector.shape_cast %893 : vector<16xf32> to vector<16x1xf32>
    %cst_323 = arith.constant 6.400000e+01 : f32
    %895 = vector.broadcast %cst_323 : f32 to vector<16x1xf32>
    %896 = arith.divf %894, %895 : vector<16x1xf32>
    %897 = vector.broadcast %889 : vector<16x1xf32> to vector<16x64xf32>
    %898 = arith.subf %885, %897 : vector<16x64xf32>
    %cst_324 = arith.constant 9.99999974E-6 : f32
    %899 = vector.broadcast %cst_324 : f32 to vector<16x1xf32>
    %900 = arith.addf %896, %899 : vector<16x1xf32>
    %901 = math.rsqrt %900 : vector<16x1xf32>
    %902 = vector.broadcast %901 : vector<16x1xf32> to vector<16x64xf32>
    %903 = arith.mulf %898, %902 : vector<16x64xf32>
    %c22 = arith.constant 22 : index
    %c0_325 = arith.constant 0 : index
    %904 = vector.load %arg9[%c22, %c0_325] : memref<35x64xf32, #tpu.memory_space<vmem>>, vector<1x64xf32>
    %905 = vector.broadcast %904 : vector<1x64xf32> to vector<16x64xf32>
    %906 = arith.mulf %903, %905 : vector<16x64xf32>
    %c34 = arith.constant 34 : index
    %c0_326 = arith.constant 0 : index
    %907 = vector.load %arg9[%c34, %c0_326] : memref<35x64xf32, #tpu.memory_space<vmem>>, vector<1x64xf32>
    %908 = vector.broadcast %907 : vector<1x64xf32> to vector<16x64xf32>
    %909 = arith.addf %906, %908 : vector<16x64xf32>
    %c0_327 = arith.constant 0 : index
    %c0_328 = arith.constant 0 : index
    %910 = vector.load %arg10[%c0_327, %c0_328] : memref<65x1xf32, #tpu.memory_space<vmem>>, vector<64x1xf32>
    %cst_329 = arith.constant dense<0.000000e+00> : vector<16x1xf32>
    %911 = tpu.matmul %909, %910, %cst_329 {dimension_numbers = #tpu.dot_dimension_numbers<[1], [0], [0], [1], [0, 0, 1, 1], [], []>} : vector<16x64xf32>, vector<64x1xf32>, vector<16x1xf32> -> vector<16x1xf32>
    %c64 = arith.constant 64 : index
    %c0_330 = arith.constant 0 : index
    %912 = vector.load %arg10[%c64, %c0_330] : memref<65x1xf32, #tpu.memory_space<vmem>>, vector<1x1xf32>
    %913 = vector.broadcast %912 : vector<1x1xf32> to vector<16x1xf32>
    %914 = arith.addf %911, %913 : vector<16x1xf32>
    %c0_331 = arith.constant 0 : index
    %c0_332 = arith.constant 0 : index
    %915 = vector.load %arg11[%c0_331, %c0_332] : memref<16x1xf32, #tpu.memory_space<vmem>>, vector<16x1xf32>
    tpu.vector_store %arg11[%c0_331, %c0_332], %914 {strides = array<i32>} : memref<16x1xf32, #tpu.memory_space<vmem>>, vector<16x1xf32>,
    return
  }
}

</mosaic_0001>

<bundles_post_ra>
// kernel: _lambda_.1
= control target key start
LH: loop header
LB: loop body
LE: loop exit
PB: predicated region body
PF: predicated region fallthrough
CT: control target
= control target key end

     0   :  { %16 = vsyncpa [#allocation3], 0  ;;  %s14949_s0 = inlined_call_operand.vmem [shape: f32[32,9], index: 0, kind: input, shape index: {}]   ;;  %s14950_s1 = inlined_call_operand.vmem [shape: f32[32,64], index: 1, kind: input, shape index: {}]   ;;  %s14951_s2 = inlined_call_operand.vmem [shape: f32[9,64], index: 2, kind: input, shape index: {}]   ;;  %s14952_s3 = inlined_call_operand.hbm [shape: f32[6,64,192], index: 3, kind: input, shape index: {}]   ;;  %s14953_s4 = inlined_call_operand.vmem [shape: f32[6,192], index: 4, kind: input, shape index: {}]   ;;  %s14954_s5 = inlined_call_operand.hbm [shape: f32[6,64,64], index: 5, kind: input, shape index: {}]   ;;  %s14955_s6 = inlined_call_operand.hbm [shape: f32[4,64,128], index: 6, kind: input, shape index: {}]   ;;  %s14956_s7 = inlined_call_operand.vmem [shape: f32[4,128], index: 7, kind: input, shape index: {}]   ;;  %s14957_s8 = inlined_call_operand.hbm [shape: f32[4,128,64], index: 8, kind: input, shape index: {}]   ;;  %s14958_s9 = inlined_call_operand.vmem [shape: f32[35,64], index: 9, kind: input, shape index: {}]   ;;  %s14959_s10 = inlined_call_operand.vmem [shape: f32[65,1], index: 10, kind: input, shape index: {}]   ;;  %s14960_s11 = inlined_call_operand.vmem [shape: f32[16,1], index: 11, kind: output, shape index: {}]  }
   0x1   :  { %17 = vsyncpa [#allocation5], 0 }
   0x2   :  { %18 = vsyncpa [#allocation8], 0  ;;  %s13356_s17 = smov [#allocation4]   ;;  %s13262_s21 = scalar_lea.hbm %s14954_s5, 6144 }
   0x3   :  { %s44_s18 = sshll.u32 %s13356_s17, 4  ;;  %p13263_p0 = scmp.ne.s32.totalorder %s14954_s5, %s13262_s21  ;;  %s45_s18 = int_to_ptr.vmem [resolvable:$true] %s44_s18 }
   0x4   :  { %p13266_p1 = scmp.lt.u32.totalorder %s13262_s21, %s14954_s5 }
   0x6   :  { %p13268_p2 = pnand %p13266_p1, %p13263_p0 }
   0x8   :  { %13271 = shalt.err (!%p13268_p2)
}
   0x9   :  { %s13272_s26 = scalar_lea.vmem %s45_s18, 6144  ;;  %p13277_p4 = scmp.lt.s32.totalorder %s45_s18, %s45_s18 }
   0xa   :  { %p13273_p3 = scmp.ne.s32.totalorder %s45_s18, %s13272_s26  ;;  %p13278_p5 = scmp.lt.s32.totalorder %s13272_s26, %s13272_s26 }
   0xc   :  { %p13279_p6 = por %p13278_p5, %p13277_p4 }
   0xe   :  { %p13280_p7 = pnand %p13279_p6, %p13273_p3 }
  0x10   :  { %13283 = shalt.err (!%p13280_p7)
}
  0x11   :  { %s13357_s27 = smov 128   ;;  %s13358_s28 = smov 8  }
  0x12   :  { %50 = dma.hbm_to_vmem [thread:$0]  %s14954_s5, 6144, %s45_s18, [#allocation5], %s13357_s27, %s13357_s27, %s13358_s28  }
  0x13   :  { %s13359_s12 = smov [#allocation2]   ;;  %s13284_s16 = scalar_lea.hbm %s14952_s3, 12288 }
  0x14   :  { %s30_s13 = sshll.u32 %s13359_s12, 4  ;;  %p13285_p8 = scmp.ne.s32.totalorder %s14952_s3, %s13284_s16  ;;  %s31_s13 = int_to_ptr.vmem [resolvable:$true] %s30_s13 }
  0x15   :  { %p13288_p9 = scmp.lt.u32.totalorder %s13284_s16, %s14952_s3 }
  0x17   :  { %p13290_p10 = pnand %p13288_p9, %p13285_p8 }
  0x19   :  { %13293 = shalt.err (!%p13290_p10)
}
  0x1a   :  { %s13294_s22 = scalar_lea.vmem %s31_s13, 12288  ;;  %p13299_p12 = scmp.lt.s32.totalorder %s31_s13, %s31_s13 }
  0x1b   :  { %p13295_p11 = scmp.ne.s32.totalorder %s31_s13, %s13294_s22  ;;  %p13300_p13 = scmp.lt.s32.totalorder %s13294_s22, %s13294_s22 }
  0x1d   :  { %p13301_p0 = por %p13300_p13, %p13299_p12 }
  0x1f   :  { %p13302_p1 = pnand %p13301_p0, %p13295_p11 }
  0x21   :  { %13305 = shalt.err (!%p13302_p1)
}
  0x22   :  { %s13360_s5 = smov 256   ;;  %s13361_s18 = smov 16  }
  0x23   :  { %36 = dma.hbm_to_vmem [thread:$0]  %s14952_s3, 12288, %s31_s13, [#allocation3], %s13360_s5, %s13360_s5, %s13361_s18  }
  0x24   :  { %s13362_s25 = smov [#allocation6]   ;;  %s13363_s29 = smov [#allocation7]  }
  0x25   :  { %s56_s26 = sshll.u32 %s13362_s25, 4  ;;  %s70_s30 = sshll.u32 %s13363_s29, 4  ;;  %s57_s26 = int_to_ptr.vmem [resolvable:$true] %s56_s26  ;;  %s13461_s30 = int_to_ptr.vmem [resolvable:$true] %s70_s30 }
  0x26   :  { %s13306_s15 = scalar_lea.hbm %s14955_s6, 4096 }
  0x27   :  { %p13307_p2 = scmp.ne.s32.totalorder %s14955_s6, %s13306_s15  ;;  %p13310_p3 = scmp.lt.u32.totalorder %s13306_s15, %s14955_s6 }
  0x29   :  { %p13312_p4 = pnand %p13310_p3, %p13307_p2 }
  0x2b   :  { %13315 = shalt.err (!%p13312_p4)
}
  0x2c   :  { %s13316_s3 = scalar_lea.vmem %s57_s26, 4096  ;;  %p13321_p6 = scmp.lt.s32.totalorder %s57_s26, %s57_s26 }
  0x2d   :  { %p13317_p5 = scmp.ne.s32.totalorder %s57_s26, %s13316_s3  ;;  %p13322_p7 = scmp.lt.s32.totalorder %s13316_s3, %s13316_s3 }
  0x2f   :  { %p13323_p8 = por %p13322_p7, %p13321_p6 }
  0x31   :  { %p13324_p9 = pnand %p13323_p8, %p13317_p5 }
  0x33   :  { %13327 = shalt.err (!%p13324_p9)
}
  0x34   :  { %62 = dma.hbm_to_vmem [thread:$0]  %s14955_s6, 4096, %s57_s26, [#allocation5], %s13357_s27, %s13357_s27, %s13358_s28  }
  0x35   :  { %s13328_s23 = scalar_lea.hbm %s14957_s8, 8192 }
  0x36   :  { %p13329_p10 = scmp.ne.s32.totalorder %s14957_s8, %s13328_s23  ;;  %p13332_p11 = scmp.lt.u32.totalorder %s13328_s23, %s14957_s8 }
  0x38   :  { %p13334_p12 = pnand %p13332_p11, %p13329_p10 }
  0x3a   :  { %13337 = shalt.err (!%p13334_p12)
}
  0x3b   :  { %s13338_s14 = scalar_lea.vmem %s13461_s30, 8192  ;;  %p13343_p0 = scmp.lt.s32.totalorder %s13461_s30, %s13461_s30 }
  0x3c   :  { %p13339_p13 = scmp.ne.s32.totalorder %s13461_s30, %s13338_s14  ;;  %p13344_p1 = scmp.lt.s32.totalorder %s13338_s14, %s13338_s14 }
  0x3e   :  { %p13345_p2 = por %p13344_p1, %p13343_p0 }
  0x40   :  { %p13346_p3 = pnand %p13345_p2, %p13339_p13 }
  0x42   :  { %13349 = shalt.err (!%p13346_p3)
}
  0x43   :  { %76 = dma.hbm_to_vmem [thread:$0]  %s14957_s8, 8192, %s13461_s30, [#allocation8], %s13357_s27, %s13357_s27, %s13358_s28  }
  0x44   :  { %13350 = dma.done.wait [#allocation3], 12288  }
  0x45   :  { %13351 = vsyncadd [#allocation3], 4294955008 }
  0x46   :  { %13352 = dma.done.wait [#allocation5], 10240  }
  0x47   :  { %13353 = vsyncadd [#allocation5], 4294957056 }
  0x48   :  { %13354 = dma.done.wait [#allocation8], 8192  }
  0x49   :  { %13355 = vsyncadd [#allocation8], 4294959104  ;;  %vm117_vm0 = vcmask 1040384   ;;  %vm104_vm1 = vcmask 72704   ;;  %vm13364_vm2 = vmmov 1   ;;  %v97_v0 = vld [vmem:[%s14951_s2] sm:$0xff]  ;;  %v232_v43 = vlaneseq }
  0x4a   :  { %vm12567_vm3 = vmpackc.low %vm117_vm0, %vm13364_vm2  ;;  %v98_v1 = vld [vmem:[%s14951_s2 + $0x8] sm:$0x1]  ;;  %v93_v2 = vld [vmem:[%s14949_s0] sm:$0xff]  ;;  %v13365_v31 = vmov 0.0   ;;  %vm242_vm4 = vcmask 523264   ;;  %vm13366_vm5 = vmmov 0  }
  0x4b   :  { %v12566_v3 = vpack.c.bf16 %v98_v1, %v97_v0  ;;  %11731 = vmatprep.mubr.msk.f32.mxu1 %vm104_vm1, %v93_v2  ;;  %v215_v4 = vld [vmem:[#allocation2 + $0x8] sm:$0xff]  ;;  %v217_v5 = vld [vmem:[#allocation2 + $0x18] sm:$0xff]  ;;  %v214_v7 = vld [vmem:[#allocation2] sm:$0xff]  ;;  %11737 = vmatprep.subr.mxu0 %v13365_v31  ;;  %v233_v44 = vshrl.u32 %v232_v43, 7  ;;  %s13367_s12 = smov 64   ;;  %vm329_vm6 = vcmask 130048  }
  0x4c   :  { %v12572_v6 = vpack.c.bf16 %v217_v5, %v215_v4  ;;  %v216_v8 = vld [vmem:[#allocation2 + $0x10] sm:$0xff]  ;;  %v219_v9 = vld [vmem:[#allocation2 + $0x28] sm:$0xff]  ;;  %v221_v10 = vld [vmem:[#allocation2 + $0x38] sm:$0xff]  ;;  %11739 = vmatprep.mubr.msk.f32.mxu0 %vm13366_vm5, %v13365_v31  ;;  %vm483_vm7 = vcmask 64512   ;;  %s13368_s14 = smov 48   ;;  %s13369_s6 = smov 112  }
  0x4d   :  { %12568 = vmatprep.subr.msk.bf16.mxu1 %vm12567_vm3, %v12566_v3  ;;  %v94_v11 = vld [vmem:[%s14949_s0 + $0x8] sm:$0xff]  ;;  %v12574_v12 = vpack.c.bf16 %v216_v8, %v214_v7  ;;  %v12576_v13 = vpack.c.bf16 %v221_v10, %v219_v9  ;;  %v218_v14 = vld [vmem:[#allocation2 + $0x20] sm:$0xff]  ;;  %v220_v15 = vld [vmem:[#allocation2 + $0x30] sm:$0xff]  ;;  %v13549_v45 = vsub.s32 0, %v233_v44  ;;  %v13555_v49 = vsub.s32 1, %v233_v44  ;;  %s13370_s26 = smov 32  }
  0x4e   :  { %12571 = vmatpush3.bf16.msk.msra.mxu1 %vm12567_vm3, %v12566_v3  ;;  %v223_v16 = vld [vmem:[#allocation2 + $0x48] sm:$0xff]  ;;  %v225_v17 = vld [vmem:[#allocation2 + $0x58] sm:$0xff]  ;;  %v12578_v18 = vpack.c.bf16 %v220_v15, %v218_v14  ;;  %v222_v20 = vld [vmem:[#allocation2 + $0x40] sm:$0xff]  ;;  %s13371_s15 = smov 96   ;;  %s13372_s16 = smov 80   ;;  %vm1679_vm8 = vcmask 392192  }
  0x4f   :  { %12573 = vmatprep.subr.bf16.mxu1 %v12572_v6  ;;  %v12580_v19 = vpack.c.bf16 %v225_v17, %v223_v16  ;;  %v224_v21 = vld [vmem:[#allocation2 + $0x50] sm:$0xff]  ;;  %v227_v24 = vld [vmem:[#allocation2 + $0x68] sm:$0xff]  ;;  %v229_v25 = vld [vmem:[#allocation2 + $0x78] sm:$0xff]  ;;  %vm1676_vm9 = vcmask 261120   ;;  %vm11105_vm10 = vcmask 7168  }
  0x50   :  { %v12582_v22 = vpack.c.bf16 %v224_v21, %v222_v20  ;;  %v95_v23 = vld [vmem:[%s14949_s0 + $0x10] sm:$0xff]  ;;  %v96_v26 = vld [vmem:[%s14949_s0 + $0x18] sm:$0xff]  ;;  %v12584_v27 = vpack.c.bf16 %v229_v25, %v227_v24  ;;  %v226_v28 = vld [vmem:[#allocation2 + $0x60] sm:$0xff] }
  0x51   :  { %11732 = vmatmul.mubr.msk.f32.vlgmr.msra.gmra.mrb[0].mxu1 %vm104_vm1, %v94_v11  ;;  %v228_v29 = vld [vmem:[#allocation2 + $0x70] sm:$0xff]  ;;  %v11115_v32 = vld [vmem:[%s14958_s9] ss:$0 sm:$0xff]  ;;  %v207_v39 = vld [vmem:[%s14950_s1 + $0x8] sm:$0xff] }
  0x52   :  { %12575 = vmatpush1.bf16.msra.mxu1 %v12574_v12  ;;  %11734 = vmatprep.mubr.msk.f32.mxu1 %vm104_vm1, %v95_v23  ;;  %v12586_v30 = vpack.c.bf16 %v228_v29, %v226_v28  ;;  %v206_v35 = vld [vmem:[%s14950_s1] sm:$0xff] }
  0x53   :  { %12577 = vmatprep.subr.bf16.mxu1 %v12576_v13  ;;  %v230_v46 = vld [vmem:[%s14953_s4] ss:$8 sm:$0x3] }
  0x54   :  { %v235_v47 = vrot.slane %v230_v46, %v13549_v45  ;;  %v239_v52 = vrot.slane %v230_v46, %v13555_v49 }
  0x55   :  { %11735 = vmatmul.mubr.msk.f32.gmra.mrb[2].mxu1 %vm104_vm1, %v96_v26 }
  0x56   :  { %12579 = vmatpush1.bf16.msra.mxu1 %v12578_v18  ;;  %313 = vmatprep.mubr.f32.mxu1 %v13365_v31 }
  0x57   :  { %12581 = vmatprep.subr.bf16.mxu1 %v12580_v19 }
  0x5a   :  { %12583 = vmatpush1.bf16.msra.mxu1 %v12582_v22 }
  0x5b   :  { %12585 = vmatprep.subr.bf16.mxu1 %v12584_v27 }
  0x5e   :  { %12587 = vmatpush1.bf16.msra.mxu1 %v12586_v30 }
  0x5f   :  { %11757 = vmatprep.subr.mxu1 %v13365_v31 }
 0x124   :  { %v11733_v33 = vpop.f32.mrb[0].mxu1 }
 0x125   :  { %v187_v34 = vpop.f32.mrb[1].mxu1  ;;  %v193_v37 = vadd.f32 %v11733_v33, %v11115_v32 }
 0x126   :  { %v188_v36 = vadd.f32 %v11115_v32, %v187_v34 }
 0x127   :  { %v13537_v40 = vadd.f32 %v207_v39, %v193_v37 }
 0x128   :  { %v13529_v38 = vadd.f32 %v206_v35, %v188_v36  ;;  %v13541_v41 = vpop.f32.mrb[2].mxu1 }
 0x129   :  { %v13543_v42 = vpop.f32.mrb[3].mxu1 }
 0x12a   :  { %11121 = vmatmul.mubr.msk.f32.vlgmr.msra.gmra.mrb[4].mxu1 %vm242_vm4, %v13529_v38 }
 0x12b   :  { %319 = vmatprep.mubr.f32.mxu1 %v13365_v31 }
 0x12e   :  { %11122 = vmatmul.mubr.msk.f32.gmra.mrb[6].mxu1 %vm242_vm4, %v13537_v40 }
 0x12f   :  { %11759 = vmatprep.mubr.msk.f32.mxu1 %vm13366_vm5, %v13365_v31 }
 0x1fd   :  { %v315_v48 = vpop.f32.mrb[4].mxu1 }
 0x1fe   :  { %v13557_v50 = vadd.f32 %v315_v48, %v235_v47  ;;  %v317_v51 = vpop.f32.mrb[5].mxu1 }
 0x1ff   :  { %v13576_v59 = vadd.f32 %v317_v51, %v239_v52 }
 0x200   :  { %327 = vrot.lane.b32.xlu0 %v13557_v50, %s13367_s12 }
 0x201   :  { %v321_v53 = vpop.f32.mrb[6].mxu1 }
 0x202   :  { %v13562_v54 = vadd.f32 %v321_v53, %v235_v47  ;;  %v323_v55 = vpop.f32.mrb[7].mxu1 }
 0x203   :  { %v13564_v56 = vadd.f32 %v323_v55, %v239_v52 }
 0x204   :  { %405 = vrot.lane.b32.xlu0 %v13562_v54, %s13367_s12 }
 0x272   :  { %v328_v57 = vpop.permute.xlu0 %327 }
 0x273   :  { %11738 = vmatpush3.xpose.msk.msra.mxu0 %vm329_vm6, %v328_v57 }
 0x274   :  { %11742 = vmatprep.subr.mxu0 %v13365_v31 }
 0x276   :  { %11740 = vmatmul.mubr.msk.f32.vlgmr.msra.gmra.mrb[0].mxu0 %vm329_vm6, %v13557_v50  ;;  %v406_v58 = vpop.permute.xlu0 %405 }
 0x277   :  { %11743 = vmatpush3.xpose.msk.msra.mxu0 %vm329_vm6, %v406_v58  ;;  %11744 = vmatprep.mubr.msk.f32.mxu0 %vm13366_vm5, %v13365_v31 }
 0x278   :  { %11747 = vmatprep.subr.mxu0 %v13365_v31 }
 0x27a   :  { %11745 = vmatmul.mubr.msk.f32.vlgmr.msra.gmra.mrb[2].mxu0 %vm329_vm6, %v13562_v54 }
 0x27b   :  { %11748 = vmatpush3.msra.mxu0 %v13576_v59  ;;  %11749 = vmatprep.mubr.msk.f32.mxu0 %vm13366_vm5, %v13365_v31 }
 0x27c   :  { %11752 = vmatprep.subr.mxu0 %v13365_v31 }
 0x349   :  { %v400_v60 = vpop.f32.mrb[0].mxu0 }
 0x34a   :  { %v481_v61 = vmul.f32 0.25, %v400_v60  ;;  %v11741_v62 = vpop.f32.mrb[1].mxu0 }
 0x34c   :  { %v484_v63 = vsel %vm483_vm7, %v481_v61, -inf }
 0x34d   :  { %485 = vmax.xlane.f32.xlu1 %v484_v63  ;;  %v477_v0 = vpop.f32.mrb[2].mxu0 }
 0x34e   :  { %v482_v1 = vmul.f32 0.25, %v477_v0  ;;  %v11746_v2 = vpop.f32.mrb[3].mxu0 }
 0x350   :  { %v487_v3 = vsel %vm483_vm7, %v482_v1, -inf }
 0x351   :  { %488 = vmax.xlane.f32.xlu1 %v487_v3 }
 0x362   :  { %654 = vrot.lane.b32.xlu1 %v13557_v50, %s13368_s14 }
 0x366   :  { %732 = vrot.lane.b32.xlu1 %v13562_v54, %s13368_s14 }
 0x36a   :  { %652 = vrot.lane.b32.xlu1 %v13557_v50, %s13369_s6 }
 0x3da   :  { %v486_v4 = vpop.xlane.xlu1 %485 }
 0x3db   :  { %v490_v5 = vsub.f32 %v481_v61, %v486_v4 }
 0x3dd   :  { %v492_v6 = vmul.f32 1.442695, %v490_v5 }
 0x3de   :  { %v489_v7 = vpop.xlane.xlu1 %488 }
 0x3df   :  { %13021 = vpow2.f32 %v492_v6  ;;  %v491_v8 = vsub.f32 %v482_v1, %v489_v7 }
 0x3e1   :  { %v494_v9 = vmul.f32 1.442695, %v491_v8 }
 0x3e2   :  { %v655_v10 = vpop.permute.xlu1 %654 }
 0x3e3   :  { %13023 = vpow2.f32 %v494_v9  ;;  %11758 = vmatpush3.xpose.msk.msra.mxu1 %vm329_vm6, %v655_v10 }
 0x3e4   :  { %11767 = vmatprep.subr.mxu1 %v13365_v31 }
 0x3e6   :  { %v733_v11 = vpop.permute.xlu1 %732 }
 0x3e9   :  { %v13022_v12 = vpop.eup %13021 }
 0x3ea   :  { %v653_v13 = vpop.permute.xlu1 %652  ;;  %v496_v14 = vsel %vm483_vm7, %v13022_v12, 0.0 }
 0x3eb   :  { %497 = vadd.xlane.f32.xlu0 %v496_v14  ;;  %11760 = vmatmul.mubr.msk.f32.vlgmr.msra.gmra.mrb[8].mxu1 %vm329_vm6, %v653_v13 }
 0x3ec   :  { %11769 = vmatprep.mubr.msk.f32.mxu1 %vm13366_vm5, %v13365_v31 }
 0x3ed   :  { %v13024_v15 = vpop.eup %13023 }
 0x3ee   :  { %v499_v16 = vsel %vm483_vm7, %v13024_v15, 0.0 }
 0x3ef   :  { %500 = vadd.xlane.f32.xlu1 %v499_v16 }
 0x400   :  { %730 = vrot.lane.b32.xlu1 %v13562_v54, %s13369_s6 }
 0x478   :  { %v498_v17 = vpop.xlane.xlu0 %497 }
 0x479   :  { %13025 = vrcp.f32 %v498_v17 }
 0x47c   :  { %v501_v18 = vpop.xlane.xlu1 %500 }
 0x47d   :  { %13027 = vrcp.f32 %v501_v18 }
 0x480   :  { %v731_v23 = vpop.permute.xlu1 %730 }
 0x483   :  { %v13026_v19 = vpop.eup %13025 }
 0x484   :  { %v503_v20 = vmul.f32 %v13026_v19, %v13022_v12 }
 0x486   :  { %11750 = vmatmul.mubr.msk.f32.vlgmr.msra.gmra.mrb[4].mxu0 %vm483_vm7, %v503_v20 }
 0x487   :  { %v13028_v21 = vpop.eup %13027  ;;  %11753 = vmatpush3.msra.mxu0 %v13564_v56  ;;  %11754 = vmatprep.mubr.msk.f32.mxu0 %vm13366_vm5, %v13365_v31 }
 0x488   :  { %v505_v22 = vmul.f32 %v13028_v21, %v13024_v15  ;;  %11762 = vmatprep.subr.mxu0 %v13365_v31 }
 0x48a   :  { %11755 = vmatmul.mubr.msk.f32.vlgmr.msra.gmra.mrb[6].mxu0 %vm483_vm7, %v505_v22 }
 0x48b   :  { %11764 = vmatprep.mubr.msk.f32.mxu0 %vm13366_vm5, %v13365_v31 }
 0x48e   :  { %11763 = vmatpush3.xpose.msk.msra.mxu0 %vm329_vm6, %v733_v11 }
 0x48f   :  { %11772 = vmatprep.subr.mxu0 %v13365_v31 }
 0x491   :  { %11765 = vmatmul.mubr.msk.f32.vlgmr.msra.gmra.mrb[8].mxu0 %vm329_vm6, %v731_v23 }
 0x492   :  { %11774 = vmatprep.mubr.msk.f32.mxu0 %vm13366_vm5, %v13365_v31 }
 0x4be   :  { %v726_v24 = vpop.f32.mrb[8].mxu1 }
 0x4bf   :  { %v808_v25 = vmul.f32 0.25, %v726_v24  ;;  %v11761_v26 = vpop.f32.mrb[9].mxu1 }
 0x4c1   :  { %v810_v27 = vsel %vm483_vm7, %v808_v25, -inf }
 0x4c2   :  { %811 = vmax.xlane.f32.xlu0 %v810_v27 }
 0x54f   :  { %v812_v28 = vpop.xlane.xlu0 %811 }
 0x550   :  { %v816_v29 = vsub.f32 %v808_v25, %v812_v28 }
 0x552   :  { %v818_v30 = vmul.f32 1.442695, %v816_v29 }
 0x554   :  { %13029 = vpow2.f32 %v818_v30 }
 0x559   :  { %v13615_v32 = vpop.f32.mrb[4].mxu0 }
 0x55a   :  { %v11751_v33 = vpop.f32.mrb[5].mxu0 }
 0x55d   :  { %v13617_v34 = vpop.f32.mrb[6].mxu0 }
 0x55e   :  { %v13030_v35 = vpop.eup %13029  ;;  %v11756_v36 = vpop.f32.mrb[7].mxu0 }
 0x55f   :  { %v822_v37 = vsel %vm483_vm7, %v13030_v35, 0.0 }
 0x560   :  { %823 = vadd.xlane.f32.xlu0 %v822_v37 }
 0x564   :  { %v804_v39 = vpop.f32.mrb[8].mxu0 }
 0x565   :  { %v809_v43 = vmul.f32 0.25, %v804_v39  ;;  %v11766_v44 = vpop.f32.mrb[9].mxu0 }
 0x567   :  { %v813_v46 = vsel %vm483_vm7, %v809_v43, -inf }
 0x568   :  { %814 = vmax.xlane.f32.xlu1 %v813_v46 }
 0x576   :  { %833 = vrot.lane.b32.xlu0 %v13576_v59, %s13369_s6 }
 0x579   :  { %1066 = vrot.lane.b32.xlu1 %v13562_v54, %s13370_s26 }
 0x57a   :  { %910 = vrot.lane.b32.xlu0 %v13564_v56, %s13369_s6 }
 0x57e   :  { %988 = vrot.lane.b32.xlu0 %v13557_v50, %s13370_s26 }
 0x582   :  { %986 = vrot.lane.b32.xlu0 %v13557_v50, %s13371_s15 }
 0x5ed   :  { %v824_v47 = vpop.xlane.xlu0 %823 }
 0x5ee   :  { %13031 = vrcp.f32 %v824_v47 }
 0x5f1   :  { %v834_v48 = vpop.permute.xlu0 %833 }
 0x5f2   :  { %11768 = vmatpush3.msra.mxu1 %v834_v48 }
 0x5f3   :  { %11777 = vmatprep.subr.mxu1 %v13365_v31 }
 0x5f5   :  { %v815_v51 = vpop.xlane.xlu1 %814  ;;  %v911_v52 = vpop.permute.xlu0 %910 }
 0x5f6   :  { %v817_v53 = vsub.f32 %v809_v43, %v815_v51  ;;  %11773 = vmatpush3.msra.mxu0 %v911_v52 }
 0x5f7   :  { %11782 = vmatprep.subr.mxu0 %v13365_v31 }
 0x5f8   :  { %v13032_v55 = vpop.eup %13031  ;;  %v820_v57 = vmul.f32 1.442695, %v817_v53 }
 0x5f9   :  { %v989_v58 = vpop.permute.xlu0 %988  ;;  %v829_v60 = vmul.f32 %v13032_v55, %v13030_v35  ;;  %v1067_v3 = vpop.permute.xlu1 %1066 }
 0x5fa   :  { %13033 = vpow2.f32 %v820_v57 }
 0x5fb   :  { %11770 = vmatmul.mubr.msk.f32.vlgmr.msra.gmra.mrb[10].mxu1 %vm483_vm7, %v829_v60 }
 0x5fc   :  { %11778 = vmatpush3.xpose.msk.msra.mxu1 %vm329_vm6, %v989_v58  ;;  %11779 = vmatprep.mubr.msk.f32.mxu1 %vm13366_vm5, %v13365_v31 }
 0x5fd   :  { %v987_v61 = vpop.permute.xlu0 %986  ;;  %11787 = vmatprep.subr.mxu1 %v13365_v31 }
 0x5ff   :  { %11780 = vmatmul.mubr.msk.f32.vlgmr.msra.gmra.mrb[12].mxu1 %vm329_vm6, %v987_v61 }
 0x600   :  { %11789 = vmatprep.mubr.msk.f32.mxu1 %vm13366_vm5, %v13365_v31 }
 0x604   :  { %v13034_v62 = vpop.eup %13033 }
 0x605   :  { %v825_v63 = vsel %vm483_vm7, %v13034_v62, 0.0 }
 0x606   :  { %826 = vadd.xlane.f32.xlu0 %v825_v63 }
 0x61c   :  { %1064 = vrot.lane.b32.xlu0 %v13562_v54, %s13371_s15 }
 0x693   :  { %v827_v0 = vpop.xlane.xlu0 %826 }
 0x694   :  { %13035 = vrcp.f32 %v827_v0 }
 0x697   :  { %v1065_v4 = vpop.permute.xlu0 %1064 }
 0x69e   :  { %v13036_v1 = vpop.eup %13035 }
 0x69f   :  { %v831_v2 = vmul.f32 %v13036_v1, %v13034_v62 }
 0x6a1   :  { %11775 = vmatmul.mubr.msk.f32.vlgmr.msra.gmra.mrb[10].mxu0 %vm483_vm7, %v831_v2 }
 0x6a2   :  { %11783 = vmatpush3.xpose.msk.msra.mxu0 %vm329_vm6, %v1067_v3  ;;  %11784 = vmatprep.mubr.msk.f32.mxu0 %vm13366_vm5, %v13365_v31 }
 0x6a3   :  { %11792 = vmatprep.subr.mxu0 %v13365_v31 }
 0x6a5   :  { %11785 = vmatmul.mubr.msk.f32.vlgmr.msra.gmra.mrb[12].mxu0 %vm329_vm6, %v1065_v4 }
 0x6a6   :  { %11794 = vmatprep.mubr.msk.f32.mxu0 %vm13366_vm5, %v13365_v31 }
 0x6ce   :  { %v13652_v5 = vpop.f32.mrb[10].mxu1 }
 0x6cf   :  { %v11771_v6 = vpop.f32.mrb[11].mxu1 }
 0x6d2   :  { %v1060_v7 = vpop.f32.mrb[12].mxu1 }
 0x6d3   :  { %v1142_v8 = vmul.f32 0.25, %v1060_v7  ;;  %v11781_v9 = vpop.f32.mrb[13].mxu1 }
 0x6d5   :  { %v1144_v10 = vsel %vm483_vm7, %v1142_v8, -inf }
 0x6d6   :  { %1145 = vmax.xlane.f32.xlu0 %v1144_v10 }
 0x763   :  { %v1146_v11 = vpop.xlane.xlu0 %1145 }
 0x764   :  { %v1150_v12 = vsub.f32 %v1142_v8, %v1146_v11 }
 0x766   :  { %v1152_v13 = vmul.f32 1.442695, %v1150_v12 }
 0x768   :  { %13037 = vpow2.f32 %v1152_v13 }
 0x772   :  { %v13038_v14 = vpop.eup %13037 }
 0x773   :  { %v1156_v15 = vsel %vm483_vm7, %v13038_v14, 0.0 }
 0x774   :  { %v13656_v16 = vpop.f32.mrb[10].mxu0  ;;  %1157 = vadd.xlane.f32.xlu0 %v1156_v15 }
 0x775   :  { %v11776_v17 = vpop.f32.mrb[11].mxu0 }
 0x778   :  { %v1138_v18 = vpop.f32.mrb[12].mxu0 }
 0x779   :  { %v1143_v19 = vmul.f32 0.25, %v1138_v18  ;;  %v11786_v20 = vpop.f32.mrb[13].mxu0  ;;  %v1682_v18 = vld [vmem:[#allocation4] sm:$0xff] }
 0x77b   :  { %v1147_v21 = vsel %vm483_vm7, %v1143_v19, -inf }
 0x77c   :  { %1148 = vmax.xlane.f32.xlu1 %v1147_v21  ;;  %v1685_v21 = vld [vmem:[#allocation4 + $0x18] sm:$0xff] }
 0x78a   :  { %1166 = vrot.lane.b32.xlu0 %v13576_v59, %s13371_s15 }
 0x78d   :  { %1242 = vrot.lane.b32.xlu1 %v13564_v56, %s13371_s15 }
 0x78e   :  { %1398 = vrot.lane.b32.xlu0 %v13562_v54, %s13361_s18 }
 0x791   :  { %1320 = vrot.lane.b32.xlu1 %v13557_v50, %s13361_s18 }
 0x795   :  { %1318 = vrot.lane.b32.xlu1 %v13557_v50, %s13372_s16 }
 0x801   :  { %v1158_v22 = vpop.xlane.xlu0 %1157 }
 0x802   :  { %13039 = vrcp.f32 %v1158_v22  ;;  %v1686_v22 = vld [vmem:[#allocation4 + $0x20] sm:$0xff] }
 0x805   :  { %v1167_v23 = vpop.permute.xlu0 %1166 }
 0x806   :  { %11788 = vmatpush3.msra.mxu1 %v1167_v23  ;;  %v1687_v23 = vld [vmem:[#allocation4 + $0x28] sm:$0xff] }
 0x807   :  { %11797 = vmatprep.subr.mxu1 %v13365_v31 }
 0x809   :  { %v1149_v24 = vpop.xlane.xlu1 %1148  ;;  %v1399_v36 = vpop.permute.xlu0 %1398 }
 0x80a   :  { %v1151_v25 = vsub.f32 %v1143_v19, %v1149_v24  ;;  %v1683_v19 = vld [vmem:[#allocation4 + $0x8] sm:$0xff]  ;;  %v12596_v24 = vpack.c.bf16 %v1687_v23, %v1686_v22  ;;  %v1921_v23 = vld [vmem:[#allocation7 + $0x30] sm:$0xff] }
 0x80b   :  { %v12588_v20 = vpack.c.bf16 %v1683_v19, %v1682_v18  ;;  %v1917_v18 = vld [vmem:[#allocation7 + $0x10] sm:$0xff] }
 0x80c   :  { %v13040_v26 = vpop.eup %13039  ;;  %v1154_v27 = vmul.f32 1.442695, %v1151_v25  ;;  %v1688_v25 = vld [vmem:[#allocation4 + $0x30] sm:$0xff] }
 0x80d   :  { %v1243_v28 = vpop.permute.xlu1 %1242  ;;  %v1163_v29 = vmul.f32 %v13040_v26, %v13038_v14  ;;  %v1689_v26 = vld [vmem:[#allocation4 + $0x38] sm:$0xff] }
 0x80e   :  { %13041 = vpow2.f32 %v1154_v27  ;;  %11793 = vmatpush3.msra.mxu0 %v1243_v28  ;;  %v12600_v27 = vpack.c.bf16 %v1689_v26, %v1688_v25  ;;  %v1923_v26 = vld [vmem:[#allocation7 + $0x40] sm:$0xff] }
 0x80f   :  { %11790 = vmatmul.mubr.msk.f32.vlgmr.msra.gmra.mrb[14].mxu1 %vm483_vm7, %v1163_v29  ;;  %11802 = vmatprep.subr.mxu0 %v13365_v31 }
 0x810   :  { %11799 = vmatprep.mubr.msk.f32.mxu1 %vm13366_vm5, %v13365_v31 }
 0x811   :  { %v1321_v50 = vpop.permute.xlu1 %1320 }
 0x812   :  { %11798 = vmatpush3.xpose.msk.msra.mxu1 %vm329_vm6, %v1321_v50 }
 0x813   :  { %11807 = vmatprep.subr.mxu1 %v13365_v31 }
 0x815   :  { %v1319_v30 = vpop.permute.xlu1 %1318 }
 0x816   :  { %11800 = vmatmul.mubr.msk.f32.vlgmr.msra.gmra.mrb[16].mxu1 %vm329_vm6, %v1319_v30 }
 0x817   :  { %11809 = vmatprep.mubr.msk.f32.mxu1 %vm13366_vm5, %v13365_v31 }
 0x818   :  { %v13042_v33 = vpop.eup %13041 }
 0x819   :  { %v1159_v35 = vsel %vm483_vm7, %v13042_v33, 0.0 }
 0x81a   :  { %1160 = vadd.xlane.f32.xlu0 %v1159_v35 }
 0x830   :  { %1396 = vrot.lane.b32.xlu0 %v13562_v54, %s13372_s16 }
 0x8a7   :  { %v1161_v37 = vpop.xlane.xlu0 %1160 }
 0x8a8   :  { %13043 = vrcp.f32 %v1161_v37 }
 0x8ab   :  { %v1397_v44 = vpop.permute.xlu0 %1396 }
 0x8b2   :  { %v13044_v39 = vpop.eup %13043 }
 0x8b3   :  { %v1165_v43 = vmul.f32 %v13044_v39, %v13042_v33 }
 0x8b5   :  { %11795 = vmatmul.mubr.msk.f32.vlgmr.msra.gmra.mrb[14].mxu0 %vm483_vm7, %v1165_v43 }
 0x8b6   :  { %11803 = vmatpush3.xpose.msk.msra.mxu0 %vm329_vm6, %v1399_v36  ;;  %11804 = vmatprep.mubr.msk.f32.mxu0 %vm13366_vm5, %v13365_v31 }
 0x8b7   :  { %11812 = vmatprep.subr.mxu0 %v13365_v31 }
 0x8b9   :  { %11805 = vmatmul.mubr.msk.f32.vlgmr.msra.gmra.mrb[16].mxu0 %vm329_vm6, %v1397_v44 }
 0x8ba   :  { %11814 = vmatprep.mubr.msk.f32.mxu0 %vm13366_vm5, %v13365_v31 }
 0x8e2   :  { %v1238_v54 = vpop.f32.mrb[14].mxu1 }
 0x8e3   :  { %v11791_v46 = vpop.f32.mrb[15].mxu1 }
 0x8e9   :  { %v1392_v47 = vpop.f32.mrb[16].mxu1 }
 0x8ea   :  { %v1474_v48 = vmul.f32 0.25, %v1392_v47  ;;  %v11801_v51 = vpop.f32.mrb[17].mxu1  ;;  %v11147_v47 = vld [vmem:[%s14958_s9 + $0x1] ss:$0 sm:$0xff] }
 0x8ec   :  { %v1476_v52 = vsel %vm483_vm7, %v1474_v48, -inf }
 0x8ed   :  { %1477 = vmax.xlane.f32.xlu1 %v1476_v52 }
 0x97a   :  { %v1478_v53 = vpop.xlane.xlu1 %1477 }
 0x97b   :  { %v1482_v55 = vsub.f32 %v1474_v48, %v1478_v53 }
 0x97d   :  { %v1484_v57 = vmul.f32 1.442695, %v1482_v55 }
 0x97f   :  { %13045 = vpow2.f32 %v1484_v57 }
 0x988   :  { %v1314_v58 = vpop.f32.mrb[14].mxu0 }
 0x989   :  { %v11796_v60 = vpop.f32.mrb[15].mxu0  ;;  %v13046_v1 = vpop.eup %13045 }
 0x98a   :  { %v1488_v2 = vsel %vm483_vm7, %v13046_v1, 0.0 }
 0x98c   :  { %v1470_v61 = vpop.f32.mrb[16].mxu0 }
 0x98d   :  { %v1475_v62 = vmul.f32 0.25, %v1470_v61  ;;  %v11806_v63 = vpop.f32.mrb[17].mxu0 }
 0x98f   :  { %v1479_v0 = vsel %vm483_vm7, %v1475_v62, -inf }
 0x990   :  { %1480 = vmax.xlane.f32.xlu0 %v1479_v0 }
 0x994   :  { %1489 = vadd.xlane.f32.xlu0 %v1488_v2 }
 0x9aa   :  { %1498 = vrot.lane.b32.xlu0 %v13576_v59, %s13372_s16 }
 0x9ae   :  { %1654 = vrot.lane.b32.xlu0 %v13656_v16, %s13361_s18 }
 0x9b2   :  { %1662 = vrot.lane.b32.xlu0 %v1314_v58, %s13370_s26 }
 0xa1d   :  { %v1481_v3 = vpop.xlane.xlu0 %1480 }
 0xa1e   :  { %v1483_v4 = vsub.f32 %v1475_v62, %v1481_v3 }
 0xa20   :  { %v1486_v6 = vmul.f32 1.442695, %v1483_v4  ;;  %v1819_v4 = vld [vmem:[#allocation6] sm:$0xff] }
 0xa21   :  { %v1490_v7 = vpop.xlane.xlu0 %1489 }
 0xa22   :  { %13047 = vpow2.f32 %v1486_v6  ;;  %v1820_v6 = vld [vmem:[#allocation6 + $0x8] sm:$0xff] }
 0xa23   :  { %13049 = vrcp.f32 %v1490_v7  ;;  %v1821_v7 = vld [vmem:[#allocation6 + $0x10] sm:$0xff] }
 0xa25   :  { %v1499_v8 = vpop.permute.xlu0 %1498 }
 0xa26   :  { %11808 = vmatpush3.msra.mxu1 %v1499_v8  ;;  %v12604_v8 = vpack.c.bf16 %v1820_v6, %v1819_v4  ;;  %v11155_v4 = vld [vmem:[%s14958_s9 + $0x7] ss:$0 sm:$0xff] }
 0xa27   :  { %12589 = vmatprep.subr.bf16.mxu1 %v12588_v20 }
 0xa29   :  { %v1655_v39 = vpop.permute.xlu0 %1654 }
 0xa2a   :  { %v1675_v44 = vsel %vm329_vm6, %v13617_v34, %v1655_v39 }
 0xa2c   :  { %v13048_v9 = vpop.eup %13047 }
 0xa2d   :  { %v13050_v10 = vpop.eup %13049  ;;  %v1491_v11 = vsel %vm483_vm7, %v13048_v9, 0.0  ;;  %v1663_v43 = vpop.permute.xlu0 %1662 }
 0xa2e   :  { %1492 = vadd.xlane.f32.xlu1 %v1491_v11  ;;  %v1495_v12 = vmul.f32 %v13050_v10, %v13046_v1  ;;  %v1823_v11 = vld [vmem:[#allocation6 + $0x20] sm:$0xff] }
 0xa30   :  { %11810 = vmatmul.mubr.msk.f32.vlgmr.msra.gmra.mrb[18].mxu1 %vm483_vm7, %v1495_v12  ;;  %v1824_v12 = vld [vmem:[#allocation6 + $0x28] sm:$0xff] }
 0xa31   :  { %12591 = vmatpush3.bf16.msra.mxu1 %v12588_v20 }
 0xa3f   :  { %1574 = vrot.lane.b32.xlu1 %v13564_v56, %s13372_s16  ;;  %v1684_v56 = vld [vmem:[#allocation4 + $0x10] sm:$0xff] }
 0xa43   :  { %1652 = vrot.lane.b32.xlu1 %v13652_v5, %s13361_s18  ;;  %v12592_v5 = vpack.c.bf16 %v1685_v21, %v1684_v56  ;;  %v1918_v56 = vld [vmem:[#allocation7 + $0x18] sm:$0xff]  ;;  %v1919_v21 = vld [vmem:[#allocation7 + $0x20] sm:$0xff] }
 0xa44   :  { %v12624_v20 = vpack.c.bf16 %v1918_v56, %v1917_v18 }
 0xa45   :  { %12593 = vmatprep.subr.bf16.mxu1 %v12592_v5 }
 0xa46   :  { %12595 = vmatpush3.bf16.msra.mxu1 %v12592_v5  ;;  %v1920_v5 = vld [vmem:[#allocation7 + $0x28] sm:$0xff] }
 0xa47   :  { %1660 = vrot.lane.b32.xlu1 %v1238_v54, %s13370_s26  ;;  %12597 = vmatprep.subr.bf16.mxu1 %v12596_v24  ;;  %v1678_v54 = vsel %vm1676_vm9, %v1675_v44, %v1663_v43  ;;  %v12628_v22 = vpack.c.bf16 %v1920_v5, %v1919_v21  ;;  %v2055_v5 = vld [vmem:[#allocation2 + $0x88] sm:$0xff] }
 0xa4a   :  { %12599 = vmatpush3.bf16.msra.mxu1 %v12596_v24  ;;  %v1922_v24 = vld [vmem:[#allocation7 + $0x38] sm:$0xff] }
 0xa4b   :  { %12601 = vmatprep.subr.bf16.mxu1 %v12600_v27  ;;  %v12632_v25 = vpack.c.bf16 %v1922_v24, %v1921_v23  ;;  %v2054_v24 = vld [vmem:[#allocation2 + $0x80] sm:$0xff] }
 0xa4e   :  { %12603 = vmatpush3.bf16.msra.mxu1 %v12600_v27  ;;  %v1924_v27 = vld [vmem:[#allocation7 + $0x48] sm:$0xff] }
 0xabb   :  { %v1493_v59 = vpop.xlane.xlu1 %1492 }
 0xabc   :  { %13051 = vrcp.f32 %v1493_v59  ;;  %v12612_v59 = vpack.c.bf16 %v1824_v12, %v1823_v11 }
 0xabf   :  { %v1575_v13 = vpop.permute.xlu1 %1574 }
 0xac0   :  { %11813 = vmatpush3.msra.mxu0 %v1575_v13  ;;  %v1825_v13 = vld [vmem:[#allocation6 + $0x30] sm:$0xff] }
 0xac1   :  { %12605 = vmatprep.subr.bf16.mxu0 %v12604_v8 }
 0xac3   :  { %v1653_v28 = vpop.permute.xlu1 %1652 }
 0xac4   :  { %v1674_v50 = vsel %vm329_vm6, %v13615_v32, %v1653_v28  ;;  %v12636_v28 = vpack.c.bf16 %v1924_v27, %v1923_v26  ;;  %v2059_v27 = vld [vmem:[#allocation2 + $0xa8] sm:$0xff] }
 0xac6   :  { %v13052_v14 = vpop.eup %13051 }
 0xac7   :  { %v1497_v15 = vmul.f32 %v13052_v14, %v13048_v9  ;;  %v1661_v29 = vpop.permute.xlu1 %1660  ;;  %v1822_v9 = vld [vmem:[#allocation6 + $0x18] sm:$0xff] }
 0xac8   :  { %v1677_v30 = vsel %vm1676_vm9, %v1674_v50, %v1661_v29  ;;  %v12608_v10 = vpack.c.bf16 %v1822_v9, %v1821_v7  ;;  %v1826_v14 = vld [vmem:[#allocation6 + $0x38] sm:$0xff]  ;;  %v1925_v29 = vld [vmem:[#allocation7 + $0x50] sm:$0xff] }
 0xac9   :  { %11815 = vmatmul.mubr.msk.f32.vlgmr.msra.gmra.mrb[18].mxu0 %vm483_vm7, %v1497_v15  ;;  %v12616_v15 = vpack.c.bf16 %v1826_v14, %v1825_v13  ;;  %v1926_v50 = vld [vmem:[#allocation7 + $0x58] sm:$0xff] }
 0xaca   :  { %12607 = vmatpush3.bf16.msra.mxu0 %v12604_v8 }
 0xacb   :  { %12609 = vmatprep.subr.bf16.mxu0 %v12608_v10 }
 0xace   :  { %12611 = vmatpush3.bf16.msra.mxu0 %v12608_v10 }
 0xacf   :  { %12613 = vmatprep.subr.bf16.mxu0 %v12612_v59 }
 0xad2   :  { %12615 = vmatpush3.bf16.msra.mxu0 %v12612_v59 }
 0xad3   :  { %12617 = vmatprep.subr.bf16.mxu0 %v12616_v15 }
 0xad6   :  { %12619 = vmatpush3.bf16.msra.mxu0 %v12616_v15 }
 0xb03   :  { %v1570_v16 = vpop.f32.mrb[18].mxu1 }
 0xb04   :  { %1668 = vrot.lane.b32.xlu1 %v1570_v16, %s13368_s14  ;;  %v11811_v17 = vpop.f32.mrb[19].mxu1  ;;  %v1915_v16 = vld [vmem:[#allocation7] sm:$0xff] }
 0xb05   :  { %v1916_v17 = vld [vmem:[#allocation7 + $0x8] sm:$0xff] }
 0xb06   :  { %v12620_v19 = vpack.c.bf16 %v1916_v17, %v1915_v16 }
 0xb08   :  { %12621 = vmatprep.subr.bf16.mxu1 %v12620_v19 }
 0xb76   :  { %v1669_v33 = vpop.permute.xlu1 %1668 }
 0xb77   :  { %v1680_v35 = vsel %vm1679_vm8, %v1677_v30, %v1669_v33  ;;  %v12640_v30 = vpack.c.bf16 %v1926_v50, %v1925_v29  ;;  %v1927_v33 = vld [vmem:[#allocation7 + $0x60] sm:$0xff] }
 0xb78   :  { %11833 = vmatprep.mubr.msk.f32.mxu1 %vm242_vm4, %v1680_v35  ;;  %v1928_v35 = vld [vmem:[#allocation7 + $0x68] sm:$0xff]  ;;  %v2058_v50 = vld [vmem:[#allocation2 + $0xa0] sm:$0xff] }
 0xb9c   :  { %v1646_v36 = vpop.f32.mrb[18].mxu0 }
 0xb9d   :  { %1670 = vrot.lane.b32.xlu0 %v1646_v36, %s13368_s14  ;;  %v11816_v37 = vpop.f32.mrb[19].mxu0  ;;  %v12644_v36 = vpack.c.bf16 %v1928_v35, %v1927_v33  ;;  %v2063_v35 = vld [vmem:[#allocation2 + $0xc8] sm:$0xff] }
 0xc0f   :  { %v1671_v46 = vpop.permute.xlu0 %1670 }
 0xc10   :  { %v1681_v32 = vsel %vm1679_vm8, %v1678_v54, %v1671_v46 }
 0xc11   :  { %11834 = vmatmul.mubr.msk.f32.vlgmr.msra.gmra.mrb[20].mxu1 %vm242_vm4, %v1681_v32 }
 0xc12   :  { %12623 = vmatpush3.bf16.msra.mxu1 %v12620_v19 }
 0xc13   :  { %12625 = vmatprep.subr.bf16.mxu1 %v12624_v20 }
 0xc16   :  { %12627 = vmatpush3.bf16.msra.mxu1 %v12624_v20 }
 0xc17   :  { %12629 = vmatprep.subr.bf16.mxu1 %v12628_v22 }
 0xc1a   :  { %12631 = vmatpush3.bf16.msra.mxu1 %v12628_v22  ;;  %v2057_v22 = vld [vmem:[#allocation2 + $0x98] sm:$0xff] }
 0xc1b   :  { %12633 = vmatprep.subr.bf16.mxu1 %v12632_v25  ;;  %v12652_v23 = vpack.c.bf16 %v2057_v22, %v2055_v5 }
 0xc1d   :  { %12653 = vmatprep.subr.bf16.mxu0 %v12652_v23 }
 0xc1e   :  { %12635 = vmatpush3.bf16.msra.mxu1 %v12632_v25  ;;  %v2056_v25 = vld [vmem:[#allocation2 + $0x90] sm:$0xff] }
 0xc1f   :  { %12637 = vmatprep.subr.bf16.mxu1 %v12636_v28  ;;  %v12654_v26 = vpack.c.bf16 %v2056_v25, %v2054_v24 }
 0xc22   :  { %12639 = vmatpush3.bf16.msra.mxu1 %v12636_v28  ;;  %v2061_v28 = vld [vmem:[#allocation2 + $0xb8] sm:$0xff] }
 0xc23   :  { %12641 = vmatprep.subr.bf16.mxu1 %v12640_v30  ;;  %v12656_v29 = vpack.c.bf16 %v2061_v28, %v2059_v27 }
 0xc26   :  { %12643 = vmatpush3.bf16.msra.mxu1 %v12640_v30  ;;  %v2060_v30 = vld [vmem:[#allocation2 + $0xb0] sm:$0xff] }
 0xc27   :  { %12645 = vmatprep.subr.bf16.mxu1 %v12644_v36  ;;  %v12658_v33 = vpack.c.bf16 %v2060_v30, %v2058_v50 }
 0xc2a   :  { %12647 = vmatpush3.bf16.msra.mxu1 %v12644_v36  ;;  %v2065_v36 = vld [vmem:[#allocation2 + $0xd8] sm:$0xff] }
 0xce4   :  { %v11835_v48 = vpop.f32.mrb[20].mxu1 }
 0xce5   :  { %v1773_v51 = vadd.f32 %v11835_v48, %v11147_v47  ;;  %v1767_v52 = vpop.f32.mrb[21].mxu1 }
 0xce6   :  { %v1768_v53 = vadd.f32 %v11147_v47, %v1767_v52  ;;  %v11150_v47 = vld [vmem:[%s14958_s9 + $0xb] ss:$0 sm:$0xff] }
 0xce7   :  { %v1777_v55 = vadd.f32 %v1773_v51, %v13537_v40 }
 0xce8   :  { %v1776_v57 = vadd.f32 %v1768_v53, %v13529_v38 }
 0xce9   :  { %v1781_v34 = vsel %vm242_vm4, %v1777_v55, 0.0 }
 0xcea   :  { %1782 = vadd.xlane.f32.xlu0 %v1781_v34  ;;  %v1778_v58 = vsel %vm242_vm4, %v1776_v57, 0.0 }
 0xceb   :  { %1779 = vadd.xlane.f32.xlu1 %v1778_v58 }
 0xd77   :  { %v1783_v60 = vpop.xlane.xlu0 %1782 }
 0xd78   :  { %v1786_v61 = vmul.f32 0.015625, %v1783_v60  ;;  %v1780_v62 = vpop.xlane.xlu1 %1779  ;;  %v1929_v60 = vld [vmem:[#allocation7 + $0x70] sm:$0xff] }
 0xd79   :  { %v1785_v63 = vmul.f32 0.015625, %v1780_v62 }
 0xd7a   :  { %v13725_v0 = vsub.f32 %v1777_v55, %v1786_v61  ;;  %v11151_v55 = vld [vmem:[%s14958_s9 + $0x17] ss:$0 sm:$0xff]  ;;  %v1930_v61 = vld [vmem:[#allocation7 + $0x78] sm:$0xff] }
 0xd7b   :  { %v13727_v1 = vsub.f32 %v1776_v57, %v1785_v63  ;;  %v12648_v62 = vpack.c.bf16 %v1930_v61, %v1929_v60  ;;  %v11152_v63 = vld [vmem:[%s14956_s7] ss:$0 sm:$0xff] }
 0xd7c   :  { %v1790_v2 = vmul.f32 %v13725_v0, %v13725_v0 }
 0xd7d   :  { %v1789_v38 = vmul.f32 %v13727_v1, %v13727_v1  ;;  %12649 = vmatprep.subr.bf16.mxu1 %v12648_v62 }
 0xd7e   :  { %v1794_v40 = vsel %vm242_vm4, %v1790_v2, 0.0  ;;  %12651 = vmatpush3.bf16.msra.mxu1 %v12648_v62  ;;  %v11156_v62 = vld [vmem:[%s14958_s9 + $0xc] ss:$0 sm:$0xff] }
 0xd7f   :  { %1795 = vadd.xlane.f32.xlu1 %v1794_v40  ;;  %v1791_v3 = vsel %vm242_vm4, %v1789_v38, 0.0  ;;  %11905 = vmatprep.subr.mxu1 %v13365_v31 }
 0xd80   :  { %1792 = vadd.xlane.f32.xlu0 %v1791_v3 }
 0xe0c   :  { %v1796_v37 = vpop.xlane.xlu1 %1795 }
 0xe0d   :  { %v1798_v39 = vmul.f32 0.015625, %v1796_v37  ;;  %v1793_v43 = vpop.xlane.xlu0 %1792  ;;  %v12660_v37 = vpack.c.bf16 %v2065_v36, %v2063_v35 }
 0xe0e   :  { %v1797_v44 = vmul.f32 0.015625, %v1793_v43  ;;  %v2064_v43 = vld [vmem:[#allocation2 + $0xd0] sm:$0xff] }
 0xe0f   :  { %v1800_v54 = vadd.f32 1e-05, %v1798_v39  ;;  %v2062_v39 = vld [vmem:[#allocation2 + $0xc0] sm:$0xff] }
 0xe10   :  { %v1799_v46 = vadd.f32 1e-05, %v1797_v44  ;;  %v12662_v44 = vpack.c.bf16 %v2064_v43, %v2062_v39 }
 0xe11   :  { %13053 = vrsqrt.f32 %v1800_v54  ;;  %v2067_v54 = vld [vmem:[#allocation2 + $0xe8] sm:$0xff] }
 0xe12   :  { %13055 = vrsqrt.f32 %v1799_v46  ;;  %v2069_v46 = vld [vmem:[#allocation2 + $0xf8] sm:$0xff] }
 0xe1b   :  { %v13054_v32 = vpop.eup %13053 }
 0xe1c   :  { %v13056_v48 = vpop.eup %13055  ;;  %v1804_v51 = vmul.f32 %v13054_v32, %v13725_v0  ;;  %v2066_v32 = vld [vmem:[#allocation2 + $0xe0] sm:$0xff] }
 0xe1d   :  { %v1803_v52 = vmul.f32 %v13056_v48, %v13727_v1  ;;  %v2068_v48 = vld [vmem:[#allocation2 + $0xf0] sm:$0xff] }
 0xe1e   :  { %v1811_v53 = vmul.f32 %v11150_v47, %v1804_v51  ;;  %v12666_v51 = vpack.c.bf16 %v2068_v48, %v2066_v32 }
 0xe1f   :  { %v1810_v57 = vmul.f32 %v11150_v47, %v1803_v52  ;;  %v12664_v47 = vpack.c.bf16 %v2069_v46, %v2067_v54 }
 0xe20   :  { %v1818_v58 = vadd.f32 %v11151_v55, %v1811_v53 }
 0xe21   :  { %v1817_v34 = vadd.f32 %v11151_v55, %v1810_v57 }
 0xe23   :  { %11852 = vmatprep.mubr.msk.f32.mxu0 %vm242_vm4, %v1817_v34 }
 0xe24   :  { %11853 = vmatmul.mubr.msk.f32.vlgmr.msra.gmra.mrb[20].mxu0 %vm242_vm4, %v1818_v58 }
 0xe25   :  { %2153 = vmatprep.mubr.f32.mxu0 %v13365_v31  ;;  %12655 = vmatpush1.bf16.msra.mxu0 %v12654_v26 }
 0xe26   :  { %12657 = vmatprep.subr.bf16.mxu0 %v12656_v29 }
 0xe29   :  { %12659 = vmatpush1.bf16.msra.mxu0 %v12658_v33 }
 0xe2a   :  { %12661 = vmatprep.subr.bf16.mxu0 %v12660_v37 }
 0xe2d   :  { %12663 = vmatpush1.bf16.msra.mxu0 %v12662_v44 }
 0xe2e   :  { %12665 = vmatprep.subr.bf16.mxu0 %v12664_v47 }
 0xe31   :  { %12667 = vmatpush1.bf16.msra.mxu0 %v12666_v51 }
 0xe32   :  { %11890 = vmatprep.subr.mxu0 %v13365_v31 }
 0xef7   :  { %v11854_v0 = vpop.f32.mrb[20].mxu0 }
 0xef8   :  { %v1910_v1 = vadd.f32 %v11854_v0, %v11152_v63  ;;  %v1904_v2 = vpop.f32.mrb[21].mxu0 }
 0xef9   :  { %v1905_v38 = vadd.f32 %v11152_v63, %v1904_v2 }
 0xefa   :  { %v1914_v3 = vmax.f32 %v1910_v1, 0.0  ;;  %v11157_v1 = vld [vmem:[%s14958_s9 + $0x18] ss:$0 sm:$0xff] }
 0xefb   :  { %v1913_v40 = vmax.f32 %v1905_v38, 0.0 }
 0xefd   :  { %11887 = vmatprep.mubr.f32.mxu1 %v1913_v40 }
 0xefe   :  { %11888 = vmatmul.mubr.f32.vlgmr.msra.gmra.mrb[22].mxu1 %v1914_v3 }
 0xeff   :  { %11907 = vmatprep.mubr.msk.f32.mxu1 %vm13366_vm5, %v13365_v31 }
 0xfd1   :  { %v11889_v6 = vpop.f32.mrb[22].mxu1 }
 0xfd2   :  { %v2008_v7 = vadd.f32 %v11889_v6, %v11155_v4  ;;  %v2002_v8 = vpop.f32.mrb[23].mxu1 }
 0xfd3   :  { %v2003_v9 = vadd.f32 %v11155_v4, %v2002_v8  ;;  %v11158_v4 = vld [vmem:[%s14953_s4 + $0x1] ss:$8 sm:$0x3] }
 0xfd4   :  { %v2012_v10 = vadd.f32 %v2008_v7, %v1818_v58  ;;  %v2076_v6 = vrot.slane %v11158_v4, %v13549_v45  ;;  %v2080_v7 = vrot.slane %v11158_v4, %v13555_v49 }
 0xfd5   :  { %v2011_v11 = vadd.f32 %v2003_v9, %v1817_v34 }
 0xfd6   :  { %v2016_v12 = vsel %vm242_vm4, %v2012_v10, 0.0 }
 0xfd7   :  { %2017 = vadd.xlane.f32.xlu1 %v2016_v12  ;;  %v2013_v59 = vsel %vm242_vm4, %v2011_v11, 0.0 }
 0xfd8   :  { %2014 = vadd.xlane.f32.xlu0 %v2013_v59 }
0x1064   :  { %v2018_v13 = vpop.xlane.xlu1 %2017 }
0x1065   :  { %v2020_v14 = vmul.f32 0.015625, %v2018_v13  ;;  %v2015_v15 = vpop.xlane.xlu0 %2014 }
0x1066   :  { %v2019_v16 = vmul.f32 0.015625, %v2015_v15 }
0x1067   :  { %v2022_v17 = vsub.f32 %v2012_v10, %v2020_v14 }
0x1068   :  { %v2021_v18 = vsub.f32 %v2011_v11, %v2019_v16 }
0x1069   :  { %v2024_v19 = vmul.f32 %v2022_v17, %v2022_v17 }
0x106a   :  { %v2023_v56 = vmul.f32 %v2021_v18, %v2021_v18 }
0x106b   :  { %v2028_v20 = vsel %vm242_vm4, %v2024_v19, 0.0 }
0x106c   :  { %2029 = vadd.xlane.f32.xlu1 %v2028_v20  ;;  %v2025_v21 = vsel %vm242_vm4, %v2023_v56, 0.0 }
0x106d   :  { %2026 = vadd.xlane.f32.xlu0 %v2025_v21 }
0x10f9   :  { %v2030_v52 = vpop.xlane.xlu1 %2029 }
0x10fa   :  { %v2032_v53 = vmul.f32 0.015625, %v2030_v52  ;;  %v2027_v55 = vpop.xlane.xlu0 %2026 }
0x10fb   :  { %v2031_v57 = vmul.f32 0.015625, %v2027_v55 }
0x10fc   :  { %v2034_v34 = vadd.f32 1e-05, %v2032_v53 }
0x10fd   :  { %v2033_v58 = vadd.f32 1e-05, %v2031_v57 }
0x10fe   :  { %13057 = vrsqrt.f32 %v2034_v34 }
0x10ff   :  { %13059 = vrsqrt.f32 %v2033_v58 }
0x1108   :  { %v13058_v60 = vpop.eup %13057 }
0x1109   :  { %v13060_v61 = vpop.eup %13059  ;;  %v2038_v0 = vmul.f32 %v13058_v60, %v2022_v17 }
0x110a   :  { %v2037_v63 = vmul.f32 %v13060_v61, %v2021_v18 }
0x110b   :  { %v2045_v40 = vmul.f32 %v11156_v62, %v2038_v0 }
0x110c   :  { %v2044_v2 = vmul.f32 %v11156_v62, %v2037_v63 }
0x110d   :  { %v13771_v3 = vadd.f32 %v11157_v1, %v2045_v40 }
0x110e   :  { %v13766_v38 = vadd.f32 %v11157_v1, %v2044_v2 }
0x1110   :  { %11159 = vmatmul.mubr.msk.f32.vlgmr.msra.gmra.mrb[22].mxu0 %vm242_vm4, %v13766_v38 }
0x1111   :  { %2159 = vmatprep.mubr.f32.mxu0 %v13365_v31 }
0x1114   :  { %11160 = vmatmul.mubr.msk.f32.gmra.mrb[24].mxu0 %vm242_vm4, %v13771_v3 }
0x1115   :  { %11892 = vmatprep.mubr.msk.f32.mxu0 %vm13366_vm5, %v13365_v31 }
0x11e3   :  { %v2155_v8 = vpop.f32.mrb[22].mxu0 }
0x11e4   :  { %v13782_v9 = vadd.f32 %v2155_v8, %v2076_v6  ;;  %v2157_v10 = vpop.f32.mrb[23].mxu0 }
0x11e5   :  { %v13784_v11 = vadd.f32 %v2157_v10, %v2080_v7 }
0x11e6   :  { %2167 = vrot.lane.b32.xlu0 %v13782_v9, %s13367_s12 }
0x11e7   :  { %v2161_v12 = vpop.f32.mrb[24].mxu0 }
0x11e8   :  { %v13788_v59 = vadd.f32 %v2161_v12, %v2076_v6  ;;  %v2163_v13 = vpop.f32.mrb[25].mxu0 }
0x11e9   :  { %v13790_v14 = vadd.f32 %v2163_v13, %v2080_v7 }
0x11ea   :  { %2244 = vrot.lane.b32.xlu1 %v13788_v59, %s13367_s12 }
0x11eb   :  { %11906 = vmatpush3.msra.mxu1 %v13790_v14 }
0x11ec   :  { %11915 = vmatprep.subr.mxu1 %v13365_v31 }
0x1258   :  { %v2168_v15 = vpop.permute.xlu0 %2167 }
0x1259   :  { %11891 = vmatpush3.xpose.msk.msra.mxu0 %vm329_vm6, %v2168_v15 }
0x125a   :  { %11895 = vmatprep.subr.mxu0 %v13365_v31 }
0x125c   :  { %v2245_v16 = vpop.permute.xlu1 %2244  ;;  %11893 = vmatmul.mubr.msk.f32.vlgmr.msra.gmra.mrb[26].mxu0 %vm329_vm6, %v13782_v9 }
0x125d   :  { %11896 = vmatpush3.xpose.msk.msra.mxu0 %vm329_vm6, %v2245_v16  ;;  %11897 = vmatprep.mubr.msk.f32.mxu0 %vm13366_vm5, %v13365_v31 }
0x125e   :  { %11900 = vmatprep.subr.mxu0 %v13365_v31 }
0x1260   :  { %11898 = vmatmul.mubr.msk.f32.vlgmr.msra.gmra.mrb[28].mxu0 %vm329_vm6, %v13788_v59 }
0x1261   :  { %11901 = vmatpush3.msra.mxu0 %v13784_v11  ;;  %11902 = vmatprep.mubr.msk.f32.mxu0 %vm13366_vm5, %v13365_v31 }
0x1262   :  { %11910 = vmatprep.subr.mxu0 %v13365_v31 }
0x132f   :  { %v2239_v17 = vpop.f32.mrb[26].mxu0 }
0x1330   :  { %v2320_v18 = vmul.f32 0.25, %v2239_v17  ;;  %v11894_v19 = vpop.f32.mrb[27].mxu0 }
0x1332   :  { %v2322_v56 = vsel %vm483_vm7, %v2320_v18, -inf }
0x1333   :  { %2323 = vmax.xlane.f32.xlu1 %v2322_v56  ;;  %v2316_v20 = vpop.f32.mrb[28].mxu0 }
0x1334   :  { %v2321_v21 = vmul.f32 0.25, %v2316_v20  ;;  %v11899_v5 = vpop.f32.mrb[29].mxu0 }
0x1336   :  { %v2325_v22 = vsel %vm483_vm7, %v2321_v21, -inf }
0x1337   :  { %2326 = vmax.xlane.f32.xlu0 %v2325_v22 }
0x1344   :  { %2570 = vrot.lane.b32.xlu1 %v13788_v59, %s13368_s14 }
0x13c0   :  { %v2324_v23 = vpop.xlane.xlu1 %2323 }
0x13c1   :  { %v2328_v24 = vsub.f32 %v2320_v18, %v2324_v23 }
0x13c3   :  { %v2330_v25 = vmul.f32 1.442695, %v2328_v24 }
0x13c4   :  { %v2327_v26 = vpop.xlane.xlu0 %2326  ;;  %v2571_v35 = vpop.permute.xlu1 %2570 }
0x13c5   :  { %13061 = vpow2.f32 %v2330_v25  ;;  %v2329_v27 = vsub.f32 %v2321_v21, %v2327_v26 }
0x13c7   :  { %v2332_v28 = vmul.f32 1.442695, %v2329_v27 }
0x13c9   :  { %13063 = vpow2.f32 %v2332_v28 }
0x13cf   :  { %v13062_v29 = vpop.eup %13061 }
0x13d0   :  { %v2334_v50 = vsel %vm483_vm7, %v13062_v29, 0.0 }
0x13d1   :  { %2335 = vadd.xlane.f32.xlu0 %v2334_v50 }
0x13d3   :  { %v13064_v30 = vpop.eup %13063 }
0x13d4   :  { %v2337_v33 = vsel %vm483_vm7, %v13064_v30, 0.0 }
0x13d5   :  { %2338 = vadd.xlane.f32.xlu1 %v2337_v33 }
0x13e6   :  { %2490 = vrot.lane.b32.xlu1 %v13782_v9, %s13369_s6 }
0x13e7   :  { %2492 = vrot.lane.b32.xlu0 %v13782_v9, %s13368_s14 }
0x13eb   :  { %2568 = vrot.lane.b32.xlu0 %v13788_v59, %s13369_s6 }
0x145e   :  { %v2336_v36 = vpop.xlane.xlu0 %2335 }
0x145f   :  { %13065 = vrcp.f32 %v2336_v36 }
0x1462   :  { %v2339_v37 = vpop.xlane.xlu1 %2338  ;;  %v2493_v44 = vpop.permute.xlu0 %2492 }
0x1463   :  { %13067 = vrcp.f32 %v2339_v37 }
0x1466   :  { %v2491_v32 = vpop.permute.xlu1 %2490  ;;  %v2569_v47 = vpop.permute.xlu0 %2568 }
0x1469   :  { %v13066_v39 = vpop.eup %13065 }
0x146a   :  { %v2341_v43 = vmul.f32 %v13066_v39, %v13062_v29 }
0x146c   :  { %11903 = vmatmul.mubr.msk.f32.vlgmr.msra.gmra.mrb[30].mxu0 %vm483_vm7, %v2341_v43 }
0x146d   :  { %v13068_v54 = vpop.eup %13067  ;;  %11911 = vmatpush3.xpose.msk.msra.mxu0 %vm329_vm6, %v2493_v44  ;;  %11912 = vmatprep.mubr.msk.f32.mxu0 %vm13366_vm5, %v13365_v31 }
0x146e   :  { %v2343_v46 = vmul.f32 %v13068_v54, %v13064_v30  ;;  %11920 = vmatprep.subr.mxu0 %v13365_v31 }
0x1470   :  { %11908 = vmatmul.mubr.msk.f32.vlgmr.msra.gmra.mrb[24].mxu1 %vm483_vm7, %v2343_v46  ;;  %11913 = vmatmul.mubr.msk.f32.vlgmr.msra.gmra.mrb[32].mxu0 %vm329_vm6, %v2491_v32 }
0x1471   :  { %11916 = vmatpush3.xpose.msk.msra.mxu1 %vm329_vm6, %v2571_v35  ;;  %11917 = vmatprep.mubr.msk.f32.mxu1 %vm13366_vm5, %v13365_v31 }
0x1472   :  { %11925 = vmatprep.subr.mxu1 %v13365_v31  ;;  %11922 = vmatprep.mubr.msk.f32.mxu0 %vm13366_vm5, %v13365_v31 }
0x1474   :  { %11918 = vmatmul.mubr.msk.f32.vlgmr.msra.gmra.mrb[26].mxu1 %vm329_vm6, %v2569_v47 }
0x1475   :  { %11927 = vmatprep.mubr.msk.f32.mxu1 %vm13366_vm5, %v13365_v31 }
0x153f   :  { %v13838_v48 = vpop.f32.mrb[30].mxu0 }
0x1540   :  { %v11904_v51 = vpop.f32.mrb[31].mxu0 }
0x1543   :  { %v13840_v52 = vpop.f32.mrb[24].mxu1  ;;  %v2564_v53 = vpop.f32.mrb[32].mxu0 }
0x1544   :  { %v2646_v55 = vmul.f32 0.25, %v2564_v53  ;;  %v11909_v57 = vpop.f32.mrb[25].mxu1  ;;  %v11914_v34 = vpop.f32.mrb[33].mxu0 }
0x1546   :  { %v2648_v58 = vsel %vm483_vm7, %v2646_v55, -inf }
0x1547   :  { %v2642_v60 = vpop.f32.mrb[26].mxu1  ;;  %2649 = vmax.xlane.f32.xlu1 %v2648_v58 }
0x1548   :  { %v2647_v61 = vmul.f32 0.25, %v2642_v60  ;;  %v11919_v62 = vpop.f32.mrb[27].mxu1 }
0x154a   :  { %v2651_v63 = vsel %vm483_vm7, %v2647_v61, -inf }
0x154b   :  { %2652 = vmax.xlane.f32.xlu0 %v2651_v63 }
0x1558   :  { %2748 = vrot.lane.b32.xlu1 %v13790_v14, %s13369_s6 }
0x155c   :  { %2826 = vrot.lane.b32.xlu1 %v13782_v9, %s13370_s26 }
0x1561   :  { %2671 = vrot.lane.b32.xlu0 %v13784_v11, %s13369_s6 }
0x15d4   :  { %v2650_v0 = vpop.xlane.xlu1 %2649 }
0x15d5   :  { %v2654_v1 = vsub.f32 %v2646_v55, %v2650_v0 }
0x15d7   :  { %v2656_v2 = vmul.f32 1.442695, %v2654_v1 }
0x15d8   :  { %v2653_v40 = vpop.xlane.xlu0 %2652  ;;  %v2749_v4 = vpop.permute.xlu1 %2748 }
0x15d9   :  { %13069 = vpow2.f32 %v2656_v2  ;;  %v2655_v6 = vsub.f32 %v2647_v61, %v2653_v40  ;;  %11926 = vmatpush3.msra.mxu1 %v2749_v4 }
0x15da   :  { %11935 = vmatprep.subr.mxu1 %v13365_v31 }
0x15db   :  { %v2658_v7 = vmul.f32 1.442695, %v2655_v6 }
0x15dc   :  { %v2672_v8 = vpop.permute.xlu0 %2671  ;;  %v2827_v16 = vpop.permute.xlu1 %2826 }
0x15dd   :  { %13071 = vpow2.f32 %v2658_v7  ;;  %11921 = vmatpush3.msra.mxu0 %v2672_v8 }
0x15de   :  { %11930 = vmatprep.subr.mxu0 %v13365_v31 }
0x15e3   :  { %v13070_v10 = vpop.eup %13069 }
0x15e4   :  { %v2660_v12 = vsel %vm483_vm7, %v13070_v10, 0.0 }
0x15e5   :  { %2661 = vadd.xlane.f32.xlu0 %v2660_v12 }
0x15e7   :  { %v13072_v13 = vpop.eup %13071 }
0x15e8   :  { %v2663_v15 = vsel %vm483_vm7, %v13072_v13, 0.0 }
0x15e9   :  { %2664 = vadd.xlane.f32.xlu1 %v2663_v15 }
0x15fa   :  { %2824 = vrot.lane.b32.xlu1 %v13782_v9, %s13371_s15 }
0x15fb   :  { %2904 = vrot.lane.b32.xlu0 %v13788_v59, %s13370_s26 }
0x15ff   :  { %2902 = vrot.lane.b32.xlu0 %v13788_v59, %s13371_s15 }
0x1672   :  { %v2662_v17 = vpop.xlane.xlu0 %2661 }
0x1673   :  { %13073 = vrcp.f32 %v2662_v17 }
0x1676   :  { %v2665_v18 = vpop.xlane.xlu1 %2664  ;;  %v2905_v21 = vpop.permute.xlu0 %2904 }
0x1677   :  { %13075 = vrcp.f32 %v2665_v18 }
0x167a   :  { %v2825_v22 = vpop.permute.xlu1 %2824  ;;  %v2903_v23 = vpop.permute.xlu0 %2902 }
0x167d   :  { %v13074_v19 = vpop.eup %13073 }
0x167e   :  { %v2667_v56 = vmul.f32 %v13074_v19, %v13070_v10 }
0x1680   :  { %11923 = vmatmul.mubr.msk.f32.vlgmr.msra.gmra.mrb[34].mxu0 %vm483_vm7, %v2667_v56 }
0x1681   :  { %v13076_v20 = vpop.eup %13075  ;;  %11931 = vmatpush3.xpose.msk.msra.mxu0 %vm329_vm6, %v2827_v16  ;;  %11932 = vmatprep.mubr.msk.f32.mxu0 %vm13366_vm5, %v13365_v31 }
0x1682   :  { %v2669_v5 = vmul.f32 %v13076_v20, %v13072_v13  ;;  %11940 = vmatprep.subr.mxu0 %v13365_v31 }
0x1684   :  { %11928 = vmatmul.mubr.msk.f32.vlgmr.msra.gmra.mrb[28].mxu1 %vm483_vm7, %v2669_v5  ;;  %11933 = vmatmul.mubr.msk.f32.vlgmr.msra.gmra.mrb[36].mxu0 %vm329_vm6, %v2825_v22 }
0x1685   :  { %11936 = vmatpush3.xpose.msk.msra.mxu1 %vm329_vm6, %v2905_v21  ;;  %11937 = vmatprep.mubr.msk.f32.mxu1 %vm13366_vm5, %v13365_v31 }
0x1686   :  { %11945 = vmatprep.subr.mxu1 %v13365_v31  ;;  %11942 = vmatprep.mubr.msk.f32.mxu0 %vm13366_vm5, %v13365_v31 }
0x1688   :  { %11938 = vmatmul.mubr.msk.f32.vlgmr.msra.gmra.mrb[30].mxu1 %vm329_vm6, %v2903_v23 }
0x1689   :  { %11947 = vmatprep.mubr.msk.f32.mxu1 %vm13366_vm5, %v13365_v31 }
0x1753   :  { %v13876_v24 = vpop.f32.mrb[34].mxu0 }
0x1754   :  { %v11924_v25 = vpop.f32.mrb[35].mxu0 }
0x1757   :  { %v13878_v26 = vpop.f32.mrb[28].mxu1  ;;  %v2898_v27 = vpop.f32.mrb[36].mxu0 }
0x1758   :  { %v2980_v28 = vmul.f32 0.25, %v2898_v27  ;;  %v11929_v29 = vpop.f32.mrb[29].mxu1  ;;  %v11934_v50 = vpop.f32.mrb[37].mxu0 }
0x175a   :  { %v2982_v30 = vsel %vm483_vm7, %v2980_v28, -inf }
0x175b   :  { %v2976_v33 = vpop.f32.mrb[30].mxu1  ;;  %2983 = vmax.xlane.f32.xlu1 %v2982_v30 }
0x175c   :  { %v2981_v35 = vmul.f32 0.25, %v2976_v33  ;;  %v11939_v36 = vpop.f32.mrb[31].mxu1 }
0x175d   :  { %v3520_v36 = vld [vmem:[#allocation4 + $0x48] sm:$0xff] }
0x175e   :  { %v2985_v37 = vsel %vm483_vm7, %v2981_v35, -inf }
0x175f   :  { %2986 = vmax.xlane.f32.xlu0 %v2985_v37  ;;  %v3521_v37 = vld [vmem:[#allocation4 + $0x50] sm:$0xff] }
0x176c   :  { %3080 = vrot.lane.b32.xlu1 %v13790_v14, %s13371_s15 }
0x1770   :  { %3158 = vrot.lane.b32.xlu1 %v13782_v9, %s13361_s18 }
0x1775   :  { %3004 = vrot.lane.b32.xlu0 %v13784_v11, %s13371_s15 }
0x17e8   :  { %v2984_v39 = vpop.xlane.xlu1 %2983 }
0x17e9   :  { %v2988_v43 = vsub.f32 %v2980_v28, %v2984_v39 }
0x17eb   :  { %v2990_v44 = vmul.f32 1.442695, %v2988_v43  ;;  %v3522_v43 = vld [vmem:[#allocation4 + $0x58] sm:$0xff] }
0x17ec   :  { %v2987_v54 = vpop.xlane.xlu0 %2986  ;;  %v3081_v46 = vpop.permute.xlu1 %3080 }
0x17ed   :  { %13077 = vpow2.f32 %v2990_v44  ;;  %v2989_v32 = vsub.f32 %v2981_v35, %v2987_v54  ;;  %11946 = vmatpush3.msra.mxu1 %v3081_v46  ;;  %v12672_v44 = vpack.c.bf16 %v3522_v43, %v3521_v37  ;;  %v3523_v54 = vld [vmem:[#allocation4 + $0x60] sm:$0xff]  ;;  %v3524_v46 = vld [vmem:[#allocation4 + $0x68] sm:$0xff] }
0x17ee   :  { %11955 = vmatprep.subr.mxu1 %v13365_v31  ;;  %v3754_v43 = vld [vmem:[#allocation7 + $0x88] sm:$0xff] }
0x17ef   :  { %v2992_v47 = vmul.f32 1.442695, %v2989_v32  ;;  %v12676_v32 = vpack.c.bf16 %v3524_v46, %v3523_v54  ;;  %v3756_v46 = vld [vmem:[#allocation7 + $0x98] sm:$0xff] }
0x17f0   :  { %v3005_v51 = vpop.permute.xlu0 %3004  ;;  %v3159_v58 = vpop.permute.xlu1 %3158 }
0x17f1   :  { %13079 = vpow2.f32 %v2992_v47  ;;  %11941 = vmatpush3.msra.mxu0 %v3005_v51  ;;  %v3525_v47 = vld [vmem:[#allocation4 + $0x70] sm:$0xff]  ;;  %v3526_v51 = vld [vmem:[#allocation4 + $0x78] sm:$0xff] }
0x17f2   :  { %11950 = vmatprep.subr.mxu0 %v13365_v31 }
0x17f7   :  { %v13078_v53 = vpop.eup %13077 }
0x17f8   :  { %v2994_v55 = vsel %vm483_vm7, %v13078_v53, 0.0 }
0x17f9   :  { %2995 = vadd.xlane.f32.xlu0 %v2994_v55 }
0x17fb   :  { %v13080_v57 = vpop.eup %13079 }
0x17fc   :  { %v2997_v34 = vsel %vm483_vm7, %v13080_v57, 0.0 }
0x17fd   :  { %2998 = vadd.xlane.f32.xlu1 %v2997_v34 }
0x180e   :  { %3156 = vrot.lane.b32.xlu1 %v13782_v9, %s13372_s16 }
0x180f   :  { %3236 = vrot.lane.b32.xlu0 %v13788_v59, %s13361_s18 }
0x1813   :  { %3234 = vrot.lane.b32.xlu0 %v13788_v59, %s13372_s16 }
0x1886   :  { %v2996_v60 = vpop.xlane.xlu0 %2995 }
0x1887   :  { %13081 = vrcp.f32 %v2996_v60 }
0x188a   :  { %v2999_v61 = vpop.xlane.xlu1 %2998  ;;  %v3237_v1 = vpop.permute.xlu0 %3236 }
0x188b   :  { %13083 = vrcp.f32 %v2999_v61 }
0x188e   :  { %v3157_v59 = vpop.permute.xlu1 %3156  ;;  %v3235_v2 = vpop.permute.xlu0 %3234 }
0x1891   :  { %v13082_v62 = vpop.eup %13081 }
0x1892   :  { %v3001_v63 = vmul.f32 %v13082_v62, %v13078_v53  ;;  %v12680_v53 = vpack.c.bf16 %v3526_v51, %v3525_v47  ;;  %v3757_v47 = vld [vmem:[#allocation7 + $0xa0] sm:$0xff]  ;;  %v3758_v51 = vld [vmem:[#allocation7 + $0xa8] sm:$0xff] }
0x1894   :  { %11943 = vmatmul.mubr.msk.f32.vlgmr.msra.gmra.mrb[38].mxu0 %vm483_vm7, %v3001_v63 }
0x1895   :  { %v13084_v0 = vpop.eup %13083  ;;  %11951 = vmatpush3.xpose.msk.msra.mxu0 %vm329_vm6, %v3159_v58  ;;  %11952 = vmatprep.mubr.msk.f32.mxu0 %vm13366_vm5, %v13365_v31 }
0x1896   :  { %v3003_v9 = vmul.f32 %v13084_v0, %v13080_v57  ;;  %11960 = vmatprep.subr.mxu0 %v13365_v31 }
0x1898   :  { %11948 = vmatmul.mubr.msk.f32.vlgmr.msra.gmra.mrb[32].mxu1 %vm483_vm7, %v3003_v9  ;;  %11953 = vmatmul.mubr.msk.f32.vlgmr.msra.gmra.mrb[40].mxu0 %vm329_vm6, %v3157_v59 }
0x1899   :  { %11956 = vmatpush3.xpose.msk.msra.mxu1 %vm329_vm6, %v3237_v1  ;;  %11957 = vmatprep.mubr.msk.f32.mxu1 %vm13366_vm5, %v13365_v31 }
0x189a   :  { %11965 = vmatprep.subr.mxu1 %v13365_v31  ;;  %11962 = vmatprep.mubr.msk.f32.mxu0 %vm13366_vm5, %v13365_v31 }
0x189c   :  { %11958 = vmatmul.mubr.msk.f32.vlgmr.msra.gmra.mrb[34].mxu1 %vm329_vm6, %v3235_v2 }
0x189d   :  { %11967 = vmatprep.mubr.msk.f32.mxu1 %vm13366_vm5, %v13365_v31 }
0x1967   :  { %v3076_v40 = vpop.f32.mrb[38].mxu0 }
0x1968   :  { %v11944_v4 = vpop.f32.mrb[39].mxu0 }
0x196b   :  { %v3152_v6 = vpop.f32.mrb[32].mxu1  ;;  %v3230_v7 = vpop.f32.mrb[40].mxu0 }
0x196c   :  { %v3312_v8 = vmul.f32 0.25, %v3230_v7  ;;  %v11949_v10 = vpop.f32.mrb[33].mxu1  ;;  %v11954_v12 = vpop.f32.mrb[41].mxu0 }
0x196e   :  { %v3314_v13 = vsel %vm483_vm7, %v3312_v8, -inf }
0x196f   :  { %v3308_v15 = vpop.f32.mrb[34].mxu1  ;;  %3315 = vmax.xlane.f32.xlu1 %v3314_v13 }
0x1970   :  { %v3313_v16 = vmul.f32 0.25, %v3308_v15  ;;  %v11959_v17 = vpop.f32.mrb[35].mxu1 }
0x1972   :  { %v3317_v18 = vsel %vm483_vm7, %v3313_v16, -inf }
0x1973   :  { %3318 = vmax.xlane.f32.xlu0 %v3317_v18 }
0x19fc   :  { %v3316_v19 = vpop.xlane.xlu1 %3315 }
0x19fd   :  { %v3320_v56 = vsub.f32 %v3312_v8, %v3316_v19 }
0x19ff   :  { %v3322_v20 = vmul.f32 1.442695, %v3320_v56 }
0x1a00   :  { %v3319_v21 = vpop.xlane.xlu0 %3318 }
0x1a01   :  { %13085 = vpow2.f32 %v3322_v20  ;;  %v3321_v5 = vsub.f32 %v3313_v16, %v3319_v21 }
0x1a03   :  { %v3324_v22 = vmul.f32 1.442695, %v3321_v5 }
0x1a05   :  { %13087 = vpow2.f32 %v3324_v22 }
0x1a0b   :  { %v13086_v23 = vpop.eup %13085 }
0x1a0c   :  { %v3326_v25 = vsel %vm483_vm7, %v13086_v23, 0.0 }
0x1a0d   :  { %3327 = vadd.xlane.f32.xlu0 %v3326_v25  ;;  %v3657_v25 = vld [vmem:[#allocation6 + $0x48] sm:$0xff] }
0x1a0f   :  { %v13088_v27 = vpop.eup %13087 }
0x1a10   :  { %v3329_v28 = vsel %vm483_vm7, %v13088_v27, 0.0 }
0x1a11   :  { %3330 = vadd.xlane.f32.xlu1 %v3329_v28  ;;  %v3658_v28 = vld [vmem:[#allocation6 + $0x50] sm:$0xff] }
0x1a22   :  { %3412 = vrot.lane.b32.xlu1 %v13790_v14, %s13372_s16 }
0x1a23   :  { %3336 = vrot.lane.b32.xlu0 %v13784_v11, %s13372_s16 }
0x1a26   :  { %3490 = vrot.lane.b32.xlu1 %v13876_v24, %s13361_s18 }
0x1a27   :  { %3492 = vrot.lane.b32.xlu0 %v13878_v26, %s13361_s18  ;;  %v3519_v26 = vld [vmem:[#allocation4 + $0x40] sm:$0xff] }
0x1a28   :  { %v12668_v39 = vpack.c.bf16 %v3520_v36, %v3519_v26  ;;  %v3933_v26 = vld [vmem:[#allocation2 + $0x108] sm:$0xff]  ;;  %v3935_v36 = vld [vmem:[#allocation2 + $0x118] sm:$0xff] }
0x1a29   :  { %v12732_v37 = vpack.c.bf16 %v3935_v36, %v3933_v26  ;;  %v3946_v26 = vld [vmem:[#allocation2 + $0x170] sm:$0xff] }
0x1a2a   :  { %3498 = vrot.lane.b32.xlu1 %v3076_v40, %s13370_s26 }
0x1a2b   :  { %3500 = vrot.lane.b32.xlu0 %v3152_v6, %s13370_s26 }
0x1a9a   :  { %v3328_v29 = vpop.xlane.xlu0 %3327 }
0x1a9b   :  { %13089 = vrcp.f32 %v3328_v29  ;;  %v3659_v29 = vld [vmem:[#allocation6 + $0x58] sm:$0xff] }
0x1a9e   :  { %v3337_v50 = vpop.permute.xlu0 %3336  ;;  %v3331_v30 = vpop.xlane.xlu1 %3330 }
0x1a9f   :  { %13091 = vrcp.f32 %v3331_v30  ;;  %11961 = vmatpush3.msra.mxu0 %v3337_v50  ;;  %v12688_v50 = vpack.c.bf16 %v3659_v29, %v3658_v28  ;;  %v3660_v30 = vld [vmem:[#allocation6 + $0x60] sm:$0xff] }
0x1aa0   :  { %12669 = vmatprep.subr.bf16.mxu0 %v12668_v39 }
0x1aa2   :  { %v3413_v14 = vpop.permute.xlu1 %3412  ;;  %v3493_v61 = vpop.permute.xlu0 %3492 }
0x1aa3   :  { %11966 = vmatpush3.msra.mxu1 %v3413_v14  ;;  %v3513_v2 = vsel %vm329_vm6, %v13840_v52, %v3493_v61  ;;  %v3661_v14 = vld [vmem:[#allocation6 + $0x68] sm:$0xff] }
0x1aa5   :  { %v13090_v33 = vpop.eup %13089 }
0x1aa6   :  { %v3333_v11 = vmul.f32 %v13090_v33, %v13086_v23  ;;  %v3491_v60 = vpop.permute.xlu1 %3490  ;;  %v3501_v0 = vpop.permute.xlu0 %3500  ;;  %v3656_v23 = vld [vmem:[#allocation6 + $0x40] sm:$0xff]  ;;  %v12692_v33 = vpack.c.bf16 %v3661_v14, %v3660_v30  ;;  %v3942_v30 = vld [vmem:[#allocation2 + $0x150] sm:$0xff]  ;;  %v3945_v14 = vld [vmem:[#allocation2 + $0x168] sm:$0xff] }
0x1aa7   :  { %v3512_v63 = vsel %vm329_vm6, %v13838_v48, %v3491_v60  ;;  %v3515_v40 = vsel %vm1676_vm9, %v3513_v2, %v3501_v0  ;;  %v11185_v48 = vld [vmem:[%s14958_s9 + $0x2] ss:$0 sm:$0xff]  ;;  %v3762_v60 = vld [vmem:[#allocation7 + $0xc8] sm:$0xff] }
0x1aa8   :  { %11963 = vmatmul.mubr.msk.f32.vlgmr.msra.gmra.mrb[42].mxu0 %vm483_vm7, %v3333_v11  ;;  %v3662_v11 = vld [vmem:[#allocation6 + $0x70] sm:$0xff] }
0x1aa9   :  { %v13092_v24 = vpop.eup %13091  ;;  %12671 = vmatpush3.bf16.msra.mxu0 %v12668_v39  ;;  %v3753_v39 = vld [vmem:[#allocation7 + $0x80] sm:$0xff] }
0x1aaa   :  { %v3335_v35 = vmul.f32 %v13092_v24, %v13088_v27  ;;  %12673 = vmatprep.subr.bf16.mxu0 %v12672_v44  ;;  %v3499_v62 = vpop.permute.xlu1 %3498  ;;  %v12684_v27 = vpack.c.bf16 %v3657_v25, %v3656_v23  ;;  %v3663_v24 = vld [vmem:[#allocation6 + $0x78] sm:$0xff]  ;;  %v12700_v54 = vpack.c.bf16 %v3754_v43, %v3753_v39  ;;  %v3936_v25 = vld [vmem:[#allocation2 + $0x120] sm:$0xff]  ;;  %v208_v43 = vld [vmem:[%s14950_s1 + $0x10] sm:$0xff] }
0x1aab   :  { %v3514_v1 = vsel %vm1676_vm9, %v3512_v63, %v3499_v62  ;;  %v3763_v62 = vld [vmem:[#allocation7 + $0xd0] sm:$0xff]  ;;  %v3764_v63 = vld [vmem:[#allocation7 + $0xd8] sm:$0xff] }
0x1aac   :  { %11968 = vmatmul.mubr.msk.f32.vlgmr.msra.gmra.mrb[36].mxu1 %vm483_vm7, %v3335_v35  ;;  %12685 = vmatprep.subr.bf16.mxu1 %v12684_v27  ;;  %v12696_v35 = vpack.c.bf16 %v3663_v24, %v3662_v11  ;;  %v12720_v0 = vpack.c.bf16 %v3764_v63, %v3763_v62 }
0x1aad   :  { %12675 = vmatpush3.bf16.msra.mxu0 %v12672_v44  ;;  %12687 = vmatpush3.bf16.msra.mxu1 %v12684_v27  ;;  %v3755_v44 = vld [vmem:[#allocation7 + $0x90] sm:$0xff]  ;;  %v3943_v27 = vld [vmem:[#allocation2 + $0x158] sm:$0xff] }
0x1aae   :  { %12677 = vmatprep.subr.bf16.mxu0 %v12676_v32  ;;  %12689 = vmatprep.subr.bf16.mxu1 %v12688_v50 }
0x1ab1   :  { %12679 = vmatpush3.bf16.msra.mxu0 %v12676_v32  ;;  %12691 = vmatpush3.bf16.msra.mxu1 %v12688_v50  ;;  %v12704_v32 = vpack.c.bf16 %v3756_v46, %v3755_v44  ;;  %v3940_v50 = vld [vmem:[#allocation2 + $0x140] sm:$0xff]  ;;  %v209_v46 = vld [vmem:[%s14950_s1 + $0x18] sm:$0xff] }
0x1ab2   :  { %12681 = vmatprep.subr.bf16.mxu0 %v12680_v53  ;;  %12693 = vmatprep.subr.bf16.mxu1 %v12692_v33  ;;  %v12742_v11 = vpack.c.bf16 %v3942_v30, %v3940_v50 }
0x1ab5   :  { %12683 = vmatpush3.bf16.msra.mxu0 %v12680_v53  ;;  %12695 = vmatpush3.bf16.msra.mxu1 %v12692_v33  ;;  %v12708_v53 = vpack.c.bf16 %v3758_v51, %v3757_v47  ;;  %v3947_v33 = vld [vmem:[#allocation2 + $0x178] sm:$0xff]  ;;  %v11190_v51 = vld [vmem:[%s14956_s7 + $0x1] ss:$0 sm:$0xff] }
0x1ab6   :  { %12697 = vmatprep.subr.bf16.mxu1 %v12696_v35  ;;  %12701 = vmatprep.subr.bf16.mxu0 %v12700_v54  ;;  %v12744_v24 = vpack.c.bf16 %v3947_v33, %v3945_v14 }
0x1ab9   :  { %12699 = vmatpush3.bf16.msra.mxu1 %v12696_v35  ;;  %v3944_v35 = vld [vmem:[#allocation2 + $0x160] sm:$0xff] }
0x1aba   :  { %12733 = vmatprep.subr.bf16.mxu1 %v12732_v37  ;;  %v12746_v36 = vpack.c.bf16 %v3946_v26, %v3944_v35  ;;  %v13261_v37 = vld [vmem:[%s14958_s9] ss:$0 sm:$0xff] }
0x1abb   :  { %v198_v39 = vadd.f32 %v13261_v37, %v13543_v42  ;;  %v203_v44 = vadd.f32 %v13261_v37, %v13541_v41  ;;  %v3767_v41 = vld [vmem:[#allocation7 + $0xf0] sm:$0xff] }
0x1abd   :  { %v13993_v42 = vadd.f32 %v209_v46, %v203_v44 }
0x1b7b   :  { %v3408_v55 = vpop.f32.mrb[42].mxu0 }
0x1b7c   :  { %3506 = vrot.lane.b32.xlu1 %v3408_v55, %s13368_s14  ;;  %v11964_v57 = vpop.f32.mrb[43].mxu0  ;;  %v3759_v55 = vld [vmem:[#allocation7 + $0xb0] sm:$0xff] }
0x1b7d   :  { %v3760_v57 = vld [vmem:[#allocation7 + $0xb8] sm:$0xff] }
0x1b7f   :  { %v3484_v34 = vpop.f32.mrb[36].mxu1 }
0x1b80   :  { %3508 = vrot.lane.b32.xlu0 %v3484_v34, %s13368_s14  ;;  %v11969_v58 = vpop.f32.mrb[37].mxu1  ;;  %v12712_v34 = vpack.c.bf16 %v3760_v57, %v3759_v55 }
0x1b81   :  { %v3761_v58 = vld [vmem:[#allocation7 + $0xc0] sm:$0xff] }
0x1b82   :  { %v12716_v61 = vpack.c.bf16 %v3762_v60, %v3761_v58 }
0x1bee   :  { %v3507_v9 = vpop.permute.xlu1 %3506 }
0x1bef   :  { %v3516_v59 = vsel %vm1679_vm8, %v3514_v1, %v3507_v9  ;;  %v3765_v1 = vld [vmem:[#allocation7 + $0xe0] sm:$0xff]  ;;  %v3766_v9 = vld [vmem:[#allocation7 + $0xe8] sm:$0xff] }
0x1bf0   :  { %11986 = vmatprep.mubr.msk.f32.mxu0 %vm242_vm4, %v3516_v59  ;;  %v12724_v59 = vpack.c.bf16 %v3766_v9, %v3765_v1 }
0x1bf2   :  { %v3509_v4 = vpop.permute.xlu0 %3508 }
0x1bf3   :  { %v3517_v6 = vsel %vm1679_vm8, %v3515_v40, %v3509_v4 }
0x1bf4   :  { %11987 = vmatmul.mubr.msk.f32.vlgmr.msra.gmra.mrb[44].mxu0 %vm242_vm4, %v3517_v6 }
0x1bf5   :  { %12703 = vmatpush3.bf16.msra.mxu0 %v12700_v54  ;;  %v13984_v54 = vadd.f32 %v208_v43, %v198_v39 }
0x1bf6   :  { %12705 = vmatprep.subr.bf16.mxu0 %v12704_v32 }
0x1bf9   :  { %12707 = vmatpush3.bf16.msra.mxu0 %v12704_v32  ;;  %v3768_v32 = vld [vmem:[#allocation7 + $0xf8] sm:$0xff] }
0x1bfa   :  { %12709 = vmatprep.subr.bf16.mxu0 %v12708_v53  ;;  %v12728_v47 = vpack.c.bf16 %v3768_v32, %v3767_v41 }
0x1bfd   :  { %12711 = vmatpush3.bf16.msra.mxu0 %v12708_v53 }
0x1bfe   :  { %12713 = vmatprep.subr.bf16.mxu0 %v12712_v34 }
0x1c01   :  { %12715 = vmatpush3.bf16.msra.mxu0 %v12712_v34 }
0x1c02   :  { %12717 = vmatprep.subr.bf16.mxu0 %v12716_v61 }
0x1c05   :  { %12719 = vmatpush3.bf16.msra.mxu0 %v12716_v61  ;;  %v11198_v61 = vld [vmem:[%s14953_s4 + $0x2] ss:$8 sm:$0x3] }
0x1c06   :  { %12721 = vmatprep.subr.bf16.mxu0 %v12720_v0  ;;  %v3954_v62 = vrot.slane %v11198_v61, %v13549_v45  ;;  %v3958_v63 = vrot.slane %v11198_v61, %v13555_v49 }
0x1c09   :  { %12723 = vmatpush3.bf16.msra.mxu0 %v12720_v0 }
0x1c0a   :  { %12725 = vmatprep.subr.bf16.mxu0 %v12724_v59 }
0x1c0d   :  { %12727 = vmatpush3.bf16.msra.mxu0 %v12724_v59 }
0x1c0e   :  { %12729 = vmatprep.subr.bf16.mxu0 %v12728_v47 }
0x1c11   :  { %12731 = vmatpush3.bf16.msra.mxu0 %v12728_v47 }
0x1c12   :  { %12058 = vmatprep.subr.mxu0 %v13365_v31 }
0x1cc7   :  { %v11988_v7 = vpop.f32.mrb[44].mxu0 }
0x1cc8   :  { %v3610_v8 = vadd.f32 %v11988_v7, %v11185_v48  ;;  %v3604_v10 = vpop.f32.mrb[45].mxu0 }
0x1cc9   :  { %v3605_v12 = vadd.f32 %v11185_v48, %v3604_v10  ;;  %v11188_v10 = vld [vmem:[%s14958_s9 + $0xd] ss:$0 sm:$0xff] }
0x1cca   :  { %v3614_v13 = vadd.f32 %v3610_v8, %v13771_v3 }
0x1ccb   :  { %v3613_v15 = vadd.f32 %v3605_v12, %v13766_v38 }
0x1ccc   :  { %v3618_v52 = vsel %vm242_vm4, %v3614_v13, 0.0 }
0x1ccd   :  { %3619 = vadd.xlane.f32.xlu0 %v3618_v52  ;;  %v3615_v16 = vsel %vm242_vm4, %v3613_v15, 0.0 }
0x1cce   :  { %3616 = vadd.xlane.f32.xlu1 %v3615_v16  ;;  %v11189_v16 = vld [vmem:[%s14958_s9 + $0x19] ss:$0 sm:$0xff] }
0x1d5a   :  { %v3620_v17 = vpop.xlane.xlu0 %3619 }
0x1d5b   :  { %v3622_v18 = vmul.f32 0.015625, %v3620_v17  ;;  %v3617_v19 = vpop.xlane.xlu1 %3616  ;;  %v3932_v17 = vld [vmem:[#allocation2 + $0x100] sm:$0xff] }
0x1d5c   :  { %v3621_v56 = vmul.f32 0.015625, %v3617_v19 }
0x1d5d   :  { %v13949_v20 = vsub.f32 %v3614_v13, %v3622_v18  ;;  %v3934_v18 = vld [vmem:[#allocation2 + $0x110] sm:$0xff] }
0x1d5e   :  { %v13951_v21 = vsub.f32 %v3613_v15, %v3621_v56  ;;  %v3937_v56 = vld [vmem:[#allocation2 + $0x128] sm:$0xff] }
0x1d5f   :  { %v3626_v5 = vmul.f32 %v13949_v20, %v13949_v20 }
0x1d60   :  { %v3625_v38 = vmul.f32 %v13951_v21, %v13951_v21 }
0x1d61   :  { %v3630_v3 = vsel %vm242_vm4, %v3626_v5, 0.0  ;;  %v3939_v5 = vld [vmem:[#allocation2 + $0x138] sm:$0xff] }
0x1d62   :  { %3631 = vadd.xlane.f32.xlu1 %v3630_v3  ;;  %v3627_v22 = vsel %vm242_vm4, %v3625_v38, 0.0  ;;  %v12734_v3 = vpack.c.bf16 %v3934_v18, %v3932_v17  ;;  %v12736_v23 = vpack.c.bf16 %v3939_v5, %v3937_v56 }
0x1d63   :  { %3628 = vadd.xlane.f32.xlu0 %v3627_v22 }
0x1def   :  { %v3632_v2 = vpop.xlane.xlu1 %3631 }
0x1df0   :  { %v3634_v40 = vmul.f32 0.015625, %v3632_v2  ;;  %v3629_v4 = vpop.xlane.xlu0 %3628 }
0x1df1   :  { %v3633_v6 = vmul.f32 0.015625, %v3629_v4 }
0x1df2   :  { %v3636_v48 = vadd.f32 1e-05, %v3634_v40 }
0x1df3   :  { %v3635_v7 = vadd.f32 1e-05, %v3633_v6 }
0x1df4   :  { %13093 = vrsqrt.f32 %v3636_v48 }
0x1df5   :  { %13095 = vrsqrt.f32 %v3635_v7 }
0x1dfe   :  { %v13094_v8 = vpop.eup %13093 }
0x1dff   :  { %v13096_v12 = vpop.eup %13095  ;;  %v3640_v13 = vmul.f32 %v13094_v8, %v13949_v20  ;;  %v3938_v20 = vld [vmem:[#allocation2 + $0x130] sm:$0xff] }
0x1e00   :  { %v3639_v15 = vmul.f32 %v13096_v12, %v13951_v21  ;;  %v3941_v21 = vld [vmem:[#allocation2 + $0x148] sm:$0xff]  ;;  %v12738_v28 = vpack.c.bf16 %v3938_v20, %v3936_v25 }
0x1e01   :  { %v3647_v52 = vmul.f32 %v11188_v10, %v3640_v13  ;;  %v12740_v29 = vpack.c.bf16 %v3943_v27, %v3941_v21 }
0x1e02   :  { %v3646_v19 = vmul.f32 %v11188_v10, %v3639_v15 }
0x1e03   :  { %v13969_v22 = vadd.f32 %v11189_v16, %v3647_v52 }
0x1e04   :  { %v13967_v38 = vadd.f32 %v11189_v16, %v3646_v19 }
0x1e06   :  { %12005 = vmatprep.mubr.msk.f32.mxu1 %vm242_vm4, %v13967_v38 }
0x1e07   :  { %12006 = vmatmul.mubr.msk.f32.vlgmr.msra.gmra.mrb[38].mxu1 %vm242_vm4, %v13969_v22 }
0x1e08   :  { %12735 = vmatpush1.bf16.msra.mxu1 %v12734_v3  ;;  %4031 = vmatprep.mubr.f32.mxu1 %v13365_v31 }
0x1e09   :  { %12737 = vmatprep.subr.bf16.mxu1 %v12736_v23 }
0x1e0c   :  { %12739 = vmatpush1.bf16.msra.mxu1 %v12738_v28 }
0x1e0d   :  { %12741 = vmatprep.subr.bf16.mxu1 %v12740_v29 }
0x1e10   :  { %12743 = vmatpush1.bf16.msra.mxu1 %v12742_v11 }
0x1e11   :  { %12745 = vmatprep.subr.bf16.mxu1 %v12744_v24 }
0x1e14   :  { %12747 = vmatpush1.bf16.msra.mxu1 %v12746_v36 }
0x1e15   :  { %12043 = vmatprep.subr.mxu1 %v13365_v31 }
0x1e17   :  { %11199 = vmatmul.mubr.msk.f32.vlgmr.msra.gmra.mrb[40].mxu1 %vm242_vm4, %v13984_v54 }
0x1e18   :  { %4037 = vmatprep.mubr.f32.mxu1 %v13365_v31 }
0x1e1b   :  { %11200 = vmatmul.mubr.msk.f32.gmra.mrb[42].mxu1 %vm242_vm4, %v13993_v42 }
0x1e1c   :  { %12045 = vmatprep.mubr.msk.f32.mxu1 %vm13366_vm5, %v13365_v31 }
0x1eda   :  { %v12007_v53 = vpop.f32.mrb[38].mxu1 }
0x1edb   :  { %v3747_v55 = vadd.f32 %v12007_v53, %v11190_v51  ;;  %v3741_v57 = vpop.f32.mrb[39].mxu1 }
0x1edc   :  { %v3742_v34 = vadd.f32 %v11190_v51, %v3741_v57 }
0x1edd   :  { %v3751_v60 = vmax.f32 %v3747_v55, 0.0 }
0x1ede   :  { %v3750_v58 = vmax.f32 %v3742_v34, 0.0 }
0x1ee0   :  { %12040 = vmatprep.mubr.f32.mxu0 %v3750_v58 }
0x1ee1   :  { %12041 = vmatmul.mubr.f32.vlgmr.msra.gmra.mrb[46].mxu0 %v3751_v60 }
0x1ee2   :  { %12060 = vmatprep.mubr.msk.f32.mxu0 %vm13366_vm5, %v13365_v31 }
0x1eea   :  { %v4033_v0 = vpop.f32.mrb[40].mxu1 }
0x1eeb   :  { %v14010_v1 = vadd.f32 %v4033_v0, %v3954_v62  ;;  %v4035_v9 = vpop.f32.mrb[41].mxu1 }
0x1eec   :  { %v14012_v59 = vadd.f32 %v4035_v9, %v3958_v63 }
0x1eed   :  { %4045 = vrot.lane.b32.xlu0 %v14010_v1, %s13367_s12 }
0x1eee   :  { %v4039_v2 = vpop.f32.mrb[42].mxu1 }
0x1eef   :  { %v14016_v40 = vadd.f32 %v4039_v2, %v3954_v62  ;;  %v4041_v4 = vpop.f32.mrb[43].mxu1 }
0x1ef0   :  { %v14018_v6 = vadd.f32 %v4041_v4, %v3958_v63 }
0x1ef1   :  { %4122 = vrot.lane.b32.xlu1 %v14016_v40, %s13367_s12 }
0x1ef2   :  { %12059 = vmatpush3.msra.mxu0 %v14018_v6 }
0x1ef3   :  { %12068 = vmatprep.subr.mxu0 %v13365_v31 }
0x1f5f   :  { %v4046_v48 = vpop.permute.xlu0 %4045 }
0x1f60   :  { %12044 = vmatpush3.xpose.msk.msra.mxu1 %vm329_vm6, %v4046_v48 }
0x1f61   :  { %12048 = vmatprep.subr.mxu1 %v13365_v31 }
0x1f63   :  { %v4123_v7 = vpop.permute.xlu1 %4122  ;;  %12046 = vmatmul.mubr.msk.f32.vlgmr.msra.gmra.mrb[44].mxu1 %vm329_vm6, %v14010_v1 }
0x1f64   :  { %12049 = vmatpush3.xpose.msk.msra.mxu1 %vm329_vm6, %v4123_v7  ;;  %12050 = vmatprep.mubr.msk.f32.mxu1 %vm13366_vm5, %v13365_v31 }
0x1f65   :  { %12053 = vmatprep.subr.mxu1 %v13365_v31 }
0x1f67   :  { %12051 = vmatmul.mubr.msk.f32.vlgmr.msra.gmra.mrb[46].mxu1 %vm329_vm6, %v14016_v40 }
0x1f68   :  { %12054 = vmatpush3.msra.mxu1 %v14012_v59  ;;  %12055 = vmatprep.mubr.msk.f32.mxu1 %vm13366_vm5, %v13365_v31 }
0x1f69   :  { %12063 = vmatprep.subr.mxu1 %v13365_v31 }
0x1fb4   :  { %v14038_v8 = vpop.f32.mrb[46].mxu0 }
0x1fb5   :  { %v14040_v10 = vpop.f32.mrb[47].mxu0 }
0x2036   :  { %v4117_v12 = vpop.f32.mrb[44].mxu1 }
0x2037   :  { %v4198_v13 = vmul.f32 0.25, %v4117_v12  ;;  %v12047_v15 = vpop.f32.mrb[45].mxu1 }
0x2039   :  { %v4200_v52 = vsel %vm483_vm7, %v4198_v13, -inf }
0x203a   :  { %4201 = vmax.xlane.f32.xlu1 %v4200_v52  ;;  %v4194_v16 = vpop.f32.mrb[46].mxu1 }
0x203b   :  { %v4199_v17 = vmul.f32 0.25, %v4194_v16  ;;  %v12052_v18 = vpop.f32.mrb[47].mxu1 }
0x203d   :  { %v4203_v19 = vsel %vm483_vm7, %v4199_v17, -inf }
0x203e   :  { %4204 = vmax.xlane.f32.xlu0 %v4203_v19 }
0x204b   :  { %4448 = vrot.lane.b32.xlu1 %v14016_v40, %s13368_s14 }
0x20c7   :  { %v4202_v56 = vpop.xlane.xlu1 %4201 }
0x20c8   :  { %v4206_v5 = vsub.f32 %v4198_v13, %v4202_v56 }
0x20ca   :  { %v4208_v3 = vmul.f32 1.442695, %v4206_v5 }
0x20cb   :  { %v4205_v23 = vpop.xlane.xlu0 %4204  ;;  %v4449_v50 = vpop.permute.xlu1 %4448 }
0x20cc   :  { %13097 = vpow2.f32 %v4208_v3  ;;  %v4207_v25 = vsub.f32 %v4199_v17, %v4205_v23 }
0x20ce   :  { %v4210_v20 = vmul.f32 1.442695, %v4207_v25 }
0x20d0   :  { %13099 = vpow2.f32 %v4210_v20 }
0x20d6   :  { %v13098_v21 = vpop.eup %13097 }
0x20d7   :  { %v4212_v27 = vsel %vm483_vm7, %v13098_v21, 0.0 }
0x20d8   :  { %4213 = vadd.xlane.f32.xlu0 %v4212_v27 }
0x20da   :  { %v13100_v28 = vpop.eup %13099 }
0x20db   :  { %v4215_v29 = vsel %vm483_vm7, %v13100_v28, 0.0 }
0x20dc   :  { %4216 = vadd.xlane.f32.xlu1 %v4215_v29 }
0x20ed   :  { %4368 = vrot.lane.b32.xlu1 %v14010_v1, %s13369_s6 }
0x20ee   :  { %4370 = vrot.lane.b32.xlu0 %v14010_v1, %s13368_s14 }
0x20f2   :  { %4446 = vrot.lane.b32.xlu0 %v14016_v40, %s13369_s6 }
0x2165   :  { %v4214_v30 = vpop.xlane.xlu0 %4213 }
0x2166   :  { %13101 = vrcp.f32 %v4214_v30 }
0x2169   :  { %v4217_v14 = vpop.xlane.xlu1 %4216  ;;  %v4371_v24 = vpop.permute.xlu0 %4370 }
0x216a   :  { %13103 = vrcp.f32 %v4217_v14 }
0x216d   :  { %v4369_v36 = vpop.permute.xlu1 %4368  ;;  %v4447_v37 = vpop.permute.xlu0 %4446 }
0x2170   :  { %v13102_v33 = vpop.eup %13101 }
0x2171   :  { %v4219_v11 = vmul.f32 %v13102_v33, %v13098_v21 }
0x2173   :  { %12056 = vmatmul.mubr.msk.f32.vlgmr.msra.gmra.mrb[48].mxu1 %vm483_vm7, %v4219_v11 }
0x2174   :  { %v13104_v35 = vpop.eup %13103  ;;  %12064 = vmatpush3.xpose.msk.msra.mxu1 %vm329_vm6, %v4371_v24  ;;  %12065 = vmatprep.mubr.msk.f32.mxu1 %vm13366_vm5, %v13365_v31 }
0x2175   :  { %v4221_v26 = vmul.f32 %v13104_v35, %v13100_v28  ;;  %12073 = vmatprep.subr.mxu1 %v13365_v31 }
0x2177   :  { %12061 = vmatmul.mubr.msk.f32.vlgmr.msra.gmra.mrb[48].mxu0 %vm483_vm7, %v4221_v26  ;;  %12066 = vmatmul.mubr.msk.f32.vlgmr.msra.gmra.mrb[50].mxu1 %vm329_vm6, %v4369_v36 }
0x2178   :  { %12069 = vmatpush3.xpose.msk.msra.mxu0 %vm329_vm6, %v4449_v50  ;;  %12070 = vmatprep.mubr.msk.f32.mxu0 %vm13366_vm5, %v13365_v31 }
0x2179   :  { %12078 = vmatprep.subr.mxu0 %v13365_v31  ;;  %12075 = vmatprep.mubr.msk.f32.mxu1 %vm13366_vm5, %v13365_v31 }
0x217b   :  { %12071 = vmatmul.mubr.msk.f32.vlgmr.msra.gmra.mrb[50].mxu0 %vm329_vm6, %v4447_v37 }
0x217c   :  { %12080 = vmatprep.mubr.msk.f32.mxu0 %vm13366_vm5, %v13365_v31 }
0x2246   :  { %v14070_v39 = vpop.f32.mrb[48].mxu1 }
0x2247   :  { %v12057_v43 = vpop.f32.mrb[49].mxu1 }
0x224a   :  { %v14072_v44 = vpop.f32.mrb[48].mxu0  ;;  %v4442_v46 = vpop.f32.mrb[50].mxu1 }
0x224b   :  { %v4524_v41 = vmul.f32 0.25, %v4442_v46  ;;  %v12062_v32 = vpop.f32.mrb[49].mxu0  ;;  %v12067_v47 = vpop.f32.mrb[51].mxu1 }
0x224d   :  { %v4526_v51 = vsel %vm483_vm7, %v4524_v41, -inf }
0x224e   :  { %4527 = vmax.xlane.f32.xlu1 %v4526_v51  ;;  %v4520_v53 = vpop.f32.mrb[50].mxu0 }
0x224f   :  { %v4525_v55 = vmul.f32 0.25, %v4520_v53  ;;  %v12072_v57 = vpop.f32.mrb[51].mxu0 }
0x2251   :  { %v4529_v34 = vsel %vm483_vm7, %v4525_v55, -inf }
0x2252   :  { %4530 = vmax.xlane.f32.xlu0 %v4529_v34 }
0x225f   :  { %4626 = vrot.lane.b32.xlu1 %v14018_v6, %s13369_s6 }
0x2263   :  { %4704 = vrot.lane.b32.xlu1 %v14010_v1, %s13370_s26 }
0x2268   :  { %4549 = vrot.lane.b32.xlu0 %v14012_v59, %s13369_s6 }
0x22db   :  { %v4528_v58 = vpop.xlane.xlu1 %4527 }
0x22dc   :  { %v4532_v60 = vsub.f32 %v4524_v41, %v4528_v58 }
0x22de   :  { %v4534_v61 = vmul.f32 1.442695, %v4532_v60 }
0x22df   :  { %v4627_v62 = vpop.permute.xlu1 %4626  ;;  %v4531_v63 = vpop.xlane.xlu0 %4530 }
0x22e0   :  { %13105 = vpow2.f32 %v4534_v61  ;;  %v4533_v0 = vsub.f32 %v4525_v55, %v4531_v63  ;;  %12079 = vmatpush3.msra.mxu0 %v4627_v62 }
0x22e1   :  { %12088 = vmatprep.subr.mxu0 %v13365_v31 }
0x22e2   :  { %v4536_v9 = vmul.f32 1.442695, %v4533_v0 }
0x22e3   :  { %v4550_v2 = vpop.permute.xlu0 %4549  ;;  %v4705_v13 = vpop.permute.xlu1 %4704 }
0x22e4   :  { %13107 = vpow2.f32 %v4536_v9  ;;  %12074 = vmatpush3.msra.mxu1 %v4550_v2 }
0x22e5   :  { %12083 = vmatprep.subr.mxu1 %v13365_v31 }
0x22ea   :  { %v13106_v4 = vpop.eup %13105 }
0x22eb   :  { %v4538_v48 = vsel %vm483_vm7, %v13106_v4, 0.0 }
0x22ec   :  { %4539 = vadd.xlane.f32.xlu0 %v4538_v48 }
0x22ee   :  { %v13108_v7 = vpop.eup %13107 }
0x22ef   :  { %v4541_v12 = vsel %vm483_vm7, %v13108_v7, 0.0 }
0x22f0   :  { %4542 = vadd.xlane.f32.xlu1 %v4541_v12 }
0x2301   :  { %4702 = vrot.lane.b32.xlu1 %v14010_v1, %s13371_s15 }
0x2302   :  { %4782 = vrot.lane.b32.xlu0 %v14016_v40, %s13370_s26 }
0x2306   :  { %4780 = vrot.lane.b32.xlu0 %v14016_v40, %s13371_s15 }
0x2379   :  { %v4540_v15 = vpop.xlane.xlu0 %4539 }
0x237a   :  { %13109 = vrcp.f32 %v4540_v15 }
0x237d   :  { %v4543_v52 = vpop.xlane.xlu1 %4542  ;;  %v4783_v19 = vpop.permute.xlu0 %4782 }
0x237e   :  { %13111 = vrcp.f32 %v4543_v52 }
0x2381   :  { %v4703_v5 = vpop.permute.xlu1 %4702  ;;  %v4781_v3 = vpop.permute.xlu0 %4780 }
0x2384   :  { %v13110_v16 = vpop.eup %13109 }
0x2385   :  { %v4545_v17 = vmul.f32 %v13110_v16, %v13106_v4 }
0x2387   :  { %12076 = vmatmul.mubr.msk.f32.vlgmr.msra.gmra.mrb[52].mxu1 %vm483_vm7, %v4545_v17 }
0x2388   :  { %v13112_v18 = vpop.eup %13111  ;;  %12084 = vmatpush3.xpose.msk.msra.mxu1 %vm329_vm6, %v4705_v13  ;;  %12085 = vmatprep.mubr.msk.f32.mxu1 %vm13366_vm5, %v13365_v31 }
0x2389   :  { %v4547_v56 = vmul.f32 %v13112_v18, %v13108_v7  ;;  %12093 = vmatprep.subr.mxu1 %v13365_v31 }
0x238b   :  { %12081 = vmatmul.mubr.msk.f32.vlgmr.msra.gmra.mrb[52].mxu0 %vm483_vm7, %v4547_v56  ;;  %12086 = vmatmul.mubr.msk.f32.vlgmr.msra.gmra.mrb[54].mxu1 %vm329_vm6, %v4703_v5 }
0x238c   :  { %12089 = vmatpush3.xpose.msk.msra.mxu0 %vm329_vm6, %v4783_v19  ;;  %12090 = vmatprep.mubr.msk.f32.mxu0 %vm13366_vm5, %v13365_v31 }
0x238d   :  { %12098 = vmatprep.subr.mxu0 %v13365_v31  ;;  %12095 = vmatprep.mubr.msk.f32.mxu1 %vm13366_vm5, %v13365_v31 }
0x238f   :  { %12091 = vmatmul.mubr.msk.f32.vlgmr.msra.gmra.mrb[54].mxu0 %vm329_vm6, %v4781_v3 }
0x2390   :  { %12100 = vmatprep.mubr.msk.f32.mxu0 %vm13366_vm5, %v13365_v31 }
0x245a   :  { %v14108_v23 = vpop.f32.mrb[52].mxu1 }
0x245b   :  { %v12077_v25 = vpop.f32.mrb[53].mxu1 }
0x245e   :  { %v14110_v20 = vpop.f32.mrb[52].mxu0  ;;  %v4776_v21 = vpop.f32.mrb[54].mxu1 }
0x245f   :  { %v4858_v27 = vmul.f32 0.25, %v4776_v21  ;;  %v12082_v28 = vpop.f32.mrb[53].mxu0  ;;  %v12087_v29 = vpop.f32.mrb[55].mxu1 }
0x2461   :  { %v4860_v50 = vsel %vm483_vm7, %v4858_v27, -inf }
0x2462   :  { %4861 = vmax.xlane.f32.xlu1 %v4860_v50  ;;  %v4854_v30 = vpop.f32.mrb[54].mxu0 }
0x2463   :  { %v4859_v14 = vmul.f32 0.25, %v4854_v30  ;;  %v12092_v33 = vpop.f32.mrb[55].mxu0 }
0x2465   :  { %v4863_v11 = vsel %vm483_vm7, %v4859_v14, -inf }
0x2466   :  { %4864 = vmax.xlane.f32.xlu0 %v4863_v11 }
0x2473   :  { %4958 = vrot.lane.b32.xlu1 %v14018_v6, %s13371_s15 }
0x2477   :  { %5036 = vrot.lane.b32.xlu1 %v14010_v1, %s13361_s18 }
0x247c   :  { %4882 = vrot.lane.b32.xlu0 %v14012_v59, %s13371_s15 }
0x24ef   :  { %v4862_v24 = vpop.xlane.xlu1 %4861 }
0x24f0   :  { %v4866_v35 = vsub.f32 %v4858_v27, %v4862_v24  ;;  %v5398_v24 = vld [vmem:[#allocation4 + $0x88] sm:$0xff] }
0x24f2   :  { %v4868_v26 = vmul.f32 1.442695, %v4866_v35  ;;  %v5399_v35 = vld [vmem:[#allocation4 + $0x90] sm:$0xff] }
0x24f3   :  { %v4959_v36 = vpop.permute.xlu1 %4958  ;;  %v4865_v37 = vpop.xlane.xlu0 %4864 }
0x24f4   :  { %13113 = vpow2.f32 %v4868_v26  ;;  %v4867_v43 = vsub.f32 %v4859_v14, %v4865_v37  ;;  %12099 = vmatpush3.msra.mxu0 %v4959_v36  ;;  %v5400_v36 = vld [vmem:[#allocation4 + $0x98] sm:$0xff] }
0x24f5   :  { %12108 = vmatprep.subr.mxu0 %v13365_v31  ;;  %v12752_v37 = vpack.c.bf16 %v5400_v36, %v5399_v35 }
0x24f6   :  { %v4870_v46 = vmul.f32 1.442695, %v4867_v43  ;;  %v5401_v43 = vld [vmem:[#allocation4 + $0xa0] sm:$0xff] }
0x24f7   :  { %v4883_v41 = vpop.permute.xlu0 %4882  ;;  %v5037_v55 = vpop.permute.xlu1 %5036 }
0x24f8   :  { %13115 = vpow2.f32 %v4870_v46  ;;  %12094 = vmatpush3.msra.mxu1 %v4883_v41  ;;  %v5402_v46 = vld [vmem:[#allocation4 + $0xa8] sm:$0xff] }
0x24f9   :  { %12103 = vmatprep.subr.mxu1 %v13365_v31  ;;  %v12756_v41 = vpack.c.bf16 %v5402_v46, %v5401_v43 }
0x24fe   :  { %v13114_v32 = vpop.eup %13113 }
0x24ff   :  { %v4872_v47 = vsel %vm483_vm7, %v13114_v32, 0.0 }
0x2500   :  { %4873 = vadd.xlane.f32.xlu0 %v4872_v47  ;;  %v5404_v47 = vld [vmem:[#allocation4 + $0xb8] sm:$0xff] }
0x2502   :  { %v13116_v51 = vpop.eup %13115 }
0x2503   :  { %v4875_v53 = vsel %vm483_vm7, %v13116_v51, 0.0 }
0x2504   :  { %4876 = vadd.xlane.f32.xlu1 %v4875_v53 }
0x2515   :  { %5034 = vrot.lane.b32.xlu1 %v14010_v1, %s13372_s16 }
0x2516   :  { %5114 = vrot.lane.b32.xlu0 %v14016_v40, %s13361_s18 }
0x251a   :  { %5112 = vrot.lane.b32.xlu0 %v14016_v40, %s13372_s16 }
0x258d   :  { %v4874_v57 = vpop.xlane.xlu0 %4873 }
0x258e   :  { %13117 = vrcp.f32 %v4874_v57 }
0x2591   :  { %v4877_v34 = vpop.xlane.xlu1 %4876  ;;  %v5115_v62 = vpop.permute.xlu0 %5114 }
0x2592   :  { %13119 = vrcp.f32 %v4877_v34 }
0x2595   :  { %v5035_v40 = vpop.permute.xlu1 %5034  ;;  %v5113_v63 = vpop.permute.xlu0 %5112 }
0x2598   :  { %v13118_v58 = vpop.eup %13117 }
0x2599   :  { %v4879_v60 = vmul.f32 %v13118_v58, %v13114_v32  ;;  %v5403_v32 = vld [vmem:[#allocation4 + $0xb0] sm:$0xff]  ;;  %v11193_v58 = vld [vmem:[%s14958_s9 + $0x8] ss:$0 sm:$0xff] }
0x259b   :  { %12096 = vmatmul.mubr.msk.f32.vlgmr.msra.gmra.mrb[56].mxu1 %vm483_vm7, %v4879_v60  ;;  %v3846_v60 = vadd.f32 %v14038_v8, %v11193_v58 }
0x259c   :  { %v13120_v61 = vpop.eup %13119  ;;  %12104 = vmatpush3.xpose.msk.msra.mxu1 %vm329_vm6, %v5037_v55  ;;  %12105 = vmatprep.mubr.msk.f32.mxu1 %vm13366_vm5, %v13365_v31 }
0x259d   :  { %v4881_v1 = vmul.f32 %v13120_v61, %v13116_v51  ;;  %12113 = vmatprep.subr.mxu1 %v13365_v31  ;;  %v12760_v51 = vpack.c.bf16 %v5404_v47, %v5403_v32  ;;  %v3841_v61 = vadd.f32 %v11193_v58, %v14040_v10 }
0x259f   :  { %12101 = vmatmul.mubr.msk.f32.vlgmr.msra.gmra.mrb[56].mxu0 %vm483_vm7, %v4881_v1  ;;  %12106 = vmatmul.mubr.msk.f32.vlgmr.msra.gmra.mrb[58].mxu1 %vm329_vm6, %v5035_v40  ;;  %v3849_v1 = vadd.f32 %v3841_v61, %v13967_v38 }
0x25a0   :  { %12109 = vmatpush3.xpose.msk.msra.mxu0 %vm329_vm6, %v5115_v62  ;;  %12110 = vmatprep.mubr.msk.f32.mxu0 %vm13366_vm5, %v13365_v31  ;;  %v3850_v62 = vadd.f32 %v3846_v60, %v13969_v22 }
0x25a1   :  { %12118 = vmatprep.subr.mxu0 %v13365_v31  ;;  %12115 = vmatprep.mubr.msk.f32.mxu1 %vm13366_vm5, %v13365_v31 }
0x25a2   :  { %v3854_v40 = vsel %vm242_vm4, %v3850_v62, 0.0 }
0x25a3   :  { %12111 = vmatmul.mubr.msk.f32.vlgmr.msra.gmra.mrb[58].mxu0 %vm329_vm6, %v5113_v63  ;;  %v3851_v63 = vsel %vm242_vm4, %v3849_v1, 0.0 }
0x25a4   :  { %12120 = vmatprep.mubr.msk.f32.mxu0 %vm13366_vm5, %v13365_v31 }
0x266e   :  { %v4954_v0 = vpop.f32.mrb[56].mxu1 }
0x266f   :  { %v12097_v9 = vpop.f32.mrb[57].mxu1 }
0x2672   :  { %v5030_v2 = vpop.f32.mrb[56].mxu0  ;;  %v5108_v4 = vpop.f32.mrb[58].mxu1 }
0x2673   :  { %v5190_v48 = vmul.f32 0.25, %v5108_v4  ;;  %v12102_v7 = vpop.f32.mrb[57].mxu0  ;;  %v12107_v12 = vpop.f32.mrb[59].mxu1 }
0x2675   :  { %v5192_v13 = vsel %vm483_vm7, %v5190_v48, -inf }
0x2676   :  { %5193 = vmax.xlane.f32.xlu1 %v5192_v13  ;;  %v5186_v15 = vpop.f32.mrb[58].mxu0 }
0x2677   :  { %v5191_v52 = vmul.f32 0.25, %v5186_v15  ;;  %v12112_v16 = vpop.f32.mrb[59].mxu0 }
0x2679   :  { %v5195_v17 = vsel %vm483_vm7, %v5191_v52, -inf }
0x267a   :  { %5196 = vmax.xlane.f32.xlu0 %v5195_v17 }
0x2703   :  { %v5194_v18 = vpop.xlane.xlu1 %5193 }
0x2704   :  { %v5198_v19 = vsub.f32 %v5190_v48, %v5194_v18 }
0x2706   :  { %v5200_v56 = vmul.f32 1.442695, %v5198_v19 }
0x2707   :  { %v5197_v5 = vpop.xlane.xlu0 %5196 }
0x2708   :  { %13121 = vpow2.f32 %v5200_v56  ;;  %v5199_v3 = vsub.f32 %v5191_v52, %v5197_v5 }
0x270a   :  { %v5202_v25 = vmul.f32 1.442695, %v5199_v3 }
0x270c   :  { %13123 = vpow2.f32 %v5202_v25 }
0x2712   :  { %v13122_v21 = vpop.eup %13121 }
0x2713   :  { %v5204_v27 = vsel %vm483_vm7, %v13122_v21, 0.0 }
0x2714   :  { %5205 = vadd.xlane.f32.xlu0 %v5204_v27 }
0x2716   :  { %v13124_v28 = vpop.eup %13123 }
0x2717   :  { %v5207_v29 = vsel %vm483_vm7, %v13124_v28, 0.0 }
0x2718   :  { %5208 = vadd.xlane.f32.xlu1 %v5207_v29 }
0x2729   :  { %5290 = vrot.lane.b32.xlu1 %v14018_v6, %s13372_s16 }
0x272a   :  { %5214 = vrot.lane.b32.xlu0 %v14012_v59, %s13372_s16 }
0x272d   :  { %5368 = vrot.lane.b32.xlu1 %v14108_v23, %s13361_s18 }
0x272e   :  { %5370 = vrot.lane.b32.xlu0 %v14110_v20, %s13361_s18  ;;  %v5397_v20 = vld [vmem:[#allocation4 + $0x80] sm:$0xff] }
0x272f   :  { %v12748_v26 = vpack.c.bf16 %v5398_v24, %v5397_v20 }
0x2731   :  { %5376 = vrot.lane.b32.xlu1 %v4954_v0, %s13370_s26 }
0x2732   :  { %5378 = vrot.lane.b32.xlu0 %v5030_v2, %s13370_s26 }
0x27a1   :  { %v5206_v50 = vpop.xlane.xlu0 %5205 }
0x27a2   :  { %13125 = vrcp.f32 %v5206_v50 }
0x27a5   :  { %v5209_v30 = vpop.xlane.xlu1 %5208  ;;  %v5215_v14 = vpop.permute.xlu0 %5214 }
0x27a6   :  { %13127 = vrcp.f32 %v5209_v30  ;;  %12114 = vmatpush3.msra.mxu1 %v5215_v14 }
0x27a7   :  { %12749 = vmatprep.subr.bf16.mxu1 %v12748_v26 }
0x27a9   :  { %v5291_v6 = vpop.permute.xlu1 %5290  ;;  %v5371_v9 = vpop.permute.xlu0 %5370 }
0x27aa   :  { %12119 = vmatpush3.msra.mxu0 %v5291_v6  ;;  %v5391_v38 = vsel %vm329_vm6, %v14072_v44, %v5371_v9  ;;  %v11225_v6 = vld [vmem:[%s14958_s9 + $0x3] ss:$0 sm:$0xff] }
0x27ac   :  { %v13126_v33 = vpop.eup %13125 }
0x27ad   :  { %v5211_v59 = vmul.f32 %v13126_v33, %v13122_v21  ;;  %v5369_v0 = vpop.permute.xlu1 %5368  ;;  %v5379_v48 = vpop.permute.xlu0 %5378  ;;  %v11194_v33 = vld [vmem:[%s14958_s9 + $0xe] ss:$0 sm:$0xff] }
0x27ae   :  { %v5390_v4 = vsel %vm329_vm6, %v14070_v39, %v5369_v0  ;;  %v5393_v7 = vsel %vm1676_vm9, %v5391_v38, %v5379_v48  ;;  %v5535_v38 = vld [vmem:[#allocation2 + $0x188] sm:$0xff] }
0x27af   :  { %12116 = vmatmul.mubr.msk.f32.vlgmr.msra.gmra.mrb[60].mxu1 %vm483_vm7, %v5211_v59 }
0x27b0   :  { %v13128_v23 = vpop.eup %13127  ;;  %12751 = vmatpush3.bf16.msra.mxu1 %v12748_v26 }
0x27b1   :  { %v5213_v11 = vmul.f32 %v13128_v23, %v13124_v28  ;;  %12753 = vmatprep.subr.bf16.mxu1 %v12752_v37  ;;  %v5377_v2 = vpop.permute.xlu1 %5376 }
0x27b2   :  { %v5392_v8 = vsel %vm1676_vm9, %v5390_v4, %v5377_v2 }
0x27b3   :  { %12121 = vmatmul.mubr.msk.f32.vlgmr.msra.gmra.mrb[60].mxu0 %vm483_vm7, %v5213_v11  ;;  %v11195_v11 = vld [vmem:[%s14958_s9 + $0x1a] ss:$0 sm:$0xff] }
0x27b4   :  { %5633 = vmatprep.mubr.f32.mxu0 %v13365_v31  ;;  %12755 = vmatpush3.bf16.msra.mxu1 %v12752_v37 }
0x27b5   :  { %12757 = vmatprep.subr.bf16.mxu1 %v12756_v41 }
0x27b8   :  { %12759 = vmatpush3.bf16.msra.mxu1 %v12756_v41 }
0x27b9   :  { %12761 = vmatprep.subr.bf16.mxu1 %v12760_v51 }
0x27bc   :  { %12763 = vmatpush3.bf16.msra.mxu1 %v12760_v51 }
0x2882   :  { %v5286_v53 = vpop.f32.mrb[60].mxu1 }
0x2883   :  { %5384 = vrot.lane.b32.xlu1 %v5286_v53, %s13368_s14  ;;  %v12117_v55 = vpop.f32.mrb[61].mxu1 }
0x2886   :  { %v5362_v57 = vpop.f32.mrb[60].mxu0 }
0x2887   :  { %5386 = vrot.lane.b32.xlu0 %v5362_v57, %s13368_s14  ;;  %v12122_v34 = vpop.f32.mrb[61].mxu0 }
0x28a6   :  { %3855 = vadd.xlane.f32.xlu0 %v3854_v40 }
0x28a7   :  { %3852 = vadd.xlane.f32.xlu1 %v3851_v63 }
0x28f5   :  { %v5385_v10 = vpop.permute.xlu1 %5384 }
0x28f6   :  { %v5394_v22 = vsel %vm1679_vm8, %v5392_v8, %v5385_v10 }
0x28f7   :  { %12139 = vmatprep.mubr.msk.f32.mxu1 %vm242_vm4, %v5394_v22 }
0x28f9   :  { %v5387_v12 = vpop.permute.xlu0 %5386 }
0x28fa   :  { %v5395_v13 = vsel %vm1679_vm8, %v5393_v7, %v5387_v12  ;;  %v5537_v7 = vld [vmem:[#allocation2 + $0x198] sm:$0xff] }
0x28fb   :  { %12140 = vmatmul.mubr.msk.f32.vlgmr.msra.gmra.mrb[62].mxu1 %vm242_vm4, %v5395_v13  ;;  %v12764_v12 = vpack.c.bf16 %v5537_v7, %v5535_v38  ;;  %v5534_v13 = vld [vmem:[#allocation2 + $0x180] sm:$0xff] }
0x28fc   :  { %5714 = vmatprep.mubr.f32.mxu1 %v13365_v31 }
0x28fd   :  { %12781 = vmatprep.subr.bf16.mxu1 %v12764_v12  ;;  %12765 = vmatprep.subr.bf16.mxu0 %v12764_v12 }
0x2933   :  { %v3856_v39 = vpop.xlane.xlu0 %3855 }
0x2934   :  { %v3858_v15 = vmul.f32 0.015625, %v3856_v39  ;;  %v3853_v52 = vpop.xlane.xlu1 %3852  ;;  %v5536_v39 = vld [vmem:[#allocation2 + $0x190] sm:$0xff] }
0x2935   :  { %v3857_v16 = vmul.f32 0.015625, %v3853_v52  ;;  %v5539_v52 = vld [vmem:[#allocation2 + $0x1a8] sm:$0xff] }
0x2936   :  { %v3860_v17 = vsub.f32 %v3850_v62, %v3858_v15  ;;  %v12766_v15 = vpack.c.bf16 %v5536_v39, %v5534_v13 }
0x2937   :  { %v3859_v18 = vsub.f32 %v3849_v1, %v3857_v16  ;;  %v5541_v16 = vld [vmem:[#allocation2 + $0x1b8] sm:$0xff] }
0x2938   :  { %v3862_v19 = vmul.f32 %v3860_v17, %v3860_v17  ;;  %12783 = vmatpush1.bf16.msra.mxu1 %v12766_v15  ;;  %12767 = vmatpush1.bf16.msra.mxu0 %v12766_v15 }
0x2939   :  { %v3861_v56 = vmul.f32 %v3859_v18, %v3859_v18 }
0x293a   :  { %v3866_v5 = vsel %vm242_vm4, %v3862_v19, 0.0  ;;  %v5540_v19 = vld [vmem:[#allocation2 + $0x1b0] sm:$0xff] }
0x293b   :  { %3867 = vadd.xlane.f32.xlu1 %v3866_v5  ;;  %v3863_v44 = vsel %vm242_vm4, %v3861_v56, 0.0  ;;  %v5543_v5 = vld [vmem:[#allocation2 + $0x1c8] sm:$0xff] }
0x293c   :  { %3864 = vadd.xlane.f32.xlu0 %v3863_v44  ;;  %v5545_v44 = vld [vmem:[#allocation2 + $0x1d8] sm:$0xff] }
0x29c8   :  { %v3868_v3 = vpop.xlane.xlu1 %3867 }
0x29c9   :  { %v3870_v25 = vmul.f32 0.015625, %v3868_v3  ;;  %v3865_v21 = vpop.xlane.xlu0 %3864  ;;  %v12772_v3 = vpack.c.bf16 %v5545_v44, %v5543_v5 }
0x29ca   :  { %v3869_v27 = vmul.f32 0.015625, %v3865_v21  ;;  %v5544_v21 = vld [vmem:[#allocation2 + $0x1d0] sm:$0xff] }
0x29cb   :  { %v3872_v28 = vadd.f32 1e-05, %v3870_v25  ;;  %v5542_v25 = vld [vmem:[#allocation2 + $0x1c0] sm:$0xff] }
0x29cc   :  { %v3871_v29 = vadd.f32 1e-05, %v3869_v27  ;;  %v12774_v27 = vpack.c.bf16 %v5544_v21, %v5542_v25 }
0x29cd   :  { %13129 = vrsqrt.f32 %v3872_v28  ;;  %v5547_v28 = vld [vmem:[#allocation2 + $0x1e8] sm:$0xff] }
0x29ce   :  { %13131 = vrsqrt.f32 %v3871_v29  ;;  %v12141_v50 = vpop.f32.mrb[62].mxu1  ;;  %v5549_v29 = vld [vmem:[#allocation2 + $0x1f8] sm:$0xff] }
0x29cf   :  { %v5482_v30 = vpop.f32.mrb[63].mxu1  ;;  %v5488_v24 = vadd.f32 %v12141_v50, %v11225_v6  ;;  %v12776_v50 = vpack.c.bf16 %v5549_v29, %v5547_v28 }
0x29d0   :  { %v5483_v26 = vadd.f32 %v11225_v6, %v5482_v30  ;;  %v5546_v30 = vld [vmem:[#allocation2 + $0x1e0] sm:$0xff] }
0x29d1   :  { %v5492_v46 = vadd.f32 %v5488_v24, %v13993_v42 }
0x29d2   :  { %v5491_v32 = vadd.f32 %v5483_v26, %v13984_v54 }
0x29d3   :  { %v5496_v51 = vsel %vm242_vm4, %v5492_v46, 0.0 }
0x29d4   :  { %v5493_v53 = vsel %vm242_vm4, %v5491_v32, 0.0 }
0x29d7   :  { %v13130_v14 = vpop.eup %13129 }
0x29d8   :  { %v13132_v59 = vpop.eup %13131  ;;  %v3876_v23 = vmul.f32 %v13130_v14, %v3860_v17  ;;  %v12768_v17 = vpack.c.bf16 %v5541_v16, %v5539_v52  ;;  %v5548_v14 = vld [vmem:[#allocation2 + $0x1f0] sm:$0xff] }
0x29d9   :  { %v3875_v20 = vmul.f32 %v13132_v59, %v3859_v18  ;;  %v5538_v18 = vld [vmem:[#allocation2 + $0x1a0] sm:$0xff]  ;;  %v12778_v6 = vpack.c.bf16 %v5548_v14, %v5546_v30 }
0x29da   :  { %v3883_v35 = vmul.f32 %v11194_v33, %v3876_v23  ;;  %v12770_v56 = vpack.c.bf16 %v5540_v19, %v5538_v18  ;;  %12785 = vmatprep.subr.bf16.mxu1 %v12768_v17  ;;  %12769 = vmatprep.subr.bf16.mxu0 %v12768_v17 }
0x29db   :  { %v3882_v36 = vmul.f32 %v11194_v33, %v3875_v20 }
0x29dc   :  { %v3890_v37 = vadd.f32 %v11195_v11, %v3883_v35  ;;  %12787 = vmatpush1.bf16.msra.mxu1 %v12770_v56  ;;  %12771 = vmatpush1.bf16.msra.mxu0 %v12770_v56 }
0x29dd   :  { %v3889_v43 = vadd.f32 %v11195_v11, %v3882_v36  ;;  %12789 = vmatprep.subr.bf16.mxu1 %v12772_v3  ;;  %12773 = vmatprep.subr.bf16.mxu0 %v12772_v3 }
0x29de   :  { %v3894_v41 = vsel %vm242_vm4, %v3890_v37, 0.0 }
0x29df   :  { %3895 = vadd.xlane.f32.xlu1 %v3894_v41  ;;  %v3891_v47 = vsel %vm242_vm4, %v3889_v43, 0.0 }
0x29e0   :  { %3892 = vadd.xlane.f32.xlu0 %v3891_v47  ;;  %12791 = vmatpush1.bf16.msra.mxu1 %v12774_v27  ;;  %v11196_v47 = vld [vmem:[%s14958_s9 + $0xf] ss:$0 sm:$0xff] }
0x29e1   :  { %12775 = vmatpush1.bf16.msra.mxu0 %v12774_v27  ;;  %12793 = vmatprep.subr.bf16.mxu1 %v12776_v50 }
0x29e2   :  { %12777 = vmatprep.subr.bf16.mxu0 %v12776_v50 }
0x29e3   :  { %5497 = vadd.xlane.f32.xlu1 %v5496_v51 }
0x29e4   :  { %5494 = vadd.xlane.f32.xlu0 %v5493_v53  ;;  %12795 = vmatpush1.bf16.msra.mxu1 %v12778_v6 }
0x29e5   :  { %12779 = vmatpush1.bf16.msra.mxu0 %v12778_v6  ;;  %12162 = vmatprep.subr.mxu1 %v13365_v31 }
0x29e6   :  { %12142 = vmatprep.subr.mxu0 %v13365_v31 }
0x2a6c   :  { %v3896_v55 = vpop.xlane.xlu1 %3895 }
0x2a6d   :  { %v3898_v57 = vmul.f32 0.015625, %v3896_v55  ;;  %v3893_v34 = vpop.xlane.xlu0 %3892  ;;  %v11197_v55 = vld [vmem:[%s14958_s9 + $0x1b] ss:$0 sm:$0xff] }
0x2a6e   :  { %v3897_v58 = vmul.f32 0.015625, %v3893_v34 }
0x2a6f   :  { %v14202_v60 = vsub.f32 %v3890_v37, %v3898_v57 }
0x2a70   :  { %v14204_v42 = vsub.f32 %v3889_v43, %v3897_v58  ;;  %v5498_v61 = vpop.xlane.xlu1 %5497 }
0x2a71   :  { %v5500_v54 = vmul.f32 0.015625, %v5498_v61  ;;  %v5495_v62 = vpop.xlane.xlu0 %5494  ;;  %v3902_v1 = vmul.f32 %v14202_v60, %v14202_v60  ;;  %v11228_v61 = vld [vmem:[%s14958_s9 + $0x10] ss:$0 sm:$0xff] }
0x2a72   :  { %v5499_v40 = vmul.f32 0.015625, %v5495_v62  ;;  %v3901_v63 = vmul.f32 %v14204_v42, %v14204_v42 }
0x2a73   :  { %v14210_v0 = vsub.f32 %v5492_v46, %v5500_v54  ;;  %v3906_v9 = vsel %vm242_vm4, %v3902_v1, 0.0 }
0x2a74   :  { %v14213_v2 = vsub.f32 %v5491_v32, %v5499_v40  ;;  %3907 = vadd.xlane.f32.xlu1 %v3906_v9  ;;  %v3903_v4 = vsel %vm242_vm4, %v3901_v63, 0.0 }
0x2a75   :  { %3904 = vadd.xlane.f32.xlu0 %v3903_v4  ;;  %v5504_v48 = vmul.f32 %v14210_v0, %v14210_v0  ;;  %v11230_v4 = vld [vmem:[%s14953_s4 + $0x3] ss:$8 sm:$0x3] }
0x2a76   :  { %v5503_v8 = vmul.f32 %v14213_v2, %v14213_v2  ;;  %v5560_v38 = vrot.slane %v11230_v4, %v13555_v49 }
0x2a77   :  { %v5508_v10 = vsel %vm242_vm4, %v5504_v48, 0.0  ;;  %v5556_v48 = vrot.slane %v11230_v4, %v13549_v45 }
0x2a78   :  { %5509 = vadd.xlane.f32.xlu1 %v5508_v10  ;;  %v5505_v22 = vsel %vm242_vm4, %v5503_v8, 0.0 }
0x2a79   :  { %5506 = vadd.xlane.f32.xlu0 %v5505_v22 }
0x2b01   :  { %v3908_v33 = vpop.xlane.xlu1 %3907 }
0x2b02   :  { %v3910_v59 = vmul.f32 0.015625, %v3908_v33  ;;  %v3905_v23 = vpop.xlane.xlu0 %3904 }
0x2b03   :  { %v3909_v11 = vmul.f32 0.015625, %v3905_v23 }
0x2b04   :  { %v3912_v20 = vadd.f32 1e-05, %v3910_v59 }
0x2b05   :  { %v3911_v24 = vadd.f32 1e-05, %v3909_v11  ;;  %v5510_v35 = vpop.xlane.xlu1 %5509 }
0x2b06   :  { %13133 = vrsqrt.f32 %v3912_v20  ;;  %v5512_v26 = vmul.f32 0.015625, %v5510_v35  ;;  %v5507_v36 = vpop.xlane.xlu0 %5506 }
0x2b07   :  { %13135 = vrsqrt.f32 %v3911_v24  ;;  %v5511_v37 = vmul.f32 0.015625, %v5507_v36 }
0x2b08   :  { %v5514_v43 = vadd.f32 1e-05, %v5512_v26 }
0x2b09   :  { %v5513_v46 = vadd.f32 1e-05, %v5511_v37 }
0x2b0a   :  { %13137 = vrsqrt.f32 %v5514_v43 }
0x2b0b   :  { %13139 = vrsqrt.f32 %v5513_v46 }
0x2b10   :  { %v13134_v41 = vpop.eup %13133 }
0x2b11   :  { %v13136_v32 = vpop.eup %13135  ;;  %v3916_v53 = vmul.f32 %v13134_v41, %v14202_v60  ;;  %v11229_v60 = vld [vmem:[%s14958_s9 + $0x1c] ss:$0 sm:$0xff] }
0x2b12   :  { %v3915_v51 = vmul.f32 %v13136_v32, %v14204_v42 }
0x2b13   :  { %v3923_v1 = vmul.f32 %v11196_v47, %v3916_v53 }
0x2b14   :  { %v13138_v57 = vpop.eup %13137  ;;  %v3922_v34 = vmul.f32 %v11196_v47, %v3915_v51 }
0x2b15   :  { %v13140_v58 = vpop.eup %13139  ;;  %v5518_v42 = vmul.f32 %v13138_v57, %v14210_v0  ;;  %v14247_v9 = vadd.f32 %v11197_v55, %v3923_v1 }
0x2b16   :  { %v5517_v54 = vmul.f32 %v13140_v58, %v14213_v2  ;;  %v14236_v62 = vadd.f32 %v11197_v55, %v3922_v34 }
0x2b17   :  { %v5525_v2 = vmul.f32 %v11228_v61, %v5518_v42 }
0x2b18   :  { %11233 = vmatmul.mubr.msk.f32.vlgmr.msra.gmra.mrb[64].mxu1 %vm242_vm4, %v14236_v62  ;;  %v5524_v40 = vmul.f32 %v11228_v61, %v5517_v54 }
0x2b19   :  { %5720 = vmatprep.mubr.f32.mxu1 %v13365_v31  ;;  %v14256_v0 = vadd.f32 %v11229_v60, %v5525_v2 }
0x2b1a   :  { %v14245_v63 = vadd.f32 %v11229_v60, %v5524_v40 }
0x2b1c   :  { %11231 = vmatmul.mubr.msk.f32.vlgmr.msra.gmra.mrb[62].mxu0 %vm242_vm4, %v14245_v63  ;;  %11234 = vmatmul.mubr.msk.f32.gmra.mrb[66].mxu1 %vm242_vm4, %v14247_v9 }
0x2b1d   :  { %5638 = vmatprep.mubr.f32.mxu0 %v13365_v31  ;;  %12164 = vmatprep.mubr.msk.f32.mxu1 %vm13366_vm5, %v13365_v31 }
0x2b20   :  { %11232 = vmatmul.mubr.msk.f32.gmra.mrb[64].mxu0 %vm242_vm4, %v14256_v0 }
0x2b21   :  { %12144 = vmatprep.mubr.msk.f32.mxu0 %vm13366_vm5, %v13365_v31 }
0x2beb   :  { %v5716_v8 = vpop.f32.mrb[64].mxu1 }
0x2bec   :  { %v14266_v10 = vadd.f32 %v5716_v8, %v5556_v48  ;;  %v5718_v22 = vpop.f32.mrb[65].mxu1 }
0x2bed   :  { %v14289_v44 = vadd.f32 %v5718_v22, %v5560_v38 }
0x2bee   :  { %5728 = vrot.lane.b32.xlu0 %v14266_v10, %s13367_s12 }
0x2bef   :  { %v5635_v7 = vpop.f32.mrb[62].mxu0  ;;  %v5722_v12 = vpop.f32.mrb[66].mxu1 }
0x2bf0   :  { %v14271_v13 = vadd.f32 %v5635_v7, %v5556_v48  ;;  %v14273_v39 = vadd.f32 %v5722_v12, %v5556_v48  ;;  %v5637_v15 = vpop.f32.mrb[63].mxu0  ;;  %v5724_v52 = vpop.f32.mrb[67].mxu1 }
0x2bf1   :  { %v14275_v16 = vadd.f32 %v5724_v52, %v5560_v38 }
0x2bf2   :  { %5806 = vrot.lane.b32.xlu1 %v14273_v39, %s13367_s12 }
0x2bf3   :  { %v5640_v17 = vpop.f32.mrb[64].mxu0 }
0x2bf4   :  { %v14279_v18 = vadd.f32 %v5640_v17, %v5556_v48  ;;  %v5642_v19 = vpop.f32.mrb[65].mxu0 }
0x2c60   :  { %v5729_v56 = vpop.permute.xlu0 %5728 }
0x2c61   :  { %12143 = vmatpush3.xpose.msk.msra.mxu0 %vm329_vm6, %v5729_v56 }
0x2c62   :  { %12147 = vmatprep.subr.mxu0 %v13365_v31 }
0x2c64   :  { %12145 = vmatmul.mubr.msk.f32.vlgmr.msra.gmra.mrb[66].mxu0 %vm329_vm6, %v14271_v13  ;;  %v5807_v5 = vpop.permute.xlu1 %5806 }
0x2c65   :  { %12148 = vmatpush3.xpose.msk.msra.mxu0 %vm329_vm6, %v5807_v5  ;;  %12149 = vmatprep.mubr.msk.f32.mxu0 %vm13366_vm5, %v13365_v31 }
0x2c66   :  { %12152 = vmatprep.subr.mxu0 %v13365_v31 }
0x2c68   :  { %12150 = vmatmul.mubr.msk.f32.vlgmr.msra.gmra.mrb[68].mxu0 %vm329_vm6, %v14279_v18 }
0x2c69   :  { %12153 = vmatpush3.msra.mxu0 %v14289_v44  ;;  %12154 = vmatprep.mubr.msk.f32.mxu0 %vm13366_vm5, %v13365_v31 }
0x2c6a   :  { %12157 = vmatprep.subr.mxu0 %v13365_v31 }
0x2d37   :  { %v5801_v3 = vpop.f32.mrb[66].mxu0 }
0x2d38   :  { %v5883_v25 = vmul.f32 0.25, %v5801_v3  ;;  %v12146_v21 = vpop.f32.mrb[67].mxu0 }
0x2d3a   :  { %v5885_v27 = vsel %vm483_vm7, %v5883_v25, -inf }
0x2d3b   :  { %5886 = vmax.xlane.f32.xlu1 %v5885_v27  ;;  %v5879_v28 = vpop.f32.mrb[68].mxu0 }
0x2d3c   :  { %v5884_v29 = vmul.f32 0.25, %v5879_v28  ;;  %v12151_v50 = vpop.f32.mrb[69].mxu0 }
0x2d3e   :  { %v5888_v30 = vsel %vm483_vm7, %v5884_v29, -inf }
0x2d3f   :  { %5889 = vmax.xlane.f32.xlu0 %v5888_v30 }
0x2d4c   :  { %6133 = vrot.lane.b32.xlu1 %v14273_v39, %s13368_s14 }
0x2dc8   :  { %v5887_v14 = vpop.xlane.xlu1 %5886 }
0x2dc9   :  { %v5891_v6 = vsub.f32 %v5883_v25, %v5887_v14 }
0x2dcb   :  { %v5893_v33 = vmul.f32 1.442695, %v5891_v6 }
0x2dcc   :  { %v5890_v59 = vpop.xlane.xlu0 %5889  ;;  %v6134_v36 = vpop.permute.xlu1 %6133 }
0x2dcd   :  { %13141 = vpow2.f32 %v5893_v33  ;;  %v5892_v23 = vsub.f32 %v5884_v29, %v5890_v59 }
0x2dcf   :  { %v5895_v11 = vmul.f32 1.442695, %v5892_v23 }
0x2dd1   :  { %13143 = vpow2.f32 %v5895_v11 }
0x2dd7   :  { %v13142_v20 = vpop.eup %13141 }
0x2dd8   :  { %v5897_v24 = vsel %vm483_vm7, %v13142_v20, 0.0 }
0x2dd9   :  { %5898 = vadd.xlane.f32.xlu0 %v5897_v24 }
0x2ddb   :  { %v13144_v35 = vpop.eup %13143 }
0x2ddc   :  { %v5900_v26 = vsel %vm483_vm7, %v13144_v35, 0.0 }
0x2ddd   :  { %5901 = vadd.xlane.f32.xlu1 %v5900_v26 }
0x2dee   :  { %6053 = vrot.lane.b32.xlu1 %v14271_v13, %s13369_s6 }
0x2def   :  { %6055 = vrot.lane.b32.xlu0 %v14266_v10, %s13368_s14 }
0x2df3   :  { %6131 = vrot.lane.b32.xlu0 %v14279_v18, %s13369_s6 }
0x2e66   :  { %v5899_v37 = vpop.xlane.xlu0 %5898 }
0x2e67   :  { %13145 = vrcp.f32 %v5899_v37 }
0x2e6a   :  { %v6056_v43 = vpop.permute.xlu0 %6055  ;;  %v5902_v46 = vpop.xlane.xlu1 %5901 }
0x2e6b   :  { %13147 = vrcp.f32 %v5902_v46  ;;  %12163 = vmatpush3.xpose.msk.msra.mxu1 %vm329_vm6, %v6056_v43 }
0x2e6c   :  { %12172 = vmatprep.subr.mxu1 %v13365_v31 }
0x2e6e   :  { %v6054_v41 = vpop.permute.xlu1 %6053  ;;  %v6132_v55 = vpop.permute.xlu0 %6131 }
0x2e6f   :  { %12165 = vmatmul.mubr.msk.f32.vlgmr.msra.gmra.mrb[68].mxu1 %vm329_vm6, %v6054_v41 }
0x2e70   :  { %12174 = vmatprep.mubr.msk.f32.mxu1 %vm13366_vm5, %v13365_v31 }
0x2e71   :  { %v13146_v32 = vpop.eup %13145 }
0x2e72   :  { %v5904_v47 = vmul.f32 %v13146_v32, %v13142_v20 }
0x2e74   :  { %12155 = vmatmul.mubr.msk.f32.vlgmr.msra.gmra.mrb[70].mxu0 %vm483_vm7, %v5904_v47 }
0x2e75   :  { %v13148_v51 = vpop.eup %13147  ;;  %12158 = vmatpush3.msra.mxu0 %v14275_v16  ;;  %12159 = vmatprep.mubr.msk.f32.mxu0 %vm13366_vm5, %v13365_v31 }
0x2e76   :  { %v5906_v53 = vmul.f32 %v13148_v51, %v13144_v35  ;;  %12167 = vmatprep.subr.mxu0 %v13365_v31 }
0x2e78   :  { %12160 = vmatmul.mubr.msk.f32.vlgmr.msra.gmra.mrb[72].mxu0 %vm483_vm7, %v5906_v53 }
0x2e79   :  { %12169 = vmatprep.mubr.msk.f32.mxu0 %vm13366_vm5, %v13365_v31 }
0x2e7c   :  { %12168 = vmatpush3.xpose.msk.msra.mxu0 %vm329_vm6, %v6134_v36 }
0x2e7d   :  { %12177 = vmatprep.subr.mxu0 %v13365_v31 }
0x2e7f   :  { %12170 = vmatmul.mubr.msk.f32.vlgmr.msra.gmra.mrb[74].mxu0 %vm329_vm6, %v6132_v55 }
0x2e80   :  { %12179 = vmatprep.mubr.msk.f32.mxu0 %vm13366_vm5, %v13365_v31 }
0x2f42   :  { %v6127_v57 = vpop.f32.mrb[68].mxu1 }
0x2f43   :  { %v6209_v34 = vmul.f32 0.25, %v6127_v57  ;;  %v12166_v58 = vpop.f32.mrb[69].mxu1 }
0x2f45   :  { %v6211_v61 = vsel %vm483_vm7, %v6209_v34, -inf }
0x2f46   :  { %6212 = vmax.xlane.f32.xlu1 %v6211_v61 }
0x2f47   :  { %v14328_v54 = vpop.f32.mrb[70].mxu0 }
0x2f48   :  { %v12156_v1 = vpop.f32.mrb[71].mxu0 }
0x2f4b   :  { %v14330_v42 = vpop.f32.mrb[72].mxu0 }
0x2f4c   :  { %v12161_v60 = vpop.f32.mrb[73].mxu0 }
0x2f52   :  { %v6205_v40 = vpop.f32.mrb[74].mxu0 }
0x2f53   :  { %v6210_v2 = vmul.f32 0.25, %v6205_v40  ;;  %v12171_v4 = vpop.f32.mrb[75].mxu0 }
0x2f55   :  { %v6214_v48 = vsel %vm483_vm7, %v6210_v2, -inf }
0x2f56   :  { %6215 = vmax.xlane.f32.xlu0 %v6214_v48 }
0x2f57   :  { %6311 = vrot.lane.b32.xlu1 %v14275_v16, %s13369_s6 }
0x2f5b   :  { %6389 = vrot.lane.b32.xlu1 %v14266_v10, %s13370_s26 }
0x2fd3   :  { %v6213_v8 = vpop.xlane.xlu1 %6212 }
0x2fd4   :  { %v6217_v22 = vsub.f32 %v6209_v34, %v6213_v8 }
0x2fd6   :  { %v6219_v38 = vmul.f32 1.442695, %v6217_v22 }
0x2fd7   :  { %v6312_v7 = vpop.permute.xlu1 %6311 }
0x2fd8   :  { %13149 = vpow2.f32 %v6219_v38  ;;  %12178 = vmatpush3.msra.mxu0 %v6312_v7 }
0x2fd9   :  { %12187 = vmatprep.subr.mxu0 %v13365_v31 }
0x2fdb   :  { %v6390_v27 = vpop.permute.xlu1 %6389 }
0x2fe2   :  { %v13150_v12 = vpop.eup %13149 }
0x2fe3   :  { %v6216_v15 = vpop.xlane.xlu0 %6215  ;;  %v6223_v52 = vsel %vm483_vm7, %v13150_v12, 0.0 }
0x2fe4   :  { %v6218_v17 = vsub.f32 %v6210_v2, %v6216_v15  ;;  %6224 = vadd.xlane.f32.xlu0 %v6223_v52 }
0x2fe6   :  { %v6221_v19 = vmul.f32 1.442695, %v6218_v17 }
0x2fe8   :  { %13151 = vpow2.f32 %v6221_v19 }
0x2ff2   :  { %v13152_v56 = vpop.eup %13151 }
0x2ff3   :  { %v6226_v5 = vsel %vm483_vm7, %v13152_v56, 0.0 }
0x2ff4   :  { %6227 = vadd.xlane.f32.xlu1 %v6226_v5 }
0x2ffa   :  { %6234 = vrot.lane.b32.xlu0 %v14289_v44, %s13369_s6 }
0x2ffe   :  { %6467 = vrot.lane.b32.xlu0 %v14273_v39, %s13370_s26 }
0x3002   :  { %6465 = vrot.lane.b32.xlu0 %v14279_v18, %s13371_s15 }
0x3005   :  { %6387 = vrot.lane.b32.xlu1 %v14271_v13, %s13371_s15 }
0x3071   :  { %v6225_v3 = vpop.xlane.xlu0 %6224 }
0x3072   :  { %13153 = vrcp.f32 %v6225_v3 }
0x3075   :  { %v6235_v25 = vpop.permute.xlu0 %6234 }
0x3076   :  { %12173 = vmatpush3.msra.mxu1 %v6235_v25 }
0x3077   :  { %12182 = vmatprep.subr.mxu1 %v13365_v31 }
0x3079   :  { %v6468_v14 = vpop.permute.xlu0 %6467 }
0x307c   :  { %v13154_v21 = vpop.eup %13153 }
0x307d   :  { %v6230_v28 = vmul.f32 %v13154_v21, %v13150_v12  ;;  %v6466_v33 = vpop.permute.xlu0 %6465 }
0x307f   :  { %12175 = vmatmul.mubr.msk.f32.vlgmr.msra.gmra.mrb[70].mxu1 %vm483_vm7, %v6230_v28 }
0x3080   :  { %12183 = vmatpush3.xpose.msk.msra.mxu1 %vm329_vm6, %v6390_v27  ;;  %12184 = vmatprep.mubr.msk.f32.mxu1 %vm13366_vm5, %v13365_v31 }
0x3081   :  { %v6228_v29 = vpop.xlane.xlu1 %6227  ;;  %12192 = vmatprep.subr.mxu1 %v13365_v31 }
0x3082   :  { %13155 = vrcp.f32 %v6228_v29 }
0x3085   :  { %v6388_v50 = vpop.permute.xlu1 %6387 }
0x3086   :  { %12185 = vmatmul.mubr.msk.f32.vlgmr.msra.gmra.mrb[72].mxu1 %vm329_vm6, %v6388_v50 }
0x3087   :  { %12194 = vmatprep.mubr.msk.f32.mxu1 %vm13366_vm5, %v13365_v31 }
0x308c   :  { %v13156_v30 = vpop.eup %13155 }
0x308d   :  { %v6232_v6 = vmul.f32 %v13156_v30, %v13152_v56 }
0x308f   :  { %12180 = vmatmul.mubr.msk.f32.vlgmr.msra.gmra.mrb[76].mxu0 %vm483_vm7, %v6232_v6 }
0x3090   :  { %12188 = vmatpush3.xpose.msk.msra.mxu0 %vm329_vm6, %v6468_v14  ;;  %12189 = vmatprep.mubr.msk.f32.mxu0 %vm13366_vm5, %v13365_v31 }
0x3091   :  { %12197 = vmatprep.subr.mxu0 %v13365_v31 }
0x3093   :  { %12190 = vmatmul.mubr.msk.f32.vlgmr.msra.gmra.mrb[78].mxu0 %vm329_vm6, %v6466_v33 }
0x3094   :  { %12199 = vmatprep.mubr.msk.f32.mxu0 %vm13366_vm5, %v13365_v31 }
0x3152   :  { %v14365_v59 = vpop.f32.mrb[70].mxu1 }
0x3153   :  { %v12176_v23 = vpop.f32.mrb[71].mxu1 }
0x3159   :  { %v6461_v11 = vpop.f32.mrb[72].mxu1 }
0x315a   :  { %v6543_v20 = vmul.f32 0.25, %v6461_v11  ;;  %v12186_v24 = vpop.f32.mrb[73].mxu1 }
0x315c   :  { %v6545_v35 = vsel %vm483_vm7, %v6543_v20, -inf }
0x315d   :  { %6546 = vmax.xlane.f32.xlu1 %v6545_v35 }
0x3162   :  { %v14368_v26 = vpop.f32.mrb[76].mxu0 }
0x3163   :  { %v12181_v36 = vpop.f32.mrb[77].mxu0 }
0x3166   :  { %v6539_v37 = vpop.f32.mrb[78].mxu0 }
0x3167   :  { %v6544_v43 = vmul.f32 0.25, %v6539_v37  ;;  %v12191_v46 = vpop.f32.mrb[79].mxu0 }
0x3168   :  { %v7082_v46 = vld [vmem:[#allocation4 + $0xc0] sm:$0xff] }
0x3169   :  { %v6548_v41 = vsel %vm483_vm7, %v6544_v43, -inf }
0x316a   :  { %6549 = vmax.xlane.f32.xlu0 %v6548_v41 }
0x316e   :  { %6643 = vrot.lane.b32.xlu1 %v14275_v16, %s13371_s15 }
0x3172   :  { %6721 = vrot.lane.b32.xlu1 %v14266_v10, %s13361_s18 }
0x31ea   :  { %v6547_v32 = vpop.xlane.xlu1 %6546 }
0x31eb   :  { %v6551_v47 = vsub.f32 %v6543_v20, %v6547_v32  ;;  %v7084_v32 = vld [vmem:[#allocation4 + $0xd0] sm:$0xff] }
0x31ed   :  { %v6553_v51 = vmul.f32 1.442695, %v6551_v47  ;;  %v7085_v47 = vld [vmem:[#allocation4 + $0xd8] sm:$0xff] }
0x31ee   :  { %v6644_v53 = vpop.permute.xlu1 %6643 }
0x31ef   :  { %13157 = vpow2.f32 %v6553_v51  ;;  %12198 = vmatpush3.msra.mxu0 %v6644_v53  ;;  %v12800_v51 = vpack.c.bf16 %v7085_v47, %v7084_v32  ;;  %v7086_v53 = vld [vmem:[#allocation4 + $0xe0] sm:$0xff]  ;;  %v7319_v47 = vld [vmem:[#allocation7 + $0x118] sm:$0xff] }
0x31f0   :  { %12207 = vmatprep.subr.mxu0 %v13365_v31 }
0x31f2   :  { %v6722_v2 = vpop.permute.xlu1 %6721 }
0x31f7   :  { %v6550_v55 = vpop.xlane.xlu0 %6549 }
0x31f8   :  { %v6552_v57 = vsub.f32 %v6544_v43, %v6550_v55  ;;  %v7087_v55 = vld [vmem:[#allocation4 + $0xe8] sm:$0xff] }
0x31f9   :  { %v13158_v34 = vpop.eup %13157 }
0x31fa   :  { %v6555_v58 = vmul.f32 1.442695, %v6552_v57  ;;  %v6557_v61 = vsel %vm483_vm7, %v13158_v34, 0.0  ;;  %v12804_v57 = vpack.c.bf16 %v7087_v55, %v7086_v53  ;;  %v7320_v53 = vld [vmem:[#allocation7 + $0x120] sm:$0xff]  ;;  %v7321_v55 = vld [vmem:[#allocation7 + $0x128] sm:$0xff] }
0x31fb   :  { %6558 = vadd.xlane.f32.xlu0 %v6557_v61 }
0x31fc   :  { %13159 = vpow2.f32 %v6555_v58  ;;  %v7089_v58 = vld [vmem:[#allocation4 + $0xf8] sm:$0xff] }
0x3206   :  { %v13160_v1 = vpop.eup %13159 }
0x3207   :  { %v6560_v60 = vsel %vm483_vm7, %v13160_v1, 0.0 }
0x3208   :  { %6561 = vadd.xlane.f32.xlu1 %v6560_v60 }
0x3211   :  { %6567 = vrot.lane.b32.xlu0 %v14289_v44, %s13371_s15 }
0x3215   :  { %6799 = vrot.lane.b32.xlu0 %v14273_v39, %s13361_s18 }
0x3219   :  { %6719 = vrot.lane.b32.xlu1 %v14271_v13, %s13372_s16  ;;  %6797 = vrot.lane.b32.xlu0 %v14279_v18, %s13372_s16 }
0x3288   :  { %v6559_v10 = vpop.xlane.xlu0 %6558 }
0x3289   :  { %13161 = vrcp.f32 %v6559_v10 }
0x328c   :  { %v6568_v40 = vpop.permute.xlu0 %6567 }
0x328d   :  { %12193 = vmatpush3.msra.mxu1 %v6568_v40 }
0x328e   :  { %12202 = vmatprep.subr.mxu1 %v13365_v31 }
0x3290   :  { %v6800_v18 = vpop.permute.xlu0 %6799 }
0x3293   :  { %v13162_v4 = vpop.eup %13161 }
0x3294   :  { %v6564_v48 = vmul.f32 %v13162_v4, %v13158_v34  ;;  %v6798_v38 = vpop.permute.xlu0 %6797  ;;  %v7088_v34 = vld [vmem:[#allocation4 + $0xf0] sm:$0xff] }
0x3295   :  { %v6562_v8 = vpop.xlane.xlu1 %6561  ;;  %v12808_v61 = vpack.c.bf16 %v7089_v58, %v7088_v34  ;;  %v7322_v34 = vld [vmem:[#allocation7 + $0x130] sm:$0xff]  ;;  %v7323_v58 = vld [vmem:[#allocation7 + $0x138] sm:$0xff] }
0x3296   :  { %13163 = vrcp.f32 %v6562_v8  ;;  %12195 = vmatmul.mubr.msk.f32.vlgmr.msra.gmra.mrb[74].mxu1 %vm483_vm7, %v6564_v48 }
0x3297   :  { %12203 = vmatpush3.xpose.msk.msra.mxu1 %vm329_vm6, %v6722_v2  ;;  %12204 = vmatprep.mubr.msk.f32.mxu1 %vm13366_vm5, %v13365_v31 }
0x3298   :  { %12212 = vmatprep.subr.mxu1 %v13365_v31 }
0x3299   :  { %v6720_v13 = vpop.permute.xlu1 %6719 }
0x329a   :  { %12205 = vmatmul.mubr.msk.f32.vlgmr.msra.gmra.mrb[76].mxu1 %vm329_vm6, %v6720_v13 }
0x329b   :  { %12214 = vmatprep.mubr.msk.f32.mxu1 %vm13366_vm5, %v13365_v31 }
0x32a0   :  { %v13164_v39 = vpop.eup %13163 }
0x32a1   :  { %v6566_v22 = vmul.f32 %v13164_v39, %v13160_v1 }
0x32a3   :  { %12200 = vmatmul.mubr.msk.f32.vlgmr.msra.gmra.mrb[80].mxu0 %vm483_vm7, %v6566_v22 }
0x32a4   :  { %12208 = vmatpush3.xpose.msk.msra.mxu0 %vm329_vm6, %v6800_v18  ;;  %12209 = vmatprep.mubr.msk.f32.mxu0 %vm13366_vm5, %v13365_v31 }
0x32a5   :  { %12217 = vmatprep.subr.mxu0 %v13365_v31 }
0x32a7   :  { %12210 = vmatmul.mubr.msk.f32.vlgmr.msra.gmra.mrb[82].mxu0 %vm329_vm6, %v6798_v38 }
0x32a8   :  { %12219 = vmatprep.mubr.msk.f32.mxu0 %vm13366_vm5, %v13365_v31 }
0x3369   :  { %v6639_v7 = vpop.f32.mrb[74].mxu1 }
0x336a   :  { %v12196_v12 = vpop.f32.mrb[75].mxu1 }
0x336d   :  { %v6793_v15 = vpop.f32.mrb[76].mxu1 }
0x336e   :  { %v6875_v52 = vmul.f32 0.25, %v6793_v15  ;;  %v12206_v17 = vpop.f32.mrb[77].mxu1 }
0x3370   :  { %v6877_v19 = vsel %vm483_vm7, %v6875_v52, -inf }
0x3371   :  { %6878 = vmax.xlane.f32.xlu1 %v6877_v19 }
0x3376   :  { %v6715_v56 = vpop.f32.mrb[80].mxu0 }
0x3377   :  { %v12201_v5 = vpop.f32.mrb[81].mxu0 }
0x337a   :  { %v6871_v3 = vpop.f32.mrb[82].mxu0 }
0x337b   :  { %v6876_v25 = vmul.f32 0.25, %v6871_v3  ;;  %v12211_v21 = vpop.f32.mrb[83].mxu0 }
0x337d   :  { %v6880_v27 = vsel %vm483_vm7, %v6876_v25, -inf }
0x337e   :  { %6881 = vmax.xlane.f32.xlu0 %v6880_v27 }
0x33fe   :  { %v6879_v28 = vpop.xlane.xlu1 %6878 }
0x33ff   :  { %v6883_v29 = vsub.f32 %v6875_v52, %v6879_v28 }
0x3401   :  { %v6885_v50 = vmul.f32 1.442695, %v6883_v29 }
0x3403   :  { %13165 = vpow2.f32 %v6885_v50 }
0x340b   :  { %v6882_v30 = vpop.xlane.xlu0 %6881 }
0x340c   :  { %v6884_v14 = vsub.f32 %v6876_v25, %v6882_v30 }
0x340d   :  { %v13166_v6 = vpop.eup %13165 }
0x340e   :  { %v6887_v33 = vmul.f32 1.442695, %v6884_v14  ;;  %v6889_v23 = vsel %vm483_vm7, %v13166_v6, 0.0 }
0x340f   :  { %6890 = vadd.xlane.f32.xlu0 %v6889_v23  ;;  %v7220_v23 = vld [vmem:[#allocation6 + $0x88] sm:$0xff] }
0x3410   :  { %13167 = vpow2.f32 %v6887_v33  ;;  %v7219_v33 = vld [vmem:[#allocation6 + $0x80] sm:$0xff] }
0x341a   :  { %v13168_v11 = vpop.eup %13167 }
0x341b   :  { %v6892_v20 = vsel %vm483_vm7, %v13168_v11, 0.0 }
0x341c   :  { %6893 = vadd.xlane.f32.xlu1 %v6892_v20  ;;  %v12812_v20 = vpack.c.bf16 %v7220_v23, %v7219_v33  ;;  %v11267_v33 = vld [vmem:[%s14958_s9 + $0x9] ss:$0 sm:$0xff] }
0x3425   :  { %6899 = vrot.lane.b32.xlu0 %v14289_v44, %s13372_s16 }
0x3429   :  { %7055 = vrot.lane.b32.xlu0 %v14368_v26, %s13361_s18 }
0x342d   :  { %6975 = vrot.lane.b32.xlu1 %v14275_v16, %s13372_s16  ;;  %7063 = vrot.lane.b32.xlu0 %v6715_v56, %s13370_s26 }
0x3431   :  { %7053 = vrot.lane.b32.xlu1 %v14365_v59, %s13361_s18  ;;  %v7083_v59 = vld [vmem:[#allocation4 + $0xc8] sm:$0xff] }
0x3432   :  { %v12796_v41 = vpack.c.bf16 %v7083_v59, %v7082_v46  ;;  %v7316_v46 = vld [vmem:[#allocation7 + $0x100] sm:$0xff]  ;;  %v7317_v59 = vld [vmem:[#allocation7 + $0x108] sm:$0xff] }
0x3433   :  { %v12828_v32 = vpack.c.bf16 %v7317_v59, %v7316_v46 }
0x3435   :  { %7061 = vrot.lane.b32.xlu1 %v6639_v7, %s13370_s26 }
0x349c   :  { %v6891_v24 = vpop.xlane.xlu0 %6890 }
0x349d   :  { %13169 = vrcp.f32 %v6891_v24  ;;  %v7222_v24 = vld [vmem:[#allocation6 + $0x98] sm:$0xff] }
0x34a0   :  { %v6900_v35 = vpop.permute.xlu0 %6899 }
0x34a1   :  { %12213 = vmatpush3.msra.mxu1 %v6900_v35 }
0x34a2   :  { %12797 = vmatprep.subr.bf16.mxu1 %v12796_v41 }
0x34a4   :  { %v7056_v18 = vpop.permute.xlu0 %7055 }
0x34a5   :  { %v7076_v38 = vsel %vm329_vm6, %v14330_v42, %v7056_v18 }
0x34a7   :  { %v13170_v36 = vpop.eup %13169 }
0x34a8   :  { %v6896_v37 = vmul.f32 %v13170_v36, %v13166_v6  ;;  %v7064_v22 = vpop.permute.xlu0 %7063  ;;  %v7223_v36 = vld [vmem:[#allocation6 + $0xa0] sm:$0xff] }
0x34a9   :  { %v6894_v44 = vpop.xlane.xlu1 %6893  ;;  %v7078_v7 = vsel %vm1676_vm9, %v7076_v38, %v7064_v22 }
0x34aa   :  { %13171 = vrcp.f32 %v6894_v44  ;;  %12215 = vmatmul.mubr.msk.f32.vlgmr.msra.gmra.mrb[78].mxu1 %vm483_vm7, %v6896_v37  ;;  %v7224_v37 = vld [vmem:[#allocation6 + $0xa8] sm:$0xff] }
0x34ab   :  { %12799 = vmatpush3.bf16.msra.mxu1 %v12796_v41  ;;  %v12820_v44 = vpack.c.bf16 %v7224_v37, %v7223_v36  ;;  %v7318_v41 = vld [vmem:[#allocation7 + $0x110] sm:$0xff] }
0x34ac   :  { %12801 = vmatprep.subr.bf16.mxu1 %v12800_v51 }
0x34ad   :  { %v6976_v26 = vpop.permute.xlu1 %6975 }
0x34ae   :  { %12218 = vmatpush3.msra.mxu0 %v6976_v26  ;;  %v7225_v26 = vld [vmem:[#allocation6 + $0xb0] sm:$0xff] }
0x34af   :  { %12803 = vmatpush3.bf16.msra.mxu1 %v12800_v51  ;;  %12813 = vmatprep.subr.bf16.mxu0 %v12812_v20  ;;  %v12832_v51 = vpack.c.bf16 %v7319_v47, %v7318_v41 }
0x34b0   :  { %12805 = vmatprep.subr.bf16.mxu1 %v12804_v57 }
0x34b1   :  { %v7054_v2 = vpop.permute.xlu1 %7053 }
0x34b2   :  { %v7075_v48 = vsel %vm329_vm6, %v14328_v54, %v7054_v2  ;;  %v11259_v54 = vld [vmem:[%s14958_s9 + $0x4] ss:$0 sm:$0xff]  ;;  %v7327_v2 = vld [vmem:[#allocation7 + $0x158] sm:$0xff] }
0x34b3   :  { %12807 = vmatpush3.bf16.msra.mxu1 %v12804_v57  ;;  %v12836_v57 = vpack.c.bf16 %v7321_v55, %v7320_v53  ;;  %v7456_v55 = vld [vmem:[#allocation2 + $0x208] sm:$0xff] }
0x34b4   :  { %v13172_v16 = vpop.eup %13171  ;;  %12809 = vmatprep.subr.bf16.mxu1 %v12808_v61 }
0x34b5   :  { %v6898_v43 = vmul.f32 %v13172_v16, %v13168_v11  ;;  %v7062_v4 = vpop.permute.xlu1 %7061  ;;  %v7221_v11 = vld [vmem:[#allocation6 + $0x90] sm:$0xff]  ;;  %v7226_v16 = vld [vmem:[#allocation6 + $0xb8] sm:$0xff] }
0x34b6   :  { %v7077_v8 = vsel %vm1676_vm9, %v7075_v48, %v7062_v4  ;;  %v12816_v35 = vpack.c.bf16 %v7222_v24, %v7221_v11  ;;  %v7328_v48 = vld [vmem:[#allocation7 + $0x160] sm:$0xff] }
0x34b7   :  { %12220 = vmatmul.mubr.msk.f32.vlgmr.msra.gmra.mrb[84].mxu0 %vm483_vm7, %v6898_v43  ;;  %12811 = vmatpush3.bf16.msra.mxu1 %v12808_v61  ;;  %v12824_v43 = vpack.c.bf16 %v7226_v16, %v7225_v26  ;;  %v12840_v61 = vpack.c.bf16 %v7323_v58, %v7322_v34  ;;  %v7455_v58 = vld [vmem:[#allocation2 + $0x200] sm:$0xff] }
0x34b8   :  { %12815 = vmatpush3.bf16.msra.mxu0 %v12812_v20  ;;  %12829 = vmatprep.subr.bf16.mxu1 %v12828_v32 }
0x34b9   :  { %12817 = vmatprep.subr.bf16.mxu0 %v12816_v35 }
0x34bc   :  { %12819 = vmatpush3.bf16.msra.mxu0 %v12816_v35 }
0x34bd   :  { %12821 = vmatprep.subr.bf16.mxu0 %v12820_v44 }
0x34c0   :  { %12823 = vmatpush3.bf16.msra.mxu0 %v12820_v44 }
0x34c1   :  { %12825 = vmatprep.subr.bf16.mxu0 %v12824_v43 }
0x34c4   :  { %12827 = vmatpush3.bf16.msra.mxu0 %v12824_v43 }
0x357d   :  { %v6971_v1 = vpop.f32.mrb[78].mxu1 }
0x357e   :  { %7069 = vrot.lane.b32.xlu1 %v6971_v1, %s13368_s14  ;;  %v12216_v60 = vpop.f32.mrb[79].mxu1  ;;  %v7324_v1 = vld [vmem:[#allocation7 + $0x140] sm:$0xff] }
0x357f   :  { %v7325_v60 = vld [vmem:[#allocation7 + $0x148] sm:$0xff] }
0x358a   :  { %v7047_v10 = vpop.f32.mrb[84].mxu0 }
0x358b   :  { %7071 = vrot.lane.b32.xlu0 %v7047_v10, %s13368_s14  ;;  %v12221_v40 = vpop.f32.mrb[85].mxu0  ;;  %v12844_v10 = vpack.c.bf16 %v7325_v60, %v7324_v1  ;;  %v7460_v60 = vld [vmem:[#allocation2 + $0x228] sm:$0xff] }
0x358c   :  { %v7326_v40 = vld [vmem:[#allocation7 + $0x150] sm:$0xff] }
0x358d   :  { %v12848_v4 = vpack.c.bf16 %v7327_v2, %v7326_v40  ;;  %v7459_v2 = vld [vmem:[#allocation2 + $0x220] sm:$0xff] }
0x35f0   :  { %v7070_v13 = vpop.permute.xlu1 %7069 }
0x35f1   :  { %v7079_v39 = vsel %vm1679_vm8, %v7077_v8, %v7070_v13  ;;  %v7329_v8 = vld [vmem:[#allocation7 + $0x168] sm:$0xff] }
0x35f2   :  { %12238 = vmatprep.mubr.msk.f32.mxu1 %vm242_vm4, %v7079_v39  ;;  %v12852_v13 = vpack.c.bf16 %v7329_v8, %v7328_v48  ;;  %v7464_v8 = vld [vmem:[#allocation2 + $0x248] sm:$0xff] }
0x35fd   :  { %v7072_v12 = vpop.permute.xlu0 %7071 }
0x35fe   :  { %v7080_v15 = vsel %vm1679_vm8, %v7078_v7, %v7072_v12 }
0x35ff   :  { %12239 = vmatmul.mubr.msk.f32.vlgmr.msra.gmra.mrb[80].mxu1 %vm242_vm4, %v7080_v15 }
0x3600   :  { %12831 = vmatpush3.bf16.msra.mxu1 %v12828_v32 }
0x3601   :  { %12833 = vmatprep.subr.bf16.mxu1 %v12832_v51 }
0x3604   :  { %12835 = vmatpush3.bf16.msra.mxu1 %v12832_v51 }
0x3605   :  { %12837 = vmatprep.subr.bf16.mxu1 %v12836_v57 }
0x3608   :  { %12839 = vmatpush3.bf16.msra.mxu1 %v12836_v57  ;;  %v7458_v57 = vld [vmem:[#allocation2 + $0x218] sm:$0xff] }
0x3609   :  { %12841 = vmatprep.subr.bf16.mxu1 %v12840_v61  ;;  %v12860_v34 = vpack.c.bf16 %v7458_v57, %v7456_v55 }
0x360b   :  { %12861 = vmatprep.subr.bf16.mxu0 %v12860_v34 }
0x360c   :  { %12843 = vmatpush3.bf16.msra.mxu1 %v12840_v61  ;;  %v7457_v61 = vld [vmem:[#allocation2 + $0x210] sm:$0xff] }
0x360d   :  { %12845 = vmatprep.subr.bf16.mxu1 %v12844_v10  ;;  %v12862_v1 = vpack.c.bf16 %v7457_v61, %v7455_v58 }
0x3610   :  { %12847 = vmatpush3.bf16.msra.mxu1 %v12844_v10  ;;  %v7462_v10 = vld [vmem:[#allocation2 + $0x238] sm:$0xff] }
0x3611   :  { %12849 = vmatprep.subr.bf16.mxu1 %v12848_v4  ;;  %v12864_v40 = vpack.c.bf16 %v7462_v10, %v7460_v60 }
0x3614   :  { %12851 = vmatpush3.bf16.msra.mxu1 %v12848_v4  ;;  %v7461_v4 = vld [vmem:[#allocation2 + $0x230] sm:$0xff] }
0x3615   :  { %12853 = vmatprep.subr.bf16.mxu1 %v12852_v13  ;;  %v12866_v48 = vpack.c.bf16 %v7461_v4, %v7459_v2 }
0x3618   :  { %12855 = vmatpush3.bf16.msra.mxu1 %v12852_v13  ;;  %v7466_v13 = vld [vmem:[#allocation2 + $0x258] sm:$0xff] }
0x36d2   :  { %v12240_v52 = vpop.f32.mrb[80].mxu1 }
0x36d3   :  { %v7173_v17 = vadd.f32 %v12240_v52, %v11259_v54  ;;  %v7167_v19 = vpop.f32.mrb[81].mxu1 }
0x36d4   :  { %v7168_v56 = vadd.f32 %v11259_v54, %v7167_v19  ;;  %v11262_v54 = vld [vmem:[%s14958_s9 + $0x11] ss:$0 sm:$0xff] }
0x36d5   :  { %v7177_v5 = vadd.f32 %v7173_v17, %v14256_v0 }
0x36d6   :  { %v7176_v3 = vadd.f32 %v7168_v56, %v14245_v63 }
0x36d7   :  { %v7181_v42 = vsel %vm242_vm4, %v7177_v5, 0.0 }
0x36d8   :  { %7182 = vadd.xlane.f32.xlu0 %v7181_v42  ;;  %v7178_v25 = vsel %vm242_vm4, %v7176_v3, 0.0 }
0x36d9   :  { %7179 = vadd.xlane.f32.xlu1 %v7178_v25 }
0x3765   :  { %v7183_v21 = vpop.xlane.xlu0 %7182 }
0x3766   :  { %v7185_v27 = vmul.f32 0.015625, %v7183_v21  ;;  %v7180_v28 = vpop.xlane.xlu1 %7179  ;;  %v7330_v21 = vld [vmem:[#allocation7 + $0x170] sm:$0xff] }
0x3767   :  { %v7184_v29 = vmul.f32 0.015625, %v7180_v28 }
0x3768   :  { %v14438_v50 = vsub.f32 %v7177_v5, %v7185_v27  ;;  %v11263_v5 = vld [vmem:[%s14958_s9 + $0x1d] ss:$0 sm:$0xff] }
0x3769   :  { %v14440_v30 = vsub.f32 %v7176_v3, %v7184_v29  ;;  %v7331_v27 = vld [vmem:[#allocation7 + $0x178] sm:$0xff]  ;;  %v11264_v29 = vld [vmem:[%s14956_s7 + $0x2] ss:$0 sm:$0xff] }
0x376a   :  { %v7189_v14 = vmul.f32 %v14438_v50, %v14438_v50  ;;  %v12856_v28 = vpack.c.bf16 %v7331_v27, %v7330_v21 }
0x376b   :  { %v7188_v63 = vmul.f32 %v14440_v30, %v14440_v30 }
0x376c   :  { %v7193_v0 = vsel %vm242_vm4, %v7189_v14, 0.0  ;;  %12857 = vmatprep.subr.bf16.mxu1 %v12856_v28 }
0x376d   :  { %7194 = vadd.xlane.f32.xlu1 %v7193_v0  ;;  %v7190_v6 = vsel %vm242_vm4, %v7188_v63, 0.0  ;;  %12859 = vmatpush3.bf16.msra.mxu1 %v12856_v28  ;;  %v11268_v28 = vld [vmem:[%s14958_s9 + $0x12] ss:$0 sm:$0xff] }
0x376e   :  { %7191 = vadd.xlane.f32.xlu0 %v7190_v6  ;;  %12310 = vmatprep.subr.mxu1 %v13365_v31 }
0x37fa   :  { %v7195_v39 = vpop.xlane.xlu1 %7194 }
0x37fb   :  { %v7197_v18 = vmul.f32 0.015625, %v7195_v39  ;;  %v7192_v22 = vpop.xlane.xlu0 %7191  ;;  %v12868_v39 = vpack.c.bf16 %v7466_v13, %v7464_v8 }
0x37fc   :  { %v7196_v38 = vmul.f32 0.015625, %v7192_v22  ;;  %v7465_v22 = vld [vmem:[#allocation2 + $0x250] sm:$0xff] }
0x37fd   :  { %v7199_v7 = vadd.f32 1e-05, %v7197_v18  ;;  %v7463_v18 = vld [vmem:[#allocation2 + $0x240] sm:$0xff] }
0x37fe   :  { %v7198_v12 = vadd.f32 1e-05, %v7196_v38  ;;  %v12870_v38 = vpack.c.bf16 %v7465_v22, %v7463_v18 }
0x37ff   :  { %13173 = vrsqrt.f32 %v7199_v7  ;;  %v7468_v7 = vld [vmem:[#allocation2 + $0x268] sm:$0xff] }
0x3800   :  { %13175 = vrsqrt.f32 %v7198_v12  ;;  %v7470_v12 = vld [vmem:[#allocation2 + $0x278] sm:$0xff] }
0x3809   :  { %v13174_v15 = vpop.eup %13173 }
0x380a   :  { %v13176_v52 = vpop.eup %13175  ;;  %v7203_v17 = vmul.f32 %v13174_v15, %v14438_v50  ;;  %v7467_v15 = vld [vmem:[#allocation2 + $0x260] sm:$0xff] }
0x380b   :  { %v7202_v19 = vmul.f32 %v13176_v52, %v14440_v30  ;;  %v7469_v52 = vld [vmem:[#allocation2 + $0x270] sm:$0xff] }
0x380c   :  { %v7210_v56 = vmul.f32 %v11262_v54, %v7203_v17  ;;  %v12874_v17 = vpack.c.bf16 %v7469_v52, %v7467_v15 }
0x380d   :  { %v7209_v3 = vmul.f32 %v11262_v54, %v7202_v19  ;;  %v12872_v54 = vpack.c.bf16 %v7470_v12, %v7468_v7 }
0x380e   :  { %v7217_v25 = vadd.f32 %v11263_v5, %v7210_v56 }
0x380f   :  { %v7216_v42 = vadd.f32 %v11263_v5, %v7209_v3 }
0x3811   :  { %12257 = vmatprep.mubr.msk.f32.mxu0 %vm242_vm4, %v7216_v42 }
0x3812   :  { %12258 = vmatmul.mubr.msk.f32.vlgmr.msra.gmra.mrb[86].mxu0 %vm242_vm4, %v7217_v25 }
0x3813   :  { %7554 = vmatprep.mubr.f32.mxu0 %v13365_v31  ;;  %12863 = vmatpush1.bf16.msra.mxu0 %v12862_v1 }
0x3814   :  { %12865 = vmatprep.subr.bf16.mxu0 %v12864_v40 }
0x3817   :  { %12867 = vmatpush1.bf16.msra.mxu0 %v12866_v48 }
0x3818   :  { %12869 = vmatprep.subr.bf16.mxu0 %v12868_v39 }
0x381b   :  { %12871 = vmatpush1.bf16.msra.mxu0 %v12870_v38 }
0x381c   :  { %12873 = vmatprep.subr.bf16.mxu0 %v12872_v54 }
0x381f   :  { %12875 = vmatpush1.bf16.msra.mxu0 %v12874_v17 }
0x3820   :  { %12295 = vmatprep.subr.mxu0 %v13365_v31 }
0x38e5   :  { %v12259_v50 = vpop.f32.mrb[86].mxu0 }
0x38e6   :  { %v7310_v30 = vadd.f32 %v12259_v50, %v11264_v29  ;;  %v7304_v14 = vpop.f32.mrb[87].mxu0 }
0x38e7   :  { %v7305_v63 = vadd.f32 %v11264_v29, %v7304_v14 }
0x38e8   :  { %v7314_v6 = vmax.f32 %v7310_v30, 0.0  ;;  %v11269_v30 = vld [vmem:[%s14958_s9 + $0x1e] ss:$0 sm:$0xff] }
0x38e9   :  { %v7313_v0 = vmax.f32 %v7305_v63, 0.0 }
0x38eb   :  { %12292 = vmatprep.mubr.f32.mxu1 %v7313_v0 }
0x38ec   :  { %12293 = vmatmul.mubr.f32.vlgmr.msra.gmra.mrb[82].mxu1 %v7314_v6 }
0x38ed   :  { %12312 = vmatprep.mubr.msk.f32.mxu1 %vm13366_vm5, %v13365_v31 }
0x39bf   :  { %v12294_v23 = vpop.f32.mrb[82].mxu1 }
0x39c0   :  { %v7409_v11 = vadd.f32 %v12294_v23, %v11267_v33  ;;  %v7403_v20 = vpop.f32.mrb[83].mxu1 }
0x39c1   :  { %v7404_v24 = vadd.f32 %v11267_v33, %v7403_v20  ;;  %v11270_v33 = vld [vmem:[%s14953_s4 + $0x4] ss:$8 sm:$0x3] }
0x39c2   :  { %v7413_v35 = vadd.f32 %v7409_v11, %v7217_v25  ;;  %v7477_v23 = vrot.slane %v11270_v33, %v13549_v45  ;;  %v7481_v11 = vrot.slane %v11270_v33, %v13555_v49 }
0x39c3   :  { %v7412_v36 = vadd.f32 %v7404_v24, %v7216_v42 }
0x39c4   :  { %v7417_v37 = vsel %vm242_vm4, %v7413_v35, 0.0 }
0x39c5   :  { %7418 = vadd.xlane.f32.xlu1 %v7417_v37  ;;  %v7414_v44 = vsel %vm242_vm4, %v7412_v36, 0.0 }
0x39c6   :  { %7415 = vadd.xlane.f32.xlu0 %v7414_v44 }
0x3a52   :  { %v7419_v26 = vpop.xlane.xlu1 %7418 }
0x3a53   :  { %v7421_v16 = vmul.f32 0.015625, %v7419_v26  ;;  %v7416_v43 = vpop.xlane.xlu0 %7415 }
0x3a54   :  { %v7420_v46 = vmul.f32 0.015625, %v7416_v43 }
0x3a55   :  { %v7423_v59 = vsub.f32 %v7413_v35, %v7421_v16 }
0x3a56   :  { %v7422_v41 = vsub.f32 %v7412_v36, %v7420_v46 }
0x3a57   :  { %v7425_v32 = vmul.f32 %v7423_v59, %v7423_v59 }
0x3a58   :  { %v7424_v47 = vmul.f32 %v7422_v41, %v7422_v41 }
0x3a59   :  { %v7429_v51 = vsel %vm242_vm4, %v7425_v32, 0.0 }
0x3a5a   :  { %7430 = vadd.xlane.f32.xlu1 %v7429_v51  ;;  %v7426_v53 = vsel %vm242_vm4, %v7424_v47, 0.0 }
0x3a5b   :  { %7427 = vadd.xlane.f32.xlu0 %v7426_v53 }
0x3ae7   :  { %v7431_v19 = vpop.xlane.xlu1 %7430 }
0x3ae8   :  { %v7433_v56 = vmul.f32 0.015625, %v7431_v19  ;;  %v7428_v5 = vpop.xlane.xlu0 %7427 }
0x3ae9   :  { %v7432_v3 = vmul.f32 0.015625, %v7428_v5 }
0x3aea   :  { %v7435_v42 = vadd.f32 1e-05, %v7433_v56 }
0x3aeb   :  { %v7434_v25 = vadd.f32 1e-05, %v7432_v3 }
0x3aec   :  { %13177 = vrsqrt.f32 %v7435_v42 }
0x3aed   :  { %13179 = vrsqrt.f32 %v7434_v25 }
0x3af6   :  { %v13178_v21 = vpop.eup %13177 }
0x3af7   :  { %v13180_v27 = vpop.eup %13179  ;;  %v7439_v50 = vmul.f32 %v13178_v21, %v7423_v59 }
0x3af8   :  { %v7438_v29 = vmul.f32 %v13180_v27, %v7422_v41 }
0x3af9   :  { %v7446_v0 = vmul.f32 %v11268_v28, %v7439_v50 }
0x3afa   :  { %v7445_v14 = vmul.f32 %v11268_v28, %v7438_v29 }
0x3afb   :  { %v14484_v6 = vadd.f32 %v11269_v30, %v7446_v0 }
0x3afc   :  { %v14479_v63 = vadd.f32 %v11269_v30, %v7445_v14 }
0x3afe   :  { %11271 = vmatmul.mubr.msk.f32.vlgmr.msra.gmra.mrb[88].mxu0 %vm242_vm4, %v14479_v63 }
0x3aff   :  { %7560 = vmatprep.mubr.f32.mxu0 %v13365_v31 }
0x3b02   :  { %11272 = vmatmul.mubr.msk.f32.gmra.mrb[90].mxu0 %vm242_vm4, %v14484_v6 }
0x3b03   :  { %12297 = vmatprep.mubr.msk.f32.mxu0 %vm13366_vm5, %v13365_v31 }
0x3bd1   :  { %v7556_v20 = vpop.f32.mrb[88].mxu0 }
0x3bd2   :  { %v14495_v24 = vadd.f32 %v7556_v20, %v7477_v23  ;;  %v7558_v35 = vpop.f32.mrb[89].mxu0 }
0x3bd3   :  { %v14497_v36 = vadd.f32 %v7558_v35, %v7481_v11 }
0x3bd4   :  { %7568 = vrot.lane.b32.xlu0 %v14495_v24, %s13367_s12 }
0x3bd5   :  { %v7562_v37 = vpop.f32.mrb[90].mxu0 }
0x3bd6   :  { %v14501_v44 = vadd.f32 %v7562_v37, %v7477_v23  ;;  %v7564_v26 = vpop.f32.mrb[91].mxu0 }
0x3bd7   :  { %v14503_v16 = vadd.f32 %v7564_v26, %v7481_v11 }
0x3bd8   :  { %7645 = vrot.lane.b32.xlu1 %v14501_v44, %s13367_s12 }
0x3bd9   :  { %12311 = vmatpush3.msra.mxu1 %v14503_v16 }
0x3bda   :  { %12320 = vmatprep.subr.mxu1 %v13365_v31 }
0x3c46   :  { %v7569_v43 = vpop.permute.xlu0 %7568 }
0x3c47   :  { %12296 = vmatpush3.xpose.msk.msra.mxu0 %vm329_vm6, %v7569_v43 }
0x3c48   :  { %12300 = vmatprep.subr.mxu0 %v13365_v31 }
0x3c4a   :  { %v7646_v46 = vpop.permute.xlu1 %7645  ;;  %12298 = vmatmul.mubr.msk.f32.vlgmr.msra.gmra.mrb[92].mxu0 %vm329_vm6, %v14495_v24 }
0x3c4b   :  { %12301 = vmatpush3.xpose.msk.msra.mxu0 %vm329_vm6, %v7646_v46  ;;  %12302 = vmatprep.mubr.msk.f32.mxu0 %vm13366_vm5, %v13365_v31 }
0x3c4c   :  { %12305 = vmatprep.subr.mxu0 %v13365_v31 }
0x3c4e   :  { %12303 = vmatmul.mubr.msk.f32.vlgmr.msra.gmra.mrb[94].mxu0 %vm329_vm6, %v14501_v44 }
0x3c4f   :  { %12306 = vmatpush3.msra.mxu0 %v14497_v36  ;;  %12307 = vmatprep.mubr.msk.f32.mxu0 %vm13366_vm5, %v13365_v31 }
0x3c50   :  { %12315 = vmatprep.subr.mxu0 %v13365_v31 }
0x3d1d   :  { %v7640_v59 = vpop.f32.mrb[92].mxu0 }
0x3d1e   :  { %v7721_v41 = vmul.f32 0.25, %v7640_v59  ;;  %v12299_v32 = vpop.f32.mrb[93].mxu0 }
0x3d20   :  { %v7723_v47 = vsel %vm483_vm7, %v7721_v41, -inf }
0x3d21   :  { %7724 = vmax.xlane.f32.xlu1 %v7723_v47  ;;  %v7717_v51 = vpop.f32.mrb[94].mxu0 }
0x3d22   :  { %v7722_v53 = vmul.f32 0.25, %v7717_v51  ;;  %v12304_v55 = vpop.f32.mrb[95].mxu0 }
0x3d24   :  { %v7726_v57 = vsel %vm483_vm7, %v7722_v53, -inf }
0x3d25   :  { %7727 = vmax.xlane.f32.xlu0 %v7726_v57 }
0x3d32   :  { %7971 = vrot.lane.b32.xlu1 %v14501_v44, %s13368_s14 }
0x3dae   :  { %v7725_v34 = vpop.xlane.xlu1 %7724 }
0x3daf   :  { %v7729_v58 = vsub.f32 %v7721_v41, %v7725_v34 }
0x3db1   :  { %v7731_v61 = vmul.f32 1.442695, %v7729_v58 }
0x3db2   :  { %v7728_v1 = vpop.xlane.xlu0 %7727  ;;  %v7972_v8 = vpop.permute.xlu1 %7971 }
0x3db3   :  { %13181 = vpow2.f32 %v7731_v61  ;;  %v7730_v60 = vsub.f32 %v7722_v53, %v7728_v1 }
0x3db5   :  { %v7733_v10 = vmul.f32 1.442695, %v7730_v60 }
0x3db7   :  { %13183 = vpow2.f32 %v7733_v10 }
0x3dbd   :  { %v13182_v40 = vpop.eup %13181 }
0x3dbe   :  { %v7735_v2 = vsel %vm483_vm7, %v13182_v40, 0.0 }
0x3dbf   :  { %7736 = vadd.xlane.f32.xlu0 %v7735_v2 }
0x3dc1   :  { %v13184_v4 = vpop.eup %13183 }
0x3dc2   :  { %v7738_v48 = vsel %vm483_vm7, %v13184_v4, 0.0 }
0x3dc3   :  { %7739 = vadd.xlane.f32.xlu1 %v7738_v48 }
0x3dd4   :  { %7891 = vrot.lane.b32.xlu1 %v14495_v24, %s13369_s6 }
0x3dd5   :  { %7893 = vrot.lane.b32.xlu0 %v14495_v24, %s13368_s14 }
0x3dd9   :  { %7969 = vrot.lane.b32.xlu0 %v14501_v44, %s13369_s6 }
0x3e4c   :  { %v7737_v13 = vpop.xlane.xlu0 %7736 }
0x3e4d   :  { %13185 = vrcp.f32 %v7737_v13 }
0x3e50   :  { %v7740_v39 = vpop.xlane.xlu1 %7739  ;;  %v7894_v38 = vpop.permute.xlu0 %7893 }
0x3e51   :  { %13187 = vrcp.f32 %v7740_v39 }
0x3e54   :  { %v7892_v15 = vpop.permute.xlu1 %7891  ;;  %v7970_v54 = vpop.permute.xlu0 %7969 }
0x3e57   :  { %v13186_v18 = vpop.eup %13185 }
0x3e58   :  { %v7742_v22 = vmul.f32 %v13186_v18, %v13182_v40 }
0x3e5a   :  { %12308 = vmatmul.mubr.msk.f32.vlgmr.msra.gmra.mrb[96].mxu0 %vm483_vm7, %v7742_v22 }
0x3e5b   :  { %v13188_v7 = vpop.eup %13187  ;;  %12316 = vmatpush3.xpose.msk.msra.mxu0 %vm329_vm6, %v7894_v38  ;;  %12317 = vmatprep.mubr.msk.f32.mxu0 %vm13366_vm5, %v13365_v31 }
0x3e5c   :  { %v7744_v12 = vmul.f32 %v13188_v7, %v13184_v4  ;;  %12325 = vmatprep.subr.mxu0 %v13365_v31 }
0x3e5e   :  { %12313 = vmatmul.mubr.msk.f32.vlgmr.msra.gmra.mrb[84].mxu1 %vm483_vm7, %v7744_v12  ;;  %12318 = vmatmul.mubr.msk.f32.vlgmr.msra.gmra.mrb[98].mxu0 %vm329_vm6, %v7892_v15 }
0x3e5f   :  { %12321 = vmatpush3.xpose.msk.msra.mxu1 %vm329_vm6, %v7972_v8  ;;  %12322 = vmatprep.mubr.msk.f32.mxu1 %vm13366_vm5, %v13365_v31 }
0x3e60   :  { %12330 = vmatprep.subr.mxu1 %v13365_v31  ;;  %12327 = vmatprep.mubr.msk.f32.mxu0 %vm13366_vm5, %v13365_v31 }
0x3e62   :  { %12323 = vmatmul.mubr.msk.f32.vlgmr.msra.gmra.mrb[86].mxu1 %vm329_vm6, %v7970_v54 }
0x3e63   :  { %12332 = vmatprep.mubr.msk.f32.mxu1 %vm13366_vm5, %v13365_v31 }
0x3f2d   :  { %v14551_v52 = vpop.f32.mrb[96].mxu0 }
0x3f2e   :  { %v12309_v17 = vpop.f32.mrb[97].mxu0 }
0x3f31   :  { %v14553_v19 = vpop.f32.mrb[84].mxu1  ;;  %v7965_v56 = vpop.f32.mrb[98].mxu0 }
0x3f32   :  { %v8047_v5 = vmul.f32 0.25, %v7965_v56  ;;  %v12314_v3 = vpop.f32.mrb[85].mxu1  ;;  %v12319_v42 = vpop.f32.mrb[99].mxu0 }
0x3f34   :  { %v8049_v25 = vsel %vm483_vm7, %v8047_v5, -inf }
0x3f35   :  { %v8043_v21 = vpop.f32.mrb[86].mxu1  ;;  %8050 = vmax.xlane.f32.xlu1 %v8049_v25 }
0x3f36   :  { %v8048_v27 = vmul.f32 0.25, %v8043_v21  ;;  %v12324_v28 = vpop.f32.mrb[87].mxu1 }
0x3f38   :  { %v8052_v29 = vsel %vm483_vm7, %v8048_v27, -inf }
0x3f39   :  { %8053 = vmax.xlane.f32.xlu0 %v8052_v29 }
0x3f46   :  { %8149 = vrot.lane.b32.xlu1 %v14503_v16, %s13369_s6 }
0x3f4a   :  { %8227 = vrot.lane.b32.xlu1 %v14495_v24, %s13370_s26 }
0x3f4f   :  { %8072 = vrot.lane.b32.xlu0 %v14497_v36, %s13369_s6 }
0x3fc2   :  { %v8051_v50 = vpop.xlane.xlu1 %8050 }
0x3fc3   :  { %v8055_v30 = vsub.f32 %v8047_v5, %v8051_v50 }
0x3fc5   :  { %v8057_v14 = vmul.f32 1.442695, %v8055_v30 }
0x3fc6   :  { %v8054_v0 = vpop.xlane.xlu0 %8053  ;;  %v8150_v33 = vpop.permute.xlu1 %8149 }
0x3fc7   :  { %13189 = vpow2.f32 %v8057_v14  ;;  %v8056_v23 = vsub.f32 %v8048_v27, %v8054_v0  ;;  %12331 = vmatpush3.msra.mxu1 %v8150_v33 }
0x3fc8   :  { %12340 = vmatprep.subr.mxu1 %v13365_v31 }
0x3fc9   :  { %v8059_v11 = vmul.f32 1.442695, %v8056_v23 }
0x3fca   :  { %v8073_v20 = vpop.permute.xlu0 %8072  ;;  %v8228_v46 = vpop.permute.xlu1 %8227 }
0x3fcb   :  { %13191 = vpow2.f32 %v8059_v11  ;;  %12326 = vmatpush3.msra.mxu0 %v8073_v20 }
0x3fcc   :  { %12335 = vmatprep.subr.mxu0 %v13365_v31 }
0x3fd1   :  { %v13190_v35 = vpop.eup %13189 }
0x3fd2   :  { %v8061_v37 = vsel %vm483_vm7, %v13190_v35, 0.0 }
0x3fd3   :  { %8062 = vadd.xlane.f32.xlu0 %v8061_v37 }
0x3fd5   :  { %v13192_v26 = vpop.eup %13191 }
0x3fd6   :  { %v8064_v43 = vsel %vm483_vm7, %v13192_v26, 0.0 }
0x3fd7   :  { %8065 = vadd.xlane.f32.xlu1 %v8064_v43 }
0x3fe8   :  { %8225 = vrot.lane.b32.xlu1 %v14495_v24, %s13371_s15 }
0x3fe9   :  { %8305 = vrot.lane.b32.xlu0 %v14501_v44, %s13370_s26 }
0x3fed   :  { %8303 = vrot.lane.b32.xlu0 %v14501_v44, %s13371_s15 }
0x4060   :  { %v8063_v59 = vpop.xlane.xlu0 %8062 }
0x4061   :  { %13193 = vrcp.f32 %v8063_v59 }
0x4064   :  { %v8066_v41 = vpop.xlane.xlu1 %8065  ;;  %v8306_v53 = vpop.permute.xlu0 %8305 }
0x4065   :  { %13195 = vrcp.f32 %v8066_v41 }
0x4068   :  { %v8226_v57 = vpop.permute.xlu1 %8225  ;;  %v8304_v34 = vpop.permute.xlu0 %8303 }
0x406b   :  { %v13194_v32 = vpop.eup %13193 }
0x406c   :  { %v8068_v47 = vmul.f32 %v13194_v32, %v13190_v35 }
0x406e   :  { %12328 = vmatmul.mubr.msk.f32.vlgmr.msra.gmra.mrb[100].mxu0 %vm483_vm7, %v8068_v47 }
0x406f   :  { %v13196_v51 = vpop.eup %13195  ;;  %12336 = vmatpush3.xpose.msk.msra.mxu0 %vm329_vm6, %v8228_v46  ;;  %12337 = vmatprep.mubr.msk.f32.mxu0 %vm13366_vm5, %v13365_v31 }
0x4070   :  { %v8070_v55 = vmul.f32 %v13196_v51, %v13192_v26  ;;  %12345 = vmatprep.subr.mxu0 %v13365_v31 }
0x4072   :  { %12333 = vmatmul.mubr.msk.f32.vlgmr.msra.gmra.mrb[88].mxu1 %vm483_vm7, %v8070_v55  ;;  %12338 = vmatmul.mubr.msk.f32.vlgmr.msra.gmra.mrb[102].mxu0 %vm329_vm6, %v8226_v57 }
0x4073   :  { %12341 = vmatpush3.xpose.msk.msra.mxu1 %vm329_vm6, %v8306_v53  ;;  %12342 = vmatprep.mubr.msk.f32.mxu1 %vm13366_vm5, %v13365_v31 }
0x4074   :  { %12350 = vmatprep.subr.mxu1 %v13365_v31  ;;  %12347 = vmatprep.mubr.msk.f32.mxu0 %vm13366_vm5, %v13365_v31 }
0x4076   :  { %12343 = vmatmul.mubr.msk.f32.vlgmr.msra.gmra.mrb[90].mxu1 %vm329_vm6, %v8304_v34 }
0x4077   :  { %12352 = vmatprep.mubr.msk.f32.mxu1 %vm13366_vm5, %v13365_v31 }
0x4141   :  { %v14589_v58 = vpop.f32.mrb[100].mxu0 }
0x4142   :  { %v12329_v61 = vpop.f32.mrb[101].mxu0 }
0x4145   :  { %v14591_v1 = vpop.f32.mrb[88].mxu1  ;;  %v8299_v60 = vpop.f32.mrb[102].mxu0 }
0x4146   :  { %v8381_v10 = vmul.f32 0.25, %v8299_v60  ;;  %v12334_v40 = vpop.f32.mrb[89].mxu1  ;;  %v12339_v2 = vpop.f32.mrb[103].mxu0 }
0x4148   :  { %v8383_v4 = vsel %vm483_vm7, %v8381_v10, -inf }
0x4149   :  { %v8377_v48 = vpop.f32.mrb[90].mxu1  ;;  %8384 = vmax.xlane.f32.xlu1 %v8383_v4 }
0x414a   :  { %v8382_v8 = vmul.f32 0.25, %v8377_v48  ;;  %v12344_v13 = vpop.f32.mrb[91].mxu1 }
0x414b   :  { %v8921_v13 = vld [vmem:[#allocation4 + $0x108] sm:$0xff] }
0x414c   :  { %v8386_v39 = vsel %vm483_vm7, %v8382_v8, -inf }
0x414d   :  { %8387 = vmax.xlane.f32.xlu0 %v8386_v39  ;;  %v8922_v39 = vld [vmem:[#allocation4 + $0x110] sm:$0xff] }
0x415a   :  { %8481 = vrot.lane.b32.xlu1 %v14503_v16, %s13371_s15 }
0x415e   :  { %8559 = vrot.lane.b32.xlu1 %v14495_v24, %s13361_s18 }
0x4163   :  { %8405 = vrot.lane.b32.xlu0 %v14497_v36, %s13371_s15 }
0x41d6   :  { %v8385_v18 = vpop.xlane.xlu1 %8384 }
0x41d7   :  { %v8389_v22 = vsub.f32 %v8381_v10, %v8385_v18 }
0x41d9   :  { %v8391_v38 = vmul.f32 1.442695, %v8389_v22  ;;  %v8923_v22 = vld [vmem:[#allocation4 + $0x118] sm:$0xff] }
0x41da   :  { %v8388_v7 = vpop.xlane.xlu0 %8387  ;;  %v8482_v12 = vpop.permute.xlu1 %8481 }
0x41db   :  { %13197 = vpow2.f32 %v8391_v38  ;;  %v8390_v15 = vsub.f32 %v8382_v8, %v8388_v7  ;;  %12351 = vmatpush3.msra.mxu1 %v8482_v12  ;;  %v12880_v38 = vpack.c.bf16 %v8923_v22, %v8922_v39  ;;  %v8924_v7 = vld [vmem:[#allocation4 + $0x120] sm:$0xff]  ;;  %v8925_v12 = vld [vmem:[#allocation4 + $0x128] sm:$0xff] }
0x41dc   :  { %12360 = vmatprep.subr.mxu1 %v13365_v31  ;;  %v11302_v39 = vld [vmem:[%s14953_s4 + $0x5] ss:$8 sm:$0x3] }
0x41dd   :  { %v8393_v54 = vmul.f32 1.442695, %v8390_v15  ;;  %v12884_v15 = vpack.c.bf16 %v8925_v12, %v8924_v7 }
0x41de   :  { %v8406_v17 = vpop.permute.xlu0 %8405  ;;  %v8560_v25 = vpop.permute.xlu1 %8559 }
0x41df   :  { %13199 = vpow2.f32 %v8393_v54  ;;  %12346 = vmatpush3.msra.mxu0 %v8406_v17  ;;  %v8926_v54 = vld [vmem:[#allocation4 + $0x130] sm:$0xff]  ;;  %v8927_v17 = vld [vmem:[#allocation4 + $0x138] sm:$0xff] }
0x41e0   :  { %12355 = vmatprep.subr.mxu0 %v13365_v31 }
0x41e5   :  { %v13198_v56 = vpop.eup %13197 }
0x41e6   :  { %v8395_v5 = vsel %vm483_vm7, %v13198_v56, 0.0 }
0x41e7   :  { %8396 = vadd.xlane.f32.xlu0 %v8395_v5  ;;  %v9058_v5 = vld [vmem:[#allocation2 + $0x288] sm:$0xff] }
0x41e9   :  { %v13200_v3 = vpop.eup %13199 }
0x41ea   :  { %v8398_v42 = vsel %vm483_vm7, %v13200_v3, 0.0 }
0x41eb   :  { %8399 = vadd.xlane.f32.xlu1 %v8398_v42 }
0x41fc   :  { %8557 = vrot.lane.b32.xlu1 %v14495_v24, %s13372_s16 }
0x41fd   :  { %8637 = vrot.lane.b32.xlu0 %v14501_v44, %s13361_s18 }
0x4201   :  { %8635 = vrot.lane.b32.xlu0 %v14501_v44, %s13372_s16 }
0x4274   :  { %v8397_v21 = vpop.xlane.xlu0 %8396 }
0x4275   :  { %13201 = vrcp.f32 %v8397_v21  ;;  %v9059_v21 = vld [vmem:[#allocation2 + $0x290] sm:$0xff] }
0x4278   :  { %v8400_v27 = vpop.xlane.xlu1 %8399  ;;  %v8638_v30 = vpop.permute.xlu0 %8637 }
0x4279   :  { %13203 = vrcp.f32 %v8400_v27 }
0x427c   :  { %v8558_v44 = vpop.permute.xlu1 %8557  ;;  %v8636_v14 = vpop.permute.xlu0 %8635 }
0x427f   :  { %v13202_v28 = vpop.eup %13201 }
0x4280   :  { %v8402_v29 = vmul.f32 %v13202_v28, %v13198_v56  ;;  %v12888_v56 = vpack.c.bf16 %v8927_v17, %v8926_v54  ;;  %v9062_v28 = vld [vmem:[#allocation2 + $0x2a8] sm:$0xff] }
0x4282   :  { %12348 = vmatmul.mubr.msk.f32.vlgmr.msra.gmra.mrb[104].mxu0 %vm483_vm7, %v8402_v29  ;;  %v9064_v29 = vld [vmem:[#allocation2 + $0x2b8] sm:$0xff] }
0x4283   :  { %v13204_v50 = vpop.eup %13203  ;;  %12356 = vmatpush3.xpose.msk.msra.mxu0 %vm329_vm6, %v8560_v25  ;;  %12357 = vmatprep.mubr.msk.f32.mxu0 %vm13366_vm5, %v13365_v31  ;;  %v9057_v25 = vld [vmem:[#allocation2 + $0x280] sm:$0xff] }
0x4284   :  { %v8404_v24 = vmul.f32 %v13204_v50, %v13200_v3  ;;  %12365 = vmatprep.subr.mxu0 %v13365_v31  ;;  %v9060_v3 = vld [vmem:[#allocation2 + $0x298] sm:$0xff]  ;;  %v12894_v27 = vpack.c.bf16 %v9059_v21, %v9057_v25  ;;  %v12896_v50 = vpack.c.bf16 %v9064_v29, %v9062_v28 }
0x4285   :  { %v12892_v42 = vpack.c.bf16 %v9060_v3, %v9058_v5 }
0x4286   :  { %12353 = vmatmul.mubr.msk.f32.vlgmr.msra.gmra.mrb[92].mxu1 %vm483_vm7, %v8404_v24  ;;  %12358 = vmatmul.mubr.msk.f32.vlgmr.msra.gmra.mrb[106].mxu0 %vm329_vm6, %v8558_v44  ;;  %v9063_v24 = vld [vmem:[#allocation2 + $0x2b0] sm:$0xff] }
0x4287   :  { %12361 = vmatpush3.xpose.msk.msra.mxu1 %vm329_vm6, %v8638_v30  ;;  %12362 = vmatprep.mubr.msk.f32.mxu1 %vm13366_vm5, %v13365_v31  ;;  %v9061_v30 = vld [vmem:[#allocation2 + $0x2a0] sm:$0xff] }
0x4288   :  { %12370 = vmatprep.subr.mxu1 %v13365_v31  ;;  %12367 = vmatprep.mubr.msk.f32.mxu0 %vm13366_vm5, %v13365_v31  ;;  %v12898_v44 = vpack.c.bf16 %v9063_v24, %v9061_v30 }
0x428a   :  { %12363 = vmatmul.mubr.msk.f32.vlgmr.msra.gmra.mrb[94].mxu1 %vm329_vm6, %v8636_v14  ;;  %v9066_v14 = vld [vmem:[#allocation2 + $0x2c8] sm:$0xff] }
0x428b   :  { %12372 = vmatprep.mubr.msk.f32.mxu1 %vm13366_vm5, %v13365_v31 }
0x4355   :  { %v8477_v0 = vpop.f32.mrb[104].mxu0 }
0x4356   :  { %v12349_v33 = vpop.f32.mrb[105].mxu0 }
0x4359   :  { %v8553_v23 = vpop.f32.mrb[92].mxu1  ;;  %v8631_v11 = vpop.f32.mrb[106].mxu0 }
0x435a   :  { %v8713_v20 = vmul.f32 0.25, %v8631_v11  ;;  %v12354_v35 = vpop.f32.mrb[93].mxu1  ;;  %v12359_v37 = vpop.f32.mrb[107].mxu0  ;;  %v9067_v11 = vld [vmem:[#allocation2 + $0x2d0] sm:$0xff] }
0x435c   :  { %v8715_v26 = vsel %vm483_vm7, %v8713_v20, -inf }
0x435d   :  { %v8709_v43 = vpop.f32.mrb[94].mxu1  ;;  %8716 = vmax.xlane.f32.xlu1 %v8715_v26  ;;  %v9070_v26 = vld [vmem:[#allocation2 + $0x2e8] sm:$0xff] }
0x435e   :  { %v8714_v46 = vmul.f32 0.25, %v8709_v43  ;;  %v12364_v59 = vpop.f32.mrb[95].mxu1  ;;  %v9072_v43 = vld [vmem:[#allocation2 + $0x2f8] sm:$0xff] }
0x435f   :  { %v9069_v59 = vld [vmem:[#allocation2 + $0x2e0] sm:$0xff] }
0x4360   :  { %v8718_v41 = vsel %vm483_vm7, %v8714_v46, -inf }
0x4361   :  { %8719 = vmax.xlane.f32.xlu0 %v8718_v41  ;;  %v9071_v41 = vld [vmem:[#allocation2 + $0x2f0] sm:$0xff] }
0x43ea   :  { %v8717_v32 = vpop.xlane.xlu1 %8716 }
0x43eb   :  { %v8721_v47 = vsub.f32 %v8713_v20, %v8717_v32 }
0x43ed   :  { %v8723_v51 = vmul.f32 1.442695, %v8721_v47  ;;  %v12906_v47 = vpack.c.bf16 %v9071_v41, %v9069_v59 }
0x43ee   :  { %v8720_v53 = vpop.xlane.xlu0 %8719 }
0x43ef   :  { %13205 = vpow2.f32 %v8723_v51  ;;  %v8722_v55 = vsub.f32 %v8714_v46, %v8720_v53  ;;  %v12904_v46 = vpack.c.bf16 %v9072_v43, %v9070_v26 }
0x43f1   :  { %v8725_v57 = vmul.f32 1.442695, %v8722_v55 }
0x43f3   :  { %13207 = vpow2.f32 %v8725_v57 }
0x43f9   :  { %v13206_v34 = vpop.eup %13205 }
0x43fa   :  { %v8727_v61 = vsel %vm483_vm7, %v13206_v34, 0.0 }
0x43fb   :  { %8728 = vadd.xlane.f32.xlu0 %v8727_v61 }
0x43fd   :  { %v13208_v60 = vpop.eup %13207 }
0x43fe   :  { %v8730_v10 = vsel %vm483_vm7, %v13208_v60, 0.0 }
0x43ff   :  { %8731 = vadd.xlane.f32.xlu1 %v8730_v10 }
0x4410   :  { %8813 = vrot.lane.b32.xlu1 %v14503_v16, %s13372_s16 }
0x4411   :  { %8737 = vrot.lane.b32.xlu0 %v14497_v36, %s13372_s16 }
0x4414   :  { %8891 = vrot.lane.b32.xlu1 %v14589_v58, %s13361_s18 }
0x4415   :  { %8893 = vrot.lane.b32.xlu0 %v14591_v1, %s13361_s18  ;;  %v8920_v1 = vld [vmem:[#allocation4 + $0x100] sm:$0xff] }
0x4416   :  { %v12876_v18 = vpack.c.bf16 %v8921_v13, %v8920_v1 }
0x4418   :  { %8899 = vrot.lane.b32.xlu1 %v8477_v0, %s13370_s26  ;;  %v9068_v0 = vld [vmem:[#allocation2 + $0x2d8] sm:$0xff] }
0x4419   :  { %8901 = vrot.lane.b32.xlu0 %v8553_v23, %s13370_s26  ;;  %v12900_v33 = vpack.c.bf16 %v9068_v0, %v9066_v14  ;;  %v9065_v23 = vld [vmem:[#allocation2 + $0x2c0] sm:$0xff] }
0x441a   :  { %v12902_v35 = vpack.c.bf16 %v9067_v11, %v9065_v23  ;;  %v11300_v23 = vld [vmem:[%s14958_s9 + $0x13] ss:$0 sm:$0xff] }
0x4488   :  { %v8729_v40 = vpop.xlane.xlu0 %8728 }
0x4489   :  { %13209 = vrcp.f32 %v8729_v40 }
0x448c   :  { %v8738_v2 = vpop.permute.xlu0 %8737  ;;  %v8732_v4 = vpop.xlane.xlu1 %8731 }
0x448d   :  { %13211 = vrcp.f32 %v8732_v4  ;;  %12366 = vmatpush3.msra.mxu0 %v8738_v2 }
0x448e   :  { %12877 = vmatprep.subr.bf16.mxu0 %v12876_v18 }
0x4490   :  { %v8814_v16 = vpop.permute.xlu1 %8813  ;;  %v8894_v55 = vpop.permute.xlu0 %8893 }
0x4491   :  { %12371 = vmatpush3.msra.mxu1 %v8814_v16  ;;  %v8914_v2 = vsel %vm329_vm6, %v14553_v19, %v8894_v55 }
0x4492   :  { %12893 = vmatprep.subr.bf16.mxu1 %v12892_v42 }
0x4493   :  { %v13210_v48 = vpop.eup %13209 }
0x4494   :  { %v8734_v36 = vmul.f32 %v13210_v48, %v13206_v34  ;;  %v8892_v53 = vpop.permute.xlu1 %8891  ;;  %v8902_v61 = vpop.permute.xlu0 %8901 }
0x4495   :  { %v8913_v34 = vsel %vm329_vm6, %v14551_v52, %v8892_v53  ;;  %v8916_v4 = vsel %vm1676_vm9, %v8914_v2, %v8902_v61  ;;  %v11297_v52 = vld [vmem:[%s14958_s9 + $0x5] ss:$0 sm:$0xff] }
0x4496   :  { %12368 = vmatmul.mubr.msk.f32.vlgmr.msra.gmra.mrb[108].mxu0 %vm483_vm7, %v8734_v36 }
0x4497   :  { %v13212_v58 = vpop.eup %13211  ;;  %12879 = vmatpush3.bf16.msra.mxu0 %v12876_v18  ;;  %v9083_v18 = vrot.slane %v11302_v39, %v13555_v49 }
0x4498   :  { %v8736_v8 = vmul.f32 %v13212_v58, %v13208_v60  ;;  %12881 = vmatprep.subr.bf16.mxu0 %v12880_v38  ;;  %v8900_v57 = vpop.permute.xlu1 %8899 }
0x4499   :  { %v8915_v60 = vsel %vm1676_vm9, %v8913_v34, %v8900_v57 }
0x449a   :  { %12373 = vmatmul.mubr.msk.f32.vlgmr.msra.gmra.mrb[96].mxu1 %vm483_vm7, %v8736_v8 }
0x449b   :  { %9156 = vmatprep.mubr.f32.mxu1 %v13365_v31  ;;  %12883 = vmatpush3.bf16.msra.mxu0 %v12880_v38 }
0x449c   :  { %12885 = vmatprep.subr.bf16.mxu0 %v12884_v15  ;;  %12895 = vmatpush1.bf16.msra.mxu1 %v12894_v27 }
0x449d   :  { %12897 = vmatprep.subr.bf16.mxu1 %v12896_v50 }
0x449f   :  { %12887 = vmatpush3.bf16.msra.mxu0 %v12884_v15 }
0x44a0   :  { %12889 = vmatprep.subr.bf16.mxu0 %v12888_v56  ;;  %12899 = vmatpush1.bf16.msra.mxu1 %v12898_v44 }
0x44a1   :  { %12901 = vmatprep.subr.bf16.mxu1 %v12900_v33 }
0x44a3   :  { %12891 = vmatpush3.bf16.msra.mxu0 %v12888_v56 }
0x44a4   :  { %12909 = vmatprep.subr.bf16.mxu0 %v12892_v42  ;;  %12903 = vmatpush1.bf16.msra.mxu1 %v12902_v35 }
0x44a5   :  { %12905 = vmatprep.subr.bf16.mxu1 %v12904_v46 }
0x44a8   :  { %12907 = vmatpush1.bf16.msra.mxu1 %v12906_v47 }
0x44a9   :  { %12394 = vmatprep.subr.mxu1 %v13365_v31 }
0x4569   :  { %v8809_v20 = vpop.f32.mrb[108].mxu0 }
0x456a   :  { %8907 = vrot.lane.b32.xlu1 %v8809_v20, %s13368_s14  ;;  %v12369_v37 = vpop.f32.mrb[109].mxu0 }
0x456d   :  { %v8885_v32 = vpop.f32.mrb[96].mxu1 }
0x456e   :  { %8909 = vrot.lane.b32.xlu0 %v8885_v32, %s13368_s14  ;;  %v12374_v51 = vpop.f32.mrb[97].mxu1 }
0x45dc   :  { %v8908_v10 = vpop.permute.xlu1 %8907 }
0x45dd   :  { %v8917_v40 = vsel %vm1679_vm8, %v8915_v60, %v8908_v10 }
0x45de   :  { %12391 = vmatprep.mubr.msk.f32.mxu0 %vm242_vm4, %v8917_v40 }
0x45e0   :  { %v8910_v16 = vpop.permute.xlu0 %8909 }
0x45e1   :  { %v8918_v48 = vsel %vm1679_vm8, %v8916_v4, %v8910_v16 }
0x45e2   :  { %12392 = vmatmul.mubr.msk.f32.vlgmr.msra.gmra.mrb[110].mxu0 %vm242_vm4, %v8918_v48 }
0x45e3   :  { %12911 = vmatpush1.bf16.msra.mxu0 %v12894_v27  ;;  %9231 = vmatprep.mubr.f32.mxu0 %v13365_v31  ;;  %v9079_v27 = vrot.slane %v11302_v39, %v13549_v45 }
0x45e4   :  { %12913 = vmatprep.subr.bf16.mxu0 %v12896_v50 }
0x45e7   :  { %12915 = vmatpush1.bf16.msra.mxu0 %v12898_v44 }
0x45e8   :  { %12917 = vmatprep.subr.bf16.mxu0 %v12900_v33 }
0x45eb   :  { %12919 = vmatpush1.bf16.msra.mxu0 %v12902_v35  ;;  %v11301_v35 = vld [vmem:[%s14958_s9 + $0x1f] ss:$0 sm:$0xff] }
0x45ec   :  { %12921 = vmatprep.subr.bf16.mxu0 %v12904_v46 }
0x45ef   :  { %12923 = vmatpush1.bf16.msra.mxu0 %v12906_v47 }
0x45f0   :  { %12414 = vmatprep.subr.mxu0 %v13365_v31 }
0x45f2   :  { %11305 = vmatmul.mubr.msk.f32.vlgmr.msra.gmra.mrb[112].mxu0 %vm242_vm4, %v14236_v62 }
0x45f3   :  { %9237 = vmatprep.mubr.f32.mxu0 %v13365_v31 }
0x45f6   :  { %11306 = vmatmul.mubr.msk.f32.gmra.mrb[114].mxu0 %vm242_vm4, %v14247_v9 }
0x45f7   :  { %12416 = vmatprep.mubr.msk.f32.mxu0 %vm13366_vm5, %v13365_v31 }
0x46b5   :  { %v12393_v19 = vpop.f32.mrb[110].mxu0 }
0x46b6   :  { %v9011_v36 = vadd.f32 %v12393_v19, %v11297_v52  ;;  %v9005_v58 = vpop.f32.mrb[111].mxu0 }
0x46b7   :  { %v9006_v8 = vadd.f32 %v11297_v52, %v9005_v58 }
0x46b8   :  { %v9015_v1 = vadd.f32 %v9011_v36, %v14484_v6 }
0x46b9   :  { %v9014_v62 = vadd.f32 %v9006_v8, %v14479_v63 }
0x46ba   :  { %v9019_v13 = vsel %vm242_vm4, %v9015_v1, 0.0 }
0x46bb   :  { %9020 = vadd.xlane.f32.xlu0 %v9019_v13  ;;  %v9016_v9 = vsel %vm242_vm4, %v9014_v62, 0.0 }
0x46bc   :  { %9017 = vadd.xlane.f32.xlu1 %v9016_v9 }
0x46c5   :  { %v9233_v22 = vpop.f32.mrb[112].mxu0 }
0x46c6   :  { %v9235_v38 = vpop.f32.mrb[113].mxu0  ;;  %v14688_v29 = vadd.f32 %v9233_v22, %v9079_v27 }
0x46c7   :  { %v14677_v7 = vadd.f32 %v9235_v38, %v9083_v18 }
0x46c9   :  { %v9239_v12 = vpop.f32.mrb[114].mxu0 }
0x46ca   :  { %v9241_v6 = vpop.f32.mrb[115].mxu0  ;;  %v14684_v28 = vadd.f32 %v9239_v12, %v9079_v27 }
0x46cb   :  { %v14679_v15 = vadd.f32 %v9241_v6, %v9083_v18 }
0x4748   :  { %v9021_v63 = vpop.xlane.xlu0 %9020 }
0x4749   :  { %v9023_v54 = vmul.f32 0.015625, %v9021_v63  ;;  %v9018_v17 = vpop.xlane.xlu1 %9017 }
0x474a   :  { %v9022_v56 = vmul.f32 0.015625, %v9018_v17 }
0x474b   :  { %v9025_v5 = vsub.f32 %v9015_v1, %v9023_v54 }
0x474c   :  { %v9024_v3 = vsub.f32 %v9014_v62, %v9022_v56 }
0x474d   :  { %v9027_v42 = vmul.f32 %v9025_v5, %v9025_v5 }
0x474e   :  { %v9026_v25 = vmul.f32 %v9024_v3, %v9024_v3 }
0x474f   :  { %v9031_v21 = vsel %vm242_vm4, %v9027_v42, 0.0 }
0x4750   :  { %9032 = vadd.xlane.f32.xlu1 %v9031_v21  ;;  %v9028_v49 = vsel %vm242_vm4, %v9026_v25, 0.0 }
0x4751   :  { %9029 = vadd.xlane.f32.xlu0 %v9028_v49 }
0x4761   :  { %9323 = vrot.lane.b32.xlu1 %v14684_v28, %s13367_s12 }
0x4767   :  { %9245 = vrot.lane.b32.xlu0 %v14688_v29, %s13367_s12 }
0x47dd   :  { %v9033_v50 = vpop.xlane.xlu1 %9032 }
0x47de   :  { %v9035_v30 = vmul.f32 0.015625, %v9033_v50  ;;  %v9030_v24 = vpop.xlane.xlu0 %9029 }
0x47df   :  { %v9034_v44 = vmul.f32 0.015625, %v9030_v24 }
0x47e0   :  { %v9037_v14 = vadd.f32 1e-05, %v9035_v30 }
0x47e1   :  { %v9036_v0 = vadd.f32 1e-05, %v9034_v44  ;;  %v9324_v51 = vpop.permute.xlu1 %9323 }
0x47e2   :  { %13213 = vrsqrt.f32 %v9037_v14  ;;  %v9246_v46 = vpop.permute.xlu0 %9245 }
0x47e3   :  { %13215 = vrsqrt.f32 %v9036_v0 }
0x47ec   :  { %v13214_v33 = vpop.eup %13213 }
0x47ed   :  { %v13216_v45 = vpop.eup %13215  ;;  %v9041_v20 = vmul.f32 %v13214_v33, %v9025_v5 }
0x47ee   :  { %v9040_v11 = vmul.f32 %v13216_v45, %v9024_v3 }
0x47ef   :  { %v9048_v43 = vmul.f32 %v11300_v23, %v9041_v20 }
0x47f0   :  { %v9047_v37 = vmul.f32 %v11300_v23, %v9040_v11 }
0x47f1   :  { %v14704_v59 = vadd.f32 %v11301_v35, %v9048_v43 }
0x47f2   :  { %v14698_v26 = vadd.f32 %v11301_v35, %v9047_v37 }
0x47f4   :  { %11303 = vmatmul.mubr.msk.f32.vlgmr.msra.gmra.mrb[98].mxu1 %vm242_vm4, %v14698_v26 }
0x47f5   :  { %12395 = vmatpush3.xpose.msk.msra.mxu1 %vm329_vm6, %v9246_v46  ;;  %9161 = vmatprep.mubr.f32.mxu1 %v13365_v31 }
0x47f6   :  { %12399 = vmatprep.subr.mxu1 %v13365_v31 }
0x47f8   :  { %11304 = vmatmul.mubr.msk.f32.gmra.mrb[100].mxu1 %vm242_vm4, %v14704_v59 }
0x47f9   :  { %12396 = vmatprep.mubr.msk.f32.mxu1 %vm13366_vm5, %v13365_v31 }
0x48c7   :  { %v9158_v41 = vpop.f32.mrb[98].mxu1 }
0x48c8   :  { %v14711_v32 = vadd.f32 %v9158_v41, %v9079_v27  ;;  %v9160_v47 = vpop.f32.mrb[99].mxu1 }
0x48ca   :  { %12397 = vmatmul.mubr.msk.f32.vlgmr.msra.gmra.mrb[102].mxu1 %vm329_vm6, %v14711_v32 }
0x48cb   :  { %12400 = vmatpush3.xpose.msk.msra.mxu1 %vm329_vm6, %v9324_v51  ;;  %v9163_v53 = vpop.f32.mrb[100].mxu1  ;;  %12401 = vmatprep.mubr.msk.f32.mxu1 %vm13366_vm5, %v13365_v31 }
0x48cc   :  { %v14718_v55 = vadd.f32 %v9163_v53, %v9079_v27  ;;  %v9165_v57 = vpop.f32.mrb[101].mxu1  ;;  %12404 = vmatprep.subr.mxu1 %v13365_v31 }
0x48ce   :  { %12402 = vmatmul.mubr.msk.f32.vlgmr.msra.gmra.mrb[104].mxu1 %vm329_vm6, %v14718_v55 }
0x48cf   :  { %12405 = vmatpush3.msra.mxu1 %v14677_v7  ;;  %12406 = vmatprep.mubr.msk.f32.mxu1 %vm13366_vm5, %v13365_v31 }
0x48d0   :  { %12409 = vmatprep.subr.mxu1 %v13365_v31 }
0x499d   :  { %v9318_v34 = vpop.f32.mrb[102].mxu1 }
0x499e   :  { %v9400_v61 = vmul.f32 0.25, %v9318_v34  ;;  %v12398_v60 = vpop.f32.mrb[103].mxu1 }
0x49a0   :  { %v9402_v10 = vsel %vm483_vm7, %v9400_v61, -inf }
0x49a1   :  { %9403 = vmax.xlane.f32.xlu1 %v9402_v10  ;;  %v9396_v40 = vpop.f32.mrb[104].mxu1 }
0x49a2   :  { %v9401_v2 = vmul.f32 0.25, %v9396_v40  ;;  %v12403_v4 = vpop.f32.mrb[105].mxu1 }
0x49a4   :  { %v9405_v16 = vsel %vm483_vm7, %v9401_v2, -inf }
0x49a5   :  { %9406 = vmax.xlane.f32.xlu0 %v9405_v16 }
0x49b2   :  { %9650 = vrot.lane.b32.xlu1 %v14684_v28, %s13368_s14 }
0x4a2e   :  { %v9404_v48 = vpop.xlane.xlu1 %9403 }
0x4a2f   :  { %v9408_v52 = vsub.f32 %v9400_v61, %v9404_v48 }
0x4a31   :  { %v9410_v19 = vmul.f32 1.442695, %v9408_v52 }
0x4a32   :  { %v9407_v36 = vpop.xlane.xlu0 %9406  ;;  %v9651_v39 = vpop.permute.xlu1 %9650 }
0x4a33   :  { %13217 = vpow2.f32 %v9410_v19  ;;  %v9409_v58 = vsub.f32 %v9401_v2, %v9407_v36 }
0x4a35   :  { %v9412_v8 = vmul.f32 1.442695, %v9409_v58 }
0x4a37   :  { %13219 = vpow2.f32 %v9412_v8 }
0x4a3d   :  { %v13218_v1 = vpop.eup %13217 }
0x4a3e   :  { %v9414_v62 = vsel %vm483_vm7, %v13218_v1, 0.0 }
0x4a3f   :  { %9415 = vadd.xlane.f32.xlu0 %v9414_v62 }
0x4a41   :  { %v13220_v13 = vpop.eup %13219 }
0x4a42   :  { %v9417_v9 = vsel %vm483_vm7, %v13220_v13, 0.0 }
0x4a43   :  { %9418 = vadd.xlane.f32.xlu1 %v9417_v9 }
0x4a54   :  { %9570 = vrot.lane.b32.xlu1 %v14711_v32, %s13369_s6 }
0x4a55   :  { %9572 = vrot.lane.b32.xlu0 %v14688_v29, %s13368_s14 }
0x4a59   :  { %9648 = vrot.lane.b32.xlu0 %v14718_v55, %s13369_s6 }
0x4acc   :  { %v9416_v18 = vpop.xlane.xlu0 %9415 }
0x4acd   :  { %13221 = vrcp.f32 %v9416_v18 }
0x4ad0   :  { %v9573_v22 = vpop.permute.xlu0 %9572  ;;  %v9419_v38 = vpop.xlane.xlu1 %9418 }
0x4ad1   :  { %13223 = vrcp.f32 %v9419_v38  ;;  %12415 = vmatpush3.xpose.msk.msra.mxu0 %vm329_vm6, %v9573_v22 }
0x4ad2   :  { %12424 = vmatprep.subr.mxu0 %v13365_v31 }
0x4ad4   :  { %v9571_v12 = vpop.permute.xlu1 %9570  ;;  %v9649_v56 = vpop.permute.xlu0 %9648 }
0x4ad5   :  { %12417 = vmatmul.mubr.msk.f32.vlgmr.msra.gmra.mrb[116].mxu0 %vm329_vm6, %v9571_v12 }
0x4ad6   :  { %12426 = vmatprep.mubr.msk.f32.mxu0 %vm13366_vm5, %v13365_v31 }
0x4ad7   :  { %v13222_v6 = vpop.eup %13221 }
0x4ad8   :  { %v9421_v63 = vmul.f32 %v13222_v6, %v13218_v1 }
0x4ada   :  { %12407 = vmatmul.mubr.msk.f32.vlgmr.msra.gmra.mrb[106].mxu1 %vm483_vm7, %v9421_v63 }
0x4adb   :  { %v13224_v54 = vpop.eup %13223  ;;  %12410 = vmatpush3.msra.mxu1 %v14679_v15  ;;  %12411 = vmatprep.mubr.msk.f32.mxu1 %vm13366_vm5, %v13365_v31 }
0x4adc   :  { %v9423_v17 = vmul.f32 %v13224_v54, %v13220_v13  ;;  %12419 = vmatprep.subr.mxu1 %v13365_v31 }
0x4ade   :  { %12412 = vmatmul.mubr.msk.f32.vlgmr.msra.gmra.mrb[108].mxu1 %vm483_vm7, %v9423_v17 }
0x4adf   :  { %12421 = vmatprep.mubr.msk.f32.mxu1 %vm13366_vm5, %v13365_v31 }
0x4ae2   :  { %12420 = vmatpush3.xpose.msk.msra.mxu1 %vm329_vm6, %v9651_v39 }
0x4ae3   :  { %12429 = vmatprep.subr.mxu1 %v13365_v31 }
0x4ae5   :  { %12422 = vmatmul.mubr.msk.f32.vlgmr.msra.gmra.mrb[110].mxu1 %vm329_vm6, %v9649_v56 }
0x4ae6   :  { %12431 = vmatprep.mubr.msk.f32.mxu1 %vm13366_vm5, %v13365_v31 }
0x4ba8   :  { %v9644_v5 = vpop.f32.mrb[116].mxu0 }
0x4ba9   :  { %v9726_v3 = vmul.f32 0.25, %v9644_v5  ;;  %v12418_v42 = vpop.f32.mrb[117].mxu0 }
0x4bab   :  { %v9728_v25 = vsel %vm483_vm7, %v9726_v3, -inf }
0x4bac   :  { %9729 = vmax.xlane.f32.xlu1 %v9728_v25 }
0x4bad   :  { %v14758_v21 = vpop.f32.mrb[106].mxu1 }
0x4bae   :  { %v12408_v49 = vpop.f32.mrb[107].mxu1 }
0x4bb1   :  { %v14760_v27 = vpop.f32.mrb[108].mxu1 }
0x4bb2   :  { %v12413_v50 = vpop.f32.mrb[109].mxu1 }
0x4bb8   :  { %v9722_v30 = vpop.f32.mrb[110].mxu1 }
0x4bb9   :  { %v9727_v24 = vmul.f32 0.25, %v9722_v30  ;;  %v12423_v44 = vpop.f32.mrb[111].mxu1 }
0x4bbb   :  { %v9731_v14 = vsel %vm483_vm7, %v9727_v24, -inf }
0x4bbc   :  { %9732 = vmax.xlane.f32.xlu0 %v9731_v14 }
0x4bbd   :  { %9828 = vrot.lane.b32.xlu1 %v14679_v15, %s13369_s6 }
0x4bc1   :  { %9906 = vrot.lane.b32.xlu1 %v14688_v29, %s13370_s26 }
0x4c39   :  { %v9730_v0 = vpop.xlane.xlu1 %9729 }
0x4c3a   :  { %v9734_v33 = vsub.f32 %v9726_v3, %v9730_v0 }
0x4c3c   :  { %v9736_v45 = vmul.f32 1.442695, %v9734_v33 }
0x4c3d   :  { %v9829_v23 = vpop.permute.xlu1 %9828 }
0x4c3e   :  { %13225 = vpow2.f32 %v9736_v45  ;;  %12430 = vmatpush3.msra.mxu1 %v9829_v23 }
0x4c3f   :  { %12439 = vmatprep.subr.mxu1 %v13365_v31 }
0x4c41   :  { %v9907_v57 = vpop.permute.xlu1 %9906 }
0x4c48   :  { %v13226_v11 = vpop.eup %13225 }
0x4c49   :  { %v9733_v20 = vpop.xlane.xlu0 %9732  ;;  %v9740_v35 = vsel %vm483_vm7, %v13226_v11, 0.0 }
0x4c4a   :  { %v9735_v37 = vsub.f32 %v9727_v24, %v9733_v20  ;;  %9741 = vadd.xlane.f32.xlu0 %v9740_v35 }
0x4c4c   :  { %v9738_v43 = vmul.f32 1.442695, %v9735_v37 }
0x4c4e   :  { %13227 = vpow2.f32 %v9738_v43 }
0x4c58   :  { %v13228_v46 = vpop.eup %13227 }
0x4c59   :  { %v9743_v41 = vsel %vm483_vm7, %v13228_v46, 0.0 }
0x4c5a   :  { %9744 = vadd.xlane.f32.xlu1 %v9743_v41 }
0x4c60   :  { %9751 = vrot.lane.b32.xlu0 %v14677_v7, %s13369_s6 }
0x4c64   :  { %9984 = vrot.lane.b32.xlu0 %v14684_v28, %s13370_s26 }
0x4c68   :  { %9982 = vrot.lane.b32.xlu0 %v14718_v55, %s13371_s15 }
0x4c6b   :  { %9904 = vrot.lane.b32.xlu1 %v14711_v32, %s13371_s15 }
0x4cd7   :  { %v9742_v47 = vpop.xlane.xlu0 %9741 }
0x4cd8   :  { %13229 = vrcp.f32 %v9742_v47 }
0x4cdb   :  { %v9752_v51 = vpop.permute.xlu0 %9751 }
0x4cdc   :  { %12425 = vmatpush3.msra.mxu0 %v9752_v51 }
0x4cdd   :  { %12434 = vmatprep.subr.mxu0 %v13365_v31 }
0x4cdf   :  { %v9985_v40 = vpop.permute.xlu0 %9984 }
0x4ce2   :  { %v13230_v53 = vpop.eup %13229 }
0x4ce3   :  { %v9747_v34 = vmul.f32 %v13230_v53, %v13226_v11  ;;  %v9983_v4 = vpop.permute.xlu0 %9982 }
0x4ce5   :  { %12427 = vmatmul.mubr.msk.f32.vlgmr.msra.gmra.mrb[118].mxu0 %vm483_vm7, %v9747_v34 }
0x4ce6   :  { %12435 = vmatpush3.xpose.msk.msra.mxu0 %vm329_vm6, %v9907_v57  ;;  %12436 = vmatprep.mubr.msk.f32.mxu0 %vm13366_vm5, %v13365_v31 }
0x4ce7   :  { %v9745_v61 = vpop.xlane.xlu1 %9744  ;;  %12444 = vmatprep.subr.mxu0 %v13365_v31 }
0x4ce8   :  { %13231 = vrcp.f32 %v9745_v61 }
0x4ceb   :  { %v9905_v60 = vpop.permute.xlu1 %9904 }
0x4cec   :  { %12437 = vmatmul.mubr.msk.f32.vlgmr.msra.gmra.mrb[120].mxu0 %vm329_vm6, %v9905_v60 }
0x4ced   :  { %12446 = vmatprep.mubr.msk.f32.mxu0 %vm13366_vm5, %v13365_v31 }
0x4cf2   :  { %v13232_v10 = vpop.eup %13231 }
0x4cf3   :  { %v9749_v2 = vmul.f32 %v13232_v10, %v13228_v46 }
0x4cf5   :  { %12432 = vmatmul.mubr.msk.f32.vlgmr.msra.gmra.mrb[112].mxu1 %vm483_vm7, %v9749_v2 }
0x4cf6   :  { %12440 = vmatpush3.xpose.msk.msra.mxu1 %vm329_vm6, %v9985_v40  ;;  %12441 = vmatprep.mubr.msk.f32.mxu1 %vm13366_vm5, %v13365_v31 }
0x4cf7   :  { %12449 = vmatprep.subr.mxu1 %v13365_v31 }
0x4cf9   :  { %12442 = vmatmul.mubr.msk.f32.vlgmr.msra.gmra.mrb[114].mxu1 %vm329_vm6, %v9983_v4 }
0x4cfa   :  { %12451 = vmatprep.mubr.msk.f32.mxu1 %vm13366_vm5, %v13365_v31 }
0x4db8   :  { %v14795_v16 = vpop.f32.mrb[118].mxu0 }
0x4db9   :  { %v12428_v48 = vpop.f32.mrb[119].mxu0 }
0x4dbf   :  { %v9978_v52 = vpop.f32.mrb[120].mxu0 }
0x4dc0   :  { %v10060_v19 = vmul.f32 0.25, %v9978_v52  ;;  %v12438_v36 = vpop.f32.mrb[121].mxu0 }
0x4dc2   :  { %v10062_v58 = vsel %vm483_vm7, %v10060_v19, -inf }
0x4dc3   :  { %10063 = vmax.xlane.f32.xlu1 %v10062_v58  ;;  %v10599_v58 = vld [vmem:[#allocation4 + $0x140] sm:$0xff] }
0x4dc8   :  { %v14798_v8 = vpop.f32.mrb[112].mxu1 }
0x4dc9   :  { %v12433_v1 = vpop.f32.mrb[113].mxu1 }
0x4dca   :  { %v10601_v1 = vld [vmem:[#allocation4 + $0x150] sm:$0xff] }
0x4dcc   :  { %v10056_v62 = vpop.f32.mrb[114].mxu1 }
0x4dcd   :  { %v10061_v13 = vmul.f32 0.25, %v10056_v62  ;;  %v12443_v9 = vpop.f32.mrb[115].mxu1  ;;  %v10602_v62 = vld [vmem:[#allocation4 + $0x158] sm:$0xff] }
0x4dce   :  { %v10603_v9 = vld [vmem:[#allocation4 + $0x160] sm:$0xff] }
0x4dcf   :  { %v10065_v39 = vsel %vm483_vm7, %v10061_v13, -inf }
0x4dd0   :  { %10066 = vmax.xlane.f32.xlu0 %v10065_v39  ;;  %v10604_v39 = vld [vmem:[#allocation4 + $0x168] sm:$0xff] }
0x4dd4   :  { %10160 = vrot.lane.b32.xlu1 %v14679_v15, %s13371_s15 }
0x4dd8   :  { %10238 = vrot.lane.b32.xlu1 %v14688_v29, %s13361_s18 }
0x4e50   :  { %v10064_v18 = vpop.xlane.xlu1 %10063 }
0x4e51   :  { %v10068_v22 = vsub.f32 %v10060_v19, %v10064_v18  ;;  %v12932_v18 = vpack.c.bf16 %v10604_v39, %v10603_v9  ;;  %v10841_v39 = vld [vmem:[#allocation7 + $0x1c0] sm:$0xff] }
0x4e53   :  { %v10070_v38 = vmul.f32 1.442695, %v10068_v22  ;;  %v10605_v22 = vld [vmem:[#allocation4 + $0x170] sm:$0xff] }
0x4e54   :  { %v10161_v12 = vpop.permute.xlu1 %10160 }
0x4e55   :  { %13233 = vpow2.f32 %v10070_v38  ;;  %12450 = vmatpush3.msra.mxu1 %v10161_v12  ;;  %v10606_v38 = vld [vmem:[#allocation4 + $0x178] sm:$0xff] }
0x4e56   :  { %12459 = vmatprep.subr.mxu1 %v13365_v31  ;;  %v12936_v12 = vpack.c.bf16 %v10606_v38, %v10605_v22  ;;  %v10843_v38 = vld [vmem:[#allocation7 + $0x1d0] sm:$0xff] }
0x4e58   :  { %v10239_v25 = vpop.permute.xlu1 %10238 }
0x4e5d   :  { %v10067_v6 = vpop.xlane.xlu0 %10066 }
0x4e5e   :  { %v10069_v63 = vsub.f32 %v10061_v13, %v10067_v6  ;;  %v12928_v13 = vpack.c.bf16 %v10602_v62, %v10601_v1  ;;  %v10839_v62 = vld [vmem:[#allocation7 + $0x1b0] sm:$0xff] }
0x4e5f   :  { %v13234_v54 = vpop.eup %13233 }
0x4e60   :  { %v10072_v17 = vmul.f32 1.442695, %v10069_v63  ;;  %v10074_v56 = vsel %vm483_vm7, %v13234_v54, 0.0 }
0x4e61   :  { %10075 = vadd.xlane.f32.xlu0 %v10074_v56 }
0x4e62   :  { %13235 = vpow2.f32 %v10072_v17 }
0x4e6c   :  { %v13236_v5 = vpop.eup %13235 }
0x4e6d   :  { %v10077_v3 = vsel %vm483_vm7, %v13236_v5, 0.0 }
0x4e6e   :  { %10078 = vadd.xlane.f32.xlu1 %v10077_v3 }
0x4e77   :  { %10084 = vrot.lane.b32.xlu0 %v14677_v7, %s13371_s15 }
0x4e7b   :  { %10316 = vrot.lane.b32.xlu0 %v14684_v28, %s13361_s18 }
0x4e7f   :  { %10236 = vrot.lane.b32.xlu1 %v14711_v32, %s13372_s16  ;;  %10314 = vrot.lane.b32.xlu0 %v14718_v55, %s13372_s16 }
0x4eee   :  { %v10076_v29 = vpop.xlane.xlu0 %10075 }
0x4eef   :  { %13237 = vrcp.f32 %v10076_v29 }
0x4ef2   :  { %v10085_v42 = vpop.permute.xlu0 %10084 }
0x4ef3   :  { %12445 = vmatpush3.msra.mxu0 %v10085_v42 }
0x4ef4   :  { %12454 = vmatprep.subr.mxu0 %v13365_v31 }
0x4ef6   :  { %v10317_v55 = vpop.permute.xlu0 %10316 }
0x4ef9   :  { %v13238_v49 = vpop.eup %13237 }
0x4efa   :  { %v10081_v50 = vmul.f32 %v13238_v49, %v13234_v54  ;;  %v10315_v44 = vpop.permute.xlu0 %10314 }
0x4efb   :  { %v10079_v30 = vpop.xlane.xlu1 %10078 }
0x4efc   :  { %13239 = vrcp.f32 %v10079_v30  ;;  %12447 = vmatmul.mubr.msk.f32.vlgmr.msra.gmra.mrb[122].mxu0 %vm483_vm7, %v10081_v50 }
0x4efd   :  { %12455 = vmatpush3.xpose.msk.msra.mxu0 %vm329_vm6, %v10239_v25  ;;  %12456 = vmatprep.mubr.msk.f32.mxu0 %vm13366_vm5, %v13365_v31 }
0x4efe   :  { %12464 = vmatprep.subr.mxu0 %v13365_v31 }
0x4eff   :  { %v10237_v28 = vpop.permute.xlu1 %10236 }
0x4f00   :  { %12457 = vmatmul.mubr.msk.f32.vlgmr.msra.gmra.mrb[124].mxu0 %vm329_vm6, %v10237_v28 }
0x4f01   :  { %12466 = vmatprep.mubr.msk.f32.mxu0 %vm13366_vm5, %v13365_v31 }
0x4f06   :  { %v13240_v32 = vpop.eup %13239 }
0x4f07   :  { %v10083_v24 = vmul.f32 %v13240_v32, %v13236_v5 }
0x4f09   :  { %12452 = vmatmul.mubr.msk.f32.vlgmr.msra.gmra.mrb[116].mxu1 %vm483_vm7, %v10083_v24 }
0x4f0a   :  { %12460 = vmatpush3.xpose.msk.msra.mxu1 %vm329_vm6, %v10317_v55  ;;  %12461 = vmatprep.mubr.msk.f32.mxu1 %vm13366_vm5, %v13365_v31 }
0x4f0b   :  { %12469 = vmatprep.subr.mxu1 %v13365_v31 }
0x4f0d   :  { %12462 = vmatmul.mubr.msk.f32.vlgmr.msra.gmra.mrb[118].mxu1 %vm329_vm6, %v10315_v44 }
0x4f0e   :  { %12471 = vmatprep.mubr.msk.f32.mxu1 %vm13366_vm5, %v13365_v31 }
0x4fcf   :  { %v10156_v14 = vpop.f32.mrb[122].mxu0 }
0x4fd0   :  { %v12448_v0 = vpop.f32.mrb[123].mxu0 }
0x4fd3   :  { %v10310_v33 = vpop.f32.mrb[124].mxu0 }
0x4fd4   :  { %v10392_v45 = vmul.f32 0.25, %v10310_v33  ;;  %v12458_v23 = vpop.f32.mrb[125].mxu0 }
0x4fd6   :  { %v10394_v11 = vsel %vm483_vm7, %v10392_v45, -inf }
0x4fd7   :  { %10395 = vmax.xlane.f32.xlu1 %v10394_v11 }
0x4fdc   :  { %v10232_v20 = vpop.f32.mrb[116].mxu1 }
0x4fdd   :  { %v12453_v35 = vpop.f32.mrb[117].mxu1 }
0x4fe0   :  { %v10388_v37 = vpop.f32.mrb[118].mxu1 }
0x4fe1   :  { %v10393_v43 = vmul.f32 0.25, %v10388_v37  ;;  %v12463_v46 = vpop.f32.mrb[119].mxu1 }
0x4fe3   :  { %v10397_v41 = vsel %vm483_vm7, %v10393_v43, -inf }
0x4fe4   :  { %10398 = vmax.xlane.f32.xlu0 %v10397_v41 }
0x5064   :  { %v10396_v47 = vpop.xlane.xlu1 %10395 }
0x5065   :  { %v10400_v51 = vsub.f32 %v10392_v45, %v10396_v47 }
0x5067   :  { %v10402_v53 = vmul.f32 1.442695, %v10400_v51  ;;  %v10736_v51 = vld [vmem:[#allocation6 + $0xc0] sm:$0xff] }
0x5069   :  { %13241 = vpow2.f32 %v10402_v53  ;;  %v10737_v53 = vld [vmem:[#allocation6 + $0xc8] sm:$0xff] }
0x5071   :  { %v10399_v31 = vpop.xlane.xlu0 %10398 }
0x5072   :  { %v10401_v57 = vsub.f32 %v10393_v43, %v10399_v31  ;;  %v12940_v31 = vpack.c.bf16 %v10737_v53, %v10736_v51 }
0x5073   :  { %v13242_v34 = vpop.eup %13241 }
0x5074   :  { %v10404_v61 = vmul.f32 1.442695, %v10401_v57  ;;  %v10406_v60 = vsel %vm483_vm7, %v13242_v34, 0.0  ;;  %v10738_v57 = vld [vmem:[#allocation6 + $0xd0] sm:$0xff] }
0x5075   :  { %10407 = vadd.xlane.f32.xlu0 %v10406_v60  ;;  %v10740_v60 = vld [vmem:[#allocation6 + $0xe0] sm:$0xff] }
0x5076   :  { %13243 = vpow2.f32 %v10404_v61 }
0x5080   :  { %v13244_v10 = vpop.eup %13243 }
0x5081   :  { %v10409_v40 = vsel %vm483_vm7, %v13244_v10, 0.0 }
0x5082   :  { %10410 = vadd.xlane.f32.xlu1 %v10409_v40 }
0x508b   :  { %10416 = vrot.lane.b32.xlu0 %v14677_v7, %s13372_s16 }
0x508f   :  { %10572 = vrot.lane.b32.xlu0 %v14798_v8, %s13361_s18 }
0x5093   :  { %10492 = vrot.lane.b32.xlu1 %v14679_v15, %s13372_s16  ;;  %10580 = vrot.lane.b32.xlu0 %v10232_v20, %s13370_s26 }
0x5097   :  { %10570 = vrot.lane.b32.xlu1 %v14795_v16, %s13361_s18  ;;  %v10600_v16 = vld [vmem:[#allocation4 + $0x148] sm:$0xff] }
0x5098   :  { %v12924_v8 = vpack.c.bf16 %v10600_v16, %v10599_v58  ;;  %v10837_v16 = vld [vmem:[#allocation7 + $0x1a0] sm:$0xff] }
0x509b   :  { %10578 = vrot.lane.b32.xlu1 %v10156_v14, %s13370_s26 }
0x5102   :  { %v10408_v2 = vpop.xlane.xlu0 %10407 }
0x5103   :  { %13245 = vrcp.f32 %v10408_v2  ;;  %v10742_v2 = vld [vmem:[#allocation6 + $0xf0] sm:$0xff] }
0x5106   :  { %v10417_v4 = vpop.permute.xlu0 %10416 }
0x5107   :  { %12465 = vmatpush3.msra.mxu0 %v10417_v4  ;;  %v10743_v4 = vld [vmem:[#allocation6 + $0xf8] sm:$0xff] }
0x5108   :  { %12925 = vmatprep.subr.bf16.mxu0 %v12924_v8 }
0x510a   :  { %v10573_v49 = vpop.permute.xlu0 %10572 }
0x510b   :  { %v10593_v30 = vsel %vm329_vm6, %v14760_v27, %v10573_v49 }
0x510d   :  { %v13246_v48 = vpop.eup %13245 }
0x510e   :  { %v10413_v52 = vmul.f32 %v13246_v48, %v13242_v34  ;;  %v10581_v50 = vpop.permute.xlu0 %10580  ;;  %v10739_v34 = vld [vmem:[#allocation6 + $0xd8] sm:$0xff]  ;;  %v12952_v48 = vpack.c.bf16 %v10743_v4, %v10742_v2 }
0x510f   :  { %v10411_v7 = vpop.xlane.xlu1 %10410  ;;  %v10595_v28 = vsel %vm1676_vm9, %v10593_v30, %v10581_v50  ;;  %v12944_v61 = vpack.c.bf16 %v10739_v34, %v10738_v57  ;;  %v11334_v50 = vld [vmem:[%s14958_s9 + $0x14] ss:$0 sm:$0xff] }
0x5110   :  { %13247 = vrcp.f32 %v10411_v7  ;;  %12467 = vmatmul.mubr.msk.f32.vlgmr.msra.gmra.mrb[126].mxu0 %vm483_vm7, %v10413_v52  ;;  %v10833_v52 = vld [vmem:[#allocation7 + $0x180] sm:$0xff]  ;;  %v10834_v7 = vld [vmem:[#allocation7 + $0x188] sm:$0xff] }
0x5111   :  { %12927 = vmatpush3.bf16.msra.mxu0 %v12924_v8  ;;  %v10838_v8 = vld [vmem:[#allocation7 + $0x1a8] sm:$0xff] }
0x5112   :  { %12929 = vmatprep.subr.bf16.mxu0 %v12928_v13  ;;  %v12964_v1 = vpack.c.bf16 %v10838_v8, %v10837_v16 }
0x5113   :  { %v10493_v19 = vpop.permute.xlu1 %10492 }
0x5114   :  { %12470 = vmatpush3.msra.mxu1 %v10493_v19  ;;  %v10835_v19 = vld [vmem:[#allocation7 + $0x190] sm:$0xff] }
0x5115   :  { %12931 = vmatpush3.bf16.msra.mxu0 %v12928_v13  ;;  %12941 = vmatprep.subr.bf16.mxu1 %v12940_v31  ;;  %v10840_v13 = vld [vmem:[#allocation7 + $0x1b8] sm:$0xff] }
0x5116   :  { %12933 = vmatprep.subr.bf16.mxu0 %v12932_v18  ;;  %v12968_v9 = vpack.c.bf16 %v10840_v13, %v10839_v62  ;;  %v11340_v62 = vld [vmem:[%s14958_s9 + $0x15] ss:$0 sm:$0xff] }
0x5117   :  { %v10571_v56 = vpop.permute.xlu1 %10570 }
0x5118   :  { %v10592_v3 = vsel %vm329_vm6, %v14758_v21, %v10571_v56  ;;  %v11331_v21 = vld [vmem:[%s14958_s9 + $0x6] ss:$0 sm:$0xff] }
0x5119   :  { %12935 = vmatpush3.bf16.msra.mxu0 %v12932_v18  ;;  %v10842_v18 = vld [vmem:[#allocation7 + $0x1c8] sm:$0xff] }
0x511a   :  { %v13248_v15 = vpop.eup %13247  ;;  %12937 = vmatprep.subr.bf16.mxu0 %v12936_v12  ;;  %v12972_v22 = vpack.c.bf16 %v10842_v18, %v10841_v39  ;;  %v11341_v39 = vld [vmem:[%s14958_s9 + $0x21] ss:$0 sm:$0xff] }
0x511b   :  { %v10415_v36 = vmul.f32 %v13248_v15, %v13244_v10  ;;  %v10579_v5 = vpop.permute.xlu1 %10578  ;;  %v10741_v10 = vld [vmem:[#allocation6 + $0xe8] sm:$0xff]  ;;  %v12956_v15 = vpack.c.bf16 %v10834_v7, %v10833_v52 }
0x511c   :  { %v10594_v29 = vsel %vm1676_vm9, %v10592_v3, %v10579_v5  ;;  %v12948_v40 = vpack.c.bf16 %v10741_v10, %v10740_v60 }
0x511d   :  { %12472 = vmatmul.mubr.msk.f32.vlgmr.msra.gmra.mrb[120].mxu1 %vm483_vm7, %v10415_v36  ;;  %12939 = vmatpush3.bf16.msra.mxu0 %v12936_v12  ;;  %v10836_v36 = vld [vmem:[#allocation7 + $0x198] sm:$0xff] }
0x511e   :  { %12943 = vmatpush3.bf16.msra.mxu1 %v12940_v31  ;;  %v12960_v58 = vpack.c.bf16 %v10836_v36, %v10835_v19  ;;  %12957 = vmatprep.subr.bf16.mxu0 %v12956_v15  ;;  %v10844_v12 = vld [vmem:[#allocation7 + $0x1d8] sm:$0xff] }
0x511f   :  { %12945 = vmatprep.subr.bf16.mxu1 %v12944_v61 }
0x5122   :  { %12947 = vmatpush3.bf16.msra.mxu1 %v12944_v61 }
0x5123   :  { %12949 = vmatprep.subr.bf16.mxu1 %v12948_v40 }
0x5126   :  { %12951 = vmatpush3.bf16.msra.mxu1 %v12948_v40 }
0x5127   :  { %12953 = vmatprep.subr.bf16.mxu1 %v12952_v48 }
0x512a   :  { %12955 = vmatpush3.bf16.msra.mxu1 %v12952_v48 }
0x51e3   :  { %v10488_v6 = vpop.f32.mrb[126].mxu0 }
0x51e4   :  { %10586 = vrot.lane.b32.xlu1 %v10488_v6, %s13368_s14  ;;  %v12468_v63 = vpop.f32.mrb[127].mxu0  ;;  %v12976_v6 = vpack.c.bf16 %v10844_v12, %v10843_v38 }
0x51e5   :  { %v10845_v63 = vld [vmem:[#allocation7 + $0x1e0] sm:$0xff] }
0x51f0   :  { %v10564_v54 = vpop.f32.mrb[120].mxu1 }
0x51f1   :  { %10588 = vrot.lane.b32.xlu0 %v10564_v54, %s13368_s14  ;;  %v12473_v17 = vpop.f32.mrb[121].mxu1  ;;  %v10846_v54 = vld [vmem:[#allocation7 + $0x1e8] sm:$0xff] }
0x51f2   :  { %v12980_v17 = vpack.c.bf16 %v10846_v54, %v10845_v63 }
0x5256   :  { %v10587_v42 = vpop.permute.xlu1 %10586 }
0x5257   :  { %v10596_v25 = vsel %vm1679_vm8, %v10594_v29, %v10587_v42 }
0x5258   :  { %12490 = vmatprep.mubr.msk.f32.mxu0 %vm242_vm4, %v10596_v25 }
0x5263   :  { %v10589_v32 = vpop.permute.xlu0 %10588 }
0x5264   :  { %v10597_v55 = vsel %vm1679_vm8, %v10595_v28, %v10589_v32 }
0x5265   :  { %12491 = vmatmul.mubr.msk.f32.vlgmr.msra.gmra.mrb[128].mxu0 %vm242_vm4, %v10597_v55 }
0x5266   :  { %12959 = vmatpush3.bf16.msra.mxu0 %v12956_v15 }
0x5267   :  { %12961 = vmatprep.subr.bf16.mxu0 %v12960_v58 }
0x526a   :  { %12963 = vmatpush3.bf16.msra.mxu0 %v12960_v58 }
0x526b   :  { %12965 = vmatprep.subr.bf16.mxu0 %v12964_v1 }
0x526e   :  { %12967 = vmatpush3.bf16.msra.mxu0 %v12964_v1 }
0x526f   :  { %12969 = vmatprep.subr.bf16.mxu0 %v12968_v9 }
0x5272   :  { %12971 = vmatpush3.bf16.msra.mxu0 %v12968_v9 }
0x5273   :  { %12973 = vmatprep.subr.bf16.mxu0 %v12972_v22 }
0x5276   :  { %12975 = vmatpush3.bf16.msra.mxu0 %v12972_v22 }
0x5277   :  { %12977 = vmatprep.subr.bf16.mxu0 %v12976_v6 }
0x527a   :  { %12979 = vmatpush3.bf16.msra.mxu0 %v12976_v6 }
0x527b   :  { %12981 = vmatprep.subr.bf16.mxu0 %v12980_v17 }
0x527e   :  { %12983 = vmatpush3.bf16.msra.mxu0 %v12980_v17 }
0x5338   :  { %v12492_v24 = vpop.f32.mrb[128].mxu0 }
0x5339   :  { %v10690_v44 = vadd.f32 %v12492_v24, %v11331_v21  ;;  %v10684_v14 = vpop.f32.mrb[129].mxu0 }
0x533a   :  { %v10685_v0 = vadd.f32 %v11331_v21, %v10684_v14  ;;  %v11335_v21 = vld [vmem:[%s14958_s9 + $0x20] ss:$0 sm:$0xff] }
0x533b   :  { %v10694_v33 = vadd.f32 %v10690_v44, %v14704_v59 }
0x533c   :  { %v10693_v45 = vadd.f32 %v10685_v0, %v14698_v26  ;;  %v10847_v0 = vld [vmem:[#allocation7 + $0x1f0] sm:$0xff] }
0x533d   :  { %v10698_v27 = vsel %vm242_vm4, %v10694_v33, 0.0 }
0x533e   :  { %10699 = vadd.xlane.f32.xlu0 %v10698_v27  ;;  %v10695_v23 = vsel %vm242_vm4, %v10693_v45, 0.0  ;;  %v11336_v27 = vld [vmem:[%s14956_s7 + $0x3] ss:$0 sm:$0xff] }
0x533f   :  { %10696 = vadd.xlane.f32.xlu1 %v10695_v23 }
0x53cb   :  { %v10700_v11 = vpop.xlane.xlu0 %10699 }
0x53cc   :  { %v10702_v20 = vmul.f32 0.015625, %v10700_v11  ;;  %v10697_v35 = vpop.xlane.xlu1 %10696 }
0x53cd   :  { %v10701_v37 = vmul.f32 0.015625, %v10697_v35 }
0x53ce   :  { %v14868_v43 = vsub.f32 %v10694_v33, %v10702_v20  ;;  %v10848_v33 = vld [vmem:[#allocation7 + $0x1f8] sm:$0xff] }
0x53cf   :  { %v14870_v46 = vsub.f32 %v10693_v45, %v10701_v37  ;;  %v12984_v45 = vpack.c.bf16 %v10848_v33, %v10847_v0  ;;  %v11016_v0 = vld [vmem:[%s14959_s10 + $0x28] sm:$0xff] }
0x53d0   :  { %v10706_v41 = vmul.f32 %v14868_v43, %v14868_v43 }
0x53d1   :  { %v10705_v26 = vmul.f32 %v14870_v46, %v14870_v46  ;;  %12985 = vmatprep.subr.bf16.mxu0 %v12984_v45 }
0x53d2   :  { %v10710_v59 = vsel %vm242_vm4, %v10706_v41, 0.0  ;;  %12987 = vmatpush3.bf16.msra.mxu0 %v12984_v45  ;;  %v11017_v45 = vld [vmem:[%s14959_s10 + $0x30] sm:$0xff] }
0x53d3   :  { %10711 = vadd.xlane.f32.xlu1 %v10710_v59  ;;  %v10707_v47 = vsel %vm242_vm4, %v10705_v26, 0.0 }
0x53d4   :  { %10708 = vadd.xlane.f32.xlu0 %v10707_v47 }
0x5460   :  { %v10712_v56 = vpop.xlane.xlu1 %10711 }
0x5461   :  { %v10714_v5 = vmul.f32 0.015625, %v10712_v56  ;;  %v10709_v3 = vpop.xlane.xlu0 %10708 }
0x5462   :  { %v10713_v29 = vmul.f32 0.015625, %v10709_v3 }
0x5463   :  { %v10716_v42 = vadd.f32 1e-05, %v10714_v5 }
0x5464   :  { %v10715_v25 = vadd.f32 1e-05, %v10713_v29 }
0x5465   :  { %13249 = vrsqrt.f32 %v10716_v42 }
0x5466   :  { %13251 = vrsqrt.f32 %v10715_v25 }
0x546f   :  { %v13250_v49 = vpop.eup %13249 }
0x5470   :  { %v13252_v30 = vpop.eup %13251  ;;  %v10720_v28 = vmul.f32 %v13250_v49, %v14868_v43 }
0x5471   :  { %v10719_v32 = vmul.f32 %v13252_v30, %v14870_v46  ;;  %v11339_v46 = vld [vmem:[%s14958_s9 + $0xa] ss:$0 sm:$0xff] }
0x5472   :  { %v10727_v55 = vmul.f32 %v11334_v50, %v10720_v28  ;;  %v11011_v28 = vld [vmem:[%s14959_s10] sm:$0xff] }
0x5473   :  { %v10726_v24 = vmul.f32 %v11334_v50, %v10719_v32  ;;  %v11012_v32 = vld [vmem:[%s14959_s10 + $0x8] sm:$0xff] }
0x5474   :  { %v10734_v14 = vadd.f32 %v11335_v21, %v10727_v55  ;;  %v12988_v55 = vpack.c.bf16 %v11012_v32, %v11011_v28 }
0x5475   :  { %v10733_v44 = vadd.f32 %v11335_v21, %v10726_v24  ;;  %v11013_v21 = vld [vmem:[%s14959_s10 + $0x10] sm:$0xff]  ;;  %v11014_v24 = vld [vmem:[%s14959_s10 + $0x18] sm:$0xff] }
0x5476   :  { %12989 = vmatprep.subr.bf16.mxu1 %v12988_v55 }
0x5477   :  { %12509 = vmatprep.mubr.msk.f32.mxu1 %vm242_vm4, %v10733_v44 }
0x5478   :  { %12510 = vmatmul.mubr.msk.f32.vlgmr.msra.gmra.mrb[122].mxu1 %vm242_vm4, %v10734_v14 }
0x5479   :  { %12991 = vmatpush3.bf16.msra.mxu1 %v12988_v55 }
0x554b   :  { %v12511_v23 = vpop.f32.mrb[122].mxu1 }
0x554c   :  { %v10827_v11 = vadd.f32 %v12511_v23, %v11336_v27  ;;  %v10821_v20 = vpop.f32.mrb[123].mxu1 }
0x554d   :  { %v10822_v35 = vadd.f32 %v11336_v27, %v10821_v20  ;;  %v11018_v27 = vld [vmem:[%s14959_s10 + $0x38] sm:$0xff] }
0x554e   :  { %v10831_v43 = vmax.f32 %v10827_v11, 0.0  ;;  %v13000_v23 = vpack.c.bf16 %v11018_v27, %v11017_v45 }
0x554f   :  { %v10830_v37 = vmax.f32 %v10822_v35, 0.0 }
0x5551   :  { %12544 = vmatprep.mubr.f32.mxu0 %v10830_v37 }
0x5552   :  { %12545 = vmatmul.mubr.f32.vlgmr.msra.gmra.mrb[130].mxu0 %v10831_v43 }
0x5625   :  { %v12546_v41 = vpop.f32.mrb[130].mxu0 }
0x5626   :  { %v10926_v26 = vadd.f32 %v12546_v41, %v11339_v46  ;;  %v10920_v59 = vpop.f32.mrb[131].mxu0 }
0x5627   :  { %v10921_v47 = vadd.f32 %v11339_v46, %v10920_v59 }
0x5628   :  { %v10930_v51 = vadd.f32 %v10926_v26, %v10734_v14  ;;  %v11015_v14 = vld [vmem:[%s14959_s10 + $0x20] sm:$0xff]  ;;  %v11342_v26 = vld [vmem:[%s14958_s9 + $0x16] ss:$0 sm:$0xff] }
0x5629   :  { %v10929_v53 = vadd.f32 %v10921_v47, %v10733_v44  ;;  %v12992_v44 = vpack.c.bf16 %v11014_v24, %v11013_v21  ;;  %v12996_v33 = vpack.c.bf16 %v11016_v0, %v11015_v14 }
0x562a   :  { %v10934_v31 = vsel %vm242_vm4, %v10930_v51, 0.0 }
0x562b   :  { %10935 = vadd.xlane.f32.xlu1 %v10934_v31  ;;  %v10931_v57 = vsel %vm242_vm4, %v10929_v53, 0.0  ;;  %12993 = vmatprep.subr.bf16.mxu1 %v12992_v44  ;;  %v11343_v31 = vld [vmem:[%s14958_s9 + $0x22] ss:$0 sm:$0xff] }
0x562c   :  { %10932 = vadd.xlane.f32.xlu0 %v10931_v57  ;;  %12995 = vmatpush3.bf16.msra.mxu1 %v12992_v44 }
0x562d   :  { %12997 = vmatprep.subr.bf16.mxu1 %v12996_v33 }
0x5630   :  { %12999 = vmatpush3.bf16.msra.mxu1 %v12996_v33 }
0x5631   :  { %13001 = vmatprep.subr.bf16.mxu1 %v13000_v23 }
0x5634   :  { %13003 = vmatpush3.bf16.msra.mxu1 %v13000_v23 }
0x56b8   :  { %v10936_v34 = vpop.xlane.xlu1 %10935 }
0x56b9   :  { %v10938_v61 = vmul.f32 0.015625, %v10936_v34  ;;  %v10933_v60 = vpop.xlane.xlu0 %10932 }
0x56ba   :  { %v10937_v10 = vmul.f32 0.015625, %v10933_v60  ;;  %v11344_v60 = vld [vmem:[%s14959_s10 + $0x40] ss:$0 sm:$0xff] }
0x56bb   :  { %v10940_v40 = vsub.f32 %v10930_v51, %v10938_v61 }
0x56bc   :  { %v10939_v2 = vsub.f32 %v10929_v53, %v10937_v10 }
0x56bd   :  { %v10942_v4 = vmul.f32 %v10940_v40, %v10940_v40 }
0x56be   :  { %v10941_v48 = vmul.f32 %v10939_v2, %v10939_v2 }
0x56bf   :  { %v10946_v52 = vsel %vm242_vm4, %v10942_v4, 0.0 }
0x56c0   :  { %10947 = vadd.xlane.f32.xlu1 %v10946_v52  ;;  %v10943_v7 = vsel %vm242_vm4, %v10941_v48, 0.0 }
0x56c1   :  { %10944 = vadd.xlane.f32.xlu0 %v10943_v7 }
0x574d   :  { %v10948_v19 = vpop.xlane.xlu1 %10947 }
0x574e   :  { %v10950_v15 = vmul.f32 0.015625, %v10948_v19  ;;  %v10945_v36 = vpop.xlane.xlu0 %10944 }
0x574f   :  { %v10949_v58 = vmul.f32 0.015625, %v10945_v36 }
0x5750   :  { %v10952_v16 = vadd.f32 1e-05, %v10950_v15 }
0x5751   :  { %v10951_v8 = vadd.f32 1e-05, %v10949_v58 }
0x5752   :  { %13253 = vrsqrt.f32 %v10952_v16 }
0x5753   :  { %13255 = vrsqrt.f32 %v10951_v8 }
0x575c   :  { %v13254_v1 = vpop.eup %13253 }
0x575d   :  { %v13256_v13 = vpop.eup %13255  ;;  %v10956_v9 = vmul.f32 %v13254_v1, %v10940_v40 }
0x575e   :  { %v10955_v18 = vmul.f32 %v13256_v13, %v10939_v2 }
0x575f   :  { %v10963_v22 = vmul.f32 %v11340_v62, %v10956_v9 }
0x5760   :  { %v10962_v38 = vmul.f32 %v11340_v62, %v10955_v18 }
0x5761   :  { %v10970_v12 = vadd.f32 %v11341_v39, %v10963_v22 }
0x5762   :  { %v10969_v6 = vadd.f32 %v11341_v39, %v10962_v38 }
0x5763   :  { %v10974_v63 = vsel %vm242_vm4, %v10970_v12, 0.0 }
0x5764   :  { %10975 = vadd.xlane.f32.xlu1 %v10974_v63  ;;  %v10971_v54 = vsel %vm242_vm4, %v10969_v6, 0.0 }
0x5765   :  { %10972 = vadd.xlane.f32.xlu0 %v10971_v54 }
0x57f1   :  { %v10976_v17 = vpop.xlane.xlu1 %10975 }
0x57f2   :  { %v10978_v56 = vmul.f32 0.015625, %v10976_v17  ;;  %v10973_v5 = vpop.xlane.xlu0 %10972 }
0x57f3   :  { %v10977_v3 = vmul.f32 0.015625, %v10973_v5 }
0x57f4   :  { %v10980_v29 = vsub.f32 %v10970_v12, %v10978_v56 }
0x57f5   :  { %v10979_v42 = vsub.f32 %v10969_v6, %v10977_v3 }
0x57f6   :  { %v10982_v25 = vmul.f32 %v10980_v29, %v10980_v29 }
0x57f7   :  { %v10981_v49 = vmul.f32 %v10979_v42, %v10979_v42 }
0x57f8   :  { %v10986_v50 = vsel %vm242_vm4, %v10982_v25, 0.0 }
0x57f9   :  { %10987 = vadd.xlane.f32.xlu1 %v10986_v50  ;;  %v10983_v30 = vsel %vm242_vm4, %v10981_v49, 0.0 }
0x57fa   :  { %10984 = vadd.xlane.f32.xlu0 %v10983_v30 }
0x5886   :  { %v10988_v11 = vpop.xlane.xlu1 %10987 }
0x5887   :  { %v10990_v20 = vmul.f32 0.015625, %v10988_v11  ;;  %v10985_v35 = vpop.xlane.xlu0 %10984 }
0x5888   :  { %v10989_v37 = vmul.f32 0.015625, %v10985_v35 }
0x5889   :  { %v10992_v43 = vadd.f32 1e-05, %v10990_v20 }
0x588a   :  { %v10991_v46 = vadd.f32 1e-05, %v10989_v37 }
0x588b   :  { %13257 = vrsqrt.f32 %v10992_v43 }
0x588c   :  { %13259 = vrsqrt.f32 %v10991_v46 }
0x5895   :  { %v13258_v41 = vpop.eup %13257 }
0x5896   :  { %v13260_v59 = vpop.eup %13259  ;;  %v10996_v47 = vmul.f32 %v13258_v41, %v10980_v29 }
0x5897   :  { %v10995_v51 = vmul.f32 %v13260_v59, %v10979_v42 }
0x5898   :  { %v11003_v53 = vmul.f32 %v11342_v26, %v10996_v47 }
0x5899   :  { %v11002_v57 = vmul.f32 %v11342_v26, %v10995_v51 }
0x589a   :  { %v11010_v61 = vadd.f32 %v11343_v31, %v11003_v53 }
0x589b   :  { %v11009_v34 = vadd.f32 %v11343_v31, %v11002_v57 }
0x589d   :  { %12563 = vmatprep.mubr.msk.f32.mxu1 %vm242_vm4, %v11009_v34 }
0x589e   :  { %12564 = vmatmul.mubr.msk.f32.vlgmr.msra.gmra.mrb[124].mxu1 %vm242_vm4, %v11010_v61 }
0x5971   :  { %v12565_v10 = vpop.f32.mrb[124].mxu1 }
0x5972   :  { %v11102_v40 = vadd.f32 %v12565_v10, %v11344_v60  ;;  %v11096_v2 = vpop.f32.mrb[125].mxu1 }
0x5973   :  { %v11097_v4 = vadd.f32 %v11344_v60, %v11096_v2 }
0x5974   :  { %11107 = vst.msk [vmem:[%s14960_s11 + $0x8] sm:$0xff] %vm11105_vm10, %v11102_v40 }
0x5975   :  { %11106 = vst.msk [vmem:[%s14960_s11] sm:$0xff] %vm11105_vm10, %v11097_v4 }
0x5976   :  { %11112 = vsyncpa [#allocation3], 1 }
0x5977   :  { %11113 = vsyncpa [#allocation5], 1 }
0x5978   :  { %11114 = vsyncpa [#allocation8], 1 }

</bundles_post_ra>
